<compile_context>
chip_gen: v7x
topology: tpu7x:2x2x1
jax: 0.10.0
libtpu: 0.0.40
codegen_flags: <defaults>
</compile_context>

<pallas_src>
import functools

import jax
import jax.numpy as jnp
from jax import lax
from jax.experimental import pallas as pl
from jax.experimental.pallas import tpu as pltpu


# ----------------------------- Pallas kernel --------------------------------
def _gated_conv_kernel(x_ref, w_ref, b_ref, o_ref, xp_scr, p_scr, *,
                       KH, KW, PAD, CIN, COUT):
    """Fused zero-pad + im2col + (conv|mask|gate) matmul + gating epilogue.

    x_ref  : (1, H*W, CIN)          one image, pixel-major / channel-minor
    w_ref  : (KH*KW*(CIN+1), 128)   fused weights [conv | mask | gate | 0-pad]
    b_ref  : (1, 128)               fused biases  [bc   | bm   | 0    | 0    ]
    o_ref  : (1, COUT, H*W)         output, channel-major (NCHW with HW fused)
    xp_scr : (Hp, Wp, CIN+1)        zero-padded input + ne-indicator channel
    p_scr  : (H*W, KH*KW*(CIN+1))   im2col patch matrix
    """
    C1 = CIN + 1
    Hp, Wp = xp_scr.shape[0], xp_scr.shape[1]
    Hi, Wi = Hp - 2 * PAD, Wp - 2 * PAD
    Ho, Wo = Hp - (KH - 1), Wp - (KW - 1)          # stride=1, dilation=1, valid

    # ---- fused ZeroPad2d + torch.ne(x_pad[:,3], 1) as extra channel CIN ----
    xp_scr[...] = jnp.zeros_like(xp_scr)
    xp_scr[PAD:PAD + Hi, PAD:PAD + Wi, 0:CIN] = x_ref[0].reshape(Hi, Wi, CIN)
    ch3 = xp_scr[:, :, 3:4]                         # zero-padded channel 3
    xp_scr[:, :, CIN:CIN + 1] = (ch3 != 1.0).astype(jnp.float32)

    # ---- im2col: 25 taps x (CIN+1) channels -> one (Ho*Wo, 125) LHS --------
    for kh in range(KH):
        for kw in range(KW):
            t = kh * KW + kw
            p_scr[:, t * C1:(t + 1) * C1] = (
                xp_scr[kh:kh + Ho, kw:kw + Wo, :].reshape(Ho * Wo, C1))

    # ---- single MXU matmul: conv, mask_conv and the 5x5 ones box-filter ----
    acc = jnp.dot(p_scr[...], w_ref[...], preferred_element_type=jnp.float32)
    acc = acc + b_ref[0]                            # (Ho*Wo, 128)
    accT = acc.T                                    # (128, Ho*Wo): lane-dense

    conv = accT[0:COUT, :]                          # (COUT, Ho*Wo)
    mask = accT[COUT:2 * COUT, :]
    gate = accT[2 * COUT:2 * COUT + 1, :]           # 5x5 count of (ch3 != 1)

    conv = jnp.where(conv >= 0, conv, 0.2 * conv)   # LeakyReLU(0.2)
    gmask = 1.0 / (1.0 + jnp.exp(-mask))            # sigmoid
    o_ref[0] = (conv * gmask * (gate * (1.0 / 25.0))).astype(o_ref.dtype)


def gated_conv2d_pallas(x_pm, w_fused, b_fused, *, KH, KW, pad, H, W, Cout):
    """x_pm: (N, H*W, Cin); w_fused: (KH*KW*(Cin+1), 128); b_fused: (1, 128)."""
    N, HW, Cin = x_pm.shape
    C1 = Cin + 1
    Hp, Wp = H + 2 * pad, W + 2 * pad
    Ho, Wo = Hp - (KH - 1), Wp - (KW - 1)
    assert Ho * Wo == HW, "k=5 / pad=2 / stride=1 keeps the spatial size"
    KK, NPAD = w_fused.shape

    kernel = functools.partial(_gated_conv_kernel, KH=KH, KW=KW, PAD=pad,
                               CIN=Cin, COUT=Cout)
    return pl.pallas_call(
        kernel,
        out_shape=jax.ShapeDtypeStruct((N, Cout, HW), jnp.float32),
        grid=(N,),
        in_specs=[
            pl.BlockSpec((1, HW, Cin), lambda n: (n, 0, 0)),
            pl.BlockSpec((KK, NPAD), lambda n: (0, 0)),
            pl.BlockSpec((1, NPAD), lambda n: (0, 0)),
        ],
        out_specs=pl.BlockSpec((1, Cout, HW), lambda n: (n, 0, 0)),
        scratch_shapes=[
            pltpu.VMEM((Hp, Wp, C1), jnp.float32),   # padded input + indicator
            pltpu.VMEM((HW, KK), jnp.float32),       # im2col patch matrix
        ],
        compiler_params=pltpu.CompilerParams(dimension_semantics=("parallel",)),
    )(x_pm, w_fused, b_fused)


# ------------------------- plain-JAX glue / params --------------------------
def l2normalize(v, eps=1e-12):
    return v / (jnp.linalg.norm(v) + eps)


def spectral_norm_weight(w_bar, u, v, power_iterations=1):
    """One power-iteration spectral norm (matches SpectralNorm._update_u_v math)."""
    # TODO(synk): PyTorch's SpectralNorm mutates/persists the u, v buffers across
    # forward calls; this functional version recomputes from the stored u, v.
    height = w_bar.shape[0]
    w2 = w_bar.reshape(height, -1)
    for _ in range(power_iterations):
        v = l2normalize(w2.T @ u)
        u = l2normalize(w2 @ v)
    sigma = u @ (w2 @ v)
    return w_bar / sigma


def init_params(key, in_channels, out_channels, kernel_size):
    ks = jax.random.split(key, 8)
    shp_w = (out_channels, in_channels, kernel_size, kernel_size)
    width = in_channels * kernel_size * kernel_size
    return {
        "wc_bar": 0.1 * jax.random.normal(ks[0], shp_w, jnp.float32),
        "bc": 0.1 * jax.random.normal(ks[1], (out_channels,), jnp.float32),
        "wc_u": l2normalize(jax.random.normal(ks[2], (out_channels,), jnp.float32)),
        "wc_v": l2normalize(jax.random.normal(ks[3], (width,), jnp.float32)),
        "wm_bar": 0.1 * jax.random.normal(ks[4], shp_w, jnp.float32),
        "bm": 0.1 * jax.random.normal(ks[5], (out_channels,), jnp.float32),
        "wm_u": l2normalize(jax.random.normal(ks[6], (out_channels,), jnp.float32)),
        "wm_v": l2normalize(jax.random.normal(ks[7], (width,), jnp.float32)),
    }


def gated_conv2d2(x_nchw, params, *, kernel_size=5, padding=2):
    """GatedConv2d2 forward (pad_type='zero', activation='lrelu', norm='none', sn=True)."""
    assert kernel_size == 5, "forward hard-codes a 5x5 ones-conv gate; ksize must be 5"
    N, Cin, H, W = x_nchw.shape
    assert Cin >= 4, "forward reads channel 3 of the input"
    Cout = params["bc"].shape[0]
    assert Cout == 48, "forward hard-codes y.repeat(1, 48, 1, 1)"
    NPAD = 128
    KH = KW = kernel_size

    # 1) spectral-norm both conv weights (tiny matvecs; param-side glue).
    wc = spectral_norm_weight(params["wc_bar"], params["wc_u"], params["wc_v"])
    wm = spectral_norm_weight(params["wm_bar"], params["wm_u"], params["wm_v"])

    # 2) fuse conv / mask_conv / gate into one (KH*KW*(Cin+1), 128) weight.
    #    Row index = (kh*KW + kw)*(Cin+1) + ci ; output cols = [conv|mask|gate|0].
    wc_k = jnp.transpose(wc, (2, 3, 1, 0))                  # (KH,KW,Cin,Cout)
    wm_k = jnp.transpose(wm, (2, 3, 1, 0))
    w_cm = jnp.concatenate([wc_k, wm_k], axis=-1)           # (KH,KW,Cin,2*Cout)
    w_cm = jnp.pad(w_cm, ((0, 0), (0, 0), (0, 0), (0, NPAD - 2 * Cout)))
    gate_ch = jnp.zeros((KH, KW, 1, NPAD), jnp.float32)
    gate_ch = gate_ch.at[:, :, 0, 2 * Cout].set(1.0)        # indicator ch -> gate col
    w_all = jnp.concatenate([w_cm, gate_ch], axis=2)        # (KH,KW,Cin+1,128)
    w_fused = w_all.reshape(KH * KW * (Cin + 1), NPAD)      # (125, 128)
    b_fused = jnp.concatenate(
        [params["bc"], params["bm"],
         jnp.zeros((NPAD - 2 * Cout,), jnp.float32)])[None, :]   # (1, 128)

    # 3) layout plumbing: pixel-major input (8 KB); output reshape below is free
    #    because the kernel already writes channel-major (NCHW) data.
    x_pm = jnp.transpose(x_nchw, (0, 2, 3, 1)).reshape(N, H * W, Cin)

    # 4) Pallas hot path: fused zero-pad + im2col + one matmul + gating epilogue.
    out = gated_conv2d_pallas(x_pm, w_fused, b_fused, KH=KH, KW=KW,
                              pad=padding, H=H, W=W, Cout=Cout)
    return out.reshape(N, Cout, H, W)


# Pure-JAX reference (lax convs) for a correctness check.
def _reference(x_nchw, params, *, kernel_size=5, padding=2):
    x = jnp.pad(x_nchw, ((0, 0), (0, 0), (padding, padding), (padding, padding)))
    ind = (x[:, 3:4, :, :] != 1.0).astype(jnp.float32)
    ones_k = jnp.ones((1, 1, 5, 5), jnp.float32)
    dn1 = lax.conv_dimension_numbers(ind.shape, ones_k.shape, ("NCHW", "OIHW", "NCHW"))
    y = lax.conv_general_dilated(ind, ones_k, (1, 1), "VALID", dimension_numbers=dn1)
    y = jnp.repeat(y, params["bc"].shape[0], axis=1)

    wc = spectral_norm_weight(params["wc_bar"], params["wc_u"], params["wc_v"])
    wm = spectral_norm_weight(params["wm_bar"], params["wm_u"], params["wm_v"])
    dn2 = lax.conv_dimension_numbers(x.shape, wc.shape, ("NCHW", "OIHW", "NCHW"))
    conv = lax.conv_general_dilated(x, wc, (1, 1), "VALID", dimension_numbers=dn2)
    conv = conv + params["bc"][None, :, None, None]
    mask = lax.conv_general_dilated(x, wm, (1, 1), "VALID", dimension_numbers=dn2)
    mask = mask + params["bm"][None, :, None, None]
    conv = jnp.where(conv >= 0, conv, 0.2 * conv)
    return conv * jax.nn.sigmoid(mask) * (y / 25.0)


if __name__ == "__main__":
    key = jax.random.PRNGKey(0)
    k_x, k_p = jax.random.split(key)

    # Shapes implied by the forward: Cin >= 4, Cout = 48, kernel_size = 5.
    N, Cin, Hin, Win = 2, 4, 16, 16
    Cout, ksize, pad = 48, 5, 2

    x = jax.random.normal(k_x, (N, Cin, Hin, Win), jnp.float32)
    # Plant exact 1.0 values in channel 3 so the torch.ne(..., 1) gate path is exercised.
    x = x.at[:, 3, ::3, ::4].set(1.0)

    params = init_params(k_p, Cin, Cout, ksize)

    fwd = jax.jit(lambda xx, pp: gated_conv2d2(xx, pp, kernel_size=ksize, padding=pad))
    out = jax.block_until_ready(fwd(x, params))

    ref = jax.block_until_ready(_reference(x, params, kernel_size=ksize, padding=pad))
    assert out.shape == (N, Cout, Hin, Win), out.shape
    assert jnp.allclose(out, ref, atol=1e-4, rtol=1e-4), float(jnp.abs(out - ref).max())

    print("KERNEL_OK")
</pallas_src>

<mosaic_0001>
module attributes {stable_mosaic.version = 11 : i64} {
  func.func @_gated_conv_kernel(%arg0: i32, %arg1: memref<1x256x4xf32, #tpu.memory_space<vmem>>, %arg2: memref<125x128xf32, #tpu.memory_space<vmem>>, %arg3: memref<1x128xf32, #tpu.memory_space<vmem>>, %arg4: memref<1x48x256xf32, #tpu.memory_space<vmem>>, %arg5: memref<20x20x5xf32, #tpu.memory_space<vmem>>, %arg6: memref<256x125xf32, #tpu.memory_space<vmem>>) attributes {dimension_semantics = [#tpu.dimension_semantics<parallel>], iteration_bounds = array<i64: 2>, scalar_prefetch = 0 : i64, scratch_operands = 2 : i64, tpu.core_type = #tpu.core_type<tc>, window_params = [{transform_indices = @transform_0, window_bounds = array<i64: 1, 256, 4>}, {pipeline_mode = #tpu.pipeline_mode<synchronous>, transform_indices = @transform_1, window_bounds = array<i64: 125, 128>}, {pipeline_mode = #tpu.pipeline_mode<synchronous>, transform_indices = @transform_2, window_bounds = array<i64: 1, 128>}, {transform_indices = @transform_3, window_bounds = array<i64: 1, 48, 256>}]} {
    %cst = arith.constant 0.000000e+00 : f32
    %0 = vector.broadcast %cst : f32 to vector<20x20x5xf32>
    %c0 = arith.constant 0 : index
    %c0_0 = arith.constant 0 : index
    %c0_1 = arith.constant 0 : index
    %1 = vector.load %arg5[%c0, %c0_0, %c0_1] : memref<20x20x5xf32, #tpu.memory_space<vmem>>, vector<20x20x5xf32>
    tpu.vector_store %arg5[%c0, %c0_0, %c0_1], %0 {strides = array<i32>} : memref<20x20x5xf32, #tpu.memory_space<vmem>>, vector<20x20x5xf32>,
    %c0_2 = arith.constant 0 : index
    %c0_3 = arith.constant 0 : index
    %c0_4 = arith.constant 0 : index
    %2 = vector.load %arg1[%c0_2, %c0_3, %c0_4] : memref<1x256x4xf32, #tpu.memory_space<vmem>>, vector<1x256x4xf32>
    %3 = vector.shape_cast %2 : vector<1x256x4xf32> to vector<256x4xf32>
    %4 = vector.shape_cast %3 : vector<256x4xf32> to vector<16x16x4xf32>
    %c2 = arith.constant 2 : index
    %c2_5 = arith.constant 2 : index
    %c0_6 = arith.constant 0 : index
    %5 = vector.load %arg5[%c2, %c2_5, %c0_6] : memref<20x20x5xf32, #tpu.memory_space<vmem>>, vector<16x16x4xf32>
    tpu.vector_store %arg5[%c2, %c2_5, %c0_6], %4 {strides = array<i32>} : memref<20x20x5xf32, #tpu.memory_space<vmem>>, vector<16x16x4xf32>,
    %c0_7 = arith.constant 0 : index
    %c0_8 = arith.constant 0 : index
    %c3 = arith.constant 3 : index
    %6 = vector.load %arg5[%c0_7, %c0_8, %c3] : memref<20x20x5xf32, #tpu.memory_space<vmem>>, vector<20x20x1xf32>
    %cst_9 = arith.constant 1.000000e+00 : f32
    %7 = vector.broadcast %cst_9 : f32 to vector<20x20x1xf32>
    %8 = arith.cmpf one, %6, %7 : vector<20x20x1xf32>
    %9 = arith.extui %8 : vector<20x20x1xi1> to vector<20x20x1xi32>
    %10 = arith.sitofp %9 : vector<20x20x1xi32> to vector<20x20x1xf32>
    %c0_10 = arith.constant 0 : index
    %c0_11 = arith.constant 0 : index
    %c4 = arith.constant 4 : index
    %11 = vector.load %arg5[%c0_10, %c0_11, %c4] : memref<20x20x5xf32, #tpu.memory_space<vmem>>, vector<20x20x1xf32>
    tpu.vector_store %arg5[%c0_10, %c0_11, %c4], %10 {strides = array<i32>} : memref<20x20x5xf32, #tpu.memory_space<vmem>>, vector<20x20x1xf32>,
    %c0_12 = arith.constant 0 : index
    %c0_13 = arith.constant 0 : index
    %c0_14 = arith.constant 0 : index
    %12 = vector.load %arg5[%c0_12, %c0_13, %c0_14] : memref<20x20x5xf32, #tpu.memory_space<vmem>>, vector<16x16x5xf32>
    %13 = vector.shape_cast %12 : vector<16x16x5xf32> to vector<256x5xf32>
    %c0_15 = arith.constant 0 : index
    %c0_16 = arith.constant 0 : index
    %14 = vector.load %arg6[%c0_15, %c0_16] : memref<256x125xf32, #tpu.memory_space<vmem>>, vector<256x5xf32>
    tpu.vector_store %arg6[%c0_15, %c0_16], %13 {strides = array<i32>} : memref<256x125xf32, #tpu.memory_space<vmem>>, vector<256x5xf32>,
    %c0_17 = arith.constant 0 : index
    %c1 = arith.constant 1 : index
    %c0_18 = arith.constant 0 : index
    %15 = vector.load %arg5[%c0_17, %c1, %c0_18] : memref<20x20x5xf32, #tpu.memory_space<vmem>>, vector<16x16x5xf32>
    %16 = vector.shape_cast %15 : vector<16x16x5xf32> to vector<256x5xf32>
    %c0_19 = arith.constant 0 : index
    %c5 = arith.constant 5 : index
    %17 = vector.load %arg6[%c0_19, %c5] : memref<256x125xf32, #tpu.memory_space<vmem>>, vector<256x5xf32>
    tpu.vector_store %arg6[%c0_19, %c5], %16 {strides = array<i32>} : memref<256x125xf32, #tpu.memory_space<vmem>>, vector<256x5xf32>,
    %c0_20 = arith.constant 0 : index
    %c2_21 = arith.constant 2 : index
    %c0_22 = arith.constant 0 : index
    %18 = vector.load %arg5[%c0_20, %c2_21, %c0_22] : memref<20x20x5xf32, #tpu.memory_space<vmem>>, vector<16x16x5xf32>
    %19 = vector.shape_cast %18 : vector<16x16x5xf32> to vector<256x5xf32>
    %c0_23 = arith.constant 0 : index
    %c10 = arith.constant 10 : index
    %20 = vector.load %arg6[%c0_23, %c10] : memref<256x125xf32, #tpu.memory_space<vmem>>, vector<256x5xf32>
    tpu.vector_store %arg6[%c0_23, %c10], %19 {strides = array<i32>} : memref<256x125xf32, #tpu.memory_space<vmem>>, vector<256x5xf32>,
    %c0_24 = arith.constant 0 : index
    %c3_25 = arith.constant 3 : index
    %c0_26 = arith.constant 0 : index
    %21 = vector.load %arg5[%c0_24, %c3_25, %c0_26] : memref<20x20x5xf32, #tpu.memory_space<vmem>>, vector<16x16x5xf32>
    %22 = vector.shape_cast %21 : vector<16x16x5xf32> to vector<256x5xf32>
    %c0_27 = arith.constant 0 : index
    %c15 = arith.constant 15 : index
    %23 = vector.load %arg6[%c0_27, %c15] : memref<256x125xf32, #tpu.memory_space<vmem>>, vector<256x5xf32>
    tpu.vector_store %arg6[%c0_27, %c15], %22 {strides = array<i32>} : memref<256x125xf32, #tpu.memory_space<vmem>>, vector<256x5xf32>,
    %c0_28 = arith.constant 0 : index
    %c4_29 = arith.constant 4 : index
    %c0_30 = arith.constant 0 : index
    %24 = vector.load %arg5[%c0_28, %c4_29, %c0_30] : memref<20x20x5xf32, #tpu.memory_space<vmem>>, vector<16x16x5xf32>
    %25 = vector.shape_cast %24 : vector<16x16x5xf32> to vector<256x5xf32>
    %c0_31 = arith.constant 0 : index
    %c20 = arith.constant 20 : index
    %26 = vector.load %arg6[%c0_31, %c20] : memref<256x125xf32, #tpu.memory_space<vmem>>, vector<256x5xf32>
    tpu.vector_store %arg6[%c0_31, %c20], %25 {strides = array<i32>} : memref<256x125xf32, #tpu.memory_space<vmem>>, vector<256x5xf32>,
    %c1_32 = arith.constant 1 : index
    %c0_33 = arith.constant 0 : index
    %c0_34 = arith.constant 0 : index
    %27 = vector.load %arg5[%c1_32, %c0_33, %c0_34] : memref<20x20x5xf32, #tpu.memory_space<vmem>>, vector<16x16x5xf32>
    %28 = vector.shape_cast %27 : vector<16x16x5xf32> to vector<256x5xf32>
    %c0_35 = arith.constant 0 : index
    %c25 = arith.constant 25 : index
    %29 = vector.load %arg6[%c0_35, %c25] : memref<256x125xf32, #tpu.memory_space<vmem>>, vector<256x5xf32>
    tpu.vector_store %arg6[%c0_35, %c25], %28 {strides = array<i32>} : memref<256x125xf32, #tpu.memory_space<vmem>>, vector<256x5xf32>,
    %c1_36 = arith.constant 1 : index
    %c1_37 = arith.constant 1 : index
    %c0_38 = arith.constant 0 : index
    %30 = vector.load %arg5[%c1_36, %c1_37, %c0_38] : memref<20x20x5xf32, #tpu.memory_space<vmem>>, vector<16x16x5xf32>
    %31 = vector.shape_cast %30 : vector<16x16x5xf32> to vector<256x5xf32>
    %c0_39 = arith.constant 0 : index
    %c30 = arith.constant 30 : index
    %32 = vector.load %arg6[%c0_39, %c30] : memref<256x125xf32, #tpu.memory_space<vmem>>, vector<256x5xf32>
    tpu.vector_store %arg6[%c0_39, %c30], %31 {strides = array<i32>} : memref<256x125xf32, #tpu.memory_space<vmem>>, vector<256x5xf32>,
    %c1_40 = arith.constant 1 : index
    %c2_41 = arith.constant 2 : index
    %c0_42 = arith.constant 0 : index
    %33 = vector.load %arg5[%c1_40, %c2_41, %c0_42] : memref<20x20x5xf32, #tpu.memory_space<vmem>>, vector<16x16x5xf32>
    %34 = vector.shape_cast %33 : vector<16x16x5xf32> to vector<256x5xf32>
    %c0_43 = arith.constant 0 : index
    %c35 = arith.constant 35 : index
    %35 = vector.load %arg6[%c0_43, %c35] : memref<256x125xf32, #tpu.memory_space<vmem>>, vector<256x5xf32>
    tpu.vector_store %arg6[%c0_43, %c35], %34 {strides = array<i32>} : memref<256x125xf32, #tpu.memory_space<vmem>>, vector<256x5xf32>,
    %c1_44 = arith.constant 1 : index
    %c3_45 = arith.constant 3 : index
    %c0_46 = arith.constant 0 : index
    %36 = vector.load %arg5[%c1_44, %c3_45, %c0_46] : memref<20x20x5xf32, #tpu.memory_space<vmem>>, vector<16x16x5xf32>
    %37 = vector.shape_cast %36 : vector<16x16x5xf32> to vector<256x5xf32>
    %c0_47 = arith.constant 0 : index
    %c40 = arith.constant 40 : index
    %38 = vector.load %arg6[%c0_47, %c40] : memref<256x125xf32, #tpu.memory_space<vmem>>, vector<256x5xf32>
    tpu.vector_store %arg6[%c0_47, %c40], %37 {strides = array<i32>} : memref<256x125xf32, #tpu.memory_space<vmem>>, vector<256x5xf32>,
    %c1_48 = arith.constant 1 : index
    %c4_49 = arith.constant 4 : index
    %c0_50 = arith.constant 0 : index
    %39 = vector.load %arg5[%c1_48, %c4_49, %c0_50] : memref<20x20x5xf32, #tpu.memory_space<vmem>>, vector<16x16x5xf32>
    %40 = vector.shape_cast %39 : vector<16x16x5xf32> to vector<256x5xf32>
    %c0_51 = arith.constant 0 : index
    %c45 = arith.constant 45 : index
    %41 = vector.load %arg6[%c0_51, %c45] : memref<256x125xf32, #tpu.memory_space<vmem>>, vector<256x5xf32>
    tpu.vector_store %arg6[%c0_51, %c45], %40 {strides = array<i32>} : memref<256x125xf32, #tpu.memory_space<vmem>>, vector<256x5xf32>,
    %c2_52 = arith.constant 2 : index
    %c0_53 = arith.constant 0 : index
    %c0_54 = arith.constant 0 : index
    %42 = vector.load %arg5[%c2_52, %c0_53, %c0_54] : memref<20x20x5xf32, #tpu.memory_space<vmem>>, vector<16x16x5xf32>
    %43 = vector.shape_cast %42 : vector<16x16x5xf32> to vector<256x5xf32>
    %c0_55 = arith.constant 0 : index
    %c50 = arith.constant 50 : index
    %44 = vector.load %arg6[%c0_55, %c50] : memref<256x125xf32, #tpu.memory_space<vmem>>, vector<256x5xf32>
    tpu.vector_store %arg6[%c0_55, %c50], %43 {strides = array<i32>} : memref<256x125xf32, #tpu.memory_space<vmem>>, vector<256x5xf32>,
    %c2_56 = arith.constant 2 : index
    %c1_57 = arith.constant 1 : index
    %c0_58 = arith.constant 0 : index
    %45 = vector.load %arg5[%c2_56, %c1_57, %c0_58] : memref<20x20x5xf32, #tpu.memory_space<vmem>>, vector<16x16x5xf32>
    %46 = vector.shape_cast %45 : vector<16x16x5xf32> to vector<256x5xf32>
    %c0_59 = arith.constant 0 : index
    %c55 = arith.constant 55 : index
    %47 = vector.load %arg6[%c0_59, %c55] : memref<256x125xf32, #tpu.memory_space<vmem>>, vector<256x5xf32>
    tpu.vector_store %arg6[%c0_59, %c55], %46 {strides = array<i32>} : memref<256x125xf32, #tpu.memory_space<vmem>>, vector<256x5xf32>,
    %c2_60 = arith.constant 2 : index
    %c2_61 = arith.constant 2 : index
    %c0_62 = arith.constant 0 : index
    %48 = vector.load %arg5[%c2_60, %c2_61, %c0_62] : memref<20x20x5xf32, #tpu.memory_space<vmem>>, vector<16x16x5xf32>
    %49 = vector.shape_cast %48 : vector<16x16x5xf32> to vector<256x5xf32>
    %c0_63 = arith.constant 0 : index
    %c60 = arith.constant 60 : index
    %50 = vector.load %arg6[%c0_63, %c60] : memref<256x125xf32, #tpu.memory_space<vmem>>, vector<256x5xf32>
    tpu.vector_store %arg6[%c0_63, %c60], %49 {strides = array<i32>} : memref<256x125xf32, #tpu.memory_space<vmem>>, vector<256x5xf32>,
    %c2_64 = arith.constant 2 : index
    %c3_65 = arith.constant 3 : index
    %c0_66 = arith.constant 0 : index
    %51 = vector.load %arg5[%c2_64, %c3_65, %c0_66] : memref<20x20x5xf32, #tpu.memory_space<vmem>>, vector<16x16x5xf32>
    %52 = vector.shape_cast %51 : vector<16x16x5xf32> to vector<256x5xf32>
    %c0_67 = arith.constant 0 : index
    %c65 = arith.constant 65 : index
    %53 = vector.load %arg6[%c0_67, %c65] : memref<256x125xf32, #tpu.memory_space<vmem>>, vector<256x5xf32>
    tpu.vector_store %arg6[%c0_67, %c65], %52 {strides = array<i32>} : memref<256x125xf32, #tpu.memory_space<vmem>>, vector<256x5xf32>,
    %c2_68 = arith.constant 2 : index
    %c4_69 = arith.constant 4 : index
    %c0_70 = arith.constant 0 : index
    %54 = vector.load %arg5[%c2_68, %c4_69, %c0_70] : memref<20x20x5xf32, #tpu.memory_space<vmem>>, vector<16x16x5xf32>
    %55 = vector.shape_cast %54 : vector<16x16x5xf32> to vector<256x5xf32>
    %c0_71 = arith.constant 0 : index
    %c70 = arith.constant 70 : index
    %56 = vector.load %arg6[%c0_71, %c70] : memref<256x125xf32, #tpu.memory_space<vmem>>, vector<256x5xf32>
    tpu.vector_store %arg6[%c0_71, %c70], %55 {strides = array<i32>} : memref<256x125xf32, #tpu.memory_space<vmem>>, vector<256x5xf32>,
    %c3_72 = arith.constant 3 : index
    %c0_73 = arith.constant 0 : index
    %c0_74 = arith.constant 0 : index
    %57 = vector.load %arg5[%c3_72, %c0_73, %c0_74] : memref<20x20x5xf32, #tpu.memory_space<vmem>>, vector<16x16x5xf32>
    %58 = vector.shape_cast %57 : vector<16x16x5xf32> to vector<256x5xf32>
    %c0_75 = arith.constant 0 : index
    %c75 = arith.constant 75 : index
    %59 = vector.load %arg6[%c0_75, %c75] : memref<256x125xf32, #tpu.memory_space<vmem>>, vector<256x5xf32>
    tpu.vector_store %arg6[%c0_75, %c75], %58 {strides = array<i32>} : memref<256x125xf32, #tpu.memory_space<vmem>>, vector<256x5xf32>,
    %c3_76 = arith.constant 3 : index
    %c1_77 = arith.constant 1 : index
    %c0_78 = arith.constant 0 : index
    %60 = vector.load %arg5[%c3_76, %c1_77, %c0_78] : memref<20x20x5xf32, #tpu.memory_space<vmem>>, vector<16x16x5xf32>
    %61 = vector.shape_cast %60 : vector<16x16x5xf32> to vector<256x5xf32>
    %c0_79 = arith.constant 0 : index
    %c80 = arith.constant 80 : index
    %62 = vector.load %arg6[%c0_79, %c80] : memref<256x125xf32, #tpu.memory_space<vmem>>, vector<256x5xf32>
    tpu.vector_store %arg6[%c0_79, %c80], %61 {strides = array<i32>} : memref<256x125xf32, #tpu.memory_space<vmem>>, vector<256x5xf32>,
    %c3_80 = arith.constant 3 : index
    %c2_81 = arith.constant 2 : index
    %c0_82 = arith.constant 0 : index
    %63 = vector.load %arg5[%c3_80, %c2_81, %c0_82] : memref<20x20x5xf32, #tpu.memory_space<vmem>>, vector<16x16x5xf32>
    %64 = vector.shape_cast %63 : vector<16x16x5xf32> to vector<256x5xf32>
    %c0_83 = arith.constant 0 : index
    %c85 = arith.constant 85 : index
    %65 = vector.load %arg6[%c0_83, %c85] : memref<256x125xf32, #tpu.memory_space<vmem>>, vector<256x5xf32>
    tpu.vector_store %arg6[%c0_83, %c85], %64 {strides = array<i32>} : memref<256x125xf32, #tpu.memory_space<vmem>>, vector<256x5xf32>,
    %c3_84 = arith.constant 3 : index
    %c3_85 = arith.constant 3 : index
    %c0_86 = arith.constant 0 : index
    %66 = vector.load %arg5[%c3_84, %c3_85, %c0_86] : memref<20x20x5xf32, #tpu.memory_space<vmem>>, vector<16x16x5xf32>
    %67 = vector.shape_cast %66 : vector<16x16x5xf32> to vector<256x5xf32>
    %c0_87 = arith.constant 0 : index
    %c90 = arith.constant 90 : index
    %68 = vector.load %arg6[%c0_87, %c90] : memref<256x125xf32, #tpu.memory_space<vmem>>, vector<256x5xf32>
    tpu.vector_store %arg6[%c0_87, %c90], %67 {strides = array<i32>} : memref<256x125xf32, #tpu.memory_space<vmem>>, vector<256x5xf32>,
    %c3_88 = arith.constant 3 : index
    %c4_89 = arith.constant 4 : index
    %c0_90 = arith.constant 0 : index
    %69 = vector.load %arg5[%c3_88, %c4_89, %c0_90] : memref<20x20x5xf32, #tpu.memory_space<vmem>>, vector<16x16x5xf32>
    %70 = vector.shape_cast %69 : vector<16x16x5xf32> to vector<256x5xf32>
    %c0_91 = arith.constant 0 : index
    %c95 = arith.constant 95 : index
    %71 = vector.load %arg6[%c0_91, %c95] : memref<256x125xf32, #tpu.memory_space<vmem>>, vector<256x5xf32>
    tpu.vector_store %arg6[%c0_91, %c95], %70 {strides = array<i32>} : memref<256x125xf32, #tpu.memory_space<vmem>>, vector<256x5xf32>,
    %c4_92 = arith.constant 4 : index
    %c0_93 = arith.constant 0 : index
    %c0_94 = arith.constant 0 : index
    %72 = vector.load %arg5[%c4_92, %c0_93, %c0_94] : memref<20x20x5xf32, #tpu.memory_space<vmem>>, vector<16x16x5xf32>
    %73 = vector.shape_cast %72 : vector<16x16x5xf32> to vector<256x5xf32>
    %c0_95 = arith.constant 0 : index
    %c100 = arith.constant 100 : index
    %74 = vector.load %arg6[%c0_95, %c100] : memref<256x125xf32, #tpu.memory_space<vmem>>, vector<256x5xf32>
    tpu.vector_store %arg6[%c0_95, %c100], %73 {strides = array<i32>} : memref<256x125xf32, #tpu.memory_space<vmem>>, vector<256x5xf32>,
    %c4_96 = arith.constant 4 : index
    %c1_97 = arith.constant 1 : index
    %c0_98 = arith.constant 0 : index
    %75 = vector.load %arg5[%c4_96, %c1_97, %c0_98] : memref<20x20x5xf32, #tpu.memory_space<vmem>>, vector<16x16x5xf32>
    %76 = vector.shape_cast %75 : vector<16x16x5xf32> to vector<256x5xf32>
    %c0_99 = arith.constant 0 : index
    %c105 = arith.constant 105 : index
    %77 = vector.load %arg6[%c0_99, %c105] : memref<256x125xf32, #tpu.memory_space<vmem>>, vector<256x5xf32>
    tpu.vector_store %arg6[%c0_99, %c105], %76 {strides = array<i32>} : memref<256x125xf32, #tpu.memory_space<vmem>>, vector<256x5xf32>,
    %c4_100 = arith.constant 4 : index
    %c2_101 = arith.constant 2 : index
    %c0_102 = arith.constant 0 : index
    %78 = vector.load %arg5[%c4_100, %c2_101, %c0_102] : memref<20x20x5xf32, #tpu.memory_space<vmem>>, vector<16x16x5xf32>
    %79 = vector.shape_cast %78 : vector<16x16x5xf32> to vector<256x5xf32>
    %c0_103 = arith.constant 0 : index
    %c110 = arith.constant 110 : index
    %80 = vector.load %arg6[%c0_103, %c110] : memref<256x125xf32, #tpu.memory_space<vmem>>, vector<256x5xf32>
    tpu.vector_store %arg6[%c0_103, %c110], %79 {strides = array<i32>} : memref<256x125xf32, #tpu.memory_space<vmem>>, vector<256x5xf32>,
    %c4_104 = arith.constant 4 : index
    %c3_105 = arith.constant 3 : index
    %c0_106 = arith.constant 0 : index
    %81 = vector.load %arg5[%c4_104, %c3_105, %c0_106] : memref<20x20x5xf32, #tpu.memory_space<vmem>>, vector<16x16x5xf32>
    %82 = vector.shape_cast %81 : vector<16x16x5xf32> to vector<256x5xf32>
    %c0_107 = arith.constant 0 : index
    %c115 = arith.constant 115 : index
    %83 = vector.load %arg6[%c0_107, %c115] : memref<256x125xf32, #tpu.memory_space<vmem>>, vector<256x5xf32>
    tpu.vector_store %arg6[%c0_107, %c115], %82 {strides = array<i32>} : memref<256x125xf32, #tpu.memory_space<vmem>>, vector<256x5xf32>,
    %c4_108 = arith.constant 4 : index
    %c4_109 = arith.constant 4 : index
    %c0_110 = arith.constant 0 : index
    %84 = vector.load %arg5[%c4_108, %c4_109, %c0_110] : memref<20x20x5xf32, #tpu.memory_space<vmem>>, vector<16x16x5xf32>
    %85 = vector.shape_cast %84 : vector<16x16x5xf32> to vector<256x5xf32>
    %c0_111 = arith.constant 0 : index
    %c120 = arith.constant 120 : index
    %86 = vector.load %arg6[%c0_111, %c120] : memref<256x125xf32, #tpu.memory_space<vmem>>, vector<256x5xf32>
    tpu.vector_store %arg6[%c0_111, %c120], %85 {strides = array<i32>} : memref<256x125xf32, #tpu.memory_space<vmem>>, vector<256x5xf32>,
    %c0_112 = arith.constant 0 : index
    %c0_113 = arith.constant 0 : index
    %87 = vector.load %arg6[%c0_112, %c0_113] : memref<256x125xf32, #tpu.memory_space<vmem>>, vector<256x125xf32>
    %c0_114 = arith.constant 0 : index
    %c0_115 = arith.constant 0 : index
    %88 = vector.load %arg2[%c0_114, %c0_115] : memref<125x128xf32, #tpu.memory_space<vmem>>, vector<125x128xf32>
    %cst_116 = arith.constant dense<0.000000e+00> : vector<256x128xf32>
    %89 = tpu.matmul %87, %88, %cst_116 {dimension_numbers = #tpu.dot_dimension_numbers<[1], [0], [0], [1], [0, 0, 1, 1], [], []>} : vector<256x125xf32>, vector<125x128xf32>, vector<256x128xf32> -> vector<256x128xf32>
    %c0_117 = arith.constant 0 : index
    %c0_118 = arith.constant 0 : index
    %90 = vector.load %arg3[%c0_117, %c0_118] : memref<1x128xf32, #tpu.memory_space<vmem>>, vector<1x128xf32>
    %91 = vector.shape_cast %90 : vector<1x128xf32> to vector<128xf32>
    %92 = vector.shape_cast %91 : vector<128xf32> to vector<1x128xf32>
    %93 = vector.broadcast %92 : vector<1x128xf32> to vector<256x128xf32>
    %94 = arith.addf %89, %93 : vector<256x128xf32>
    %95 = tpu.transpose %94, [1, 0] : vector<256x128xf32> -> vector<128x256xf32>
    %96 = vector.extract_strided_slice %95 {offsets = [0, 0], sizes = [48, 256], strides = [1, 1]} : vector<128x256xf32> to vector<48x256xf32>
    %97 = vector.extract_strided_slice %95 {offsets = [48, 0], sizes = [48, 256], strides = [1, 1]} : vector<128x256xf32> to vector<48x256xf32>
    %98 = vector.extract_strided_slice %95 {offsets = [96, 0], sizes = [1, 256], strides = [1, 1]} : vector<128x256xf32> to vector<1x256xf32>
    %cst_119 = arith.constant 0.000000e+00 : f32
    %99 = vector.broadcast %cst_119 : f32 to vector<48x256xf32>
    %100 = arith.cmpf oge, %96, %99 : vector<48x256xf32>
    %cst_120 = arith.constant 2.000000e-01 : f32
    %101 = vector.broadcast %cst_120 : f32 to vector<48x256xf32>
    %102 = arith.mulf %101, %96 : vector<48x256xf32>
    %103 = arith.select %100, %96, %102 : vector<48x256xi1>, vector<48x256xf32>
    %cst_121 = arith.constant 0.000000e+00 : f32
    %104 = vector.broadcast %cst_121 : f32 to vector<48x256xf32>
    %105 = arith.subf %104, %97 : vector<48x256xf32>
    %106 = math.exp %105 : vector<48x256xf32>
    %cst_122 = arith.constant 1.000000e+00 : f32
    %107 = vector.broadcast %cst_122 : f32 to vector<48x256xf32>
    %108 = arith.addf %107, %106 : vector<48x256xf32>
    %cst_123 = arith.constant 1.000000e+00 : f32
    %109 = vector.broadcast %cst_123 : f32 to vector<48x256xf32>
    %110 = arith.divf %109, %108 : vector<48x256xf32>
    %111 = arith.mulf %103, %110 : vector<48x256xf32>
    %cst_124 = arith.constant 4.000000e-02 : f32
    %112 = vector.broadcast %cst_124 : f32 to vector<1x256xf32>
    %113 = arith.mulf %98, %112 : vector<1x256xf32>
    %114 = vector.broadcast %113 : vector<1x256xf32> to vector<48x256xf32>
    %115 = arith.mulf %111, %114 : vector<48x256xf32>
    %c0_125 = arith.constant 0 : index
    %c0_126 = arith.constant 0 : index
    %c0_127 = arith.constant 0 : index
    %116 = vector.load %arg4[%c0_125, %c0_126, %c0_127] : memref<1x48x256xf32, #tpu.memory_space<vmem>>, vector<1x48x256xf32>
    %117 = vector.shape_cast %116 : vector<1x48x256xf32> to vector<48x256xf32>
    %118 = vector.shape_cast %115 : vector<48x256xf32> to vector<1x48x256xf32>
    tpu.vector_store %arg4[%c0_125, %c0_126, %c0_127], %118 {strides = array<i32>} : memref<1x48x256xf32, #tpu.memory_space<vmem>>, vector<1x48x256xf32>,
    return
  }
  func.func @transform_0(%arg0: i32) -> (i32, i32, i32) {
    %c0_i32 = arith.constant 0 : i32
    %c0_i32_0 = arith.constant 0 : i32
    %c0_i32_1 = arith.constant 0 : i32
    return %arg0, %c0_i32, %c0_i32_0 : i32, i32, i32
  }
  func.func @transform_1(%arg0: i32) -> (i32, i32) {
    %c0_i32 = arith.constant 0 : i32
    %c0_i32_0 = arith.constant 0 : i32
    %c0_i32_1 = arith.constant 0 : i32
    return %c0_i32, %c0_i32_0 : i32, i32
  }
  func.func @transform_2(%arg0: i32) -> (i32, i32) {
    %c0_i32 = arith.constant 0 : i32
    %c0_i32_0 = arith.constant 0 : i32
    %c0_i32_1 = arith.constant 0 : i32
    return %c0_i32, %c0_i32_0 : i32, i32
  }
  func.func @transform_3(%arg0: i32) -> (i32, i32, i32) {
    %c0_i32 = arith.constant 0 : i32
    %c0_i32_0 = arith.constant 0 : i32
    %c0_i32_1 = arith.constant 0 : i32
    return %arg0, %c0_i32, %c0_i32_0 : i32, i32, i32
  }
}

</mosaic_0001>

<bundles_post_ra>
// kernel: _lambda_.1
= control target key start
LH: loop header
LB: loop body
LE: loop exit
PB: predicated region body
PF: predicated region fallthrough
CT: control target
= control target key end

     0   :  { %s6771_s12 = smov 0   ;;  %s9201_s0 = inlined_call_operand.vmem [shape: f32[2,256,4], index: 0, kind: input, shape index: {}]   ;;  %s9202_s1 = inlined_call_operand.vmem [shape: f32[125,128], index: 1, kind: input, shape index: {}]   ;;  %s9203_s2 = inlined_call_operand.vmem [shape: f32[1,128], index: 2, kind: input, shape index: {}]   ;;  %s9204_s3 = inlined_call_operand.vmem [shape: f32[2,48,256], index: 3, kind: output, shape index: {}]  }
   0x1 LB: > { %s6194_s13 = sadd.s32 4294967295, %s6722_s12   ;;  %p6198_p0 = scmp.ge.s32.totalorder %s6722_s12, 1  ;;  %s6722_s12 = sphi %s6771_s12, %s13_s12  }
   0x2   : > { %p137_p1 = scmp.lt.s32.totalorder %s6722_s12, 3 }
   0x4   : > { %p138_p2 = pnand %p6198_p0, %p137_p1 }
   0x5   : > { %vm171_vm0 = vcmask (!%p138_p2), 39936   ;;  %vm174_vm1 = vcmask (!%p138_p2), 35840   ;;  %p6781_p3 = scmp.lt.s32.totalorder (!%p138_p2), %s6194_s13, 1  ;;  %v6724_v0 = vmov (!%p138_p2), 0.0   ;;  %vm266_vm2 = vcmask (!%p138_p2), 31744   ;;  %s6725_s19 = smov (!%p138_p2), 1  }
   0x6   : > { %141 = sbr.rel (%p138_p2) target bundleno = 2186 (0x88a), region = 32  ;;  %172 = vst.msk [vmem:[#allocation2] sm:$0xff] (!%p138_p2), %vm171_vm0, %v6724_v0  ;;  %173 = vst.msk [vmem:[#allocation2 + $0x8] sm:$0xff] (!%p138_p2), %vm171_vm0, %v6724_v0  ;;  %s6726_s20 = smov (!%p138_p2), 5  }
   0x7   : > { %176 = vst.msk [vmem:[#allocation2 + $0x18] sm:$0xff] (!%p138_p2), %vm171_vm0, %v6724_v0  ;;  %177 = vst.msk [vmem:[#allocation2 + $0x20] sm:$0xff] (!%p138_p2), %vm171_vm0, %v6724_v0  ;;  %s6727_s21 = smov (!%p138_p2), 10   ;;  %s6728_s22 = smov (!%p138_p2), 15  }
   0x8   : > { %179 = vst.msk [vmem:[#allocation2 + $0x30] sm:$0xff] (!%p138_p2), %vm171_vm0, %v6724_v0  ;;  %180 = vst.msk [vmem:[#allocation2 + $0x38] sm:$0xff] (!%p138_p2), %vm171_vm0, %v6724_v0  ;;  %s6729_s23 = smov (!%p138_p2), 20   ;;  %s6730_s24 = smov (!%p138_p2), 25  }
   0x9   : > { %182 = vst.msk [vmem:[#allocation2 + $0x48] sm:$0xff] (!%p138_p2), %vm171_vm0, %v6724_v0  ;;  %183 = vst.msk [vmem:[#allocation2 + $0x50] sm:$0xff] (!%p138_p2), %vm171_vm0, %v6724_v0  ;;  %s6731_s25 = smov (!%p138_p2), 30   ;;  %s6732_s26 = smov (!%p138_p2), 35  }
   0xa   : > { %185 = vst.msk [vmem:[#allocation2 + $0x60] sm:$0xff] (!%p138_p2), %vm171_vm0, %v6724_v0  ;;  %186 = vst.msk [vmem:[#allocation2 + $0x68] sm:$0xff] (!%p138_p2), %vm171_vm0, %v6724_v0  ;;  %s6733_s27 = smov (!%p138_p2), 40   ;;  %s6734_s28 = smov (!%p138_p2), 45  }
   0xb   : > { %188 = vst.msk [vmem:[#allocation2 + $0x78] sm:$0xff] (!%p138_p2), %vm171_vm0, %v6724_v0  ;;  %189 = vst.msk [vmem:[#allocation2 + $0x80] sm:$0xff] (!%p138_p2), %vm171_vm0, %v6724_v0  ;;  %s6735_s29 = smov (!%p138_p2), 50   ;;  %s6736_s30 = smov (!%p138_p2), 55  }
   0xc   : > { %191 = vst.msk [vmem:[#allocation2 + $0x90] sm:$0xff] (!%p138_p2), %vm171_vm0, %v6724_v0  ;;  %192 = vst.msk [vmem:[#allocation2 + $0x98] sm:$0xff] (!%p138_p2), %vm171_vm0, %v6724_v0  ;;  %s6737_s4 = smov (!%p138_p2), 60   ;;  %s6738_s5 = smov (!%p138_p2), 65  }
   0xd   : > { %194 = vst.msk [vmem:[#allocation2 + $0xa8] sm:$0xff] %vm171_vm0, %v6724_v0  ;;  %195 = vst.msk [vmem:[#allocation2 + $0xb0] sm:$0xff] %vm171_vm0, %v6724_v0  ;;  %s9207_s13 = smov (!%p6781_p3, %s6194_s13), 1  ;;  %v299_v7 = vld [vmem:[#allocation2] sm:$0xff]  ;;  %v300_v8 = vld [vmem:[#allocation2 + $0x8] sm:$0xff]  ;;  %s6739_s6 = smov 70  }
   0xe   : > { %197 = vst.msk [vmem:[#allocation2 + $0xc0] sm:$0xff] %vm171_vm0, %v6724_v0  ;;  %198 = vst.msk [vmem:[#allocation2 + $0xc8] sm:$0xff] %vm171_vm0, %v6724_v0  ;;  %s6298_s15 = sshll.u32 %s9207_s13, 8  ;;  %v303_v9 = vld [vmem:[#allocation2 + $0x20] sm:$0xff]  ;;  %vm359_vm3 = vcmp.ne.f32.partialorder %v299_v7, 1.0  ;;  %vm360_vm4 = vcmp.ne.f32.partialorder %v300_v8, 1.0 }
   0xf   : > { %200 = vst.msk [vmem:[#allocation2 + $0xd8] sm:$0xff] %vm171_vm0, %v6724_v0  ;;  %201 = vst.msk [vmem:[#allocation2 + $0xe0] sm:$0xff] %vm171_vm0, %v6724_v0  ;;  %s6915_s18 = scalar_lea.vmem %s9201_s0, %s6298_s15  ;;  %vm363_vm5 = vcmp.ne.f32.partialorder %v303_v9, 1.0  ;;  %v302_v11 = vld [vmem:[#allocation2 + $0x18] sm:$0xff]  ;;  %v6202_v12 = vsel %vm359_vm3, 1.0, %v6724_v0  ;;  %v6203_v13 = vsel %vm360_vm4, 1.0, %v6724_v0 }
  0x10   : > { %203 = vst.msk [vmem:[#allocation2 + $0xf0] sm:$0xff] %vm171_vm0, %v6724_v0  ;;  %204 = vst.msk [vmem:[#allocation2 + $0xf8] sm:$0xff] %vm171_vm0, %v6724_v0  ;;  %v233_v1 = vld [vmem:[%s6915_s18] sm:$0xff]  ;;  %v234_v2 = vld [vmem:[%s6915_s18 + $0x8] sm:$0xff]  ;;  %v6206_v14 = vsel %vm363_vm5, 1.0, %v6724_v0  ;;  %v6513_v16 = vpack.i.bf16 %v6203_v13, %v6202_v12  ;;  %vm362_vm8 = vcmp.ne.f32.partialorder %v302_v11, 1.0 }
  0x11   : > { %206 = vst.msk [vmem:[#allocation2 + $0x108] sm:$0xff] %vm171_vm0, %v6724_v0  ;;  %207 = vst.msk [vmem:[#allocation2 + $0x110] sm:$0xff] %vm171_vm0, %v6724_v0  ;;  %v235_v3 = vld [vmem:[%s6915_s18 + $0x10] sm:$0xff]  ;;  %v236_v4 = vld [vmem:[%s6915_s18 + $0x18] sm:$0xff]  ;;  %v6205_v23 = vsel %vm362_vm8, 1.0, %v6724_v0  ;;  %s6740_s7 = smov 75  }
  0x12   : > { %209 = vst.msk [vmem:[#allocation2 + $0x120] sm:$0xff] %vm171_vm0, %v6724_v0  ;;  %210 = vst.msk [vmem:[#allocation2 + $0x128] sm:$0xff] %vm171_vm0, %v6724_v0  ;;  %v237_v5 = vld [vmem:[%s6915_s18 + $0x20] sm:$0xff]  ;;  %v238_v6 = vld [vmem:[%s6915_s18 + $0x28] sm:$0xff]  ;;  %6514 = vrot.lane.b32.xlu0 %v6513_v16, %s6725_s19  ;;  %s6741_s8 = smov 80   ;;  %s6742_s9 = smov 85  }
  0x13   : > { %212 = vst.msk [vmem:[#allocation2 + $0x138] sm:$0xff] %vm171_vm0, %v6724_v0  ;;  %213 = vst.msk [vmem:[#allocation2 + $0x140] sm:$0xff] %vm171_vm0, %v6724_v0  ;;  %v239_v18 = vld [vmem:[%s6915_s18 + $0x30] sm:$0xff]  ;;  %v240_v19 = vld [vmem:[%s6915_s18 + $0x38] sm:$0xff]  ;;  %s6743_s10 = smov 90   ;;  %s6744_s11 = smov 95  }
  0x14   : > { %215 = vst.msk [vmem:[#allocation2 + $0x150] sm:$0xff] %vm171_vm0, %v6724_v0  ;;  %216 = vst.msk [vmem:[#allocation2 + $0x158] sm:$0xff] %vm171_vm0, %v6724_v0  ;;  %v241_v20 = vld [vmem:[%s6915_s18 + $0x40] sm:$0xff]  ;;  %v242_v24 = vld [vmem:[%s6915_s18 + $0x48] sm:$0xff]  ;;  %s6745_s14 = smov 100   ;;  %s6746_s15 = smov 105  }
  0x15   : > { %218 = vst.msk [vmem:[#allocation2 + $0x168] sm:$0xff] %vm171_vm0, %v6724_v0  ;;  %219 = vst.msk [vmem:[#allocation2 + $0x170] sm:$0xff] %vm171_vm0, %v6724_v0  ;;  %v243_v25 = vld [vmem:[%s6915_s18 + $0x50] sm:$0xff]  ;;  %v244_v26 = vld [vmem:[%s6915_s18 + $0x58] sm:$0xff] }
  0x16   : > { %221 = vst.msk [vmem:[#allocation2 + $0x180] sm:$0xff] %vm171_vm0, %v6724_v0  ;;  %222 = vst.msk [vmem:[#allocation2 + $0x188] sm:$0xff] %vm171_vm0, %v6724_v0  ;;  %v245_v28 = vld [vmem:[%s6915_s18 + $0x60] sm:$0xff]  ;;  %v246_v29 = vld [vmem:[%s6915_s18 + $0x68] sm:$0xff] }
  0x17   : > { %224 = vst.msk [vmem:[#allocation2 + $0x198] sm:$0xff] %vm171_vm0, %v6724_v0  ;;  %225 = vst.msk [vmem:[#allocation2 + $0x1a0] sm:$0xff] %vm171_vm0, %v6724_v0  ;;  %v247_v30 = vld [vmem:[%s6915_s18 + $0x70] sm:$0xff]  ;;  %v248_v48 = vld [vmem:[%s6915_s18 + $0x78] sm:$0xff] }
  0x18   : > { %227 = vst.msk [vmem:[#allocation2 + $0x1b0] sm:$0xff] %vm171_vm0, %v6724_v0  ;;  %228 = vst.msk [vmem:[#allocation2 + $0x1b8] sm:$0xff] %vm171_vm0, %v6724_v0  ;;  %v249_v49 = vld [vmem:[%s6915_s18 + $0x80] sm:$0xff]  ;;  %v250_v50 = vld [vmem:[%s6915_s18 + $0x88] sm:$0xff] }
  0x19   : > { %230 = vst.msk [vmem:[#allocation2 + $0x1c8] sm:$0xff] %vm171_vm0, %v6724_v0  ;;  %231 = vst.msk [vmem:[#allocation2 + $0x1d0] sm:$0xff] %vm171_vm0, %v6724_v0  ;;  %v251_v11 = vld [vmem:[%s6915_s18 + $0x90] sm:$0xff]  ;;  %v252_v12 = vld [vmem:[%s6915_s18 + $0x98] sm:$0xff] }
  0x1a   : > { %178 = vst.msk [vmem:[#allocation2 + $0x28] sm:$0xf] %vm174_vm1, %v6724_v0  ;;  %175 = vst.msk [vmem:[#allocation2 + $0x10] sm:$0xf] %vm174_vm1, %v6724_v0  ;;  %v253_v13 = vld [vmem:[%s6915_s18 + $0xa0] sm:$0xff] }
  0x1b   : > { %181 = vst.msk [vmem:[#allocation2 + $0x40] sm:$0xf] %vm174_vm1, %v6724_v0  ;;  %184 = vst.msk [vmem:[#allocation2 + $0x58] sm:$0xf] %vm174_vm1, %v6724_v0 }
  0x1c   : > { %187 = vst.msk [vmem:[#allocation2 + $0x70] sm:$0xf] %vm174_vm1, %v6724_v0  ;;  %190 = vst.msk [vmem:[#allocation2 + $0x88] sm:$0xf] %vm174_vm1, %v6724_v0 }
  0x1d   : > { %193 = vst.msk [vmem:[#allocation2 + $0xa0] sm:$0xf] %vm174_vm1, %v6724_v0  ;;  %196 = vst.msk [vmem:[#allocation2 + $0xb8] sm:$0xf] %vm174_vm1, %v6724_v0 }
  0x1e   : > { %199 = vst.msk [vmem:[#allocation2 + $0xd0] sm:$0xf] %vm174_vm1, %v6724_v0  ;;  %202 = vst.msk [vmem:[#allocation2 + $0xe8] sm:$0xf] %vm174_vm1, %v6724_v0 }
  0x1f   : > { %205 = vst.msk [vmem:[#allocation2 + $0x100] sm:$0xf] %vm174_vm1, %v6724_v0  ;;  %208 = vst.msk [vmem:[#allocation2 + $0x118] sm:$0xf] %vm174_vm1, %v6724_v0 }
  0x20   : > { %211 = vst.msk [vmem:[#allocation2 + $0x130] sm:$0xf] %vm174_vm1, %v6724_v0  ;;  %214 = vst.msk [vmem:[#allocation2 + $0x148] sm:$0xf] %vm174_vm1, %v6724_v0 }
  0x21   : > { %217 = vst.msk [vmem:[#allocation2 + $0x160] sm:$0xf] %vm174_vm1, %v6724_v0  ;;  %220 = vst.msk [vmem:[#allocation2 + $0x178] sm:$0xf] %vm174_vm1, %v6724_v0  ;;  %v304_v10 = vld [vmem:[#allocation2 + $0x28] sm:$0xf] }
  0x22   : > { %223 = vst.msk [vmem:[#allocation2 + $0x190] sm:$0xf] %vm174_vm1, %v6724_v0  ;;  %226 = vst.msk [vmem:[#allocation2 + $0x1a8] sm:$0xf] %vm174_vm1, %v6724_v0  ;;  %vm364_vm6 = vcmp.ne.f32.partialorder %v304_v10, 1.0 }
  0x23   : > { %229 = vst.msk [vmem:[#allocation2 + $0x1c0] sm:$0xf] %vm174_vm1, %v6724_v0  ;;  %232 = vst.msk [vmem:[#allocation2 + $0x1d8] sm:$0xf] %vm174_vm1, %v6724_v0  ;;  %v301_v15 = vld [vmem:[#allocation2 + $0x10] sm:$0xf] }
  0x24   : > { %267 = vst.msk [vmem:[#allocation2 + $0x32] sm:$0xff] %vm266_vm2, %v233_v1  ;;  %268 = vst.msk [vmem:[#allocation2 + $0x3a] sm:$0xff] %vm266_vm2, %v234_v2  ;;  %v6207_v17 = vsel %vm364_vm6, 1.0, %v6724_v0  ;;  %vm361_vm7 = vcmp.ne.f32.partialorder %v301_v15, 1.0 }
  0x25   : > { %269 = vst.msk [vmem:[#allocation2 + $0x4a] sm:$0xff] %vm266_vm2, %v235_v3  ;;  %270 = vst.msk [vmem:[#allocation2 + $0x52] sm:$0xff] %vm266_vm2, %v236_v4  ;;  %v6523_v21 = vpack.i.bf16 %v6207_v17, %v6206_v14  ;;  %v6204_v22 = vsel %vm361_vm7, 1.0, %v6724_v0 }
  0x26   : > { %271 = vst.msk [vmem:[#allocation2 + $0x62] sm:$0xff] %vm266_vm2, %v237_v5  ;;  %272 = vst.msk [vmem:[#allocation2 + $0x6a] sm:$0xff] %vm266_vm2, %v238_v6  ;;  %v6518_v27 = vpack.i.bf16 %v6205_v23, %v6204_v22 }
  0x27   : > { %273 = vst.msk [vmem:[#allocation2 + $0x7a] sm:$0xff] %vm266_vm2, %v239_v18  ;;  %274 = vst.msk [vmem:[#allocation2 + $0x82] sm:$0xff] %vm266_vm2, %v240_v19  ;;  %6524 = vrot.lane.b32.xlu1 %v6523_v21, %s6725_s19 }
  0x28   : > { %275 = vst.msk [vmem:[#allocation2 + $0x92] sm:$0xff] %vm266_vm2, %v241_v20  ;;  %276 = vst.msk [vmem:[#allocation2 + $0x9a] sm:$0xff] %vm266_vm2, %v242_v24  ;;  %6519 = vrot.lane.b32.xlu0 %v6518_v27, %s6725_s19  ;;  %v254_v20 = vld [vmem:[%s6915_s18 + $0xa8] sm:$0xff] }
  0x29   : > { %277 = vst.msk [vmem:[#allocation2 + $0xaa] sm:$0xff] %vm266_vm2, %v243_v25  ;;  %278 = vst.msk [vmem:[#allocation2 + $0xb2] sm:$0xff] %vm266_vm2, %v244_v26  ;;  %v255_v25 = vld [vmem:[%s6915_s18 + $0xb0] sm:$0xff] }
  0x2a   : > { %279 = vst.msk [vmem:[#allocation2 + $0xc2] sm:$0xff] %vm266_vm2, %v245_v28  ;;  %280 = vst.msk [vmem:[#allocation2 + $0xca] sm:$0xff] %vm266_vm2, %v246_v29  ;;  %v256_v28 = vld [vmem:[%s6915_s18 + $0xb8] sm:$0xff]  ;;  %v257_v29 = vld [vmem:[%s6915_s18 + $0xc0] sm:$0xff] }
  0x2b   : > { %v305_v31 = vld [vmem:[#allocation2 + $0x30] sm:$0xff]  ;;  %v306_v32 = vld [vmem:[#allocation2 + $0x38] sm:$0xff]  ;;  %v307_v33 = vld [vmem:[#allocation2 + $0x40] sm:$0xf]  ;;  %281 = vst.msk [vmem:[#allocation2 + $0xda] sm:$0xff] %vm266_vm2, %v247_v30 }
  0x2c   : > { %vm365_vm9 = vcmp.ne.f32.partialorder %v305_v31, 1.0  ;;  %vm366_vm10 = vcmp.ne.f32.partialorder %v306_v32, 1.0  ;;  %v308_v34 = vld [vmem:[#allocation2 + $0x48] sm:$0xff]  ;;  %vm367_vm11 = vcmp.ne.f32.partialorder %v307_v33, 1.0  ;;  %v309_v35 = vld [vmem:[#allocation2 + $0x50] sm:$0xff]  ;;  %282 = vst.msk [vmem:[#allocation2 + $0xe2] sm:$0xff] %vm266_vm2, %v248_v48 }
  0x2d   : > { %v311_v36 = vld [vmem:[#allocation2 + $0x60] sm:$0xff]  ;;  %v6208_v37 = vsel %vm365_vm9, 1.0, %v6724_v0  ;;  %v6209_v38 = vsel %vm366_vm10, 1.0, %v6724_v0  ;;  %vm368_vm12 = vcmp.ne.f32.partialorder %v308_v34, 1.0  ;;  %v6210_v39 = vsel %vm367_vm11, 1.0, %v6724_v0  ;;  %v312_v43 = vld [vmem:[#allocation2 + $0x68] sm:$0xff] }
  0x2e   : > { %v310_v40 = vld [vmem:[#allocation2 + $0x58] sm:$0xf]  ;;  %v6528_v41 = vpack.i.bf16 %v6209_v38, %v6208_v37  ;;  %v6211_v42 = vsel %vm368_vm12, 1.0, %v6724_v0  ;;  %vm369_vm13 = vcmp.ne.f32.partialorder %v309_v35, 1.0  ;;  %v313_v44 = vld [vmem:[#allocation2 + $0x70] sm:$0xf] }
  0x2f   : > { %vm370_vm14 = vcmp.ne.f32.partialorder %v310_v40, 1.0  ;;  %v6533_v45 = vpack.i.bf16 %v6211_v42, %v6210_v39  ;;  %v6212_v46 = vsel %vm369_vm13, 1.0, %v6724_v0  ;;  %vm371_vm15 = vcmp.ne.f32.partialorder %v311_v36, 1.0  ;;  %v315_v53 = vld [vmem:[#allocation2 + $0x80] sm:$0xff]  ;;  %v316_v54 = vld [vmem:[#allocation2 + $0x88] sm:$0xf] }
  0x30   : > { %v6213_v47 = vsel %vm370_vm14, 1.0, %v6724_v0  ;;  %6529 = vrot.lane.b32.xlu1 %v6528_v41, %s6725_s19  ;;  %vm372_vm1 = vcmp.ne.f32.partialorder %v312_v43, 1.0  ;;  %v6214_v52 = vsel %vm371_vm15, 1.0, %v6724_v0  ;;  %v314_v55 = vld [vmem:[#allocation2 + $0x78] sm:$0xff]  ;;  %283 = vst.msk [vmem:[#allocation2 + $0xf2] sm:$0xff] %vm266_vm2, %v249_v49  ;;  %284 = vst.msk [vmem:[#allocation2 + $0xfa] sm:$0xff] %vm266_vm2, %v250_v50 }
  0x31   : > { %v6538_v51 = vpack.i.bf16 %v6213_v47, %v6212_v46  ;;  %v6215_v56 = vsel %vm372_vm1, 1.0, %v6724_v0  ;;  %vm375_vm3 = vcmp.ne.f32.partialorder %v315_v53, 1.0  ;;  %vm376_vm4 = vcmp.ne.f32.partialorder %v316_v54, 1.0  ;;  %v317_v57 = vld [vmem:[#allocation2 + $0x90] sm:$0xff]  ;;  %v318_v58 = vld [vmem:[#allocation2 + $0x98] sm:$0xff]  ;;  %6534 = vrot.lane.b32.xlu0 %v6533_v45, %s6725_s19  ;;  %v320_v63 = vld [vmem:[#allocation2 + $0xa8] sm:$0xff] }
  0x32   : > { %vm373_vm5 = vcmp.ne.f32.partialorder %v313_v44, 1.0  ;;  %v6543_v59 = vpack.i.bf16 %v6215_v56, %v6214_v52  ;;  %v6218_v60 = vsel %vm375_vm3, 1.0, %v6724_v0  ;;  %v6219_v61 = vsel %vm376_vm4, 1.0, %v6724_v0  ;;  %v319_v62 = vld [vmem:[#allocation2 + $0xa0] sm:$0xf]  ;;  %v321_v3 = vld [vmem:[#allocation2 + $0xb0] sm:$0xff] }
  0x33   : > { %vm374_vm6 = vcmp.ne.f32.partialorder %v314_v55, 1.0  ;;  %v6216_v1 = vsel %vm373_vm5, 1.0, %v6724_v0  ;;  %vm377_vm7 = vcmp.ne.f32.partialorder %v317_v57, 1.0  ;;  %v322_v4 = vld [vmem:[#allocation2 + $0xb8] sm:$0xf]  ;;  %vm378_vm8 = vcmp.ne.f32.partialorder %v318_v58, 1.0 }
  0x34   : > { %v6217_v2 = vsel %vm374_vm6, 1.0, %v6724_v0  ;;  %6539 = vrot.lane.b32.xlu1 %v6538_v51, %s6725_s19  ;;  %vm379_vm9 = vcmp.ne.f32.partialorder %v319_v62, 1.0  ;;  %v6220_v6 = vsel %vm377_vm7, 1.0, %v6724_v0  ;;  %v6221_v7 = vsel %vm378_vm8, 1.0, %v6724_v0  ;;  %v323_v8 = vld [vmem:[#allocation2 + $0xc0] sm:$0xff]  ;;  %v324_v9 = vld [vmem:[#allocation2 + $0xc8] sm:$0xff] }
  0x35   : > { %v6548_v5 = vpack.i.bf16 %v6217_v2, %v6216_v1  ;;  %vm380_vm10 = vcmp.ne.f32.partialorder %v320_v63, 1.0  ;;  %6544 = vrot.lane.b32.xlu0 %v6543_v59, %s6725_s19  ;;  %v6553_v10 = vpack.i.bf16 %v6219_v61, %v6218_v60  ;;  %vm381_vm11 = vcmp.ne.f32.partialorder %v321_v3, 1.0  ;;  %v325_v16 = vld [vmem:[#allocation2 + $0xd0] sm:$0xf]  ;;  %v326_v17 = vld [vmem:[#allocation2 + $0xd8] sm:$0xff]  ;;  %285 = vst.msk [vmem:[#allocation2 + $0x10a] sm:$0xff] %vm266_vm2, %v251_v11 }
  0x36   : > { %vm382_vm12 = vcmp.ne.f32.partialorder %v322_v4, 1.0  ;;  %v6222_v14 = vsel %vm379_vm9, 1.0, %v6724_v0  ;;  %v6223_v15 = vsel %vm380_vm10, 1.0, %v6724_v0  ;;  %286 = vst.msk [vmem:[#allocation2 + $0x112] sm:$0xff] %vm266_vm2, %v252_v12  ;;  %287 = vst.msk [vmem:[#allocation2 + $0x122] sm:$0xff] %vm266_vm2, %v253_v13  ;;  %v6558_v18 = vpack.i.bf16 %v6221_v7, %v6220_v6  ;;  %v327_v19 = vld [vmem:[#allocation2 + $0xe0] sm:$0xff] }
  0x37   : > { %vm383_vm13 = vcmp.ne.f32.partialorder %v323_v8, 1.0  ;;  %vm384_vm14 = vcmp.ne.f32.partialorder %v324_v9, 1.0  ;;  %v6224_v21 = vsel %vm381_vm11, 1.0, %v6724_v0  ;;  %v6225_v22 = vsel %vm382_vm12, 1.0, %v6724_v0  ;;  %v328_v23 = vld [vmem:[#allocation2 + $0xe8] sm:$0xf] }
  0x38   : > { %6549 = vrot.lane.b32.xlu1 %v6548_v5, %s6725_s19  ;;  %v329_v24 = vld [vmem:[#allocation2 + $0xf0] sm:$0xff]  ;;  %288 = vst.msk [vmem:[#allocation2 + $0x12a] sm:$0xff] %vm266_vm2, %v254_v20  ;;  %v6563_v26 = vpack.i.bf16 %v6223_v15, %v6222_v14  ;;  %vm385_vm15 = vcmp.ne.f32.partialorder %v325_v16, 1.0  ;;  %vm386_vm1 = vcmp.ne.f32.partialorder %v326_v17, 1.0  ;;  %v330_v27 = vld [vmem:[#allocation2 + $0xf8] sm:$0xff]  ;;  %289 = vst.msk [vmem:[#allocation2 + $0x13a] sm:$0xff] %vm266_vm2, %v255_v25  ;;  %v6568_v35 = vpack.i.bf16 %v6225_v22, %v6224_v21 }
  0x39   : > { %6554 = vrot.lane.b32.xlu0 %v6553_v10, %s6725_s19  ;;  %v6226_v30 = vsel %vm383_vm13, 1.0, %v6724_v0  ;;  %v6227_v31 = vsel %vm384_vm14, 1.0, %v6724_v0  ;;  %290 = vst.msk [vmem:[#allocation2 + $0x142] sm:$0xff] %vm266_vm2, %v256_v28  ;;  %v258_v32 = vld [vmem:[%s6915_s18 + $0xc8] sm:$0xff]  ;;  %291 = vst.msk [vmem:[#allocation2 + $0x152] sm:$0xff] %vm266_vm2, %v257_v29  ;;  %v259_v33 = vld [vmem:[%s6915_s18 + $0xd0] sm:$0xff] }
  0x3a   : > { %v260_v34 = vld [vmem:[%s6915_s18 + $0xd8] sm:$0xff]  ;;  %vm387_vm3 = vcmp.ne.f32.partialorder %v327_v19, 1.0  ;;  %vm388_vm4 = vcmp.ne.f32.partialorder %v328_v23, 1.0  ;;  %292 = vst.msk [vmem:[#allocation2 + $0x15a] sm:$0xff] %vm266_vm2, %v258_v32  ;;  %293 = vst.msk [vmem:[#allocation2 + $0x16a] sm:$0xff] %vm266_vm2, %v259_v33  ;;  %v261_v36 = vld [vmem:[%s6915_s18 + $0xe0] sm:$0xff]  ;;  %v6573_v43 = vpack.i.bf16 %v6227_v31, %v6226_v30 }
  0x3b   : > { %294 = vst.msk [vmem:[#allocation2 + $0x172] sm:$0xff] %vm266_vm2, %v260_v34  ;;  %v262_v37 = vld [vmem:[%s6915_s18 + $0xe8] sm:$0xff]  ;;  %v263_v38 = vld [vmem:[%s6915_s18 + $0xf0] sm:$0xff]  ;;  %v6228_v39 = vsel %vm385_vm15, 1.0, %v6724_v0  ;;  %v6229_v40 = vsel %vm386_vm1, 1.0, %v6724_v0  ;;  %295 = vst.msk [vmem:[#allocation2 + $0x182] sm:$0xff] %vm266_vm2, %v261_v36 }
  0x3c   : > { %6559 = vrot.lane.b32.xlu1 %v6558_v18, %s6725_s19  ;;  %v331_v41 = vld [vmem:[#allocation2 + $0x100] sm:$0xf]  ;;  %296 = vst.msk [vmem:[#allocation2 + $0x18a] sm:$0xff] %vm266_vm2, %v262_v37  ;;  %v264_v42 = vld [vmem:[%s6915_s18 + $0xf8] sm:$0xff]  ;;  %297 = vst.msk [vmem:[#allocation2 + $0x19a] sm:$0xff] %vm266_vm2, %v263_v38  ;;  %vm389_vm5 = vcmp.ne.f32.partialorder %v329_v24, 1.0  ;;  %v6578_v49 = vpack.i.bf16 %v6229_v40, %v6228_v39 }
  0x3d   : > { %6564 = vrot.lane.b32.xlu0 %v6563_v26, %s6725_s19  ;;  %vm390_vm6 = vcmp.ne.f32.partialorder %v330_v27, 1.0  ;;  %v332_v44 = vld [vmem:[#allocation2 + $0x108] sm:$0xff]  ;;  %298 = vst.msk [vmem:[#allocation2 + $0x1a2] sm:$0xff] %vm266_vm2, %v264_v42  ;;  %v6230_v45 = vsel %vm387_vm3, 1.0, %v6724_v0  ;;  %v6231_v46 = vsel %vm388_vm4, 1.0, %v6724_v0  ;;  %v333_v47 = vld [vmem:[#allocation2 + $0x110] sm:$0xff] }
  0x3e   : > { %v334_v48 = vld [vmem:[#allocation2 + $0x118] sm:$0xf]  ;;  %vm391_vm7 = vcmp.ne.f32.partialorder %v331_v41, 1.0  ;;  %vm392_vm8 = vcmp.ne.f32.partialorder %v332_v44, 1.0  ;;  %v6232_v50 = vsel %vm389_vm5, 1.0, %v6724_v0  ;;  %v6233_v51 = vsel %vm390_vm6, 1.0, %v6724_v0 }
  0x3f   : > { %v335_v52 = vld [vmem:[#allocation2 + $0x120] sm:$0xff]  ;;  %v336_v53 = vld [vmem:[#allocation2 + $0x128] sm:$0xff]  ;;  %v6583_v54 = vpack.i.bf16 %v6231_v46, %v6230_v45  ;;  %vm393_vm2 = vcmp.ne.f32.partialorder %v333_v47, 1.0  ;;  %vm394_vm9 = vcmp.ne.f32.partialorder %v334_v48, 1.0  ;;  %v6234_v55 = vsel %vm391_vm7, 1.0, %v6724_v0  ;;  %v338_v58 = vld [vmem:[#allocation2 + $0x138] sm:$0xff] }
  0x40   : > { %6569 = vrot.lane.b32.xlu1 %v6568_v35, %s6725_s19  ;;  %v6235_v56 = vsel %vm392_vm8, 1.0, %v6724_v0  ;;  %v337_v57 = vld [vmem:[#allocation2 + $0x130] sm:$0xf]  ;;  %v6588_v59 = vpack.i.bf16 %v6233_v51, %v6232_v50  ;;  %vm395_vm10 = vcmp.ne.f32.partialorder %v335_v52, 1.0  ;;  %vm396_vm11 = vcmp.ne.f32.partialorder %v336_v53, 1.0  ;;  %v339_v62 = vld [vmem:[#allocation2 + $0x140] sm:$0xff] }
  0x41   : > { %6574 = vrot.lane.b32.xlu0 %v6573_v43, %s6725_s19  ;;  %v6236_v60 = vsel %vm393_vm2, 1.0, %v6724_v0  ;;  %v6237_v61 = vsel %vm394_vm9, 1.0, %v6724_v0  ;;  %v340_v63 = vld [vmem:[#allocation2 + $0x148] sm:$0xf]  ;;  %v6593_v1 = vpack.i.bf16 %v6235_v56, %v6234_v55  ;;  %vm397_vm12 = vcmp.ne.f32.partialorder %v337_v57, 1.0  ;;  %v341_v4 = vld [vmem:[#allocation2 + $0x150] sm:$0xff] }
  0x42   : > { %vm398_vm13 = vcmp.ne.f32.partialorder %v338_v58, 1.0  ;;  %v6238_v2 = vsel %vm395_vm10, 1.0, %v6724_v0  ;;  %v6239_v3 = vsel %vm396_vm11, 1.0, %v6724_v0  ;;  %v342_v5 = vld [vmem:[#allocation2 + $0x158] sm:$0xff]  ;;  %v6598_v6 = vpack.i.bf16 %v6237_v61, %v6236_v60  ;;  %v343_v9 = vld [vmem:[#allocation2 + $0x160] sm:$0xf] }
  0x43   : > { %vm399_vm14 = vcmp.ne.f32.partialorder %v339_v62, 1.0  ;;  %vm400_vm15 = vcmp.ne.f32.partialorder %v340_v63, 1.0  ;;  %v6240_v7 = vsel %vm397_vm12, 1.0, %v6724_v0  ;;  %v6241_v8 = vsel %vm398_vm13, 1.0, %v6724_v0  ;;  %v344_v10 = vld [vmem:[#allocation2 + $0x168] sm:$0xff]  ;;  %v345_v14 = vld [vmem:[#allocation2 + $0x170] sm:$0xff] }
  0x44   : > { %6579 = vrot.lane.b32.xlu1 %v6578_v49, %s6725_s19  ;;  %v6603_v11 = vpack.i.bf16 %v6239_v3, %v6238_v2  ;;  %vm401_vm1 = vcmp.ne.f32.partialorder %v341_v4, 1.0  ;;  %vm402_vm3 = vcmp.ne.f32.partialorder %v342_v5, 1.0  ;;  %v6242_v12 = vsel %vm399_vm14, 1.0, %v6724_v0  ;;  %v346_v15 = vld [vmem:[#allocation2 + $0x178] sm:$0xf]  ;;  %v347_v19 = vld [vmem:[#allocation2 + $0x180] sm:$0xff] }
  0x45   : > { %6584 = vrot.lane.b32.xlu0 %v6583_v54, %s6725_s19  ;;  %v6243_v13 = vsel %vm400_vm15, 1.0, %v6724_v0  ;;  %v6608_v16 = vpack.i.bf16 %v6241_v8, %v6240_v7  ;;  %vm403_vm4 = vcmp.ne.f32.partialorder %v343_v9, 1.0  ;;  %vm404_vm5 = vcmp.ne.f32.partialorder %v344_v10, 1.0  ;;  %v348_v20 = vld [vmem:[#allocation2 + $0x188] sm:$0xff]  ;;  %v349_v24 = vld [vmem:[#allocation2 + $0x190] sm:$0xf] }
  0x46   : > { %v6244_v17 = vsel %vm401_vm1, 1.0, %v6724_v0  ;;  %v6245_v18 = vsel %vm402_vm3, 1.0, %v6724_v0  ;;  %v6613_v21 = vpack.i.bf16 %v6243_v13, %v6242_v12  ;;  %vm405_vm6 = vcmp.ne.f32.partialorder %v345_v14, 1.0  ;;  %v350_v25 = vld [vmem:[#allocation2 + $0x198] sm:$0xff]  ;;  %v351_v29 = vld [vmem:[#allocation2 + $0x1a0] sm:$0xff]  ;;  %v353_v34 = vld [vmem:[#allocation2 + $0x1b0] sm:$0xff] }
  0x47   : > { %vm406_vm7 = vcmp.ne.f32.partialorder %v346_v15, 1.0  ;;  %v6246_v22 = vsel %vm403_vm4, 1.0, %v6724_v0  ;;  %v6247_v23 = vsel %vm404_vm5, 1.0, %v6724_v0  ;;  %v6618_v26 = vpack.i.bf16 %v6245_v18, %v6244_v17  ;;  %v352_v30 = vld [vmem:[#allocation2 + $0x1a8] sm:$0xf]  ;;  %v354_v35 = vld [vmem:[#allocation2 + $0x1b8] sm:$0xff] }
  0x48   : > { %6589 = vrot.lane.b32.xlu1 %v6588_v59, %s6725_s19  ;;  %vm407_vm8 = vcmp.ne.f32.partialorder %v347_v19, 1.0  ;;  %vm408_vm2 = vcmp.ne.f32.partialorder %v348_v20, 1.0  ;;  %v6248_v27 = vsel %vm405_vm6, 1.0, %v6724_v0  ;;  %v6249_v28 = vsel %vm406_vm7, 1.0, %v6724_v0  ;;  %v355_v39 = vld [vmem:[#allocation2 + $0x1c0] sm:$0xf] }
  0x49   : > { %6594 = vrot.lane.b32.xlu0 %v6593_v1, %s6725_s19  ;;  %v6623_v31 = vpack.i.bf16 %v6247_v23, %v6246_v22  ;;  %vm409_vm9 = vcmp.ne.f32.partialorder %v349_v24, 1.0  ;;  %vm410_vm10 = vcmp.ne.f32.partialorder %v350_v25, 1.0  ;;  %v6250_v32 = vsel %vm407_vm8, 1.0, %v6724_v0  ;;  %v356_v40 = vld [vmem:[#allocation2 + $0x1c8] sm:$0xff]  ;;  %v357_v44 = vld [vmem:[#allocation2 + $0x1d0] sm:$0xff] }
  0x4a   : > { %v6251_v33 = vsel %vm408_vm2, 1.0, %v6724_v0  ;;  %v6628_v36 = vpack.i.bf16 %v6249_v28, %v6248_v27  ;;  %vm411_vm11 = vcmp.ne.f32.partialorder %v351_v29, 1.0  ;;  %vm412_vm12 = vcmp.ne.f32.partialorder %v352_v30, 1.0  ;;  %v358_v45 = vld [vmem:[#allocation2 + $0x1d8] sm:$0xf] }
  0x4b   : > { %v6252_v37 = vsel %vm409_vm9, 1.0, %v6724_v0  ;;  %v6253_v38 = vsel %vm410_vm10, 1.0, %v6724_v0  ;;  %v6633_v41 = vpack.i.bf16 %v6251_v33, %v6250_v32  ;;  %vm413_vm13 = vcmp.ne.f32.partialorder %v353_v34, 1.0 }
  0x4c   : > { %6599 = vrot.lane.b32.xlu1 %v6598_v6, %s6725_s19  ;;  %vm414_vm14 = vcmp.ne.f32.partialorder %v354_v35, 1.0  ;;  %v6254_v42 = vsel %vm411_vm11, 1.0, %v6724_v0  ;;  %v6255_v43 = vsel %vm412_vm12, 1.0, %v6724_v0  ;;  %v6638_v46 = vpack.i.bf16 %v6253_v38, %v6252_v37 }
  0x4d   : > { %6604 = vrot.lane.b32.xlu0 %v6603_v11, %s6725_s19  ;;  %vm415_vm15 = vcmp.ne.f32.partialorder %v355_v39, 1.0  ;;  %vm416_vm1 = vcmp.ne.f32.partialorder %v356_v40, 1.0  ;;  %v6256_v47 = vsel %vm413_vm13, 1.0, %v6724_v0  ;;  %v6257_v48 = vsel %vm414_vm14, 1.0, %v6724_v0 }
  0x4e   : > { %v6643_v49 = vpack.i.bf16 %v6255_v43, %v6254_v42  ;;  %vm417_vm3 = vcmp.ne.f32.partialorder %v357_v44, 1.0  ;;  %vm418_vm4 = vcmp.ne.f32.partialorder %v358_v45, 1.0  ;;  %v6258_v50 = vsel %vm415_vm15, 1.0, %v6724_v0 }
  0x4f   : > { %v6259_v51 = vsel %vm416_vm1, 1.0, %v6724_v0  ;;  %v6648_v52 = vpack.i.bf16 %v6257_v48, %v6256_v47  ;;  %v6260_v53 = vsel %vm417_vm3, 1.0, %v6724_v0  ;;  %v6261_v54 = vsel %vm418_vm4, 1.0, %v6724_v0 }
  0x50   : > { %6609 = vrot.lane.b32.xlu1 %v6608_v16, %s6725_s19  ;;  %v6653_v55 = vpack.i.bf16 %v6259_v51, %v6258_v50  ;;  %v6658_v56 = vpack.i.bf16 %v6261_v54, %v6260_v53  ;;  %vm779_vm5 = vcmask 39968   ;;  %vm782_vm6 = vcmask 35872  }
  0x51   : > { %6614 = vrot.lane.b32.xlu0 %v6613_v21, %s6725_s19  ;;  %vm1258_vm7 = vcmask 121936   ;;  %vm1451_vm8 = vcmask 162936   ;;  %vm1644_vm2 = vcmask 203936   ;;  %vm1838_vm9 = vcmask 244936  }
  0x52   : > { %vm2031_vm10 = vcmask 285936   ;;  %vm2224_vm11 = vcmask 326936   ;;  %vm2417_vm12 = vcmask 367936   ;;  %vm2610_vm13 = vcmask 408936  }
  0x53   : > { %vm2803_vm14 = vcmask 449936   ;;  %vm2996_vm15 = vcmask 490936   ;;  %vm3189_vm1 = vcmask 531936   ;;  %vm3382_vm3 = vcmask 572936  }
  0x54   : > { %6619 = vrot.lane.b32.xlu1 %v6618_v26, %s6725_s19  ;;  %vm3575_vm4 = vcmask 613936  }
  0x55   : > { %6624 = vrot.lane.b32.xlu0 %v6623_v31, %s6725_s19 }
  0x58   : > { %6629 = vrot.lane.b32.xlu1 %v6628_v36, %s6725_s19 }
  0x59   : > { %6634 = vrot.lane.b32.xlu0 %v6633_v41, %s6725_s19 }
  0x5c   : > { %6639 = vrot.lane.b32.xlu1 %v6638_v46, %s6725_s19 }
  0x5d   : > { %6644 = vrot.lane.b32.xlu0 %v6643_v49, %s6725_s19 }
  0x60   : > { %6649 = vrot.lane.b32.xlu1 %v6648_v52, %s6725_s19 }
  0x61   : > { %6654 = vrot.lane.b32.xlu0 %v6653_v55, %s6725_s19 }
  0x64   : > { %6659 = vrot.lane.b32.xlu1 %v6658_v56, %s6725_s19 }
  0x84   : > { %v6515_v57 = vpop.permute.xlu0 %6514 }
  0x85   : > { %v6517_v58 = vunpack.i.h.bf16 %v6515_v57  ;;  %v6516_v59 = vunpack.i.l.bf16 %v6515_v57 }
  0x87   : > { %781 = vst.msk [vmem:[#allocation2 + $0x8] sm:$0xff] %vm779_vm5, %v6517_v58  ;;  %780 = vst.msk [vmem:[#allocation2] sm:$0xff] %vm779_vm5, %v6516_v59 }
  0x8e   : > { %v905_v8 = vld [vmem:[#allocation2 + $0x1] sm:$0xff] }
  0x8f   : > { %v841_v10 = vld [vmem:[#allocation2] sm:$0xff]  ;;  %969 = vrot.lane.b32.xlu0 %v905_v8, %s6726_s20  ;;  %v842_v13 = vld [vmem:[#allocation2 + $0x8] sm:$0xff] }
  0x90   : > { %873 = vst.msk [vmem:[#allocation3] sm:$0xff] %vm171_vm0, %v841_v10  ;;  %874 = vst.msk [vmem:[#allocation3 + $0x8] sm:$0xff] %vm171_vm0, %v842_v13  ;;  %v1098_v30 = vld [vmem:[#allocation2 + $0x2] sm:$0xff] }
  0x99   : > { %v6525_v60 = vpop.permute.xlu1 %6524 }
  0x9a   : > { %v6527_v61 = vunpack.i.h.bf16 %v6525_v60  ;;  %v6526_v62 = vunpack.i.l.bf16 %v6525_v60  ;;  %v6520_v0 = vpop.permute.xlu0 %6519 }
  0x9b   : > { %v6522_v63 = vunpack.i.h.bf16 %v6520_v0  ;;  %v6521_v1 = vunpack.i.l.bf16 %v6520_v0 }
  0x9c   : > { %786 = vst.msk [vmem:[#allocation2 + $0x28] sm:$0xf] %vm782_vm6, %v6527_v61 }
  0x9d   : > { %785 = vst.msk [vmem:[#allocation2 + $0x20] sm:$0xff] %vm779_vm5, %v6526_v62  ;;  %784 = vst.msk [vmem:[#allocation2 + $0x18] sm:$0xff] %vm779_vm5, %v6522_v63 }
  0x9e   : > { %783 = vst.msk [vmem:[#allocation2 + $0x10] sm:$0xf] %vm782_vm6, %v6521_v1 }
  0xa2   : > { %v6530_v2 = vpop.permute.xlu1 %6529 }
  0xa3   : > { %v6532_v3 = vunpack.i.h.bf16 %v6530_v2  ;;  %v6531_v4 = vunpack.i.l.bf16 %v6530_v2  ;;  %v6535_v5 = vpop.permute.xlu0 %6534 }
  0xa4   : > { %v6537_v6 = vunpack.i.h.bf16 %v6535_v5  ;;  %v6536_v7 = vunpack.i.l.bf16 %v6535_v5  ;;  %v7092_v15 = vld [vmem:[#allocation2 + $0x20] sm:$0xff]  ;;  %v7102_v23 = vld [vmem:[#allocation2 + $0x18] sm:$0xff] }
  0xa5   : > { %788 = vst.msk [vmem:[#allocation2 + $0x38] sm:$0xff] %vm779_vm5, %v6532_v3  ;;  %787 = vst.msk [vmem:[#allocation2 + $0x30] sm:$0xff] %vm779_vm5, %v6531_v4  ;;  %v907_v18 = vld [vmem:[#allocation2 + $0x19] sm:$0xff]  ;;  %v906_v19 = vld [vmem:[#allocation2 + $0x9] sm:$0xff] }
  0xa6   : > { %v6540_v9 = vpop.permute.xlu1 %6539  ;;  %790 = vst.msk [vmem:[#allocation2 + $0x48] sm:$0xff] %vm779_vm5, %v6537_v6  ;;  %973 = vrot.lane.b32.xlu0 %v907_v18, %s6726_s20  ;;  %971 = vrot.lane.b32.xlu1 %v906_v19, %s6726_s20  ;;  %v908_v24 = vld [vmem:[#allocation2 + $0x21] sm:$0xff]  ;;  %v1099_v40 = vld [vmem:[#allocation2 + $0xa] sm:$0xff] }
  0xa7   : > { %789 = vst.msk [vmem:[#allocation2 + $0x40] sm:$0xf] %vm782_vm6, %v6536_v7  ;;  %v6542_v11 = vunpack.i.h.bf16 %v6540_v9  ;;  %v6541_v12 = vunpack.i.l.bf16 %v6540_v9  ;;  %v6545_v14 = vpop.permute.xlu0 %6544  ;;  %v1100_v39 = vld [vmem:[#allocation2 + $0x1a] sm:$0xff]  ;;  %v1101_v51 = vld [vmem:[#allocation2 + $0x22] sm:$0xff] }
  0xa8   : > { %v6547_v16 = vunpack.i.h.bf16 %v6545_v14  ;;  %v6546_v17 = vunpack.i.l.bf16 %v6545_v14  ;;  %876 = vst.msk [vmem:[#allocation3 + $0x18] sm:$0xff] %vm171_vm0, %v7092_v15  ;;  %875 = vst.msk [vmem:[#allocation3 + $0x10] sm:$0xff] %vm171_vm0, %v7102_v23 }
  0xa9   : > { %792 = vst.msk [vmem:[#allocation2 + $0x58] sm:$0xf] %vm782_vm6, %v6542_v11 }
  0xaa   : > { %791 = vst.msk [vmem:[#allocation2 + $0x50] sm:$0xff] %vm779_vm5, %v6541_v12  ;;  %v6550_v20 = vpop.permute.xlu1 %6549  ;;  %794 = vst.msk [vmem:[#allocation2 + $0x68] sm:$0xff] %vm779_vm5, %v6547_v16  ;;  %1162 = vrot.lane.b32.xlu0 %v1098_v30, %s6727_s21  ;;  %975 = vrot.lane.b32.xlu1 %v908_v24, %s6726_s20 }
  0xab   : > { %793 = vst.msk [vmem:[#allocation2 + $0x60] sm:$0xff] %vm779_vm5, %v6546_v17  ;;  %v6552_v21 = vunpack.i.h.bf16 %v6550_v20  ;;  %v6551_v22 = vunpack.i.l.bf16 %v6550_v20  ;;  %v6555_v25 = vpop.permute.xlu0 %6554 }
  0xac   : > { %v7106_v26 = vld [vmem:[#allocation2 + $0x30] sm:$0xff]  ;;  %v6557_v27 = vunpack.i.h.bf16 %v6555_v25  ;;  %v6556_v28 = vunpack.i.l.bf16 %v6555_v25  ;;  %v7112_v29 = vld [vmem:[#allocation2 + $0x38] sm:$0xff] }
  0xad   : > { %796 = vst.msk [vmem:[#allocation2 + $0x78] sm:$0xff] %vm779_vm5, %v6552_v21  ;;  %v7116_v32 = vld [vmem:[#allocation2 + $0x48] sm:$0xff]  ;;  %v909_v46 = vld [vmem:[#allocation2 + $0x31] sm:$0xff] }
  0xae   : > { %795 = vst.msk [vmem:[#allocation2 + $0x70] sm:$0xf] %vm782_vm6, %v6551_v22  ;;  %v6560_v31 = vpop.permute.xlu1 %6559  ;;  %798 = vst.msk [vmem:[#allocation2 + $0x88] sm:$0xf] %vm782_vm6, %v6557_v27  ;;  %1166 = vrot.lane.b32.xlu0 %v1100_v39, %s6727_s21  ;;  %1164 = vrot.lane.b32.xlu1 %v1099_v40, %s6727_s21  ;;  %v910_v56 = vld [vmem:[#allocation2 + $0x39] sm:$0xff] }
  0xaf   : > { %877 = vst.msk [vmem:[#allocation3 + $0x20] sm:$0xff] %vm171_vm0, %v7106_v26  ;;  %878 = vst.msk [vmem:[#allocation3 + $0x28] sm:$0xff] %vm171_vm0, %v7112_v29  ;;  %v6562_v33 = vunpack.i.h.bf16 %v6560_v31  ;;  %v6561_v34 = vunpack.i.l.bf16 %v6560_v31  ;;  %v6565_v35 = vpop.permute.xlu0 %6564 }
  0xb0   : > { %797 = vst.msk [vmem:[#allocation2 + $0x80] sm:$0xff] %vm779_vm5, %v6556_v28  ;;  %v6567_v36 = vunpack.i.h.bf16 %v6565_v35  ;;  %v6566_v37 = vunpack.i.l.bf16 %v6565_v35 }
  0xb1   : > { %879 = vst.msk [vmem:[#allocation3 + $0x30] sm:$0xff] %vm171_vm0, %v7116_v32  ;;  %v7126_v38 = vld [vmem:[#allocation2 + $0x50] sm:$0xff]  ;;  %v7138_v45 = vld [vmem:[#allocation2 + $0x68] sm:$0xff] }
  0xb2   : > { %800 = vst.msk [vmem:[#allocation2 + $0x98] sm:$0xff] %vm779_vm5, %v6562_v33  ;;  %799 = vst.msk [vmem:[#allocation2 + $0x90] sm:$0xff] %vm779_vm5, %v6561_v34  ;;  %v6570_v41 = vpop.permute.xlu1 %6569  ;;  %v7130_v42 = vld [vmem:[#allocation2 + $0x60] sm:$0xff]  ;;  %1168 = vrot.lane.b32.xlu1 %v1101_v51, %s6727_s21  ;;  %977 = vrot.lane.b32.xlu0 %v909_v46, %s6726_s20  ;;  %v911_v57 = vld [vmem:[#allocation2 + $0x49] sm:$0xff] }
  0xb3   : > { %880 = vst.msk [vmem:[#allocation3 + $0x38] sm:$0xff] %vm171_vm0, %v7126_v38  ;;  %v6572_v43 = vunpack.i.h.bf16 %v6570_v41  ;;  %v6571_v44 = vunpack.i.l.bf16 %v6570_v41  ;;  %881 = vst.msk [vmem:[#allocation3 + $0x40] sm:$0xff] %vm171_vm0, %v7130_v42  ;;  %v6575_v47 = vpop.permute.xlu0 %6574  ;;  %v912_v3 = vld [vmem:[#allocation2 + $0x51] sm:$0xff]  ;;  %v913_v4 = vld [vmem:[#allocation2 + $0x61] sm:$0xff] }
  0xb4   : > { %802 = vst.msk [vmem:[#allocation2 + $0xa8] sm:$0xff] %vm779_vm5, %v6567_v36  ;;  %v7142_v48 = vld [vmem:[#allocation2 + $0x78] sm:$0xff]  ;;  %v6577_v49 = vunpack.i.h.bf16 %v6575_v47  ;;  %v6576_v50 = vunpack.i.l.bf16 %v6575_v47 }
  0xb5   : > { %801 = vst.msk [vmem:[#allocation2 + $0xa0] sm:$0xf] %vm782_vm6, %v6566_v37  ;;  %804 = vst.msk [vmem:[#allocation2 + $0xb8] sm:$0xf] %vm782_vm6, %v6572_v43  ;;  %v914_v14 = vld [vmem:[#allocation2 + $0x69] sm:$0xff] }
  0xb6   : > { %882 = vst.msk [vmem:[#allocation3 + $0x48] sm:$0xff] %vm171_vm0, %v7138_v45  ;;  %883 = vst.msk [vmem:[#allocation3 + $0x50] sm:$0xff] %vm171_vm0, %v7142_v48  ;;  %v6580_v52 = vpop.permute.xlu1 %6579  ;;  %979 = vrot.lane.b32.xlu1 %v910_v56, %s6726_s20  ;;  %981 = vrot.lane.b32.xlu0 %v911_v57, %s6726_s20 }
  0xb7   : > { %803 = vst.msk [vmem:[#allocation2 + $0xb0] sm:$0xff] %vm779_vm5, %v6571_v44  ;;  %806 = vst.msk [vmem:[#allocation2 + $0xc8] sm:$0xff] %vm779_vm5, %v6577_v49  ;;  %v6582_v53 = vunpack.i.h.bf16 %v6580_v52  ;;  %v6581_v54 = vunpack.i.l.bf16 %v6580_v52  ;;  %v7152_v55 = vld [vmem:[#allocation2 + $0x80] sm:$0xff]  ;;  %v6585_v58 = vpop.permute.xlu0 %6584 }
  0xb8   : > { %805 = vst.msk [vmem:[#allocation2 + $0xc0] sm:$0xff] %vm779_vm5, %v6576_v50  ;;  %v6587_v60 = vunpack.i.h.bf16 %v6585_v58  ;;  %v6586_v61 = vunpack.i.l.bf16 %v6585_v58  ;;  %v915_v16 = vld [vmem:[#allocation2 + $0x79] sm:$0xff]  ;;  %v916_v27 = vld [vmem:[#allocation2 + $0x81] sm:$0xff] }
  0xb9   : > { %884 = vst.msk [vmem:[#allocation3 + $0x58] sm:$0xff] %vm171_vm0, %v7152_v55  ;;  %v7156_v59 = vld [vmem:[#allocation2 + $0x90] sm:$0xff]  ;;  %v7162_v62 = vld [vmem:[#allocation2 + $0x98] sm:$0xff] }
  0xba   : > { %808 = vst.msk [vmem:[#allocation2 + $0xd8] sm:$0xff] %vm779_vm5, %v6582_v53  ;;  %v6590_v0 = vpop.permute.xlu1 %6589  ;;  %809 = vst.msk [vmem:[#allocation2 + $0xe0] sm:$0xff] %vm779_vm5, %v6586_v61  ;;  %983 = vrot.lane.b32.xlu1 %v912_v3, %s6726_s20  ;;  %985 = vrot.lane.b32.xlu0 %v913_v4, %s6726_s20  ;;  %v917_v28 = vld [vmem:[#allocation2 + $0x91] sm:$0xff] }
  0xbb   : > { %807 = vst.msk [vmem:[#allocation2 + $0xd0] sm:$0xf] %vm782_vm6, %v6581_v54  ;;  %v7166_v63 = vld [vmem:[#allocation2 + $0xa8] sm:$0xff]  ;;  %810 = vst.msk [vmem:[#allocation2 + $0xe8] sm:$0xf] %vm782_vm6, %v6587_v60  ;;  %v6592_v1 = vunpack.i.h.bf16 %v6590_v0  ;;  %v6591_v2 = vunpack.i.l.bf16 %v6590_v0  ;;  %v6595_v5 = vpop.permute.xlu0 %6594 }
  0xbc   : > { %885 = vst.msk [vmem:[#allocation3 + $0x60] sm:$0xff] %vm171_vm0, %v7156_v59  ;;  %886 = vst.msk [vmem:[#allocation3 + $0x68] sm:$0xff] %vm171_vm0, %v7162_v62  ;;  %v6597_v6 = vunpack.i.h.bf16 %v6595_v5  ;;  %v6596_v7 = vunpack.i.l.bf16 %v6595_v5  ;;  %v918_v41 = vld [vmem:[#allocation2 + $0x99] sm:$0xff] }
  0xbd   : > { %887 = vst.msk [vmem:[#allocation3 + $0x70] sm:$0xff] %vm171_vm0, %v7166_v63 }
  0xbe   : > { %812 = vst.msk [vmem:[#allocation2 + $0xf8] sm:$0xff] %vm779_vm5, %v6592_v1  ;;  %811 = vst.msk [vmem:[#allocation2 + $0xf0] sm:$0xff] %vm779_vm5, %v6591_v2  ;;  %v7176_v8 = vld [vmem:[#allocation2 + $0xb0] sm:$0xff]  ;;  %v6600_v9 = vpop.permute.xlu1 %6599  ;;  %v7188_v13 = vld [vmem:[#allocation2 + $0xc8] sm:$0xff]  ;;  %987 = vrot.lane.b32.xlu1 %v914_v14, %s6726_s20  ;;  %989 = vrot.lane.b32.xlu0 %v915_v16, %s6726_s20 }
  0xbf   : > { %888 = vst.msk [vmem:[#allocation3 + $0x78] sm:$0xff] %vm171_vm0, %v7176_v8  ;;  %v7180_v10 = vld [vmem:[#allocation2 + $0xc0] sm:$0xff]  ;;  %v6602_v11 = vunpack.i.h.bf16 %v6600_v9  ;;  %v6601_v12 = vunpack.i.l.bf16 %v6600_v9  ;;  %v6605_v17 = vpop.permute.xlu0 %6604  ;;  %890 = vst.msk [vmem:[#allocation3 + $0x88] sm:$0xff] %vm171_vm0, %v7188_v13  ;;  %v919_v43 = vld [vmem:[#allocation2 + $0xa9] sm:$0xff] }
  0xc0   : > { %814 = vst.msk [vmem:[#allocation2 + $0x108] sm:$0xff] %vm779_vm5, %v6597_v6  ;;  %v6607_v19 = vunpack.i.h.bf16 %v6605_v17  ;;  %v6606_v20 = vunpack.i.l.bf16 %v6605_v17  ;;  %v920_v56 = vld [vmem:[#allocation2 + $0xb1] sm:$0xff]  ;;  %v921_v57 = vld [vmem:[#allocation2 + $0xc1] sm:$0xff] }
  0xc1   : > { %813 = vst.msk [vmem:[#allocation2 + $0x100] sm:$0xf] %vm782_vm6, %v6596_v7  ;;  %v7192_v18 = vld [vmem:[#allocation2 + $0xd8] sm:$0xff]  ;;  %816 = vst.msk [vmem:[#allocation2 + $0x118] sm:$0xf] %vm782_vm6, %v6602_v11  ;;  %v7202_v25 = vld [vmem:[#allocation2 + $0xe0] sm:$0xff] }
  0xc2   : > { %889 = vst.msk [vmem:[#allocation3 + $0x80] sm:$0xff] %vm171_vm0, %v7180_v10  ;;  %891 = vst.msk [vmem:[#allocation3 + $0x90] sm:$0xff] %vm171_vm0, %v7192_v18  ;;  %v6610_v21 = vpop.permute.xlu1 %6609  ;;  %991 = vrot.lane.b32.xlu1 %v916_v27, %s6726_s20  ;;  %993 = vrot.lane.b32.xlu0 %v917_v28, %s6726_s20  ;;  %v922_v5 = vld [vmem:[#allocation2 + $0xc9] sm:$0xff]  ;;  %v923_v6 = vld [vmem:[#allocation2 + $0xd9] sm:$0xff] }
  0xc3   : > { %815 = vst.msk [vmem:[#allocation2 + $0x110] sm:$0xff] %vm779_vm5, %v6601_v12  ;;  %818 = vst.msk [vmem:[#allocation2 + $0x128] sm:$0xff] %vm779_vm5, %v6607_v19  ;;  %v6612_v22 = vunpack.i.h.bf16 %v6610_v21  ;;  %v6611_v24 = vunpack.i.l.bf16 %v6610_v21  ;;  %v6615_v30 = vpop.permute.xlu0 %6614  ;;  %v924_v21 = vld [vmem:[#allocation2 + $0xe1] sm:$0xff] }
  0xc4   : > { %817 = vst.msk [vmem:[#allocation2 + $0x120] sm:$0xff] %vm779_vm5, %v6606_v20  ;;  %v6617_v33 = vunpack.i.h.bf16 %v6615_v30  ;;  %v6616_v34 = vunpack.i.l.bf16 %v6615_v30 }
  0xc5   : > { %892 = vst.msk [vmem:[#allocation3 + $0x98] sm:$0xff] %vm171_vm0, %v7202_v25  ;;  %v7206_v31 = vld [vmem:[#allocation2 + $0xf0] sm:$0xff]  ;;  %v7212_v35 = vld [vmem:[#allocation2 + $0xf8] sm:$0xff] }
  0xc6   : > { %820 = vst.msk [vmem:[#allocation2 + $0x138] sm:$0xff] %vm779_vm5, %v6612_v22  ;;  %v6620_v36 = vpop.permute.xlu1 %6619  ;;  %821 = vst.msk [vmem:[#allocation2 + $0x140] sm:$0xff] %vm779_vm5, %v6616_v34  ;;  %995 = vrot.lane.b32.xlu1 %v918_v41, %s6726_s20  ;;  %997 = vrot.lane.b32.xlu0 %v919_v43, %s6726_s20  ;;  %v925_v22 = vld [vmem:[#allocation2 + $0xf1] sm:$0xff] }
  0xc7   : > { %819 = vst.msk [vmem:[#allocation2 + $0x130] sm:$0xf] %vm782_vm6, %v6611_v24  ;;  %v7216_v37 = vld [vmem:[#allocation2 + $0x108] sm:$0xff]  ;;  %822 = vst.msk [vmem:[#allocation2 + $0x148] sm:$0xf] %vm782_vm6, %v6617_v33  ;;  %v6622_v39 = vunpack.i.h.bf16 %v6620_v36  ;;  %v6621_v40 = vunpack.i.l.bf16 %v6620_v36  ;;  %v6625_v44 = vpop.permute.xlu0 %6624 }
  0xc8   : > { %893 = vst.msk [vmem:[#allocation3 + $0xa0] sm:$0xff] %vm171_vm0, %v7206_v31  ;;  %894 = vst.msk [vmem:[#allocation3 + $0xa8] sm:$0xff] %vm171_vm0, %v7212_v35  ;;  %v6627_v46 = vunpack.i.h.bf16 %v6625_v44  ;;  %v6626_v47 = vunpack.i.l.bf16 %v6625_v44 }
  0xc9   : > { %895 = vst.msk [vmem:[#allocation3 + $0xb0] sm:$0xff] %vm171_vm0, %v7216_v37 }
  0xca   : > { %824 = vst.msk [vmem:[#allocation2 + $0x158] sm:$0xff] %vm779_vm5, %v6622_v39  ;;  %823 = vst.msk [vmem:[#allocation2 + $0x150] sm:$0xff] %vm779_vm5, %v6621_v40  ;;  %v7226_v49 = vld [vmem:[#allocation2 + $0x110] sm:$0xff]  ;;  %v6630_v50 = vpop.permute.xlu1 %6629  ;;  %v7238_v54 = vld [vmem:[#allocation2 + $0x128] sm:$0xff]  ;;  %999 = vrot.lane.b32.xlu1 %v920_v56, %s6726_s20  ;;  %1001 = vrot.lane.b32.xlu0 %v921_v57, %s6726_s20 }
  0xcb   : > { %896 = vst.msk [vmem:[#allocation3 + $0xb8] sm:$0xff] %vm171_vm0, %v7226_v49  ;;  %v7230_v51 = vld [vmem:[#allocation2 + $0x120] sm:$0xff]  ;;  %v6632_v52 = vunpack.i.h.bf16 %v6630_v50  ;;  %v6631_v53 = vunpack.i.l.bf16 %v6630_v50  ;;  %v6635_v58 = vpop.permute.xlu0 %6634  ;;  %898 = vst.msk [vmem:[#allocation3 + $0xc8] sm:$0xff] %vm171_vm0, %v7238_v54  ;;  %v927_v40 = vld [vmem:[#allocation2 + $0x109] sm:$0xff] }
  0xcc   : > { %826 = vst.msk [vmem:[#allocation2 + $0x168] sm:$0xff] %vm779_vm5, %v6627_v46  ;;  %v6637_v61 = vunpack.i.h.bf16 %v6635_v58  ;;  %v6636_v0 = vunpack.i.l.bf16 %v6635_v58  ;;  %v926_v39 = vld [vmem:[#allocation2 + $0xf9] sm:$0xff]  ;;  %v928_v41 = vld [vmem:[#allocation2 + $0x111] sm:$0xff]  ;;  %v929_v43 = vld [vmem:[#allocation2 + $0x121] sm:$0xff] }
  0xcd   : > { %825 = vst.msk [vmem:[#allocation2 + $0x160] sm:$0xf] %vm782_vm6, %v6626_v47  ;;  %v7242_v60 = vld [vmem:[#allocation2 + $0x138] sm:$0xff]  ;;  %828 = vst.msk [vmem:[#allocation2 + $0x178] sm:$0xf] %vm782_vm6, %v6632_v52  ;;  %v7252_v4 = vld [vmem:[#allocation2 + $0x140] sm:$0xff] }
  0xce   : > { %897 = vst.msk [vmem:[#allocation3 + $0xc0] sm:$0xff] %vm171_vm0, %v7230_v51  ;;  %899 = vst.msk [vmem:[#allocation3 + $0xd0] sm:$0xff] %vm171_vm0, %v7242_v60  ;;  %v6640_v1 = vpop.permute.xlu1 %6639  ;;  %1003 = vrot.lane.b32.xlu1 %v922_v5, %s6726_s20  ;;  %1005 = vrot.lane.b32.xlu0 %v923_v6, %s6726_s20  ;;  %v930_v44 = vld [vmem:[#allocation2 + $0x129] sm:$0xff]  ;;  %v931_v46 = vld [vmem:[#allocation2 + $0x139] sm:$0xff] }
  0xcf   : > { %827 = vst.msk [vmem:[#allocation2 + $0x170] sm:$0xff] %vm779_vm5, %v6631_v53  ;;  %830 = vst.msk [vmem:[#allocation2 + $0x188] sm:$0xff] %vm779_vm5, %v6637_v61  ;;  %v6642_v2 = vunpack.i.h.bf16 %v6640_v1  ;;  %v6641_v3 = vunpack.i.l.bf16 %v6640_v1  ;;  %v6645_v7 = vpop.permute.xlu0 %6644  ;;  %v932_v47 = vld [vmem:[#allocation2 + $0x141] sm:$0xff]  ;;  %v1102_v57 = vld [vmem:[#allocation2 + $0x32] sm:$0xff] }
  0xd0   : > { %829 = vst.msk [vmem:[#allocation2 + $0x180] sm:$0xff] %vm779_vm5, %v6636_v0  ;;  %v6647_v11 = vunpack.i.h.bf16 %v6645_v7  ;;  %v6646_v12 = vunpack.i.l.bf16 %v6645_v7  ;;  %v1103_v58 = vld [vmem:[#allocation2 + $0x3a] sm:$0xff]  ;;  %v1104_v61 = vld [vmem:[#allocation2 + $0x4a] sm:$0xff]  ;;  %v1105_v0 = vld [vmem:[#allocation2 + $0x52] sm:$0xff] }
  0xd1   : > { %900 = vst.msk [vmem:[#allocation3 + $0xd8] sm:$0xff] %vm171_vm0, %v7252_v4  ;;  %v7256_v9 = vld [vmem:[#allocation2 + $0x150] sm:$0xff]  ;;  %v7262_v14 = vld [vmem:[#allocation2 + $0x158] sm:$0xff]  ;;  %v1106_v1 = vld [vmem:[#allocation2 + $0x62] sm:$0xff] }
  0xd2   : > { %832 = vst.msk [vmem:[#allocation2 + $0x198] sm:$0xff] %vm779_vm5, %v6642_v2  ;;  %v6650_v16 = vpop.permute.xlu1 %6649  ;;  %833 = vst.msk [vmem:[#allocation2 + $0x1a0] sm:$0xff] %vm779_vm5, %v6646_v12  ;;  %1007 = vrot.lane.b32.xlu1 %v924_v21, %s6726_s20  ;;  %1009 = vrot.lane.b32.xlu0 %v925_v22, %s6726_s20  ;;  %v933_v50 = vld [vmem:[#allocation2 + $0x151] sm:$0xff]  ;;  %v1109_v5 = vld [vmem:[#allocation2 + $0x82] sm:$0xff] }
  0xd3   : > { %831 = vst.msk [vmem:[#allocation2 + $0x190] sm:$0xf] %vm782_vm6, %v6641_v3  ;;  %v7266_v17 = vld [vmem:[#allocation2 + $0x168] sm:$0xff]  ;;  %834 = vst.msk [vmem:[#allocation2 + $0x1a8] sm:$0xf] %vm782_vm6, %v6647_v11  ;;  %v6652_v19 = vunpack.i.h.bf16 %v6650_v16  ;;  %v6651_v20 = vunpack.i.l.bf16 %v6650_v16  ;;  %v6655_v24 = vpop.permute.xlu0 %6654  ;;  %v1108_v3 = vld [vmem:[#allocation2 + $0x7a] sm:$0xff] }
  0xd4   : > { %901 = vst.msk [vmem:[#allocation3 + $0xe0] sm:$0xff] %vm171_vm0, %v7256_v9  ;;  %902 = vst.msk [vmem:[#allocation3 + $0xe8] sm:$0xff] %vm171_vm0, %v7262_v14  ;;  %v6657_v27 = vunpack.i.h.bf16 %v6655_v24  ;;  %v6656_v28 = vunpack.i.l.bf16 %v6655_v24  ;;  %v934_v52 = vld [vmem:[#allocation2 + $0x159] sm:$0xff]  ;;  %v1107_v2 = vld [vmem:[#allocation2 + $0x6a] sm:$0xff] }
  0xd5   : > { %903 = vst.msk [vmem:[#allocation3 + $0xf0] sm:$0xff] %vm171_vm0, %v7266_v17  ;;  %v1110_v6 = vld [vmem:[#allocation2 + $0x92] sm:$0xff]  ;;  %v1111_v7 = vld [vmem:[#allocation2 + $0x9a] sm:$0xff]  ;;  %v1112_v11 = vld [vmem:[#allocation2 + $0xaa] sm:$0xff] }
  0xd6   : > { %836 = vst.msk [vmem:[#allocation2 + $0x1b8] sm:$0xff] %vm779_vm5, %v6652_v19  ;;  %835 = vst.msk [vmem:[#allocation2 + $0x1b0] sm:$0xff] %vm779_vm5, %v6651_v20  ;;  %v7276_v30 = vld [vmem:[#allocation2 + $0x170] sm:$0xff]  ;;  %v6660_v33 = vpop.permute.xlu1 %6659  ;;  %1011 = vrot.lane.b32.xlu1 %v926_v39, %s6726_s20  ;;  %1013 = vrot.lane.b32.xlu0 %v927_v40, %s6726_s20  ;;  %v1114_v16 = vld [vmem:[#allocation2 + $0xc2] sm:$0xff] }
  0xd7   : > { %904 = vst.msk [vmem:[#allocation3 + $0xf8] sm:$0xff] %vm171_vm0, %v7276_v30  ;;  %v6662_v34 = vunpack.i.h.bf16 %v6660_v33  ;;  %v6661_v36 = vunpack.i.l.bf16 %v6660_v33  ;;  %v935_v53 = vld [vmem:[#allocation2 + $0x169] sm:$0xff]  ;;  %v936_v56 = vld [vmem:[#allocation2 + $0x171] sm:$0xff]  ;;  %v1116_v20 = vld [vmem:[#allocation2 + $0xda] sm:$0xff]  ;;  %vm1065_vm0 = vcmask 80936  }
  0xd8   : > { %838 = vst.msk [vmem:[#allocation2 + $0x1c8] sm:$0xff] %vm779_vm5, %v6657_v27  ;;  %v1113_v12 = vld [vmem:[#allocation2 + $0xb2] sm:$0xff]  ;;  %v1115_v19 = vld [vmem:[#allocation2 + $0xca] sm:$0xff]  ;;  %v1117_v21 = vld [vmem:[#allocation2 + $0xe2] sm:$0xff] }
  0xd9   : > { %837 = vst.msk [vmem:[#allocation2 + $0x1c0] sm:$0xf] %vm782_vm6, %v6656_v28  ;;  %840 = vst.msk [vmem:[#allocation2 + $0x1d8] sm:$0xf] %vm782_vm6, %v6662_v34  ;;  %v1118_v22 = vld [vmem:[#allocation2 + $0xf2] sm:$0xff]  ;;  %v1119_v24 = vld [vmem:[#allocation2 + $0xfa] sm:$0xff] }
  0xda   : > { %839 = vst.msk [vmem:[#allocation2 + $0x1d0] sm:$0xff] %vm779_vm5, %v6661_v36  ;;  %1015 = vrot.lane.b32.xlu1 %v928_v41, %s6726_s20  ;;  %1017 = vrot.lane.b32.xlu0 %v929_v43, %s6726_s20  ;;  %v1120_v27 = vld [vmem:[#allocation2 + $0x10a] sm:$0xff]  ;;  %v1121_v28 = vld [vmem:[#allocation2 + $0x112] sm:$0xff]  ;;  %v1122_v33 = vld [vmem:[#allocation2 + $0x122] sm:$0xff]  ;;  %vm3769_vm5 = vcmask 654936   ;;  %vm3962_vm6 = vcmask 695936  }
  0xdb   : > { %v1123_v36 = vld [vmem:[#allocation2 + $0x12a] sm:$0xff]  ;;  %v1124_v39 = vld [vmem:[#allocation2 + $0x13a] sm:$0xff]  ;;  %v1125_v43 = vld [vmem:[#allocation2 + $0x142] sm:$0xff] }
  0xde   : > { %1019 = vrot.lane.b32.xlu1 %v930_v44, %s6726_s20  ;;  %1021 = vrot.lane.b32.xlu0 %v931_v46, %s6726_s20  ;;  %v1126_v44 = vld [vmem:[#allocation2 + $0x152] sm:$0xff] }
  0xe2   : > { %1023 = vrot.lane.b32.xlu1 %v932_v47, %s6726_s20  ;;  %1025 = vrot.lane.b32.xlu0 %v933_v50, %s6726_s20  ;;  %v1127_v50 = vld [vmem:[#allocation2 + $0x15a] sm:$0xff] }
  0xe6   : > { %1027 = vrot.lane.b32.xlu1 %v934_v52, %s6726_s20  ;;  %1029 = vrot.lane.b32.xlu0 %v935_v53, %s6726_s20  ;;  %v1128_v52 = vld [vmem:[#allocation2 + $0x16a] sm:$0xff] }
  0xea   : > { %1031 = vrot.lane.b32.xlu1 %v936_v56, %s6726_s20  ;;  %1170 = vrot.lane.b32.xlu0 %v1102_v57, %s6727_s21  ;;  %v1129_v57 = vld [vmem:[#allocation2 + $0x172] sm:$0xff] }
  0xee   : > { %1172 = vrot.lane.b32.xlu1 %v1103_v58, %s6727_s21  ;;  %1174 = vrot.lane.b32.xlu0 %v1104_v61, %s6727_s21  ;;  %v1291_v58 = vld [vmem:[#allocation2 + $0x3] sm:$0xff] }
  0xf2   : > { %1176 = vrot.lane.b32.xlu1 %v1105_v0, %s6727_s21  ;;  %1178 = vrot.lane.b32.xlu0 %v1106_v1, %s6727_s21  ;;  %v1292_v1 = vld [vmem:[#allocation2 + $0xb] sm:$0xff] }
  0xf6   : > { %1180 = vrot.lane.b32.xlu1 %v1107_v2, %s6727_s21  ;;  %1182 = vrot.lane.b32.xlu0 %v1108_v3, %s6727_s21  ;;  %v1293_v2 = vld [vmem:[#allocation2 + $0x1b] sm:$0xff] }
  0xfa   : > { %1184 = vrot.lane.b32.xlu1 %v1109_v5, %s6727_s21  ;;  %1186 = vrot.lane.b32.xlu0 %v1110_v6, %s6727_s21  ;;  %v1294_v6 = vld [vmem:[#allocation2 + $0x23] sm:$0xff] }
  0xfe   : > { %1188 = vrot.lane.b32.xlu1 %v1111_v7, %s6727_s21  ;;  %1190 = vrot.lane.b32.xlu0 %v1112_v11, %s6727_s21  ;;  %v1295_v7 = vld [vmem:[#allocation2 + $0x33] sm:$0xff] }
 0x101   : > { %v970_v34 = vpop.permute.xlu0 %969 }
 0x102   : > { %1192 = vrot.lane.b32.xlu1 %v1113_v12, %s6727_s21  ;;  %1194 = vrot.lane.b32.xlu0 %v1114_v16, %s6727_s21  ;;  %1066 = vst.msk [vmem:[#allocation3] sm:$0xff] %vm1065_vm0, %v970_v34  ;;  %v1296_v16 = vld [vmem:[#allocation2 + $0x3b] sm:$0xff] }
 0x103   : > { %v1301_v34 = vld [vmem:[#allocation2 + $0x7b] sm:$0xff] }
 0x106   : > { %1196 = vrot.lane.b32.xlu1 %v1115_v19, %s6727_s21  ;;  %1198 = vrot.lane.b32.xlu0 %v1116_v20, %s6727_s21  ;;  %v1297_v19 = vld [vmem:[#allocation2 + $0x4b] sm:$0xff] }
 0x10a   : > { %1200 = vrot.lane.b32.xlu1 %v1117_v21, %s6727_s21  ;;  %1202 = vrot.lane.b32.xlu0 %v1118_v22, %s6727_s21  ;;  %v1298_v22 = vld [vmem:[#allocation2 + $0x53] sm:$0xff] }
 0x10e   : > { %1204 = vrot.lane.b32.xlu1 %v1119_v24, %s6727_s21  ;;  %1206 = vrot.lane.b32.xlu0 %v1120_v27, %s6727_s21  ;;  %v1299_v24 = vld [vmem:[#allocation2 + $0x63] sm:$0xff] }
 0x112   : > { %1208 = vrot.lane.b32.xlu1 %v1121_v28, %s6727_s21  ;;  %1210 = vrot.lane.b32.xlu0 %v1122_v33, %s6727_s21  ;;  %v1300_v33 = vld [vmem:[#allocation2 + $0x6b] sm:$0xff] }
 0x116   : > { %1212 = vrot.lane.b32.xlu1 %v1123_v36, %s6727_s21  ;;  %1214 = vrot.lane.b32.xlu0 %v1124_v39, %s6727_s21 }
 0x118   : > { %v974_v40 = vpop.permute.xlu0 %973  ;;  %v972_v41 = vpop.permute.xlu1 %971 }
 0x119   : > { %1068 = vst.msk [vmem:[#allocation3 + $0x10] sm:$0xff] %vm1065_vm0, %v974_v40  ;;  %1067 = vst.msk [vmem:[#allocation3 + $0x8] sm:$0xff] %vm1065_vm0, %v972_v41  ;;  %v1302_v40 = vld [vmem:[#allocation2 + $0x83] sm:$0xff]  ;;  %v1303_v41 = vld [vmem:[#allocation2 + $0x93] sm:$0xff] }
 0x11a   : > { %1216 = vrot.lane.b32.xlu1 %v1125_v43, %s6727_s21  ;;  %1218 = vrot.lane.b32.xlu0 %v1126_v44, %s6727_s21 }
 0x11c   : > { %v1163_v46 = vpop.permute.xlu0 %1162  ;;  %v976_v47 = vpop.permute.xlu1 %975 }
 0x11d   : > { %1259 = vst.msk [vmem:[#allocation3] sm:$0xff] %vm1258_vm7, %v1163_v46  ;;  %v1304_v46 = vld [vmem:[#allocation2 + $0x9b] sm:$0xff] }
 0x11e   : > { %1069 = vst.msk [vmem:[#allocation3 + $0x18] sm:$0xff] %vm1065_vm0, %v976_v47  ;;  %1220 = vrot.lane.b32.xlu1 %v1127_v50, %s6727_s21  ;;  %1222 = vrot.lane.b32.xlu0 %v1128_v52, %s6727_s21  ;;  %v1305_v47 = vld [vmem:[#allocation2 + $0xab] sm:$0xff] }
 0x120   : > { %v1167_v53 = vpop.permute.xlu0 %1166  ;;  %v1165_v56 = vpop.permute.xlu1 %1164 }
 0x121   : > { %1261 = vst.msk [vmem:[#allocation3 + $0x10] sm:$0xff] %vm1258_vm7, %v1167_v53  ;;  %1260 = vst.msk [vmem:[#allocation3 + $0x8] sm:$0xff] %vm1258_vm7, %v1165_v56  ;;  %v1306_v53 = vld [vmem:[#allocation2 + $0xb3] sm:$0xff]  ;;  %v1307_v56 = vld [vmem:[#allocation2 + $0xc3] sm:$0xff] }
 0x122   : > { %1224 = vrot.lane.b32.xlu1 %v1129_v57, %s6727_s21  ;;  %1355 = vrot.lane.b32.xlu0 %v1291_v58, %s6728_s22 }
 0x124   : > { %v1169_v61 = vpop.permute.xlu1 %1168  ;;  %v978_v0 = vpop.permute.xlu0 %977 }
 0x125   : > { %1262 = vst.msk [vmem:[#allocation3 + $0x18] sm:$0xff] %vm1258_vm7, %v1169_v61  ;;  %v1308_v61 = vld [vmem:[#allocation2 + $0xcb] sm:$0xff] }
 0x126   : > { %1070 = vst.msk [vmem:[#allocation3 + $0x20] sm:$0xff] %vm1065_vm0, %v978_v0  ;;  %1357 = vrot.lane.b32.xlu1 %v1292_v1, %s6728_s22  ;;  %1359 = vrot.lane.b32.xlu0 %v1293_v2, %s6728_s22  ;;  %v1309_v0 = vld [vmem:[#allocation2 + $0xdb] sm:$0xff] }
 0x128   : > { %v980_v3 = vpop.permute.xlu1 %979  ;;  %v982_v5 = vpop.permute.xlu0 %981 }
 0x129   : > { %1071 = vst.msk [vmem:[#allocation3 + $0x28] sm:$0xff] %vm1065_vm0, %v980_v3  ;;  %1072 = vst.msk [vmem:[#allocation3 + $0x30] sm:$0xff] %vm1065_vm0, %v982_v5  ;;  %v1310_v3 = vld [vmem:[#allocation2 + $0xe3] sm:$0xff]  ;;  %v1311_v5 = vld [vmem:[#allocation2 + $0xf3] sm:$0xff] }
 0x12a   : > { %1361 = vrot.lane.b32.xlu1 %v1294_v6, %s6728_s22  ;;  %1363 = vrot.lane.b32.xlu0 %v1295_v7, %s6728_s22 }
 0x12c   : > { %v984_v11 = vpop.permute.xlu1 %983  ;;  %v986_v12 = vpop.permute.xlu0 %985 }
 0x12d   : > { %1073 = vst.msk [vmem:[#allocation3 + $0x38] sm:$0xff] %vm1065_vm0, %v984_v11  ;;  %1074 = vst.msk [vmem:[#allocation3 + $0x40] sm:$0xff] %vm1065_vm0, %v986_v12  ;;  %v1312_v11 = vld [vmem:[#allocation2 + $0xfb] sm:$0xff]  ;;  %v1313_v12 = vld [vmem:[#allocation2 + $0x10b] sm:$0xff] }
 0x12e   : > { %1365 = vrot.lane.b32.xlu1 %v1296_v16, %s6728_s22  ;;  %1367 = vrot.lane.b32.xlu0 %v1297_v19, %s6728_s22 }
 0x130   : > { %v988_v20 = vpop.permute.xlu1 %987  ;;  %v990_v21 = vpop.permute.xlu0 %989 }
 0x131   : > { %1075 = vst.msk [vmem:[#allocation3 + $0x48] sm:$0xff] %vm1065_vm0, %v988_v20  ;;  %1076 = vst.msk [vmem:[#allocation3 + $0x50] sm:$0xff] %vm1065_vm0, %v990_v21  ;;  %v1314_v20 = vld [vmem:[#allocation2 + $0x113] sm:$0xff]  ;;  %v1315_v21 = vld [vmem:[#allocation2 + $0x123] sm:$0xff] }
 0x132   : > { %1369 = vrot.lane.b32.xlu1 %v1298_v22, %s6728_s22  ;;  %1371 = vrot.lane.b32.xlu0 %v1299_v24, %s6728_s22 }
 0x134   : > { %v992_v27 = vpop.permute.xlu1 %991  ;;  %v994_v28 = vpop.permute.xlu0 %993 }
 0x135   : > { %1077 = vst.msk [vmem:[#allocation3 + $0x58] sm:$0xff] %vm1065_vm0, %v992_v27  ;;  %1078 = vst.msk [vmem:[#allocation3 + $0x60] sm:$0xff] %vm1065_vm0, %v994_v28  ;;  %v1316_v27 = vld [vmem:[#allocation2 + $0x12b] sm:$0xff]  ;;  %v1317_v28 = vld [vmem:[#allocation2 + $0x13b] sm:$0xff] }
 0x136   : > { %1373 = vrot.lane.b32.xlu1 %v1300_v33, %s6728_s22  ;;  %1375 = vrot.lane.b32.xlu0 %v1301_v34, %s6728_s22 }
 0x138   : > { %v996_v36 = vpop.permute.xlu1 %995  ;;  %v998_v39 = vpop.permute.xlu0 %997 }
 0x139   : > { %1079 = vst.msk [vmem:[#allocation3 + $0x68] sm:$0xff] %vm1065_vm0, %v996_v36  ;;  %1080 = vst.msk [vmem:[#allocation3 + $0x70] sm:$0xff] %vm1065_vm0, %v998_v39  ;;  %v1318_v36 = vld [vmem:[#allocation2 + $0x143] sm:$0xff]  ;;  %v1319_v39 = vld [vmem:[#allocation2 + $0x153] sm:$0xff] }
 0x13a   : > { %1377 = vrot.lane.b32.xlu1 %v1302_v40, %s6728_s22  ;;  %1379 = vrot.lane.b32.xlu0 %v1303_v41, %s6728_s22 }
 0x13c   : > { %v1000_v43 = vpop.permute.xlu1 %999  ;;  %v1002_v44 = vpop.permute.xlu0 %1001 }
 0x13d   : > { %1081 = vst.msk [vmem:[#allocation3 + $0x78] sm:$0xff] %vm1065_vm0, %v1000_v43  ;;  %1082 = vst.msk [vmem:[#allocation3 + $0x80] sm:$0xff] %vm1065_vm0, %v1002_v44  ;;  %v1320_v43 = vld [vmem:[#allocation2 + $0x15b] sm:$0xff]  ;;  %v1321_v44 = vld [vmem:[#allocation2 + $0x16b] sm:$0xff] }
 0x13e   : > { %1381 = vrot.lane.b32.xlu1 %v1304_v46, %s6728_s22  ;;  %1383 = vrot.lane.b32.xlu0 %v1305_v47, %s6728_s22 }
 0x140   : > { %v1004_v50 = vpop.permute.xlu1 %1003  ;;  %v1006_v52 = vpop.permute.xlu0 %1005 }
 0x141   : > { %1083 = vst.msk [vmem:[#allocation3 + $0x88] sm:$0xff] %vm1065_vm0, %v1004_v50  ;;  %1084 = vst.msk [vmem:[#allocation3 + $0x90] sm:$0xff] %vm1065_vm0, %v1006_v52  ;;  %v1322_v50 = vld [vmem:[#allocation2 + $0x173] sm:$0xff]  ;;  %v1484_v52 = vld [vmem:[#allocation2 + $0x4] sm:$0xff] }
 0x142   : > { %1385 = vrot.lane.b32.xlu1 %v1306_v53, %s6728_s22  ;;  %1387 = vrot.lane.b32.xlu0 %v1307_v56, %s6728_s22 }
 0x144   : > { %v1008_v57 = vpop.permute.xlu1 %1007  ;;  %v1010_v58 = vpop.permute.xlu0 %1009 }
 0x145   : > { %1085 = vst.msk [vmem:[#allocation3 + $0x98] sm:$0xff] %vm1065_vm0, %v1008_v57  ;;  %1086 = vst.msk [vmem:[#allocation3 + $0xa0] sm:$0xff] %vm1065_vm0, %v1010_v58  ;;  %v1485_v57 = vld [vmem:[#allocation2 + $0xc] sm:$0xff]  ;;  %v1486_v58 = vld [vmem:[#allocation2 + $0x1c] sm:$0xff] }
 0x146   : > { %1389 = vrot.lane.b32.xlu1 %v1308_v61, %s6728_s22  ;;  %1391 = vrot.lane.b32.xlu0 %v1309_v0, %s6728_s22 }
 0x148   : > { %v1012_v1 = vpop.permute.xlu1 %1011  ;;  %v1014_v2 = vpop.permute.xlu0 %1013 }
 0x149   : > { %1087 = vst.msk [vmem:[#allocation3 + $0xa8] sm:$0xff] %vm1065_vm0, %v1012_v1  ;;  %1088 = vst.msk [vmem:[#allocation3 + $0xb0] sm:$0xff] %vm1065_vm0, %v1014_v2  ;;  %v1487_v1 = vld [vmem:[#allocation2 + $0x24] sm:$0xff]  ;;  %v1488_v2 = vld [vmem:[#allocation2 + $0x34] sm:$0xff] }
 0x14a   : > { %1393 = vrot.lane.b32.xlu1 %v1310_v3, %s6728_s22  ;;  %1395 = vrot.lane.b32.xlu0 %v1311_v5, %s6728_s22 }
 0x14c   : > { %v1016_v6 = vpop.permute.xlu1 %1015  ;;  %v1018_v7 = vpop.permute.xlu0 %1017 }
 0x14d   : > { %1089 = vst.msk [vmem:[#allocation3 + $0xb8] sm:$0xff] %vm1065_vm0, %v1016_v6  ;;  %1090 = vst.msk [vmem:[#allocation3 + $0xc0] sm:$0xff] %vm1065_vm0, %v1018_v7  ;;  %v1489_v6 = vld [vmem:[#allocation2 + $0x3c] sm:$0xff]  ;;  %v1490_v7 = vld [vmem:[#allocation2 + $0x4c] sm:$0xff] }
 0x14e   : > { %1397 = vrot.lane.b32.xlu1 %v1312_v11, %s6728_s22  ;;  %1399 = vrot.lane.b32.xlu0 %v1313_v12, %s6728_s22 }
 0x150   : > { %v1020_v16 = vpop.permute.xlu1 %1019  ;;  %v1022_v19 = vpop.permute.xlu0 %1021 }
 0x151   : > { %1091 = vst.msk [vmem:[#allocation3 + $0xc8] sm:$0xff] %vm1065_vm0, %v1020_v16  ;;  %1092 = vst.msk [vmem:[#allocation3 + $0xd0] sm:$0xff] %vm1065_vm0, %v1022_v19  ;;  %v1491_v16 = vld [vmem:[#allocation2 + $0x54] sm:$0xff]  ;;  %v1492_v19 = vld [vmem:[#allocation2 + $0x64] sm:$0xff] }
 0x152   : > { %1401 = vrot.lane.b32.xlu1 %v1314_v20, %s6728_s22  ;;  %1403 = vrot.lane.b32.xlu0 %v1315_v21, %s6728_s22 }
 0x154   : > { %v1024_v22 = vpop.permute.xlu1 %1023  ;;  %v1026_v24 = vpop.permute.xlu0 %1025 }
 0x155   : > { %1093 = vst.msk [vmem:[#allocation3 + $0xd8] sm:$0xff] %vm1065_vm0, %v1024_v22  ;;  %1094 = vst.msk [vmem:[#allocation3 + $0xe0] sm:$0xff] %vm1065_vm0, %v1026_v24  ;;  %v1493_v22 = vld [vmem:[#allocation2 + $0x6c] sm:$0xff]  ;;  %v1494_v24 = vld [vmem:[#allocation2 + $0x7c] sm:$0xff] }
 0x156   : > { %1405 = vrot.lane.b32.xlu1 %v1316_v27, %s6728_s22  ;;  %1407 = vrot.lane.b32.xlu0 %v1317_v28, %s6728_s22 }
 0x158   : > { %v1028_v33 = vpop.permute.xlu1 %1027  ;;  %v1030_v34 = vpop.permute.xlu0 %1029 }
 0x159   : > { %1095 = vst.msk [vmem:[#allocation3 + $0xe8] sm:$0xff] %vm1065_vm0, %v1028_v33  ;;  %1096 = vst.msk [vmem:[#allocation3 + $0xf0] sm:$0xff] %vm1065_vm0, %v1030_v34  ;;  %v1495_v33 = vld [vmem:[#allocation2 + $0x84] sm:$0xff]  ;;  %v1496_v34 = vld [vmem:[#allocation2 + $0x94] sm:$0xff] }
 0x15a   : > { %1409 = vrot.lane.b32.xlu1 %v1318_v36, %s6728_s22  ;;  %1411 = vrot.lane.b32.xlu0 %v1319_v39, %s6728_s22 }
 0x15c   : > { %v1032_v40 = vpop.permute.xlu1 %1031  ;;  %v1171_v41 = vpop.permute.xlu0 %1170 }
 0x15d   : > { %1097 = vst.msk [vmem:[#allocation3 + $0xf8] sm:$0xff] %vm1065_vm0, %v1032_v40  ;;  %v1497_v40 = vld [vmem:[#allocation2 + $0x9c] sm:$0xff]  ;;  %vm4155_vm0 = vcmask 736936  }
 0x15e   : > { %1263 = vst.msk [vmem:[#allocation3 + $0x20] sm:$0xff] %vm1258_vm7, %v1171_v41  ;;  %1413 = vrot.lane.b32.xlu1 %v1320_v43, %s6728_s22  ;;  %1415 = vrot.lane.b32.xlu0 %v1321_v44, %s6728_s22  ;;  %v1498_v41 = vld [vmem:[#allocation2 + $0xac] sm:$0xff] }
 0x160   : > { %v1173_v46 = vpop.permute.xlu1 %1172  ;;  %v1175_v47 = vpop.permute.xlu0 %1174 }
 0x161   : > { %1264 = vst.msk [vmem:[#allocation3 + $0x28] sm:$0xff] %vm1258_vm7, %v1173_v46  ;;  %1265 = vst.msk [vmem:[#allocation3 + $0x30] sm:$0xff] %vm1258_vm7, %v1175_v47  ;;  %v1499_v46 = vld [vmem:[#allocation2 + $0xb4] sm:$0xff]  ;;  %v1500_v47 = vld [vmem:[#allocation2 + $0xc4] sm:$0xff] }
 0x162   : > { %1417 = vrot.lane.b32.xlu1 %v1322_v50, %s6728_s22  ;;  %1548 = vrot.lane.b32.xlu0 %v1484_v52, %s6729_s23 }
 0x164   : > { %v1177_v53 = vpop.permute.xlu1 %1176  ;;  %v1179_v56 = vpop.permute.xlu0 %1178 }
 0x165   : > { %1266 = vst.msk [vmem:[#allocation3 + $0x38] sm:$0xff] %vm1258_vm7, %v1177_v53  ;;  %1267 = vst.msk [vmem:[#allocation3 + $0x40] sm:$0xff] %vm1258_vm7, %v1179_v56  ;;  %v1501_v53 = vld [vmem:[#allocation2 + $0xcc] sm:$0xff]  ;;  %v1502_v56 = vld [vmem:[#allocation2 + $0xdc] sm:$0xff] }
 0x166   : > { %1550 = vrot.lane.b32.xlu1 %v1485_v57, %s6729_s23  ;;  %1552 = vrot.lane.b32.xlu0 %v1486_v58, %s6729_s23 }
 0x168   : > { %v1181_v61 = vpop.permute.xlu1 %1180  ;;  %v1183_v0 = vpop.permute.xlu0 %1182 }
 0x169   : > { %1268 = vst.msk [vmem:[#allocation3 + $0x48] sm:$0xff] %vm1258_vm7, %v1181_v61  ;;  %1269 = vst.msk [vmem:[#allocation3 + $0x50] sm:$0xff] %vm1258_vm7, %v1183_v0  ;;  %v1503_v61 = vld [vmem:[#allocation2 + $0xe4] sm:$0xff]  ;;  %v1504_v0 = vld [vmem:[#allocation2 + $0xf4] sm:$0xff] }
 0x16a   : > { %1554 = vrot.lane.b32.xlu1 %v1487_v1, %s6729_s23  ;;  %1556 = vrot.lane.b32.xlu0 %v1488_v2, %s6729_s23 }
 0x16c   : > { %v1185_v3 = vpop.permute.xlu1 %1184  ;;  %v1187_v5 = vpop.permute.xlu0 %1186 }
 0x16d   : > { %1270 = vst.msk [vmem:[#allocation3 + $0x58] sm:$0xff] %vm1258_vm7, %v1185_v3  ;;  %1271 = vst.msk [vmem:[#allocation3 + $0x60] sm:$0xff] %vm1258_vm7, %v1187_v5  ;;  %v1505_v3 = vld [vmem:[#allocation2 + $0xfc] sm:$0xff]  ;;  %v1506_v5 = vld [vmem:[#allocation2 + $0x10c] sm:$0xff] }
 0x16e   : > { %1558 = vrot.lane.b32.xlu1 %v1489_v6, %s6729_s23  ;;  %1560 = vrot.lane.b32.xlu0 %v1490_v7, %s6729_s23 }
 0x170   : > { %v1189_v11 = vpop.permute.xlu1 %1188  ;;  %v1191_v12 = vpop.permute.xlu0 %1190 }
 0x171   : > { %1272 = vst.msk [vmem:[#allocation3 + $0x68] sm:$0xff] %vm1258_vm7, %v1189_v11  ;;  %1273 = vst.msk [vmem:[#allocation3 + $0x70] sm:$0xff] %vm1258_vm7, %v1191_v12  ;;  %v1507_v11 = vld [vmem:[#allocation2 + $0x114] sm:$0xff]  ;;  %v1508_v12 = vld [vmem:[#allocation2 + $0x124] sm:$0xff] }
 0x172   : > { %1562 = vrot.lane.b32.xlu1 %v1491_v16, %s6729_s23  ;;  %1564 = vrot.lane.b32.xlu0 %v1492_v19, %s6729_s23 }
 0x174   : > { %v1193_v20 = vpop.permute.xlu1 %1192  ;;  %v1195_v21 = vpop.permute.xlu0 %1194 }
 0x175   : > { %1274 = vst.msk [vmem:[#allocation3 + $0x78] sm:$0xff] %vm1258_vm7, %v1193_v20  ;;  %1275 = vst.msk [vmem:[#allocation3 + $0x80] sm:$0xff] %vm1258_vm7, %v1195_v21  ;;  %v1509_v20 = vld [vmem:[#allocation2 + $0x12c] sm:$0xff]  ;;  %v1510_v21 = vld [vmem:[#allocation2 + $0x13c] sm:$0xff] }
 0x176   : > { %1566 = vrot.lane.b32.xlu1 %v1493_v22, %s6729_s23  ;;  %1568 = vrot.lane.b32.xlu0 %v1494_v24, %s6729_s23 }
 0x178   : > { %v1197_v27 = vpop.permute.xlu1 %1196  ;;  %v1199_v28 = vpop.permute.xlu0 %1198 }
 0x179   : > { %1276 = vst.msk [vmem:[#allocation3 + $0x88] sm:$0xff] %vm1258_vm7, %v1197_v27  ;;  %1277 = vst.msk [vmem:[#allocation3 + $0x90] sm:$0xff] %vm1258_vm7, %v1199_v28  ;;  %v1511_v27 = vld [vmem:[#allocation2 + $0x144] sm:$0xff]  ;;  %v1512_v28 = vld [vmem:[#allocation2 + $0x154] sm:$0xff] }
 0x17a   : > { %1570 = vrot.lane.b32.xlu1 %v1495_v33, %s6729_s23  ;;  %1572 = vrot.lane.b32.xlu0 %v1496_v34, %s6729_s23 }
 0x17c   : > { %v1201_v36 = vpop.permute.xlu1 %1200  ;;  %v1203_v39 = vpop.permute.xlu0 %1202 }
 0x17d   : > { %1278 = vst.msk [vmem:[#allocation3 + $0x98] sm:$0xff] %vm1258_vm7, %v1201_v36  ;;  %1279 = vst.msk [vmem:[#allocation3 + $0xa0] sm:$0xff] %vm1258_vm7, %v1203_v39  ;;  %v1513_v36 = vld [vmem:[#allocation2 + $0x15c] sm:$0xff]  ;;  %v1514_v39 = vld [vmem:[#allocation2 + $0x16c] sm:$0xff] }
 0x17e   : > { %1574 = vrot.lane.b32.xlu1 %v1497_v40, %s6729_s23  ;;  %1576 = vrot.lane.b32.xlu0 %v1498_v41, %s6729_s23 }
 0x180   : > { %v1205_v43 = vpop.permute.xlu1 %1204  ;;  %v1207_v44 = vpop.permute.xlu0 %1206 }
 0x181   : > { %1280 = vst.msk [vmem:[#allocation3 + $0xa8] sm:$0xff] %vm1258_vm7, %v1205_v43  ;;  %1281 = vst.msk [vmem:[#allocation3 + $0xb0] sm:$0xff] %vm1258_vm7, %v1207_v44  ;;  %v1515_v43 = vld [vmem:[#allocation2 + $0x174] sm:$0xff] }
 0x182   : > { %1578 = vrot.lane.b32.xlu1 %v1499_v46, %s6729_s23  ;;  %1580 = vrot.lane.b32.xlu0 %v1500_v47, %s6729_s23 }
 0x184   : > { %v1209_v50 = vpop.permute.xlu1 %1208  ;;  %v1211_v52 = vpop.permute.xlu0 %1210 }
 0x185   : > { %1282 = vst.msk [vmem:[#allocation3 + $0xb8] sm:$0xff] %vm1258_vm7, %v1209_v50  ;;  %1283 = vst.msk [vmem:[#allocation3 + $0xc0] sm:$0xff] %vm1258_vm7, %v1211_v52 }
 0x186   : > { %1582 = vrot.lane.b32.xlu1 %v1501_v53, %s6729_s23  ;;  %1584 = vrot.lane.b32.xlu0 %v1502_v56, %s6729_s23 }
 0x188   : > { %v1213_v57 = vpop.permute.xlu1 %1212  ;;  %v1215_v58 = vpop.permute.xlu0 %1214 }
 0x189   : > { %1284 = vst.msk [vmem:[#allocation3 + $0xc8] sm:$0xff] %vm1258_vm7, %v1213_v57  ;;  %1285 = vst.msk [vmem:[#allocation3 + $0xd0] sm:$0xff] %vm1258_vm7, %v1215_v58  ;;  %v1873_v58 = vld [vmem:[#allocation2 + $0x31] sm:$0xff] }
 0x18a   : > { %1586 = vrot.lane.b32.xlu1 %v1503_v61, %s6729_s23  ;;  %1588 = vrot.lane.b32.xlu0 %v1504_v0, %s6729_s23 }
 0x18c   : > { %v1217_v1 = vpop.permute.xlu1 %1216  ;;  %v1219_v2 = vpop.permute.xlu0 %1218 }
 0x18d   : > { %1286 = vst.msk [vmem:[#allocation3 + $0xd8] sm:$0xff] %vm1258_vm7, %v1217_v1  ;;  %1287 = vst.msk [vmem:[#allocation3 + $0xe0] sm:$0xff] %vm1258_vm7, %v1219_v2  ;;  %v1874_v1 = vld [vmem:[#allocation2 + $0x39] sm:$0xff]  ;;  %v1875_v2 = vld [vmem:[#allocation2 + $0x49] sm:$0xff] }
 0x18e   : > { %1590 = vrot.lane.b32.xlu1 %v1505_v3, %s6729_s23  ;;  %1592 = vrot.lane.b32.xlu0 %v1506_v5, %s6729_s23 }
 0x190   : > { %v1221_v6 = vpop.permute.xlu1 %1220  ;;  %v1223_v7 = vpop.permute.xlu0 %1222 }
 0x191   : > { %1288 = vst.msk [vmem:[#allocation3 + $0xe8] sm:$0xff] %vm1258_vm7, %v1221_v6  ;;  %1289 = vst.msk [vmem:[#allocation3 + $0xf0] sm:$0xff] %vm1258_vm7, %v1223_v7  ;;  %v1876_v6 = vld [vmem:[#allocation2 + $0x51] sm:$0xff]  ;;  %v1877_v7 = vld [vmem:[#allocation2 + $0x61] sm:$0xff] }
 0x192   : > { %1594 = vrot.lane.b32.xlu1 %v1507_v11, %s6729_s23  ;;  %1596 = vrot.lane.b32.xlu0 %v1508_v12, %s6729_s23 }
 0x194   : > { %v1225_v16 = vpop.permute.xlu1 %1224  ;;  %v1356_v19 = vpop.permute.xlu0 %1355 }
 0x195   : > { %1290 = vst.msk [vmem:[#allocation3 + $0xf8] sm:$0xff] %vm1258_vm7, %v1225_v16  ;;  %v1878_v16 = vld [vmem:[#allocation2 + $0x69] sm:$0xff]  ;;  %vm4348_vm7 = vcmask 777936  }
 0x196   : > { %1452 = vst.msk [vmem:[#allocation3] sm:$0xff] %vm1451_vm8, %v1356_v19  ;;  %1598 = vrot.lane.b32.xlu1 %v1509_v20, %s6729_s23  ;;  %1600 = vrot.lane.b32.xlu0 %v1510_v21, %s6729_s23  ;;  %v1879_v19 = vld [vmem:[#allocation2 + $0x79] sm:$0xff] }
 0x198   : > { %v1358_v22 = vpop.permute.xlu1 %1357  ;;  %v1360_v24 = vpop.permute.xlu0 %1359 }
 0x199   : > { %1453 = vst.msk [vmem:[#allocation3 + $0x8] sm:$0xff] %vm1451_vm8, %v1358_v22  ;;  %1454 = vst.msk [vmem:[#allocation3 + $0x10] sm:$0xff] %vm1451_vm8, %v1360_v24  ;;  %v1880_v22 = vld [vmem:[#allocation2 + $0x81] sm:$0xff]  ;;  %v1881_v24 = vld [vmem:[#allocation2 + $0x91] sm:$0xff] }
 0x19a   : > { %1602 = vrot.lane.b32.xlu1 %v1511_v27, %s6729_s23  ;;  %1604 = vrot.lane.b32.xlu0 %v1512_v28, %s6729_s23 }
 0x19c   : > { %v1362_v33 = vpop.permute.xlu1 %1361  ;;  %v1364_v34 = vpop.permute.xlu0 %1363 }
 0x19d   : > { %1455 = vst.msk [vmem:[#allocation3 + $0x18] sm:$0xff] %vm1451_vm8, %v1362_v33  ;;  %1456 = vst.msk [vmem:[#allocation3 + $0x20] sm:$0xff] %vm1451_vm8, %v1364_v34  ;;  %v1882_v33 = vld [vmem:[#allocation2 + $0x99] sm:$0xff]  ;;  %v1883_v34 = vld [vmem:[#allocation2 + $0xa9] sm:$0xff] }
 0x19e   : > { %1606 = vrot.lane.b32.xlu1 %v1513_v36, %s6729_s23  ;;  %1608 = vrot.lane.b32.xlu0 %v1514_v39, %s6729_s23 }
 0x1a0   : > { %v1366_v40 = vpop.permute.xlu1 %1365  ;;  %v1368_v41 = vpop.permute.xlu0 %1367 }
 0x1a1   : > { %1457 = vst.msk [vmem:[#allocation3 + $0x28] sm:$0xff] %vm1451_vm8, %v1366_v40  ;;  %1458 = vst.msk [vmem:[#allocation3 + $0x30] sm:$0xff] %vm1451_vm8, %v1368_v41  ;;  %v1884_v40 = vld [vmem:[#allocation2 + $0xb1] sm:$0xff]  ;;  %v1885_v41 = vld [vmem:[#allocation2 + $0xc1] sm:$0xff] }
 0x1a2   : > { %1610 = vrot.lane.b32.xlu1 %v1515_v43, %s6729_s23  ;;  %1742 = vrot.lane.b32.xlu0 %v7102_v23, %s6730_s24 }
 0x1a4   : > { %v1370_v44 = vpop.permute.xlu1 %1369  ;;  %v1372_v46 = vpop.permute.xlu0 %1371 }
 0x1a5   : > { %1459 = vst.msk [vmem:[#allocation3 + $0x38] sm:$0xff] %vm1451_vm8, %v1370_v44  ;;  %1460 = vst.msk [vmem:[#allocation3 + $0x40] sm:$0xff] %vm1451_vm8, %v1372_v46  ;;  %v1886_v46 = vld [vmem:[#allocation2 + $0xc9] sm:$0xff] }
 0x1a6   : > { %1744 = vrot.lane.b32.xlu1 %v7092_v15, %s6730_s24  ;;  %1746 = vrot.lane.b32.xlu0 %v7106_v26, %s6730_s24 }
 0x1a8   : > { %v1374_v47 = vpop.permute.xlu1 %1373  ;;  %v1376_v50 = vpop.permute.xlu0 %1375 }
 0x1a9   : > { %1461 = vst.msk [vmem:[#allocation3 + $0x48] sm:$0xff] %vm1451_vm8, %v1374_v47  ;;  %1462 = vst.msk [vmem:[#allocation3 + $0x50] sm:$0xff] %vm1451_vm8, %v1376_v50  ;;  %v1887_v47 = vld [vmem:[#allocation2 + $0xd9] sm:$0xff] }
 0x1aa   : > { %1748 = vrot.lane.b32.xlu1 %v7112_v29, %s6730_s24  ;;  %1750 = vrot.lane.b32.xlu0 %v7116_v32, %s6730_s24 }
 0x1ac   : > { %v1378_v23 = vpop.permute.xlu1 %1377  ;;  %v1380_v52 = vpop.permute.xlu0 %1379 }
 0x1ad   : > { %1463 = vst.msk [vmem:[#allocation3 + $0x58] sm:$0xff] %vm1451_vm8, %v1378_v23  ;;  %1464 = vst.msk [vmem:[#allocation3 + $0x60] sm:$0xff] %vm1451_vm8, %v1380_v52  ;;  %v1888_v52 = vld [vmem:[#allocation2 + $0xe1] sm:$0xff] }
 0x1ae   : > { %1752 = vrot.lane.b32.xlu1 %v7126_v38, %s6730_s24  ;;  %1754 = vrot.lane.b32.xlu0 %v7130_v42, %s6730_s24 }
 0x1b0   : > { %v1382_v15 = vpop.permute.xlu1 %1381  ;;  %v1384_v26 = vpop.permute.xlu0 %1383 }
 0x1b1   : > { %1465 = vst.msk [vmem:[#allocation3 + $0x68] sm:$0xff] %vm1451_vm8, %v1382_v15  ;;  %1466 = vst.msk [vmem:[#allocation3 + $0x70] sm:$0xff] %vm1451_vm8, %v1384_v26  ;;  %v1889_v15 = vld [vmem:[#allocation2 + $0xf1] sm:$0xff] }
 0x1b2   : > { %1756 = vrot.lane.b32.xlu1 %v7138_v45, %s6730_s24  ;;  %1758 = vrot.lane.b32.xlu0 %v7142_v48, %s6730_s24 }
 0x1b4   : > { %v1386_v29 = vpop.permute.xlu1 %1385  ;;  %v1388_v32 = vpop.permute.xlu0 %1387 }
 0x1b5   : > { %1467 = vst.msk [vmem:[#allocation3 + $0x78] sm:$0xff] %vm1451_vm8, %v1386_v29  ;;  %1468 = vst.msk [vmem:[#allocation3 + $0x80] sm:$0xff] %vm1451_vm8, %v1388_v32  ;;  %v1890_v32 = vld [vmem:[#allocation2 + $0xf9] sm:$0xff] }
 0x1b6   : > { %1760 = vrot.lane.b32.xlu1 %v7152_v55, %s6730_s24  ;;  %1762 = vrot.lane.b32.xlu0 %v7156_v59, %s6730_s24 }
 0x1b8   : > { %v1390_v38 = vpop.permute.xlu1 %1389  ;;  %v1392_v42 = vpop.permute.xlu0 %1391 }
 0x1b9   : > { %1469 = vst.msk [vmem:[#allocation3 + $0x88] sm:$0xff] %vm1451_vm8, %v1390_v38  ;;  %1470 = vst.msk [vmem:[#allocation3 + $0x90] sm:$0xff] %vm1451_vm8, %v1392_v42  ;;  %v1891_v38 = vld [vmem:[#allocation2 + $0x109] sm:$0xff] }
 0x1ba   : > { %1764 = vrot.lane.b32.xlu1 %v7162_v62, %s6730_s24  ;;  %1766 = vrot.lane.b32.xlu0 %v7166_v63, %s6730_s24 }
 0x1bc   : > { %v1394_v45 = vpop.permute.xlu1 %1393  ;;  %v1396_v48 = vpop.permute.xlu0 %1395 }
 0x1bd   : > { %1471 = vst.msk [vmem:[#allocation3 + $0x98] sm:$0xff] %vm1451_vm8, %v1394_v45  ;;  %1472 = vst.msk [vmem:[#allocation3 + $0xa0] sm:$0xff] %vm1451_vm8, %v1396_v48  ;;  %v1892_v48 = vld [vmem:[#allocation2 + $0x111] sm:$0xff] }
 0x1be   : > { %1768 = vrot.lane.b32.xlu1 %v7176_v8, %s6730_s24  ;;  %1770 = vrot.lane.b32.xlu0 %v7180_v10, %s6730_s24 }
 0x1c0   : > { %v1398_v55 = vpop.permute.xlu1 %1397  ;;  %v1400_v59 = vpop.permute.xlu0 %1399 }
 0x1c1   : > { %1473 = vst.msk [vmem:[#allocation3 + $0xa8] sm:$0xff] %vm1451_vm8, %v1398_v55  ;;  %1474 = vst.msk [vmem:[#allocation3 + $0xb0] sm:$0xff] %vm1451_vm8, %v1400_v59  ;;  %v1893_v55 = vld [vmem:[#allocation2 + $0x121] sm:$0xff] }
 0x1c2   : > { %1772 = vrot.lane.b32.xlu1 %v7188_v13, %s6730_s24  ;;  %1774 = vrot.lane.b32.xlu0 %v7192_v18, %s6730_s24 }
 0x1c4   : > { %v1402_v62 = vpop.permute.xlu1 %1401  ;;  %v1404_v63 = vpop.permute.xlu0 %1403 }
 0x1c5   : > { %1475 = vst.msk [vmem:[#allocation3 + $0xb8] sm:$0xff] %vm1451_vm8, %v1402_v62  ;;  %1476 = vst.msk [vmem:[#allocation3 + $0xc0] sm:$0xff] %vm1451_vm8, %v1404_v63  ;;  %v1894_v63 = vld [vmem:[#allocation2 + $0x129] sm:$0xff] }
 0x1c6   : > { %1776 = vrot.lane.b32.xlu1 %v7202_v25, %s6730_s24  ;;  %1778 = vrot.lane.b32.xlu0 %v7206_v31, %s6730_s24 }
 0x1c8   : > { %v1406_v8 = vpop.permute.xlu1 %1405  ;;  %v1408_v10 = vpop.permute.xlu0 %1407 }
 0x1c9   : > { %1477 = vst.msk [vmem:[#allocation3 + $0xc8] sm:$0xff] %vm1451_vm8, %v1406_v8  ;;  %1478 = vst.msk [vmem:[#allocation3 + $0xd0] sm:$0xff] %vm1451_vm8, %v1408_v10  ;;  %v1895_v8 = vld [vmem:[#allocation2 + $0x139] sm:$0xff] }
 0x1ca   : > { %1780 = vrot.lane.b32.xlu1 %v7212_v35, %s6730_s24  ;;  %1782 = vrot.lane.b32.xlu0 %v7216_v37, %s6730_s24 }
 0x1cc   : > { %v1410_v13 = vpop.permute.xlu1 %1409  ;;  %v1412_v18 = vpop.permute.xlu0 %1411 }
 0x1cd   : > { %1479 = vst.msk [vmem:[#allocation3 + $0xd8] sm:$0xff] %vm1451_vm8, %v1410_v13  ;;  %1480 = vst.msk [vmem:[#allocation3 + $0xe0] sm:$0xff] %vm1451_vm8, %v1412_v18  ;;  %v1896_v18 = vld [vmem:[#allocation2 + $0x141] sm:$0xff] }
 0x1ce   : > { %1784 = vrot.lane.b32.xlu1 %v7226_v49, %s6730_s24  ;;  %1786 = vrot.lane.b32.xlu0 %v7230_v51, %s6730_s24 }
 0x1d0   : > { %v1414_v25 = vpop.permute.xlu1 %1413  ;;  %v1416_v31 = vpop.permute.xlu0 %1415 }
 0x1d1   : > { %1481 = vst.msk [vmem:[#allocation3 + $0xe8] sm:$0xff] %vm1451_vm8, %v1414_v25  ;;  %1482 = vst.msk [vmem:[#allocation3 + $0xf0] sm:$0xff] %vm1451_vm8, %v1416_v31  ;;  %v1897_v25 = vld [vmem:[#allocation2 + $0x151] sm:$0xff] }
 0x1d2   : > { %1788 = vrot.lane.b32.xlu1 %v7238_v54, %s6730_s24  ;;  %1790 = vrot.lane.b32.xlu0 %v7242_v60, %s6730_s24 }
 0x1d4   : > { %v1418_v35 = vpop.permute.xlu1 %1417  ;;  %v1549_v37 = vpop.permute.xlu0 %1548 }
 0x1d5   : > { %1483 = vst.msk [vmem:[#allocation3 + $0xf8] sm:$0xff] %vm1451_vm8, %v1418_v35  ;;  %vm5692_vm8 = vcmask 1044480  }
 0x1d6   : > { %1645 = vst.msk [vmem:[#allocation3] sm:$0xff] %vm1644_vm2, %v1549_v37  ;;  %1792 = vrot.lane.b32.xlu1 %v7252_v4, %s6730_s24  ;;  %1794 = vrot.lane.b32.xlu0 %v7256_v9, %s6730_s24  ;;  %v1708_v4 = vld [vmem:[#allocation2 + $0x180] sm:$0xff] }
 0x1d7   : > { %v1898_v37 = vld [vmem:[#allocation2 + $0x159] sm:$0xff] }
 0x1d8   : > { %v1551_v49 = vpop.permute.xlu1 %1550  ;;  %v1553_v51 = vpop.permute.xlu0 %1552 }
 0x1d9   : > { %1646 = vst.msk [vmem:[#allocation3 + $0x8] sm:$0xff] %vm1644_vm2, %v1551_v49  ;;  %1647 = vst.msk [vmem:[#allocation3 + $0x10] sm:$0xff] %vm1644_vm2, %v1553_v51  ;;  %v1899_v49 = vld [vmem:[#allocation2 + $0x169] sm:$0xff] }
 0x1da   : > { %1796 = vrot.lane.b32.xlu1 %v7262_v14, %s6730_s24  ;;  %1798 = vrot.lane.b32.xlu0 %v7266_v17, %s6730_s24  ;;  %v1709_v14 = vld [vmem:[#allocation2 + $0x188] sm:$0xff]  ;;  %v1871_v17 = vld [vmem:[#allocation2 + $0x19] sm:$0xff] }
 0x1dc   : > { %v1555_v54 = vpop.permute.xlu1 %1554  ;;  %v1557_v60 = vpop.permute.xlu0 %1556 }
 0x1dd   : > { %1648 = vst.msk [vmem:[#allocation3 + $0x18] sm:$0xff] %vm1644_vm2, %v1555_v54  ;;  %1649 = vst.msk [vmem:[#allocation3 + $0x20] sm:$0xff] %vm1644_vm2, %v1557_v60  ;;  %v1900_v60 = vld [vmem:[#allocation2 + $0x171] sm:$0xff] }
 0x1de   : > { %1800 = vrot.lane.b32.xlu1 %v7276_v30, %s6730_s24  ;;  %1802 = vrot.lane.b32.xlu0 %v1708_v4, %s6730_s24  ;;  %v1872_v30 = vld [vmem:[#allocation2 + $0x21] sm:$0xff] }
 0x1df   : > { %v1901_v4 = vld [vmem:[#allocation2 + $0x181] sm:$0xff] }
 0x1e0   : > { %v1559_v9 = vpop.permute.xlu1 %1558  ;;  %v1561_v53 = vpop.permute.xlu0 %1560 }
 0x1e1   : > { %1650 = vst.msk [vmem:[#allocation3 + $0x28] sm:$0xff] %vm1644_vm2, %v1559_v9  ;;  %1651 = vst.msk [vmem:[#allocation3 + $0x30] sm:$0xff] %vm1644_vm2, %v1561_v53 }
 0x1e2   : > { %1804 = vrot.lane.b32.xlu1 %v1709_v14, %s6730_s24  ;;  %1935 = vrot.lane.b32.xlu0 %v1871_v17, %s6731_s25  ;;  %v1902_v14 = vld [vmem:[#allocation2 + $0x189] sm:$0xff]  ;;  %v2064_v17 = vld [vmem:[#allocation2 + $0x1a] sm:$0xff]  ;;  %s6747_s24 = smov 110  }
 0x1e4   : > { %v1563_v56 = vpop.permute.xlu1 %1562  ;;  %v1565_v57 = vpop.permute.xlu0 %1564 }
 0x1e5   : > { %1652 = vst.msk [vmem:[#allocation3 + $0x38] sm:$0xff] %vm1644_vm2, %v1563_v56  ;;  %1653 = vst.msk [vmem:[#allocation3 + $0x40] sm:$0xff] %vm1644_vm2, %v1565_v57 }
 0x1e6   : > { %1937 = vrot.lane.b32.xlu1 %v1872_v30, %s6731_s25  ;;  %1939 = vrot.lane.b32.xlu0 %v1873_v58, %s6731_s25  ;;  %v2065_v30 = vld [vmem:[#allocation2 + $0x22] sm:$0xff]  ;;  %v2066_v58 = vld [vmem:[#allocation2 + $0x32] sm:$0xff] }
 0x1e8   : > { %v1567_v61 = vpop.permute.xlu1 %1566  ;;  %v1569_v0 = vpop.permute.xlu0 %1568 }
 0x1e9   : > { %1654 = vst.msk [vmem:[#allocation3 + $0x48] sm:$0xff] %vm1644_vm2, %v1567_v61  ;;  %1655 = vst.msk [vmem:[#allocation3 + $0x50] sm:$0xff] %vm1644_vm2, %v1569_v0 }
 0x1ea   : > { %1941 = vrot.lane.b32.xlu1 %v1874_v1, %s6731_s25  ;;  %1943 = vrot.lane.b32.xlu0 %v1875_v2, %s6731_s25  ;;  %v2067_v1 = vld [vmem:[#allocation2 + $0x3a] sm:$0xff]  ;;  %v2068_v2 = vld [vmem:[#allocation2 + $0x4a] sm:$0xff] }
 0x1ec   : > { %v1571_v3 = vpop.permute.xlu1 %1570  ;;  %v1573_v5 = vpop.permute.xlu0 %1572 }
 0x1ed   : > { %1656 = vst.msk [vmem:[#allocation3 + $0x58] sm:$0xff] %vm1644_vm2, %v1571_v3  ;;  %1657 = vst.msk [vmem:[#allocation3 + $0x60] sm:$0xff] %vm1644_vm2, %v1573_v5 }
 0x1ee   : > { %1945 = vrot.lane.b32.xlu1 %v1876_v6, %s6731_s25  ;;  %1947 = vrot.lane.b32.xlu0 %v1877_v7, %s6731_s25  ;;  %v2069_v6 = vld [vmem:[#allocation2 + $0x52] sm:$0xff]  ;;  %v2070_v7 = vld [vmem:[#allocation2 + $0x62] sm:$0xff] }
 0x1f0   : > { %v1575_v11 = vpop.permute.xlu1 %1574  ;;  %v1577_v12 = vpop.permute.xlu0 %1576 }
 0x1f1   : > { %1658 = vst.msk [vmem:[#allocation3 + $0x68] sm:$0xff] %vm1644_vm2, %v1575_v11  ;;  %1659 = vst.msk [vmem:[#allocation3 + $0x70] sm:$0xff] %vm1644_vm2, %v1577_v12 }
 0x1f2   : > { %1949 = vrot.lane.b32.xlu1 %v1878_v16, %s6731_s25  ;;  %1951 = vrot.lane.b32.xlu0 %v1879_v19, %s6731_s25  ;;  %v2071_v16 = vld [vmem:[#allocation2 + $0x6a] sm:$0xff]  ;;  %v2072_v19 = vld [vmem:[#allocation2 + $0x7a] sm:$0xff] }
 0x1f4   : > { %v1579_v20 = vpop.permute.xlu1 %1578  ;;  %v1581_v21 = vpop.permute.xlu0 %1580 }
 0x1f5   : > { %1660 = vst.msk [vmem:[#allocation3 + $0x78] sm:$0xff] %vm1644_vm2, %v1579_v20  ;;  %1661 = vst.msk [vmem:[#allocation3 + $0x80] sm:$0xff] %vm1644_vm2, %v1581_v21 }
 0x1f6   : > { %1953 = vrot.lane.b32.xlu1 %v1880_v22, %s6731_s25  ;;  %1955 = vrot.lane.b32.xlu0 %v1881_v24, %s6731_s25  ;;  %v2073_v22 = vld [vmem:[#allocation2 + $0x82] sm:$0xff]  ;;  %v2074_v24 = vld [vmem:[#allocation2 + $0x92] sm:$0xff] }
 0x1f8   : > { %v1583_v27 = vpop.permute.xlu1 %1582  ;;  %v1585_v28 = vpop.permute.xlu0 %1584 }
 0x1f9   : > { %1662 = vst.msk [vmem:[#allocation3 + $0x88] sm:$0xff] %vm1644_vm2, %v1583_v27  ;;  %1663 = vst.msk [vmem:[#allocation3 + $0x90] sm:$0xff] %vm1644_vm2, %v1585_v28 }
 0x1fa   : > { %1957 = vrot.lane.b32.xlu1 %v1882_v33, %s6731_s25  ;;  %1959 = vrot.lane.b32.xlu0 %v1883_v34, %s6731_s25  ;;  %v2075_v33 = vld [vmem:[#allocation2 + $0x9a] sm:$0xff]  ;;  %v2076_v34 = vld [vmem:[#allocation2 + $0xaa] sm:$0xff] }
 0x1fc   : > { %v1587_v36 = vpop.permute.xlu1 %1586  ;;  %v1589_v39 = vpop.permute.xlu0 %1588 }
 0x1fd   : > { %1664 = vst.msk [vmem:[#allocation3 + $0x98] sm:$0xff] %vm1644_vm2, %v1587_v36  ;;  %1665 = vst.msk [vmem:[#allocation3 + $0xa0] sm:$0xff] %vm1644_vm2, %v1589_v39 }
 0x1fe   : > { %1961 = vrot.lane.b32.xlu1 %v1884_v40, %s6731_s25  ;;  %1963 = vrot.lane.b32.xlu0 %v1885_v41, %s6731_s25  ;;  %v2077_v40 = vld [vmem:[#allocation2 + $0xb2] sm:$0xff]  ;;  %v2078_v41 = vld [vmem:[#allocation2 + $0xc2] sm:$0xff] }
 0x200   : > { %v1591_v43 = vpop.permute.xlu1 %1590  ;;  %v1593_v44 = vpop.permute.xlu0 %1592 }
 0x201   : > { %1666 = vst.msk [vmem:[#allocation3 + $0xa8] sm:$0xff] %vm1644_vm2, %v1591_v43  ;;  %1667 = vst.msk [vmem:[#allocation3 + $0xb0] sm:$0xff] %vm1644_vm2, %v1593_v44 }
 0x202   : > { %1965 = vrot.lane.b32.xlu1 %v1886_v46, %s6731_s25  ;;  %1967 = vrot.lane.b32.xlu0 %v1887_v47, %s6731_s25  ;;  %v2079_v46 = vld [vmem:[#allocation2 + $0xca] sm:$0xff]  ;;  %v2080_v47 = vld [vmem:[#allocation2 + $0xda] sm:$0xff] }
 0x204   : > { %v1595_v50 = vpop.permute.xlu1 %1594  ;;  %v1597_v23 = vpop.permute.xlu0 %1596 }
 0x205   : > { %1668 = vst.msk [vmem:[#allocation3 + $0xb8] sm:$0xff] %vm1644_vm2, %v1595_v50  ;;  %1669 = vst.msk [vmem:[#allocation3 + $0xc0] sm:$0xff] %vm1644_vm2, %v1597_v23 }
 0x206   : > { %1969 = vrot.lane.b32.xlu1 %v1888_v52, %s6731_s25  ;;  %1971 = vrot.lane.b32.xlu0 %v1889_v15, %s6731_s25  ;;  %v2081_v52 = vld [vmem:[#allocation2 + $0xe2] sm:$0xff]  ;;  %v2082_v15 = vld [vmem:[#allocation2 + $0xf2] sm:$0xff] }
 0x208   : > { %v1599_v26 = vpop.permute.xlu1 %1598  ;;  %v1601_v29 = vpop.permute.xlu0 %1600 }
 0x209   : > { %1670 = vst.msk [vmem:[#allocation3 + $0xc8] sm:$0xff] %vm1644_vm2, %v1599_v26  ;;  %1671 = vst.msk [vmem:[#allocation3 + $0xd0] sm:$0xff] %vm1644_vm2, %v1601_v29 }
 0x20a   : > { %1973 = vrot.lane.b32.xlu1 %v1890_v32, %s6731_s25  ;;  %1975 = vrot.lane.b32.xlu0 %v1891_v38, %s6731_s25  ;;  %v2083_v32 = vld [vmem:[#allocation2 + $0xfa] sm:$0xff]  ;;  %v2084_v38 = vld [vmem:[#allocation2 + $0x10a] sm:$0xff] }
 0x20c   : > { %v1603_v42 = vpop.permute.xlu1 %1602  ;;  %v1605_v45 = vpop.permute.xlu0 %1604 }
 0x20d   : > { %1672 = vst.msk [vmem:[#allocation3 + $0xd8] sm:$0xff] %vm1644_vm2, %v1603_v42  ;;  %1673 = vst.msk [vmem:[#allocation3 + $0xe0] sm:$0xff] %vm1644_vm2, %v1605_v45 }
 0x20e   : > { %1977 = vrot.lane.b32.xlu1 %v1892_v48, %s6731_s25  ;;  %1979 = vrot.lane.b32.xlu0 %v1893_v55, %s6731_s25  ;;  %v2085_v48 = vld [vmem:[#allocation2 + $0x112] sm:$0xff]  ;;  %v2086_v55 = vld [vmem:[#allocation2 + $0x122] sm:$0xff] }
 0x210   : > { %v1607_v59 = vpop.permute.xlu1 %1606  ;;  %v1609_v62 = vpop.permute.xlu0 %1608 }
 0x211   : > { %1674 = vst.msk [vmem:[#allocation3 + $0xe8] sm:$0xff] %vm1644_vm2, %v1607_v59  ;;  %1675 = vst.msk [vmem:[#allocation3 + $0xf0] sm:$0xff] %vm1644_vm2, %v1609_v62 }
 0x212   : > { %1981 = vrot.lane.b32.xlu1 %v1894_v63, %s6731_s25  ;;  %1983 = vrot.lane.b32.xlu0 %v1895_v8, %s6731_s25  ;;  %v2087_v63 = vld [vmem:[#allocation2 + $0x12a] sm:$0xff]  ;;  %v2088_v8 = vld [vmem:[#allocation2 + $0x13a] sm:$0xff] }
 0x214   : > { %v1611_v10 = vpop.permute.xlu1 %1610  ;;  %v1743_v13 = vpop.permute.xlu0 %1742 }
 0x215   : > { %1676 = vst.msk [vmem:[#allocation3 + $0xf8] sm:$0xff] %vm1644_vm2, %v1611_v10  ;;  %vm6750_vm2 = vmmov 1  }
 0x216   : > { %1839 = vst.msk [vmem:[#allocation3] sm:$0xff] %vm1838_vm9, %v1743_v13  ;;  %1985 = vrot.lane.b32.xlu1 %v1896_v18, %s6731_s25  ;;  %1987 = vrot.lane.b32.xlu0 %v1897_v25, %s6731_s25  ;;  %v2089_v18 = vld [vmem:[#allocation2 + $0x142] sm:$0xff]  ;;  %v2090_v25 = vld [vmem:[#allocation2 + $0x152] sm:$0xff] }
 0x218   : > { %v1745_v31 = vpop.permute.xlu1 %1744  ;;  %v1747_v35 = vpop.permute.xlu0 %1746 }
 0x219   : > { %1840 = vst.msk [vmem:[#allocation3 + $0x8] sm:$0xff] %vm1838_vm9, %v1745_v31  ;;  %1841 = vst.msk [vmem:[#allocation3 + $0x10] sm:$0xff] %vm1838_vm9, %v1747_v35 }
 0x21a   : > { %1989 = vrot.lane.b32.xlu1 %v1898_v37, %s6731_s25  ;;  %1991 = vrot.lane.b32.xlu0 %v1899_v49, %s6731_s25  ;;  %v2091_v37 = vld [vmem:[#allocation2 + $0x15a] sm:$0xff]  ;;  %v2092_v49 = vld [vmem:[#allocation2 + $0x16a] sm:$0xff] }
 0x21c   : > { %v1749_v51 = vpop.permute.xlu1 %1748  ;;  %v1751_v54 = vpop.permute.xlu0 %1750 }
 0x21d   : > { %1842 = vst.msk [vmem:[#allocation3 + $0x18] sm:$0xff] %vm1838_vm9, %v1749_v51  ;;  %1843 = vst.msk [vmem:[#allocation3 + $0x20] sm:$0xff] %vm1838_vm9, %v1751_v54 }
 0x21e   : > { %1993 = vrot.lane.b32.xlu1 %v1900_v60, %s6731_s25  ;;  %1995 = vrot.lane.b32.xlu0 %v1901_v4, %s6731_s25  ;;  %v2093_v60 = vld [vmem:[#allocation2 + $0x172] sm:$0xff]  ;;  %v2094_v4 = vld [vmem:[#allocation2 + $0x182] sm:$0xff] }
 0x220   : > { %v1753_v9 = vpop.permute.xlu1 %1752  ;;  %v1755_v53 = vpop.permute.xlu0 %1754 }
 0x221   : > { %1844 = vst.msk [vmem:[#allocation3 + $0x28] sm:$0xff] %vm1838_vm9, %v1753_v9  ;;  %1845 = vst.msk [vmem:[#allocation3 + $0x30] sm:$0xff] %vm1838_vm9, %v1755_v53 }
 0x222   : > { %1997 = vrot.lane.b32.xlu1 %v1902_v14, %s6731_s25  ;;  %2128 = vrot.lane.b32.xlu0 %v2064_v17, %s6732_s26  ;;  %v2095_v14 = vld [vmem:[#allocation2 + $0x18a] sm:$0xff]  ;;  %v2257_v17 = vld [vmem:[#allocation2 + $0x1b] sm:$0xff]  ;;  %s6749_s25 = smov 120  }
 0x224   : > { %v1757_v56 = vpop.permute.xlu1 %1756  ;;  %v1759_v57 = vpop.permute.xlu0 %1758 }
 0x225   : > { %1846 = vst.msk [vmem:[#allocation3 + $0x38] sm:$0xff] %vm1838_vm9, %v1757_v56  ;;  %1847 = vst.msk [vmem:[#allocation3 + $0x40] sm:$0xff] %vm1838_vm9, %v1759_v57 }
 0x226   : > { %2130 = vrot.lane.b32.xlu1 %v2065_v30, %s6732_s26  ;;  %2132 = vrot.lane.b32.xlu0 %v2066_v58, %s6732_s26  ;;  %v2258_v30 = vld [vmem:[#allocation2 + $0x23] sm:$0xff]  ;;  %v2259_v58 = vld [vmem:[#allocation2 + $0x33] sm:$0xff] }
 0x228   : > { %v1761_v61 = vpop.permute.xlu1 %1760  ;;  %v1763_v0 = vpop.permute.xlu0 %1762 }
 0x229   : > { %1848 = vst.msk [vmem:[#allocation3 + $0x48] sm:$0xff] %vm1838_vm9, %v1761_v61  ;;  %1849 = vst.msk [vmem:[#allocation3 + $0x50] sm:$0xff] %vm1838_vm9, %v1763_v0 }
 0x22a   : > { %2134 = vrot.lane.b32.xlu1 %v2067_v1, %s6732_s26  ;;  %2136 = vrot.lane.b32.xlu0 %v2068_v2, %s6732_s26  ;;  %v2260_v1 = vld [vmem:[#allocation2 + $0x3b] sm:$0xff]  ;;  %v2261_v2 = vld [vmem:[#allocation2 + $0x4b] sm:$0xff] }
 0x22c   : > { %v1765_v3 = vpop.permute.xlu1 %1764  ;;  %v1767_v5 = vpop.permute.xlu0 %1766 }
 0x22d   : > { %1850 = vst.msk [vmem:[#allocation3 + $0x58] sm:$0xff] %vm1838_vm9, %v1765_v3  ;;  %1851 = vst.msk [vmem:[#allocation3 + $0x60] sm:$0xff] %vm1838_vm9, %v1767_v5 }
 0x22e   : > { %2138 = vrot.lane.b32.xlu1 %v2069_v6, %s6732_s26  ;;  %2140 = vrot.lane.b32.xlu0 %v2070_v7, %s6732_s26  ;;  %v2262_v6 = vld [vmem:[#allocation2 + $0x53] sm:$0xff]  ;;  %v2263_v7 = vld [vmem:[#allocation2 + $0x63] sm:$0xff] }
 0x230   : > { %v1769_v11 = vpop.permute.xlu1 %1768  ;;  %v1771_v12 = vpop.permute.xlu0 %1770 }
 0x231   : > { %1852 = vst.msk [vmem:[#allocation3 + $0x68] sm:$0xff] %vm1838_vm9, %v1769_v11  ;;  %1853 = vst.msk [vmem:[#allocation3 + $0x70] sm:$0xff] %vm1838_vm9, %v1771_v12 }
 0x232   : > { %2142 = vrot.lane.b32.xlu1 %v2071_v16, %s6732_s26  ;;  %2144 = vrot.lane.b32.xlu0 %v2072_v19, %s6732_s26  ;;  %v2264_v16 = vld [vmem:[#allocation2 + $0x6b] sm:$0xff]  ;;  %v2265_v19 = vld [vmem:[#allocation2 + $0x7b] sm:$0xff] }
 0x234   : > { %v1773_v20 = vpop.permute.xlu1 %1772  ;;  %v1775_v21 = vpop.permute.xlu0 %1774 }
 0x235   : > { %1854 = vst.msk [vmem:[#allocation3 + $0x78] sm:$0xff] %vm1838_vm9, %v1773_v20  ;;  %1855 = vst.msk [vmem:[#allocation3 + $0x80] sm:$0xff] %vm1838_vm9, %v1775_v21 }
 0x236   : > { %2146 = vrot.lane.b32.xlu1 %v2073_v22, %s6732_s26  ;;  %2148 = vrot.lane.b32.xlu0 %v2074_v24, %s6732_s26  ;;  %v2266_v22 = vld [vmem:[#allocation2 + $0x83] sm:$0xff]  ;;  %v2267_v24 = vld [vmem:[#allocation2 + $0x93] sm:$0xff] }
 0x238   : > { %v1777_v27 = vpop.permute.xlu1 %1776  ;;  %v1779_v28 = vpop.permute.xlu0 %1778 }
 0x239   : > { %1856 = vst.msk [vmem:[#allocation3 + $0x88] sm:$0xff] %vm1838_vm9, %v1777_v27  ;;  %1857 = vst.msk [vmem:[#allocation3 + $0x90] sm:$0xff] %vm1838_vm9, %v1779_v28 }
 0x23a   : > { %2150 = vrot.lane.b32.xlu1 %v2075_v33, %s6732_s26  ;;  %2152 = vrot.lane.b32.xlu0 %v2076_v34, %s6732_s26  ;;  %v2268_v33 = vld [vmem:[#allocation2 + $0x9b] sm:$0xff]  ;;  %v2269_v34 = vld [vmem:[#allocation2 + $0xab] sm:$0xff] }
 0x23c   : > { %v1781_v36 = vpop.permute.xlu1 %1780  ;;  %v1783_v39 = vpop.permute.xlu0 %1782 }
 0x23d   : > { %1858 = vst.msk [vmem:[#allocation3 + $0x98] sm:$0xff] %vm1838_vm9, %v1781_v36  ;;  %1859 = vst.msk [vmem:[#allocation3 + $0xa0] sm:$0xff] %vm1838_vm9, %v1783_v39 }
 0x23e   : > { %2154 = vrot.lane.b32.xlu1 %v2077_v40, %s6732_s26  ;;  %2156 = vrot.lane.b32.xlu0 %v2078_v41, %s6732_s26  ;;  %v2270_v40 = vld [vmem:[#allocation2 + $0xb3] sm:$0xff]  ;;  %v2271_v41 = vld [vmem:[#allocation2 + $0xc3] sm:$0xff] }
 0x240   : > { %v1785_v43 = vpop.permute.xlu1 %1784  ;;  %v1787_v44 = vpop.permute.xlu0 %1786 }
 0x241   : > { %1860 = vst.msk [vmem:[#allocation3 + $0xa8] sm:$0xff] %vm1838_vm9, %v1785_v43  ;;  %1861 = vst.msk [vmem:[#allocation3 + $0xb0] sm:$0xff] %vm1838_vm9, %v1787_v44 }
 0x242   : > { %2158 = vrot.lane.b32.xlu1 %v2079_v46, %s6732_s26  ;;  %2160 = vrot.lane.b32.xlu0 %v2080_v47, %s6732_s26  ;;  %v2272_v46 = vld [vmem:[#allocation2 + $0xcb] sm:$0xff]  ;;  %v2273_v47 = vld [vmem:[#allocation2 + $0xdb] sm:$0xff] }
 0x244   : > { %v1789_v50 = vpop.permute.xlu1 %1788  ;;  %v1791_v23 = vpop.permute.xlu0 %1790 }
 0x245   : > { %1862 = vst.msk [vmem:[#allocation3 + $0xb8] sm:$0xff] %vm1838_vm9, %v1789_v50  ;;  %1863 = vst.msk [vmem:[#allocation3 + $0xc0] sm:$0xff] %vm1838_vm9, %v1791_v23 }
 0x246   : > { %2162 = vrot.lane.b32.xlu1 %v2081_v52, %s6732_s26  ;;  %2164 = vrot.lane.b32.xlu0 %v2082_v15, %s6732_s26  ;;  %v2274_v52 = vld [vmem:[#allocation2 + $0xe3] sm:$0xff]  ;;  %v2275_v15 = vld [vmem:[#allocation2 + $0xf3] sm:$0xff] }
 0x248   : > { %v1793_v26 = vpop.permute.xlu1 %1792  ;;  %v1795_v29 = vpop.permute.xlu0 %1794 }
 0x249   : > { %1864 = vst.msk [vmem:[#allocation3 + $0xc8] sm:$0xff] %vm1838_vm9, %v1793_v26  ;;  %1865 = vst.msk [vmem:[#allocation3 + $0xd0] sm:$0xff] %vm1838_vm9, %v1795_v29 }
 0x24a   : > { %2166 = vrot.lane.b32.xlu1 %v2083_v32, %s6732_s26  ;;  %2168 = vrot.lane.b32.xlu0 %v2084_v38, %s6732_s26  ;;  %v2276_v32 = vld [vmem:[#allocation2 + $0xfb] sm:$0xff]  ;;  %v2277_v38 = vld [vmem:[#allocation2 + $0x10b] sm:$0xff] }
 0x24c   : > { %v1797_v42 = vpop.permute.xlu1 %1796  ;;  %v1799_v45 = vpop.permute.xlu0 %1798 }
 0x24d   : > { %1866 = vst.msk [vmem:[#allocation3 + $0xd8] sm:$0xff] %vm1838_vm9, %v1797_v42  ;;  %1867 = vst.msk [vmem:[#allocation3 + $0xe0] sm:$0xff] %vm1838_vm9, %v1799_v45 }
 0x24e   : > { %2170 = vrot.lane.b32.xlu1 %v2085_v48, %s6732_s26  ;;  %2172 = vrot.lane.b32.xlu0 %v2086_v55, %s6732_s26  ;;  %v2278_v48 = vld [vmem:[#allocation2 + $0x113] sm:$0xff]  ;;  %v2279_v55 = vld [vmem:[#allocation2 + $0x123] sm:$0xff] }
 0x250   : > { %v1801_v59 = vpop.permute.xlu1 %1800  ;;  %v1803_v62 = vpop.permute.xlu0 %1802 }
 0x251   : > { %1868 = vst.msk [vmem:[#allocation3 + $0xe8] sm:$0xff] %vm1838_vm9, %v1801_v59  ;;  %1869 = vst.msk [vmem:[#allocation3 + $0xf0] sm:$0xff] %vm1838_vm9, %v1803_v62 }
 0x252   : > { %2174 = vrot.lane.b32.xlu1 %v2087_v63, %s6732_s26  ;;  %2176 = vrot.lane.b32.xlu0 %v2088_v8, %s6732_s26  ;;  %v2280_v63 = vld [vmem:[#allocation2 + $0x12b] sm:$0xff]  ;;  %v2281_v8 = vld [vmem:[#allocation2 + $0x13b] sm:$0xff] }
 0x254   : > { %v1805_v10 = vpop.permute.xlu1 %1804  ;;  %v1936_v13 = vpop.permute.xlu0 %1935 }
 0x255   : > { %1870 = vst.msk [vmem:[#allocation3 + $0xf8] sm:$0xff] %vm1838_vm9, %v1805_v10  ;;  %vm6456_vm9 = vmpackc.low %vm5692_vm8, %vm6750_vm2 }
 0x256   : > { %2032 = vst.msk [vmem:[#allocation3] sm:$0xff] %vm2031_vm10, %v1936_v13  ;;  %2178 = vrot.lane.b32.xlu1 %v2089_v18, %s6732_s26  ;;  %2180 = vrot.lane.b32.xlu0 %v2090_v25, %s6732_s26  ;;  %v2282_v18 = vld [vmem:[#allocation2 + $0x143] sm:$0xff]  ;;  %v2283_v25 = vld [vmem:[#allocation2 + $0x153] sm:$0xff] }
 0x258   : > { %v1938_v31 = vpop.permute.xlu1 %1937  ;;  %v1940_v35 = vpop.permute.xlu0 %1939 }
 0x259   : > { %2033 = vst.msk [vmem:[#allocation3 + $0x8] sm:$0xff] %vm2031_vm10, %v1938_v31  ;;  %2034 = vst.msk [vmem:[#allocation3 + $0x10] sm:$0xff] %vm2031_vm10, %v1940_v35 }
 0x25a   : > { %2182 = vrot.lane.b32.xlu1 %v2091_v37, %s6732_s26  ;;  %2184 = vrot.lane.b32.xlu0 %v2092_v49, %s6732_s26  ;;  %v2284_v37 = vld [vmem:[#allocation2 + $0x15b] sm:$0xff]  ;;  %v2285_v49 = vld [vmem:[#allocation2 + $0x16b] sm:$0xff] }
 0x25c   : > { %v1942_v51 = vpop.permute.xlu1 %1941  ;;  %v1944_v54 = vpop.permute.xlu0 %1943 }
 0x25d   : > { %2035 = vst.msk [vmem:[#allocation3 + $0x18] sm:$0xff] %vm2031_vm10, %v1942_v51  ;;  %2036 = vst.msk [vmem:[#allocation3 + $0x20] sm:$0xff] %vm2031_vm10, %v1944_v54 }
 0x25e   : > { %2186 = vrot.lane.b32.xlu1 %v2093_v60, %s6732_s26  ;;  %2188 = vrot.lane.b32.xlu0 %v2094_v4, %s6732_s26  ;;  %v2286_v60 = vld [vmem:[#allocation2 + $0x173] sm:$0xff]  ;;  %v2287_v4 = vld [vmem:[#allocation2 + $0x183] sm:$0xff] }
 0x260   : > { %v1946_v9 = vpop.permute.xlu1 %1945  ;;  %v1948_v53 = vpop.permute.xlu0 %1947 }
 0x261   : > { %2037 = vst.msk [vmem:[#allocation3 + $0x28] sm:$0xff] %vm2031_vm10, %v1946_v9  ;;  %2038 = vst.msk [vmem:[#allocation3 + $0x30] sm:$0xff] %vm2031_vm10, %v1948_v53 }
 0x262   : > { %2190 = vrot.lane.b32.xlu1 %v2095_v14, %s6732_s26  ;;  %2321 = vrot.lane.b32.xlu0 %v2257_v17, %s6733_s27  ;;  %v2288_v14 = vld [vmem:[#allocation2 + $0x18b] sm:$0xff]  ;;  %v2450_v17 = vld [vmem:[#allocation2 + $0x1c] sm:$0xff] }
 0x264   : > { %v1950_v56 = vpop.permute.xlu1 %1949  ;;  %v1952_v57 = vpop.permute.xlu0 %1951 }
 0x265   : > { %2039 = vst.msk [vmem:[#allocation3 + $0x38] sm:$0xff] %vm2031_vm10, %v1950_v56  ;;  %2040 = vst.msk [vmem:[#allocation3 + $0x40] sm:$0xff] %vm2031_vm10, %v1952_v57 }
 0x266   : > { %2323 = vrot.lane.b32.xlu1 %v2258_v30, %s6733_s27  ;;  %2325 = vrot.lane.b32.xlu0 %v2259_v58, %s6733_s27  ;;  %v2451_v30 = vld [vmem:[#allocation2 + $0x24] sm:$0xff]  ;;  %v2452_v58 = vld [vmem:[#allocation2 + $0x34] sm:$0xff] }
 0x268   : > { %v1954_v61 = vpop.permute.xlu1 %1953  ;;  %v1956_v0 = vpop.permute.xlu0 %1955 }
 0x269   : > { %2041 = vst.msk [vmem:[#allocation3 + $0x48] sm:$0xff] %vm2031_vm10, %v1954_v61  ;;  %2042 = vst.msk [vmem:[#allocation3 + $0x50] sm:$0xff] %vm2031_vm10, %v1956_v0 }
 0x26a   : > { %2327 = vrot.lane.b32.xlu1 %v2260_v1, %s6733_s27  ;;  %2329 = vrot.lane.b32.xlu0 %v2261_v2, %s6733_s27  ;;  %v2453_v1 = vld [vmem:[#allocation2 + $0x3c] sm:$0xff]  ;;  %v2454_v2 = vld [vmem:[#allocation2 + $0x4c] sm:$0xff] }
 0x26c   : > { %v1958_v3 = vpop.permute.xlu1 %1957  ;;  %v1960_v5 = vpop.permute.xlu0 %1959 }
 0x26d   : > { %2043 = vst.msk [vmem:[#allocation3 + $0x58] sm:$0xff] %vm2031_vm10, %v1958_v3  ;;  %2044 = vst.msk [vmem:[#allocation3 + $0x60] sm:$0xff] %vm2031_vm10, %v1960_v5 }
 0x26e   : > { %2331 = vrot.lane.b32.xlu1 %v2262_v6, %s6733_s27  ;;  %2333 = vrot.lane.b32.xlu0 %v2263_v7, %s6733_s27  ;;  %v2455_v6 = vld [vmem:[#allocation2 + $0x54] sm:$0xff]  ;;  %v2456_v7 = vld [vmem:[#allocation2 + $0x64] sm:$0xff] }
 0x270   : > { %v1962_v11 = vpop.permute.xlu1 %1961  ;;  %v1964_v12 = vpop.permute.xlu0 %1963 }
 0x271   : > { %2045 = vst.msk [vmem:[#allocation3 + $0x68] sm:$0xff] %vm2031_vm10, %v1962_v11  ;;  %2046 = vst.msk [vmem:[#allocation3 + $0x70] sm:$0xff] %vm2031_vm10, %v1964_v12 }
 0x272   : > { %2335 = vrot.lane.b32.xlu1 %v2264_v16, %s6733_s27  ;;  %2337 = vrot.lane.b32.xlu0 %v2265_v19, %s6733_s27  ;;  %v2457_v16 = vld [vmem:[#allocation2 + $0x6c] sm:$0xff]  ;;  %v2458_v19 = vld [vmem:[#allocation2 + $0x7c] sm:$0xff] }
 0x274   : > { %v1966_v20 = vpop.permute.xlu1 %1965  ;;  %v1968_v21 = vpop.permute.xlu0 %1967 }
 0x275   : > { %2047 = vst.msk [vmem:[#allocation3 + $0x78] sm:$0xff] %vm2031_vm10, %v1966_v20  ;;  %2048 = vst.msk [vmem:[#allocation3 + $0x80] sm:$0xff] %vm2031_vm10, %v1968_v21 }
 0x276   : > { %2339 = vrot.lane.b32.xlu1 %v2266_v22, %s6733_s27  ;;  %2341 = vrot.lane.b32.xlu0 %v2267_v24, %s6733_s27  ;;  %v2459_v22 = vld [vmem:[#allocation2 + $0x84] sm:$0xff]  ;;  %v2460_v24 = vld [vmem:[#allocation2 + $0x94] sm:$0xff] }
 0x278   : > { %v1970_v27 = vpop.permute.xlu1 %1969  ;;  %v1972_v28 = vpop.permute.xlu0 %1971 }
 0x279   : > { %2049 = vst.msk [vmem:[#allocation3 + $0x88] sm:$0xff] %vm2031_vm10, %v1970_v27  ;;  %2050 = vst.msk [vmem:[#allocation3 + $0x90] sm:$0xff] %vm2031_vm10, %v1972_v28 }
 0x27a   : > { %2343 = vrot.lane.b32.xlu1 %v2268_v33, %s6733_s27  ;;  %2345 = vrot.lane.b32.xlu0 %v2269_v34, %s6733_s27  ;;  %v2461_v33 = vld [vmem:[#allocation2 + $0x9c] sm:$0xff]  ;;  %v2462_v34 = vld [vmem:[#allocation2 + $0xac] sm:$0xff] }
 0x27c   : > { %v1974_v36 = vpop.permute.xlu1 %1973  ;;  %v1976_v39 = vpop.permute.xlu0 %1975 }
 0x27d   : > { %2051 = vst.msk [vmem:[#allocation3 + $0x98] sm:$0xff] %vm2031_vm10, %v1974_v36  ;;  %2052 = vst.msk [vmem:[#allocation3 + $0xa0] sm:$0xff] %vm2031_vm10, %v1976_v39 }
 0x27e   : > { %2347 = vrot.lane.b32.xlu1 %v2270_v40, %s6733_s27  ;;  %2349 = vrot.lane.b32.xlu0 %v2271_v41, %s6733_s27  ;;  %v2463_v40 = vld [vmem:[#allocation2 + $0xb4] sm:$0xff]  ;;  %v2464_v41 = vld [vmem:[#allocation2 + $0xc4] sm:$0xff] }
 0x280   : > { %v1978_v43 = vpop.permute.xlu1 %1977  ;;  %v1980_v44 = vpop.permute.xlu0 %1979 }
 0x281   : > { %2053 = vst.msk [vmem:[#allocation3 + $0xa8] sm:$0xff] %vm2031_vm10, %v1978_v43  ;;  %2054 = vst.msk [vmem:[#allocation3 + $0xb0] sm:$0xff] %vm2031_vm10, %v1980_v44 }
 0x282   : > { %2351 = vrot.lane.b32.xlu1 %v2272_v46, %s6733_s27  ;;  %2353 = vrot.lane.b32.xlu0 %v2273_v47, %s6733_s27  ;;  %v2465_v46 = vld [vmem:[#allocation2 + $0xcc] sm:$0xff]  ;;  %v2466_v47 = vld [vmem:[#allocation2 + $0xdc] sm:$0xff] }
 0x284   : > { %v1982_v50 = vpop.permute.xlu1 %1981  ;;  %v1984_v23 = vpop.permute.xlu0 %1983 }
 0x285   : > { %2055 = vst.msk [vmem:[#allocation3 + $0xb8] sm:$0xff] %vm2031_vm10, %v1982_v50  ;;  %2056 = vst.msk [vmem:[#allocation3 + $0xc0] sm:$0xff] %vm2031_vm10, %v1984_v23 }
 0x286   : > { %2355 = vrot.lane.b32.xlu1 %v2274_v52, %s6733_s27  ;;  %2357 = vrot.lane.b32.xlu0 %v2275_v15, %s6733_s27  ;;  %v2467_v52 = vld [vmem:[#allocation2 + $0xe4] sm:$0xff]  ;;  %v2468_v15 = vld [vmem:[#allocation2 + $0xf4] sm:$0xff] }
 0x288   : > { %v1986_v26 = vpop.permute.xlu1 %1985  ;;  %v1988_v29 = vpop.permute.xlu0 %1987 }
 0x289   : > { %2057 = vst.msk [vmem:[#allocation3 + $0xc8] sm:$0xff] %vm2031_vm10, %v1986_v26  ;;  %2058 = vst.msk [vmem:[#allocation3 + $0xd0] sm:$0xff] %vm2031_vm10, %v1988_v29 }
 0x28a   : > { %2359 = vrot.lane.b32.xlu1 %v2276_v32, %s6733_s27  ;;  %2361 = vrot.lane.b32.xlu0 %v2277_v38, %s6733_s27  ;;  %v2469_v32 = vld [vmem:[#allocation2 + $0xfc] sm:$0xff]  ;;  %v2470_v38 = vld [vmem:[#allocation2 + $0x10c] sm:$0xff] }
 0x28c   : > { %v1990_v42 = vpop.permute.xlu1 %1989  ;;  %v1992_v45 = vpop.permute.xlu0 %1991 }
 0x28d   : > { %2059 = vst.msk [vmem:[#allocation3 + $0xd8] sm:$0xff] %vm2031_vm10, %v1990_v42  ;;  %2060 = vst.msk [vmem:[#allocation3 + $0xe0] sm:$0xff] %vm2031_vm10, %v1992_v45 }
 0x28e   : > { %2363 = vrot.lane.b32.xlu1 %v2278_v48, %s6733_s27  ;;  %2365 = vrot.lane.b32.xlu0 %v2279_v55, %s6733_s27  ;;  %v2471_v48 = vld [vmem:[#allocation2 + $0x114] sm:$0xff]  ;;  %v2472_v55 = vld [vmem:[#allocation2 + $0x124] sm:$0xff] }
 0x290   : > { %v1994_v59 = vpop.permute.xlu1 %1993  ;;  %v1996_v62 = vpop.permute.xlu0 %1995 }
 0x291   : > { %2061 = vst.msk [vmem:[#allocation3 + $0xe8] sm:$0xff] %vm2031_vm10, %v1994_v59  ;;  %2062 = vst.msk [vmem:[#allocation3 + $0xf0] sm:$0xff] %vm2031_vm10, %v1996_v62 }
 0x292   : > { %2367 = vrot.lane.b32.xlu1 %v2280_v63, %s6733_s27  ;;  %2369 = vrot.lane.b32.xlu0 %v2281_v8, %s6733_s27  ;;  %v2473_v63 = vld [vmem:[#allocation2 + $0x12c] sm:$0xff]  ;;  %v2474_v8 = vld [vmem:[#allocation2 + $0x13c] sm:$0xff] }
 0x294   : > { %v1998_v10 = vpop.permute.xlu1 %1997  ;;  %v2129_v13 = vpop.permute.xlu0 %2128 }
 0x295   : > { %2063 = vst.msk [vmem:[#allocation3 + $0xf8] sm:$0xff] %vm2031_vm10, %v1998_v10  ;;  %vm4541_vm10 = vcmask 818936  }
 0x296   : > { %2225 = vst.msk [vmem:[#allocation3] sm:$0xff] %vm2224_vm11, %v2129_v13  ;;  %2371 = vrot.lane.b32.xlu1 %v2282_v18, %s6733_s27  ;;  %2373 = vrot.lane.b32.xlu0 %v2283_v25, %s6733_s27  ;;  %v2475_v18 = vld [vmem:[#allocation2 + $0x144] sm:$0xff]  ;;  %v2476_v25 = vld [vmem:[#allocation2 + $0x154] sm:$0xff] }
 0x298   : > { %v2131_v31 = vpop.permute.xlu1 %2130  ;;  %v2133_v35 = vpop.permute.xlu0 %2132 }
 0x299   : > { %2226 = vst.msk [vmem:[#allocation3 + $0x8] sm:$0xff] %vm2224_vm11, %v2131_v31  ;;  %2227 = vst.msk [vmem:[#allocation3 + $0x10] sm:$0xff] %vm2224_vm11, %v2133_v35 }
 0x29a   : > { %2375 = vrot.lane.b32.xlu1 %v2284_v37, %s6733_s27  ;;  %2377 = vrot.lane.b32.xlu0 %v2285_v49, %s6733_s27  ;;  %v2477_v37 = vld [vmem:[#allocation2 + $0x15c] sm:$0xff]  ;;  %v2478_v49 = vld [vmem:[#allocation2 + $0x16c] sm:$0xff] }
 0x29c   : > { %v2135_v51 = vpop.permute.xlu1 %2134  ;;  %v2137_v54 = vpop.permute.xlu0 %2136 }
 0x29d   : > { %2228 = vst.msk [vmem:[#allocation3 + $0x18] sm:$0xff] %vm2224_vm11, %v2135_v51  ;;  %2229 = vst.msk [vmem:[#allocation3 + $0x20] sm:$0xff] %vm2224_vm11, %v2137_v54 }
 0x29e   : > { %2379 = vrot.lane.b32.xlu1 %v2286_v60, %s6733_s27  ;;  %2381 = vrot.lane.b32.xlu0 %v2287_v4, %s6733_s27  ;;  %v2479_v60 = vld [vmem:[#allocation2 + $0x174] sm:$0xff]  ;;  %v2480_v4 = vld [vmem:[#allocation2 + $0x184] sm:$0xff] }
 0x2a0   : > { %v2139_v9 = vpop.permute.xlu1 %2138  ;;  %v2141_v53 = vpop.permute.xlu0 %2140 }
 0x2a1   : > { %2230 = vst.msk [vmem:[#allocation3 + $0x28] sm:$0xff] %vm2224_vm11, %v2139_v9  ;;  %2231 = vst.msk [vmem:[#allocation3 + $0x30] sm:$0xff] %vm2224_vm11, %v2141_v53 }
 0x2a2   : > { %2383 = vrot.lane.b32.xlu1 %v2288_v14, %s6733_s27  ;;  %2514 = vrot.lane.b32.xlu0 %v2450_v17, %s6734_s28  ;;  %v2481_v14 = vld [vmem:[#allocation2 + $0x18c] sm:$0xff] }
 0x2a3   : > { %v2643_v17 = vld [vmem:[#allocation2 + $0x30] sm:$0xff] }
 0x2a4   : > { %v2143_v56 = vpop.permute.xlu1 %2142  ;;  %v2145_v57 = vpop.permute.xlu0 %2144 }
 0x2a5   : > { %2232 = vst.msk [vmem:[#allocation3 + $0x38] sm:$0xff] %vm2224_vm11, %v2143_v56  ;;  %2233 = vst.msk [vmem:[#allocation3 + $0x40] sm:$0xff] %vm2224_vm11, %v2145_v57 }
 0x2a6   : > { %2516 = vrot.lane.b32.xlu1 %v2451_v30, %s6734_s28  ;;  %2518 = vrot.lane.b32.xlu0 %v2452_v58, %s6734_s28  ;;  %v2644_v30 = vld [vmem:[#allocation2 + $0x38] sm:$0xff]  ;;  %v2645_v58 = vld [vmem:[#allocation2 + $0x48] sm:$0xff] }
 0x2a8   : > { %v2147_v61 = vpop.permute.xlu1 %2146  ;;  %v2149_v0 = vpop.permute.xlu0 %2148 }
 0x2a9   : > { %2234 = vst.msk [vmem:[#allocation3 + $0x48] sm:$0xff] %vm2224_vm11, %v2147_v61  ;;  %2235 = vst.msk [vmem:[#allocation3 + $0x50] sm:$0xff] %vm2224_vm11, %v2149_v0 }
 0x2aa   : > { %2520 = vrot.lane.b32.xlu1 %v2453_v1, %s6734_s28  ;;  %2522 = vrot.lane.b32.xlu0 %v2454_v2, %s6734_s28  ;;  %v2646_v1 = vld [vmem:[#allocation2 + $0x50] sm:$0xff]  ;;  %v2647_v2 = vld [vmem:[#allocation2 + $0x60] sm:$0xff] }
 0x2ac   : > { %v2151_v3 = vpop.permute.xlu1 %2150  ;;  %v2153_v5 = vpop.permute.xlu0 %2152 }
 0x2ad   : > { %2236 = vst.msk [vmem:[#allocation3 + $0x58] sm:$0xff] %vm2224_vm11, %v2151_v3  ;;  %2237 = vst.msk [vmem:[#allocation3 + $0x60] sm:$0xff] %vm2224_vm11, %v2153_v5 }
 0x2ae   : > { %2524 = vrot.lane.b32.xlu1 %v2455_v6, %s6734_s28  ;;  %2526 = vrot.lane.b32.xlu0 %v2456_v7, %s6734_s28  ;;  %v2648_v6 = vld [vmem:[#allocation2 + $0x68] sm:$0xff]  ;;  %v2649_v7 = vld [vmem:[#allocation2 + $0x78] sm:$0xff] }
 0x2b0   : > { %v2155_v11 = vpop.permute.xlu1 %2154  ;;  %v2157_v12 = vpop.permute.xlu0 %2156 }
 0x2b1   : > { %2238 = vst.msk [vmem:[#allocation3 + $0x68] sm:$0xff] %vm2224_vm11, %v2155_v11  ;;  %2239 = vst.msk [vmem:[#allocation3 + $0x70] sm:$0xff] %vm2224_vm11, %v2157_v12 }
 0x2b2   : > { %2528 = vrot.lane.b32.xlu1 %v2457_v16, %s6734_s28  ;;  %2530 = vrot.lane.b32.xlu0 %v2458_v19, %s6734_s28  ;;  %v2650_v16 = vld [vmem:[#allocation2 + $0x80] sm:$0xff]  ;;  %v2651_v19 = vld [vmem:[#allocation2 + $0x90] sm:$0xff] }
 0x2b4   : > { %v2159_v20 = vpop.permute.xlu1 %2158  ;;  %v2161_v21 = vpop.permute.xlu0 %2160 }
 0x2b5   : > { %2240 = vst.msk [vmem:[#allocation3 + $0x78] sm:$0xff] %vm2224_vm11, %v2159_v20  ;;  %2241 = vst.msk [vmem:[#allocation3 + $0x80] sm:$0xff] %vm2224_vm11, %v2161_v21 }
 0x2b6   : > { %2532 = vrot.lane.b32.xlu1 %v2459_v22, %s6734_s28  ;;  %2534 = vrot.lane.b32.xlu0 %v2460_v24, %s6734_s28  ;;  %v2652_v22 = vld [vmem:[#allocation2 + $0x98] sm:$0xff]  ;;  %v2653_v24 = vld [vmem:[#allocation2 + $0xa8] sm:$0xff] }
 0x2b8   : > { %v2163_v27 = vpop.permute.xlu1 %2162  ;;  %v2165_v28 = vpop.permute.xlu0 %2164 }
 0x2b9   : > { %2242 = vst.msk [vmem:[#allocation3 + $0x88] sm:$0xff] %vm2224_vm11, %v2163_v27  ;;  %2243 = vst.msk [vmem:[#allocation3 + $0x90] sm:$0xff] %vm2224_vm11, %v2165_v28 }
 0x2ba   : > { %2536 = vrot.lane.b32.xlu1 %v2461_v33, %s6734_s28  ;;  %2538 = vrot.lane.b32.xlu0 %v2462_v34, %s6734_s28  ;;  %v2654_v33 = vld [vmem:[#allocation2 + $0xb0] sm:$0xff]  ;;  %v2655_v34 = vld [vmem:[#allocation2 + $0xc0] sm:$0xff] }
 0x2bc   : > { %v2167_v36 = vpop.permute.xlu1 %2166  ;;  %v2169_v39 = vpop.permute.xlu0 %2168 }
 0x2bd   : > { %2244 = vst.msk [vmem:[#allocation3 + $0x98] sm:$0xff] %vm2224_vm11, %v2167_v36  ;;  %2245 = vst.msk [vmem:[#allocation3 + $0xa0] sm:$0xff] %vm2224_vm11, %v2169_v39 }
 0x2be   : > { %2540 = vrot.lane.b32.xlu1 %v2463_v40, %s6734_s28  ;;  %2542 = vrot.lane.b32.xlu0 %v2464_v41, %s6734_s28  ;;  %v2656_v40 = vld [vmem:[#allocation2 + $0xc8] sm:$0xff]  ;;  %v2657_v41 = vld [vmem:[#allocation2 + $0xd8] sm:$0xff] }
 0x2c0   : > { %v2171_v43 = vpop.permute.xlu1 %2170  ;;  %v2173_v44 = vpop.permute.xlu0 %2172 }
 0x2c1   : > { %2246 = vst.msk [vmem:[#allocation3 + $0xa8] sm:$0xff] %vm2224_vm11, %v2171_v43  ;;  %2247 = vst.msk [vmem:[#allocation3 + $0xb0] sm:$0xff] %vm2224_vm11, %v2173_v44 }
 0x2c2   : > { %2544 = vrot.lane.b32.xlu1 %v2465_v46, %s6734_s28  ;;  %2546 = vrot.lane.b32.xlu0 %v2466_v47, %s6734_s28  ;;  %v2658_v46 = vld [vmem:[#allocation2 + $0xe0] sm:$0xff]  ;;  %v2659_v47 = vld [vmem:[#allocation2 + $0xf0] sm:$0xff] }
 0x2c4   : > { %v2175_v50 = vpop.permute.xlu1 %2174  ;;  %v2177_v23 = vpop.permute.xlu0 %2176 }
 0x2c5   : > { %2248 = vst.msk [vmem:[#allocation3 + $0xb8] sm:$0xff] %vm2224_vm11, %v2175_v50  ;;  %2249 = vst.msk [vmem:[#allocation3 + $0xc0] sm:$0xff] %vm2224_vm11, %v2177_v23 }
 0x2c6   : > { %2548 = vrot.lane.b32.xlu1 %v2467_v52, %s6734_s28  ;;  %2550 = vrot.lane.b32.xlu0 %v2468_v15, %s6734_s28  ;;  %v2660_v52 = vld [vmem:[#allocation2 + $0xf8] sm:$0xff]  ;;  %v2661_v15 = vld [vmem:[#allocation2 + $0x108] sm:$0xff] }
 0x2c8   : > { %v2179_v26 = vpop.permute.xlu1 %2178  ;;  %v2181_v29 = vpop.permute.xlu0 %2180 }
 0x2c9   : > { %2250 = vst.msk [vmem:[#allocation3 + $0xc8] sm:$0xff] %vm2224_vm11, %v2179_v26  ;;  %2251 = vst.msk [vmem:[#allocation3 + $0xd0] sm:$0xff] %vm2224_vm11, %v2181_v29 }
 0x2ca   : > { %2552 = vrot.lane.b32.xlu1 %v2469_v32, %s6734_s28  ;;  %2554 = vrot.lane.b32.xlu0 %v2470_v38, %s6734_s28  ;;  %v2662_v32 = vld [vmem:[#allocation2 + $0x110] sm:$0xff]  ;;  %v2663_v38 = vld [vmem:[#allocation2 + $0x120] sm:$0xff] }
 0x2cc   : > { %v2183_v42 = vpop.permute.xlu1 %2182  ;;  %v2185_v45 = vpop.permute.xlu0 %2184 }
 0x2cd   : > { %2252 = vst.msk [vmem:[#allocation3 + $0xd8] sm:$0xff] %vm2224_vm11, %v2183_v42  ;;  %2253 = vst.msk [vmem:[#allocation3 + $0xe0] sm:$0xff] %vm2224_vm11, %v2185_v45 }
 0x2ce   : > { %2556 = vrot.lane.b32.xlu1 %v2471_v48, %s6734_s28  ;;  %2558 = vrot.lane.b32.xlu0 %v2472_v55, %s6734_s28  ;;  %v2664_v48 = vld [vmem:[#allocation2 + $0x128] sm:$0xff]  ;;  %v2665_v55 = vld [vmem:[#allocation2 + $0x138] sm:$0xff] }
 0x2d0   : > { %v2187_v59 = vpop.permute.xlu1 %2186  ;;  %v2189_v62 = vpop.permute.xlu0 %2188 }
 0x2d1   : > { %2254 = vst.msk [vmem:[#allocation3 + $0xe8] sm:$0xff] %vm2224_vm11, %v2187_v59  ;;  %2255 = vst.msk [vmem:[#allocation3 + $0xf0] sm:$0xff] %vm2224_vm11, %v2189_v62 }
 0x2d2   : > { %2560 = vrot.lane.b32.xlu1 %v2473_v63, %s6734_s28  ;;  %2562 = vrot.lane.b32.xlu0 %v2474_v8, %s6734_s28  ;;  %v2666_v63 = vld [vmem:[#allocation2 + $0x140] sm:$0xff]  ;;  %v2667_v8 = vld [vmem:[#allocation2 + $0x150] sm:$0xff] }
 0x2d4   : > { %v2191_v10 = vpop.permute.xlu1 %2190  ;;  %v2322_v13 = vpop.permute.xlu0 %2321 }
 0x2d5   : > { %2256 = vst.msk [vmem:[#allocation3 + $0xf8] sm:$0xff] %vm2224_vm11, %v2191_v10  ;;  %vm4735_vm11 = vcmask 859936  }
 0x2d6   : > { %2418 = vst.msk [vmem:[#allocation3] sm:$0xff] %vm2417_vm12, %v2322_v13  ;;  %2564 = vrot.lane.b32.xlu1 %v2475_v18, %s6734_s28  ;;  %2566 = vrot.lane.b32.xlu0 %v2476_v25, %s6734_s28  ;;  %v2668_v18 = vld [vmem:[#allocation2 + $0x158] sm:$0xff]  ;;  %v2669_v25 = vld [vmem:[#allocation2 + $0x168] sm:$0xff] }
 0x2d8   : > { %v2324_v31 = vpop.permute.xlu1 %2323  ;;  %v2326_v35 = vpop.permute.xlu0 %2325 }
 0x2d9   : > { %2419 = vst.msk [vmem:[#allocation3 + $0x8] sm:$0xff] %vm2417_vm12, %v2324_v31  ;;  %2420 = vst.msk [vmem:[#allocation3 + $0x10] sm:$0xff] %vm2417_vm12, %v2326_v35 }
 0x2da   : > { %2568 = vrot.lane.b32.xlu1 %v2477_v37, %s6734_s28  ;;  %2570 = vrot.lane.b32.xlu0 %v2478_v49, %s6734_s28  ;;  %v2670_v37 = vld [vmem:[#allocation2 + $0x170] sm:$0xff]  ;;  %v2671_v49 = vld [vmem:[#allocation2 + $0x180] sm:$0xff] }
 0x2dc   : > { %v2328_v51 = vpop.permute.xlu1 %2327  ;;  %v2330_v54 = vpop.permute.xlu0 %2329 }
 0x2dd   : > { %2421 = vst.msk [vmem:[#allocation3 + $0x18] sm:$0xff] %vm2417_vm12, %v2328_v51  ;;  %2422 = vst.msk [vmem:[#allocation3 + $0x20] sm:$0xff] %vm2417_vm12, %v2330_v54 }
 0x2de   : > { %2572 = vrot.lane.b32.xlu1 %v2479_v60, %s6734_s28  ;;  %2574 = vrot.lane.b32.xlu0 %v2480_v4, %s6734_s28  ;;  %v2672_v60 = vld [vmem:[#allocation2 + $0x188] sm:$0xff]  ;;  %v2673_v4 = vld [vmem:[#allocation2 + $0x198] sm:$0xff] }
 0x2e0   : > { %v2332_v9 = vpop.permute.xlu1 %2331  ;;  %v2334_v53 = vpop.permute.xlu0 %2333 }
 0x2e1   : > { %2423 = vst.msk [vmem:[#allocation3 + $0x28] sm:$0xff] %vm2417_vm12, %v2332_v9  ;;  %2424 = vst.msk [vmem:[#allocation3 + $0x30] sm:$0xff] %vm2417_vm12, %v2334_v53 }
 0x2e2   : > { %2576 = vrot.lane.b32.xlu1 %v2481_v14, %s6734_s28  ;;  %2707 = vrot.lane.b32.xlu0 %v2643_v17, %s6735_s29  ;;  %v2674_v14 = vld [vmem:[#allocation2 + $0x1a0] sm:$0xff]  ;;  %v2836_v17 = vld [vmem:[#allocation2 + $0x31] sm:$0xff] }
 0x2e4   : > { %v2336_v56 = vpop.permute.xlu1 %2335  ;;  %v2338_v57 = vpop.permute.xlu0 %2337 }
 0x2e5   : > { %2425 = vst.msk [vmem:[#allocation3 + $0x38] sm:$0xff] %vm2417_vm12, %v2336_v56  ;;  %2426 = vst.msk [vmem:[#allocation3 + $0x40] sm:$0xff] %vm2417_vm12, %v2338_v57 }
 0x2e6   : > { %2709 = vrot.lane.b32.xlu1 %v2644_v30, %s6735_s29  ;;  %2711 = vrot.lane.b32.xlu0 %v2645_v58, %s6735_s29  ;;  %v2837_v30 = vld [vmem:[#allocation2 + $0x39] sm:$0xff]  ;;  %v2838_v58 = vld [vmem:[#allocation2 + $0x49] sm:$0xff] }
 0x2e8   : > { %v2340_v61 = vpop.permute.xlu1 %2339  ;;  %v2342_v0 = vpop.permute.xlu0 %2341 }
 0x2e9   : > { %2427 = vst.msk [vmem:[#allocation3 + $0x48] sm:$0xff] %vm2417_vm12, %v2340_v61  ;;  %2428 = vst.msk [vmem:[#allocation3 + $0x50] sm:$0xff] %vm2417_vm12, %v2342_v0 }
 0x2ea   : > { %2713 = vrot.lane.b32.xlu1 %v2646_v1, %s6735_s29  ;;  %2715 = vrot.lane.b32.xlu0 %v2647_v2, %s6735_s29  ;;  %v2839_v1 = vld [vmem:[#allocation2 + $0x51] sm:$0xff]  ;;  %v2840_v2 = vld [vmem:[#allocation2 + $0x61] sm:$0xff] }
 0x2ec   : > { %v2344_v3 = vpop.permute.xlu1 %2343  ;;  %v2346_v5 = vpop.permute.xlu0 %2345 }
 0x2ed   : > { %2429 = vst.msk [vmem:[#allocation3 + $0x58] sm:$0xff] %vm2417_vm12, %v2344_v3  ;;  %2430 = vst.msk [vmem:[#allocation3 + $0x60] sm:$0xff] %vm2417_vm12, %v2346_v5 }
 0x2ee   : > { %2717 = vrot.lane.b32.xlu1 %v2648_v6, %s6735_s29  ;;  %2719 = vrot.lane.b32.xlu0 %v2649_v7, %s6735_s29  ;;  %v2841_v6 = vld [vmem:[#allocation2 + $0x69] sm:$0xff]  ;;  %v2842_v7 = vld [vmem:[#allocation2 + $0x79] sm:$0xff] }
 0x2f0   : > { %v2348_v11 = vpop.permute.xlu1 %2347  ;;  %v2350_v12 = vpop.permute.xlu0 %2349 }
 0x2f1   : > { %2431 = vst.msk [vmem:[#allocation3 + $0x68] sm:$0xff] %vm2417_vm12, %v2348_v11  ;;  %2432 = vst.msk [vmem:[#allocation3 + $0x70] sm:$0xff] %vm2417_vm12, %v2350_v12 }
 0x2f2   : > { %2721 = vrot.lane.b32.xlu1 %v2650_v16, %s6735_s29  ;;  %2723 = vrot.lane.b32.xlu0 %v2651_v19, %s6735_s29  ;;  %v2843_v16 = vld [vmem:[#allocation2 + $0x81] sm:$0xff]  ;;  %v2844_v19 = vld [vmem:[#allocation2 + $0x91] sm:$0xff] }
 0x2f4   : > { %v2352_v20 = vpop.permute.xlu1 %2351  ;;  %v2354_v21 = vpop.permute.xlu0 %2353 }
 0x2f5   : > { %2433 = vst.msk [vmem:[#allocation3 + $0x78] sm:$0xff] %vm2417_vm12, %v2352_v20  ;;  %2434 = vst.msk [vmem:[#allocation3 + $0x80] sm:$0xff] %vm2417_vm12, %v2354_v21 }
 0x2f6   : > { %2725 = vrot.lane.b32.xlu1 %v2652_v22, %s6735_s29  ;;  %2727 = vrot.lane.b32.xlu0 %v2653_v24, %s6735_s29  ;;  %v2845_v22 = vld [vmem:[#allocation2 + $0x99] sm:$0xff]  ;;  %v2846_v24 = vld [vmem:[#allocation2 + $0xa9] sm:$0xff] }
 0x2f8   : > { %v2356_v27 = vpop.permute.xlu1 %2355  ;;  %v2358_v28 = vpop.permute.xlu0 %2357 }
 0x2f9   : > { %2435 = vst.msk [vmem:[#allocation3 + $0x88] sm:$0xff] %vm2417_vm12, %v2356_v27  ;;  %2436 = vst.msk [vmem:[#allocation3 + $0x90] sm:$0xff] %vm2417_vm12, %v2358_v28 }
 0x2fa   : > { %2729 = vrot.lane.b32.xlu1 %v2654_v33, %s6735_s29  ;;  %2731 = vrot.lane.b32.xlu0 %v2655_v34, %s6735_s29  ;;  %v2847_v33 = vld [vmem:[#allocation2 + $0xb1] sm:$0xff]  ;;  %v2848_v34 = vld [vmem:[#allocation2 + $0xc1] sm:$0xff] }
 0x2fc   : > { %v2360_v36 = vpop.permute.xlu1 %2359  ;;  %v2362_v39 = vpop.permute.xlu0 %2361 }
 0x2fd   : > { %2437 = vst.msk [vmem:[#allocation3 + $0x98] sm:$0xff] %vm2417_vm12, %v2360_v36  ;;  %2438 = vst.msk [vmem:[#allocation3 + $0xa0] sm:$0xff] %vm2417_vm12, %v2362_v39 }
 0x2fe   : > { %2733 = vrot.lane.b32.xlu1 %v2656_v40, %s6735_s29  ;;  %2735 = vrot.lane.b32.xlu0 %v2657_v41, %s6735_s29  ;;  %v2849_v40 = vld [vmem:[#allocation2 + $0xc9] sm:$0xff]  ;;  %v2850_v41 = vld [vmem:[#allocation2 + $0xd9] sm:$0xff] }
 0x300   : > { %v2364_v43 = vpop.permute.xlu1 %2363  ;;  %v2366_v44 = vpop.permute.xlu0 %2365 }
 0x301   : > { %2439 = vst.msk [vmem:[#allocation3 + $0xa8] sm:$0xff] %vm2417_vm12, %v2364_v43  ;;  %2440 = vst.msk [vmem:[#allocation3 + $0xb0] sm:$0xff] %vm2417_vm12, %v2366_v44 }
 0x302   : > { %2737 = vrot.lane.b32.xlu1 %v2658_v46, %s6735_s29  ;;  %2739 = vrot.lane.b32.xlu0 %v2659_v47, %s6735_s29  ;;  %v2851_v46 = vld [vmem:[#allocation2 + $0xe1] sm:$0xff]  ;;  %v2852_v47 = vld [vmem:[#allocation2 + $0xf1] sm:$0xff] }
 0x304   : > { %v2368_v50 = vpop.permute.xlu1 %2367  ;;  %v2370_v23 = vpop.permute.xlu0 %2369 }
 0x305   : > { %2441 = vst.msk [vmem:[#allocation3 + $0xb8] sm:$0xff] %vm2417_vm12, %v2368_v50  ;;  %2442 = vst.msk [vmem:[#allocation3 + $0xc0] sm:$0xff] %vm2417_vm12, %v2370_v23 }
 0x306   : > { %2741 = vrot.lane.b32.xlu1 %v2660_v52, %s6735_s29  ;;  %2743 = vrot.lane.b32.xlu0 %v2661_v15, %s6735_s29  ;;  %v2853_v52 = vld [vmem:[#allocation2 + $0xf9] sm:$0xff]  ;;  %v2854_v15 = vld [vmem:[#allocation2 + $0x109] sm:$0xff] }
 0x308   : > { %v2372_v26 = vpop.permute.xlu1 %2371  ;;  %v2374_v29 = vpop.permute.xlu0 %2373 }
 0x309   : > { %2443 = vst.msk [vmem:[#allocation3 + $0xc8] sm:$0xff] %vm2417_vm12, %v2372_v26  ;;  %2444 = vst.msk [vmem:[#allocation3 + $0xd0] sm:$0xff] %vm2417_vm12, %v2374_v29 }
 0x30a   : > { %2745 = vrot.lane.b32.xlu1 %v2662_v32, %s6735_s29  ;;  %2747 = vrot.lane.b32.xlu0 %v2663_v38, %s6735_s29  ;;  %v2855_v32 = vld [vmem:[#allocation2 + $0x111] sm:$0xff]  ;;  %v2856_v38 = vld [vmem:[#allocation2 + $0x121] sm:$0xff] }
 0x30c   : > { %v2376_v42 = vpop.permute.xlu1 %2375  ;;  %v2378_v45 = vpop.permute.xlu0 %2377 }
 0x30d   : > { %2445 = vst.msk [vmem:[#allocation3 + $0xd8] sm:$0xff] %vm2417_vm12, %v2376_v42  ;;  %2446 = vst.msk [vmem:[#allocation3 + $0xe0] sm:$0xff] %vm2417_vm12, %v2378_v45 }
 0x30e   : > { %2749 = vrot.lane.b32.xlu1 %v2664_v48, %s6735_s29  ;;  %2751 = vrot.lane.b32.xlu0 %v2665_v55, %s6735_s29  ;;  %v2857_v48 = vld [vmem:[#allocation2 + $0x129] sm:$0xff]  ;;  %v2858_v55 = vld [vmem:[#allocation2 + $0x139] sm:$0xff] }
 0x310   : > { %v2380_v59 = vpop.permute.xlu1 %2379  ;;  %v2382_v62 = vpop.permute.xlu0 %2381 }
 0x311   : > { %2447 = vst.msk [vmem:[#allocation3 + $0xe8] sm:$0xff] %vm2417_vm12, %v2380_v59  ;;  %2448 = vst.msk [vmem:[#allocation3 + $0xf0] sm:$0xff] %vm2417_vm12, %v2382_v62 }
 0x312   : > { %2753 = vrot.lane.b32.xlu1 %v2666_v63, %s6735_s29  ;;  %2755 = vrot.lane.b32.xlu0 %v2667_v8, %s6735_s29  ;;  %v2859_v63 = vld [vmem:[#allocation2 + $0x141] sm:$0xff]  ;;  %v2860_v8 = vld [vmem:[#allocation2 + $0x151] sm:$0xff] }
 0x314   : > { %v2384_v10 = vpop.permute.xlu1 %2383  ;;  %v2515_v13 = vpop.permute.xlu0 %2514 }
 0x315   : > { %2449 = vst.msk [vmem:[#allocation3 + $0xf8] sm:$0xff] %vm2417_vm12, %v2384_v10  ;;  %vm4928_vm12 = vcmask 900936  }
 0x316   : > { %2611 = vst.msk [vmem:[#allocation3] sm:$0xff] %vm2610_vm13, %v2515_v13  ;;  %2757 = vrot.lane.b32.xlu1 %v2668_v18, %s6735_s29  ;;  %2759 = vrot.lane.b32.xlu0 %v2669_v25, %s6735_s29  ;;  %v2861_v18 = vld [vmem:[#allocation2 + $0x159] sm:$0xff]  ;;  %v2862_v25 = vld [vmem:[#allocation2 + $0x169] sm:$0xff] }
 0x318   : > { %v2517_v31 = vpop.permute.xlu1 %2516  ;;  %v2519_v35 = vpop.permute.xlu0 %2518 }
 0x319   : > { %2612 = vst.msk [vmem:[#allocation3 + $0x8] sm:$0xff] %vm2610_vm13, %v2517_v31  ;;  %2613 = vst.msk [vmem:[#allocation3 + $0x10] sm:$0xff] %vm2610_vm13, %v2519_v35 }
 0x31a   : > { %2761 = vrot.lane.b32.xlu1 %v2670_v37, %s6735_s29  ;;  %2763 = vrot.lane.b32.xlu0 %v2671_v49, %s6735_s29  ;;  %v2863_v37 = vld [vmem:[#allocation2 + $0x171] sm:$0xff]  ;;  %v2864_v49 = vld [vmem:[#allocation2 + $0x181] sm:$0xff] }
 0x31c   : > { %v2521_v51 = vpop.permute.xlu1 %2520  ;;  %v2523_v54 = vpop.permute.xlu0 %2522 }
 0x31d   : > { %2614 = vst.msk [vmem:[#allocation3 + $0x18] sm:$0xff] %vm2610_vm13, %v2521_v51  ;;  %2615 = vst.msk [vmem:[#allocation3 + $0x20] sm:$0xff] %vm2610_vm13, %v2523_v54 }
 0x31e   : > { %2765 = vrot.lane.b32.xlu1 %v2672_v60, %s6735_s29  ;;  %2767 = vrot.lane.b32.xlu0 %v2673_v4, %s6735_s29  ;;  %v2865_v60 = vld [vmem:[#allocation2 + $0x189] sm:$0xff]  ;;  %v2866_v4 = vld [vmem:[#allocation2 + $0x199] sm:$0xff] }
 0x320   : > { %v2525_v9 = vpop.permute.xlu1 %2524  ;;  %v2527_v53 = vpop.permute.xlu0 %2526 }
 0x321   : > { %2616 = vst.msk [vmem:[#allocation3 + $0x28] sm:$0xff] %vm2610_vm13, %v2525_v9  ;;  %2617 = vst.msk [vmem:[#allocation3 + $0x30] sm:$0xff] %vm2610_vm13, %v2527_v53 }
 0x322   : > { %2769 = vrot.lane.b32.xlu1 %v2674_v14, %s6735_s29  ;;  %2900 = vrot.lane.b32.xlu0 %v2836_v17, %s6736_s30  ;;  %v2867_v14 = vld [vmem:[#allocation2 + $0x1a1] sm:$0xff]  ;;  %v3029_v17 = vld [vmem:[#allocation2 + $0x32] sm:$0xff] }
 0x324   : > { %v2529_v56 = vpop.permute.xlu1 %2528  ;;  %v2531_v57 = vpop.permute.xlu0 %2530 }
 0x325   : > { %2618 = vst.msk [vmem:[#allocation3 + $0x38] sm:$0xff] %vm2610_vm13, %v2529_v56  ;;  %2619 = vst.msk [vmem:[#allocation3 + $0x40] sm:$0xff] %vm2610_vm13, %v2531_v57 }
 0x326   : > { %2902 = vrot.lane.b32.xlu1 %v2837_v30, %s6736_s30  ;;  %2904 = vrot.lane.b32.xlu0 %v2838_v58, %s6736_s30  ;;  %v3030_v30 = vld [vmem:[#allocation2 + $0x3a] sm:$0xff]  ;;  %v3031_v58 = vld [vmem:[#allocation2 + $0x4a] sm:$0xff] }
 0x328   : > { %v2533_v61 = vpop.permute.xlu1 %2532  ;;  %v2535_v0 = vpop.permute.xlu0 %2534 }
 0x329   : > { %2620 = vst.msk [vmem:[#allocation3 + $0x48] sm:$0xff] %vm2610_vm13, %v2533_v61  ;;  %2621 = vst.msk [vmem:[#allocation3 + $0x50] sm:$0xff] %vm2610_vm13, %v2535_v0 }
 0x32a   : > { %2906 = vrot.lane.b32.xlu1 %v2839_v1, %s6736_s30  ;;  %2908 = vrot.lane.b32.xlu0 %v2840_v2, %s6736_s30  ;;  %v3032_v1 = vld [vmem:[#allocation2 + $0x52] sm:$0xff]  ;;  %v3033_v2 = vld [vmem:[#allocation2 + $0x62] sm:$0xff] }
 0x32c   : > { %v2537_v3 = vpop.permute.xlu1 %2536  ;;  %v2539_v5 = vpop.permute.xlu0 %2538 }
 0x32d   : > { %2622 = vst.msk [vmem:[#allocation3 + $0x58] sm:$0xff] %vm2610_vm13, %v2537_v3  ;;  %2623 = vst.msk [vmem:[#allocation3 + $0x60] sm:$0xff] %vm2610_vm13, %v2539_v5 }
 0x32e   : > { %2910 = vrot.lane.b32.xlu1 %v2841_v6, %s6736_s30  ;;  %2912 = vrot.lane.b32.xlu0 %v2842_v7, %s6736_s30  ;;  %v3034_v6 = vld [vmem:[#allocation2 + $0x6a] sm:$0xff]  ;;  %v3035_v7 = vld [vmem:[#allocation2 + $0x7a] sm:$0xff] }
 0x330   : > { %v2541_v11 = vpop.permute.xlu1 %2540  ;;  %v2543_v12 = vpop.permute.xlu0 %2542 }
 0x331   : > { %2624 = vst.msk [vmem:[#allocation3 + $0x68] sm:$0xff] %vm2610_vm13, %v2541_v11  ;;  %2625 = vst.msk [vmem:[#allocation3 + $0x70] sm:$0xff] %vm2610_vm13, %v2543_v12 }
 0x332   : > { %2914 = vrot.lane.b32.xlu1 %v2843_v16, %s6736_s30  ;;  %2916 = vrot.lane.b32.xlu0 %v2844_v19, %s6736_s30  ;;  %v3036_v16 = vld [vmem:[#allocation2 + $0x82] sm:$0xff]  ;;  %v3037_v19 = vld [vmem:[#allocation2 + $0x92] sm:$0xff] }
 0x334   : > { %v2545_v20 = vpop.permute.xlu1 %2544  ;;  %v2547_v21 = vpop.permute.xlu0 %2546 }
 0x335   : > { %2626 = vst.msk [vmem:[#allocation3 + $0x78] sm:$0xff] %vm2610_vm13, %v2545_v20  ;;  %2627 = vst.msk [vmem:[#allocation3 + $0x80] sm:$0xff] %vm2610_vm13, %v2547_v21 }
 0x336   : > { %2918 = vrot.lane.b32.xlu1 %v2845_v22, %s6736_s30  ;;  %2920 = vrot.lane.b32.xlu0 %v2846_v24, %s6736_s30  ;;  %v3038_v22 = vld [vmem:[#allocation2 + $0x9a] sm:$0xff]  ;;  %v3039_v24 = vld [vmem:[#allocation2 + $0xaa] sm:$0xff] }
 0x338   : > { %v2549_v27 = vpop.permute.xlu1 %2548  ;;  %v2551_v28 = vpop.permute.xlu0 %2550 }
 0x339   : > { %2628 = vst.msk [vmem:[#allocation3 + $0x88] sm:$0xff] %vm2610_vm13, %v2549_v27  ;;  %2629 = vst.msk [vmem:[#allocation3 + $0x90] sm:$0xff] %vm2610_vm13, %v2551_v28 }
 0x33a   : > { %2922 = vrot.lane.b32.xlu1 %v2847_v33, %s6736_s30  ;;  %2924 = vrot.lane.b32.xlu0 %v2848_v34, %s6736_s30  ;;  %v3040_v33 = vld [vmem:[#allocation2 + $0xb2] sm:$0xff]  ;;  %v3041_v34 = vld [vmem:[#allocation2 + $0xc2] sm:$0xff] }
 0x33c   : > { %v2553_v36 = vpop.permute.xlu1 %2552  ;;  %v2555_v39 = vpop.permute.xlu0 %2554 }
 0x33d   : > { %2630 = vst.msk [vmem:[#allocation3 + $0x98] sm:$0xff] %vm2610_vm13, %v2553_v36  ;;  %2631 = vst.msk [vmem:[#allocation3 + $0xa0] sm:$0xff] %vm2610_vm13, %v2555_v39 }
 0x33e   : > { %2926 = vrot.lane.b32.xlu1 %v2849_v40, %s6736_s30  ;;  %2928 = vrot.lane.b32.xlu0 %v2850_v41, %s6736_s30  ;;  %v3042_v40 = vld [vmem:[#allocation2 + $0xca] sm:$0xff]  ;;  %v3043_v41 = vld [vmem:[#allocation2 + $0xda] sm:$0xff] }
 0x340   : > { %v2557_v43 = vpop.permute.xlu1 %2556  ;;  %v2559_v44 = vpop.permute.xlu0 %2558 }
 0x341   : > { %2632 = vst.msk [vmem:[#allocation3 + $0xa8] sm:$0xff] %vm2610_vm13, %v2557_v43  ;;  %2633 = vst.msk [vmem:[#allocation3 + $0xb0] sm:$0xff] %vm2610_vm13, %v2559_v44 }
 0x342   : > { %2930 = vrot.lane.b32.xlu1 %v2851_v46, %s6736_s30  ;;  %2932 = vrot.lane.b32.xlu0 %v2852_v47, %s6736_s30  ;;  %v3044_v46 = vld [vmem:[#allocation2 + $0xe2] sm:$0xff]  ;;  %v3045_v47 = vld [vmem:[#allocation2 + $0xf2] sm:$0xff] }
 0x344   : > { %v2561_v50 = vpop.permute.xlu1 %2560  ;;  %v2563_v23 = vpop.permute.xlu0 %2562 }
 0x345   : > { %2634 = vst.msk [vmem:[#allocation3 + $0xb8] sm:$0xff] %vm2610_vm13, %v2561_v50  ;;  %2635 = vst.msk [vmem:[#allocation3 + $0xc0] sm:$0xff] %vm2610_vm13, %v2563_v23 }
 0x346   : > { %2934 = vrot.lane.b32.xlu1 %v2853_v52, %s6736_s30  ;;  %2936 = vrot.lane.b32.xlu0 %v2854_v15, %s6736_s30  ;;  %v3046_v52 = vld [vmem:[#allocation2 + $0xfa] sm:$0xff]  ;;  %v3047_v15 = vld [vmem:[#allocation2 + $0x10a] sm:$0xff] }
 0x348   : > { %v2565_v26 = vpop.permute.xlu1 %2564  ;;  %v2567_v29 = vpop.permute.xlu0 %2566 }
 0x349   : > { %2636 = vst.msk [vmem:[#allocation3 + $0xc8] sm:$0xff] %vm2610_vm13, %v2565_v26  ;;  %2637 = vst.msk [vmem:[#allocation3 + $0xd0] sm:$0xff] %vm2610_vm13, %v2567_v29 }
 0x34a   : > { %2938 = vrot.lane.b32.xlu1 %v2855_v32, %s6736_s30  ;;  %2940 = vrot.lane.b32.xlu0 %v2856_v38, %s6736_s30  ;;  %v3048_v32 = vld [vmem:[#allocation2 + $0x112] sm:$0xff]  ;;  %v3049_v38 = vld [vmem:[#allocation2 + $0x122] sm:$0xff] }
 0x34c   : > { %v2569_v42 = vpop.permute.xlu1 %2568  ;;  %v2571_v45 = vpop.permute.xlu0 %2570 }
 0x34d   : > { %2638 = vst.msk [vmem:[#allocation3 + $0xd8] sm:$0xff] %vm2610_vm13, %v2569_v42  ;;  %2639 = vst.msk [vmem:[#allocation3 + $0xe0] sm:$0xff] %vm2610_vm13, %v2571_v45 }
 0x34e   : > { %2942 = vrot.lane.b32.xlu1 %v2857_v48, %s6736_s30  ;;  %2944 = vrot.lane.b32.xlu0 %v2858_v55, %s6736_s30  ;;  %v3050_v48 = vld [vmem:[#allocation2 + $0x12a] sm:$0xff]  ;;  %v3051_v55 = vld [vmem:[#allocation2 + $0x13a] sm:$0xff] }
 0x350   : > { %v2573_v59 = vpop.permute.xlu1 %2572  ;;  %v2575_v62 = vpop.permute.xlu0 %2574 }
 0x351   : > { %2640 = vst.msk [vmem:[#allocation3 + $0xe8] sm:$0xff] %vm2610_vm13, %v2573_v59  ;;  %2641 = vst.msk [vmem:[#allocation3 + $0xf0] sm:$0xff] %vm2610_vm13, %v2575_v62 }
 0x352   : > { %2946 = vrot.lane.b32.xlu1 %v2859_v63, %s6736_s30  ;;  %2948 = vrot.lane.b32.xlu0 %v2860_v8, %s6736_s30  ;;  %v3052_v63 = vld [vmem:[#allocation2 + $0x142] sm:$0xff]  ;;  %v3053_v8 = vld [vmem:[#allocation2 + $0x152] sm:$0xff] }
 0x354   : > { %v2577_v10 = vpop.permute.xlu1 %2576  ;;  %v2708_v13 = vpop.permute.xlu0 %2707 }
 0x355   : > { %2642 = vst.msk [vmem:[#allocation3 + $0xf8] sm:$0xff] %vm2610_vm13, %v2577_v10  ;;  %vm5121_vm13 = vcmask 941936  }
 0x356   : > { %2804 = vst.msk [vmem:[#allocation3] sm:$0xff] %vm2803_vm14, %v2708_v13  ;;  %2950 = vrot.lane.b32.xlu1 %v2861_v18, %s6736_s30  ;;  %2952 = vrot.lane.b32.xlu0 %v2862_v25, %s6736_s30  ;;  %v3054_v18 = vld [vmem:[#allocation2 + $0x15a] sm:$0xff]  ;;  %v3055_v25 = vld [vmem:[#allocation2 + $0x16a] sm:$0xff] }
 0x358   : > { %v2710_v31 = vpop.permute.xlu1 %2709  ;;  %v2712_v35 = vpop.permute.xlu0 %2711 }
 0x359   : > { %2805 = vst.msk [vmem:[#allocation3 + $0x8] sm:$0xff] %vm2803_vm14, %v2710_v31  ;;  %2806 = vst.msk [vmem:[#allocation3 + $0x10] sm:$0xff] %vm2803_vm14, %v2712_v35 }
 0x35a   : > { %2954 = vrot.lane.b32.xlu1 %v2863_v37, %s6736_s30  ;;  %2956 = vrot.lane.b32.xlu0 %v2864_v49, %s6736_s30  ;;  %v3056_v37 = vld [vmem:[#allocation2 + $0x172] sm:$0xff]  ;;  %v3057_v49 = vld [vmem:[#allocation2 + $0x182] sm:$0xff] }
 0x35c   : > { %v2714_v51 = vpop.permute.xlu1 %2713  ;;  %v2716_v54 = vpop.permute.xlu0 %2715 }
 0x35d   : > { %2807 = vst.msk [vmem:[#allocation3 + $0x18] sm:$0xff] %vm2803_vm14, %v2714_v51  ;;  %2808 = vst.msk [vmem:[#allocation3 + $0x20] sm:$0xff] %vm2803_vm14, %v2716_v54 }
 0x35e   : > { %2958 = vrot.lane.b32.xlu1 %v2865_v60, %s6736_s30  ;;  %2960 = vrot.lane.b32.xlu0 %v2866_v4, %s6736_s30  ;;  %v3058_v60 = vld [vmem:[#allocation2 + $0x18a] sm:$0xff]  ;;  %v3059_v4 = vld [vmem:[#allocation2 + $0x19a] sm:$0xff] }
 0x360   : > { %v2718_v9 = vpop.permute.xlu1 %2717  ;;  %v2720_v53 = vpop.permute.xlu0 %2719 }
 0x361   : > { %2809 = vst.msk [vmem:[#allocation3 + $0x28] sm:$0xff] %vm2803_vm14, %v2718_v9  ;;  %2810 = vst.msk [vmem:[#allocation3 + $0x30] sm:$0xff] %vm2803_vm14, %v2720_v53 }
 0x362   : > { %2962 = vrot.lane.b32.xlu1 %v2867_v14, %s6736_s30  ;;  %3093 = vrot.lane.b32.xlu0 %v3029_v17, %s6737_s4  ;;  %v3060_v14 = vld [vmem:[#allocation2 + $0x1a2] sm:$0xff]  ;;  %v3222_v17 = vld [vmem:[#allocation2 + $0x33] sm:$0xff] }
 0x364   : > { %v2722_v56 = vpop.permute.xlu1 %2721  ;;  %v2724_v57 = vpop.permute.xlu0 %2723 }
 0x365   : > { %2811 = vst.msk [vmem:[#allocation3 + $0x38] sm:$0xff] %vm2803_vm14, %v2722_v56  ;;  %2812 = vst.msk [vmem:[#allocation3 + $0x40] sm:$0xff] %vm2803_vm14, %v2724_v57 }
 0x366   : > { %3095 = vrot.lane.b32.xlu1 %v3030_v30, %s6737_s4  ;;  %3097 = vrot.lane.b32.xlu0 %v3031_v58, %s6737_s4  ;;  %v3223_v30 = vld [vmem:[#allocation2 + $0x3b] sm:$0xff]  ;;  %v3224_v58 = vld [vmem:[#allocation2 + $0x4b] sm:$0xff] }
 0x368   : > { %v2726_v61 = vpop.permute.xlu1 %2725  ;;  %v2728_v0 = vpop.permute.xlu0 %2727 }
 0x369   : > { %2813 = vst.msk [vmem:[#allocation3 + $0x48] sm:$0xff] %vm2803_vm14, %v2726_v61  ;;  %2814 = vst.msk [vmem:[#allocation3 + $0x50] sm:$0xff] %vm2803_vm14, %v2728_v0 }
 0x36a   : > { %3099 = vrot.lane.b32.xlu1 %v3032_v1, %s6737_s4  ;;  %3101 = vrot.lane.b32.xlu0 %v3033_v2, %s6737_s4  ;;  %v3225_v1 = vld [vmem:[#allocation2 + $0x53] sm:$0xff]  ;;  %v3226_v2 = vld [vmem:[#allocation2 + $0x63] sm:$0xff] }
 0x36c   : > { %v2730_v3 = vpop.permute.xlu1 %2729  ;;  %v2732_v5 = vpop.permute.xlu0 %2731 }
 0x36d   : > { %2815 = vst.msk [vmem:[#allocation3 + $0x58] sm:$0xff] %vm2803_vm14, %v2730_v3  ;;  %2816 = vst.msk [vmem:[#allocation3 + $0x60] sm:$0xff] %vm2803_vm14, %v2732_v5 }
 0x36e   : > { %3103 = vrot.lane.b32.xlu1 %v3034_v6, %s6737_s4  ;;  %3105 = vrot.lane.b32.xlu0 %v3035_v7, %s6737_s4  ;;  %v3227_v6 = vld [vmem:[#allocation2 + $0x6b] sm:$0xff]  ;;  %v3228_v7 = vld [vmem:[#allocation2 + $0x7b] sm:$0xff] }
 0x370   : > { %v2734_v11 = vpop.permute.xlu1 %2733  ;;  %v2736_v12 = vpop.permute.xlu0 %2735 }
 0x371   : > { %2817 = vst.msk [vmem:[#allocation3 + $0x68] sm:$0xff] %vm2803_vm14, %v2734_v11  ;;  %2818 = vst.msk [vmem:[#allocation3 + $0x70] sm:$0xff] %vm2803_vm14, %v2736_v12 }
 0x372   : > { %3107 = vrot.lane.b32.xlu1 %v3036_v16, %s6737_s4  ;;  %3109 = vrot.lane.b32.xlu0 %v3037_v19, %s6737_s4  ;;  %v3229_v16 = vld [vmem:[#allocation2 + $0x83] sm:$0xff]  ;;  %v3230_v19 = vld [vmem:[#allocation2 + $0x93] sm:$0xff] }
 0x374   : > { %v2738_v20 = vpop.permute.xlu1 %2737  ;;  %v2740_v21 = vpop.permute.xlu0 %2739 }
 0x375   : > { %2819 = vst.msk [vmem:[#allocation3 + $0x78] sm:$0xff] %vm2803_vm14, %v2738_v20  ;;  %2820 = vst.msk [vmem:[#allocation3 + $0x80] sm:$0xff] %vm2803_vm14, %v2740_v21 }
 0x376   : > { %3111 = vrot.lane.b32.xlu1 %v3038_v22, %s6737_s4  ;;  %3113 = vrot.lane.b32.xlu0 %v3039_v24, %s6737_s4  ;;  %v3231_v22 = vld [vmem:[#allocation2 + $0x9b] sm:$0xff]  ;;  %v3232_v24 = vld [vmem:[#allocation2 + $0xab] sm:$0xff] }
 0x378   : > { %v2742_v27 = vpop.permute.xlu1 %2741  ;;  %v2744_v28 = vpop.permute.xlu0 %2743 }
 0x379   : > { %2821 = vst.msk [vmem:[#allocation3 + $0x88] sm:$0xff] %vm2803_vm14, %v2742_v27  ;;  %2822 = vst.msk [vmem:[#allocation3 + $0x90] sm:$0xff] %vm2803_vm14, %v2744_v28 }
 0x37a   : > { %3115 = vrot.lane.b32.xlu1 %v3040_v33, %s6737_s4  ;;  %3117 = vrot.lane.b32.xlu0 %v3041_v34, %s6737_s4  ;;  %v3233_v33 = vld [vmem:[#allocation2 + $0xb3] sm:$0xff]  ;;  %v3234_v34 = vld [vmem:[#allocation2 + $0xc3] sm:$0xff] }
 0x37c   : > { %v2746_v36 = vpop.permute.xlu1 %2745  ;;  %v2748_v39 = vpop.permute.xlu0 %2747 }
 0x37d   : > { %2823 = vst.msk [vmem:[#allocation3 + $0x98] sm:$0xff] %vm2803_vm14, %v2746_v36  ;;  %2824 = vst.msk [vmem:[#allocation3 + $0xa0] sm:$0xff] %vm2803_vm14, %v2748_v39 }
 0x37e   : > { %3119 = vrot.lane.b32.xlu1 %v3042_v40, %s6737_s4  ;;  %3121 = vrot.lane.b32.xlu0 %v3043_v41, %s6737_s4  ;;  %v3235_v40 = vld [vmem:[#allocation2 + $0xcb] sm:$0xff]  ;;  %v3236_v41 = vld [vmem:[#allocation2 + $0xdb] sm:$0xff] }
 0x380   : > { %v2750_v43 = vpop.permute.xlu1 %2749  ;;  %v2752_v44 = vpop.permute.xlu0 %2751 }
 0x381   : > { %2825 = vst.msk [vmem:[#allocation3 + $0xa8] sm:$0xff] %vm2803_vm14, %v2750_v43  ;;  %2826 = vst.msk [vmem:[#allocation3 + $0xb0] sm:$0xff] %vm2803_vm14, %v2752_v44 }
 0x382   : > { %3123 = vrot.lane.b32.xlu1 %v3044_v46, %s6737_s4  ;;  %3125 = vrot.lane.b32.xlu0 %v3045_v47, %s6737_s4  ;;  %v3237_v46 = vld [vmem:[#allocation2 + $0xe3] sm:$0xff]  ;;  %v3238_v47 = vld [vmem:[#allocation2 + $0xf3] sm:$0xff] }
 0x384   : > { %v2754_v50 = vpop.permute.xlu1 %2753  ;;  %v2756_v23 = vpop.permute.xlu0 %2755 }
 0x385   : > { %2827 = vst.msk [vmem:[#allocation3 + $0xb8] sm:$0xff] %vm2803_vm14, %v2754_v50  ;;  %2828 = vst.msk [vmem:[#allocation3 + $0xc0] sm:$0xff] %vm2803_vm14, %v2756_v23 }
 0x386   : > { %3127 = vrot.lane.b32.xlu1 %v3046_v52, %s6737_s4  ;;  %3129 = vrot.lane.b32.xlu0 %v3047_v15, %s6737_s4  ;;  %v3239_v52 = vld [vmem:[#allocation2 + $0xfb] sm:$0xff]  ;;  %v3240_v15 = vld [vmem:[#allocation2 + $0x10b] sm:$0xff] }
 0x388   : > { %v2758_v26 = vpop.permute.xlu1 %2757  ;;  %v2760_v29 = vpop.permute.xlu0 %2759 }
 0x389   : > { %2829 = vst.msk [vmem:[#allocation3 + $0xc8] sm:$0xff] %vm2803_vm14, %v2758_v26  ;;  %2830 = vst.msk [vmem:[#allocation3 + $0xd0] sm:$0xff] %vm2803_vm14, %v2760_v29 }
 0x38a   : > { %3131 = vrot.lane.b32.xlu1 %v3048_v32, %s6737_s4  ;;  %3133 = vrot.lane.b32.xlu0 %v3049_v38, %s6737_s4  ;;  %v3241_v32 = vld [vmem:[#allocation2 + $0x113] sm:$0xff]  ;;  %v3242_v38 = vld [vmem:[#allocation2 + $0x123] sm:$0xff] }
 0x38c   : > { %v2762_v42 = vpop.permute.xlu1 %2761  ;;  %v2764_v45 = vpop.permute.xlu0 %2763 }
 0x38d   : > { %2831 = vst.msk [vmem:[#allocation3 + $0xd8] sm:$0xff] %vm2803_vm14, %v2762_v42  ;;  %2832 = vst.msk [vmem:[#allocation3 + $0xe0] sm:$0xff] %vm2803_vm14, %v2764_v45 }
 0x38e   : > { %3135 = vrot.lane.b32.xlu1 %v3050_v48, %s6737_s4  ;;  %3137 = vrot.lane.b32.xlu0 %v3051_v55, %s6737_s4  ;;  %v3243_v48 = vld [vmem:[#allocation2 + $0x12b] sm:$0xff]  ;;  %v3244_v55 = vld [vmem:[#allocation2 + $0x13b] sm:$0xff] }
 0x390   : > { %v2766_v59 = vpop.permute.xlu1 %2765  ;;  %v2768_v62 = vpop.permute.xlu0 %2767 }
 0x391   : > { %2833 = vst.msk [vmem:[#allocation3 + $0xe8] sm:$0xff] %vm2803_vm14, %v2766_v59  ;;  %2834 = vst.msk [vmem:[#allocation3 + $0xf0] sm:$0xff] %vm2803_vm14, %v2768_v62 }
 0x392   : > { %3139 = vrot.lane.b32.xlu1 %v3052_v63, %s6737_s4  ;;  %3141 = vrot.lane.b32.xlu0 %v3053_v8, %s6737_s4  ;;  %v3245_v63 = vld [vmem:[#allocation2 + $0x143] sm:$0xff]  ;;  %v3246_v8 = vld [vmem:[#allocation2 + $0x153] sm:$0xff] }
 0x394   : > { %v2770_v10 = vpop.permute.xlu1 %2769  ;;  %v2901_v13 = vpop.permute.xlu0 %2900 }
 0x395   : > { %2835 = vst.msk [vmem:[#allocation3 + $0xf8] sm:$0xff] %vm2803_vm14, %v2770_v10  ;;  %vm5314_vm14 = vcmask 982936  }
 0x396   : > { %2997 = vst.msk [vmem:[#allocation3] sm:$0xff] %vm2996_vm15, %v2901_v13  ;;  %3143 = vrot.lane.b32.xlu1 %v3054_v18, %s6737_s4  ;;  %3145 = vrot.lane.b32.xlu0 %v3055_v25, %s6737_s4  ;;  %v3247_v18 = vld [vmem:[#allocation2 + $0x15b] sm:$0xff]  ;;  %v3248_v25 = vld [vmem:[#allocation2 + $0x16b] sm:$0xff] }
 0x398   : > { %v2903_v31 = vpop.permute.xlu1 %2902  ;;  %v2905_v35 = vpop.permute.xlu0 %2904 }
 0x399   : > { %2998 = vst.msk [vmem:[#allocation3 + $0x8] sm:$0xff] %vm2996_vm15, %v2903_v31  ;;  %2999 = vst.msk [vmem:[#allocation3 + $0x10] sm:$0xff] %vm2996_vm15, %v2905_v35 }
 0x39a   : > { %3147 = vrot.lane.b32.xlu1 %v3056_v37, %s6737_s4  ;;  %3149 = vrot.lane.b32.xlu0 %v3057_v49, %s6737_s4  ;;  %v3249_v37 = vld [vmem:[#allocation2 + $0x173] sm:$0xff]  ;;  %v3250_v49 = vld [vmem:[#allocation2 + $0x183] sm:$0xff] }
 0x39c   : > { %v2907_v51 = vpop.permute.xlu1 %2906  ;;  %v2909_v54 = vpop.permute.xlu0 %2908 }
 0x39d   : > { %3000 = vst.msk [vmem:[#allocation3 + $0x18] sm:$0xff] %vm2996_vm15, %v2907_v51  ;;  %3001 = vst.msk [vmem:[#allocation3 + $0x20] sm:$0xff] %vm2996_vm15, %v2909_v54 }
 0x39e   : > { %3151 = vrot.lane.b32.xlu1 %v3058_v60, %s6737_s4  ;;  %3153 = vrot.lane.b32.xlu0 %v3059_v4, %s6737_s4  ;;  %v3251_v60 = vld [vmem:[#allocation2 + $0x18b] sm:$0xff]  ;;  %v3252_v4 = vld [vmem:[#allocation2 + $0x19b] sm:$0xff] }
 0x3a0   : > { %v2911_v9 = vpop.permute.xlu1 %2910  ;;  %v2913_v53 = vpop.permute.xlu0 %2912 }
 0x3a1   : > { %3002 = vst.msk [vmem:[#allocation3 + $0x28] sm:$0xff] %vm2996_vm15, %v2911_v9  ;;  %3003 = vst.msk [vmem:[#allocation3 + $0x30] sm:$0xff] %vm2996_vm15, %v2913_v53 }
 0x3a2   : > { %3155 = vrot.lane.b32.xlu1 %v3060_v14, %s6737_s4  ;;  %3286 = vrot.lane.b32.xlu0 %v3222_v17, %s6738_s5  ;;  %v3253_v14 = vld [vmem:[#allocation2 + $0x1a3] sm:$0xff]  ;;  %v3415_v17 = vld [vmem:[#allocation2 + $0x34] sm:$0xff] }
 0x3a4   : > { %v2915_v56 = vpop.permute.xlu1 %2914  ;;  %v2917_v57 = vpop.permute.xlu0 %2916 }
 0x3a5   : > { %3004 = vst.msk [vmem:[#allocation3 + $0x38] sm:$0xff] %vm2996_vm15, %v2915_v56  ;;  %3005 = vst.msk [vmem:[#allocation3 + $0x40] sm:$0xff] %vm2996_vm15, %v2917_v57 }
 0x3a6   : > { %3288 = vrot.lane.b32.xlu1 %v3223_v30, %s6738_s5  ;;  %3290 = vrot.lane.b32.xlu0 %v3224_v58, %s6738_s5  ;;  %v3416_v30 = vld [vmem:[#allocation2 + $0x3c] sm:$0xff]  ;;  %v3417_v58 = vld [vmem:[#allocation2 + $0x4c] sm:$0xff] }
 0x3a8   : > { %v2919_v61 = vpop.permute.xlu1 %2918  ;;  %v2921_v0 = vpop.permute.xlu0 %2920 }
 0x3a9   : > { %3006 = vst.msk [vmem:[#allocation3 + $0x48] sm:$0xff] %vm2996_vm15, %v2919_v61  ;;  %3007 = vst.msk [vmem:[#allocation3 + $0x50] sm:$0xff] %vm2996_vm15, %v2921_v0 }
 0x3aa   : > { %3292 = vrot.lane.b32.xlu1 %v3225_v1, %s6738_s5  ;;  %3294 = vrot.lane.b32.xlu0 %v3226_v2, %s6738_s5  ;;  %v3418_v1 = vld [vmem:[#allocation2 + $0x54] sm:$0xff]  ;;  %v3419_v2 = vld [vmem:[#allocation2 + $0x64] sm:$0xff] }
 0x3ac   : > { %v2923_v3 = vpop.permute.xlu1 %2922  ;;  %v2925_v5 = vpop.permute.xlu0 %2924 }
 0x3ad   : > { %3008 = vst.msk [vmem:[#allocation3 + $0x58] sm:$0xff] %vm2996_vm15, %v2923_v3  ;;  %3009 = vst.msk [vmem:[#allocation3 + $0x60] sm:$0xff] %vm2996_vm15, %v2925_v5 }
 0x3ae   : > { %3296 = vrot.lane.b32.xlu1 %v3227_v6, %s6738_s5  ;;  %3298 = vrot.lane.b32.xlu0 %v3228_v7, %s6738_s5  ;;  %v3420_v6 = vld [vmem:[#allocation2 + $0x6c] sm:$0xff]  ;;  %v3421_v7 = vld [vmem:[#allocation2 + $0x7c] sm:$0xff] }
 0x3b0   : > { %v2927_v11 = vpop.permute.xlu1 %2926  ;;  %v2929_v12 = vpop.permute.xlu0 %2928 }
 0x3b1   : > { %3010 = vst.msk [vmem:[#allocation3 + $0x68] sm:$0xff] %vm2996_vm15, %v2927_v11  ;;  %3011 = vst.msk [vmem:[#allocation3 + $0x70] sm:$0xff] %vm2996_vm15, %v2929_v12 }
 0x3b2   : > { %3300 = vrot.lane.b32.xlu1 %v3229_v16, %s6738_s5  ;;  %3302 = vrot.lane.b32.xlu0 %v3230_v19, %s6738_s5  ;;  %v3422_v16 = vld [vmem:[#allocation2 + $0x84] sm:$0xff]  ;;  %v3423_v19 = vld [vmem:[#allocation2 + $0x94] sm:$0xff] }
 0x3b4   : > { %v2931_v20 = vpop.permute.xlu1 %2930  ;;  %v2933_v21 = vpop.permute.xlu0 %2932 }
 0x3b5   : > { %3012 = vst.msk [vmem:[#allocation3 + $0x78] sm:$0xff] %vm2996_vm15, %v2931_v20  ;;  %3013 = vst.msk [vmem:[#allocation3 + $0x80] sm:$0xff] %vm2996_vm15, %v2933_v21 }
 0x3b6   : > { %3304 = vrot.lane.b32.xlu1 %v3231_v22, %s6738_s5  ;;  %3306 = vrot.lane.b32.xlu0 %v3232_v24, %s6738_s5  ;;  %v3424_v22 = vld [vmem:[#allocation2 + $0x9c] sm:$0xff]  ;;  %v3425_v24 = vld [vmem:[#allocation2 + $0xac] sm:$0xff] }
 0x3b8   : > { %v2935_v27 = vpop.permute.xlu1 %2934  ;;  %v2937_v28 = vpop.permute.xlu0 %2936 }
 0x3b9   : > { %3014 = vst.msk [vmem:[#allocation3 + $0x88] sm:$0xff] %vm2996_vm15, %v2935_v27  ;;  %3015 = vst.msk [vmem:[#allocation3 + $0x90] sm:$0xff] %vm2996_vm15, %v2937_v28 }
 0x3ba   : > { %3308 = vrot.lane.b32.xlu1 %v3233_v33, %s6738_s5  ;;  %3310 = vrot.lane.b32.xlu0 %v3234_v34, %s6738_s5  ;;  %v3426_v33 = vld [vmem:[#allocation2 + $0xb4] sm:$0xff]  ;;  %v3427_v34 = vld [vmem:[#allocation2 + $0xc4] sm:$0xff] }
 0x3bc   : > { %v2939_v36 = vpop.permute.xlu1 %2938  ;;  %v2941_v39 = vpop.permute.xlu0 %2940 }
 0x3bd   : > { %3016 = vst.msk [vmem:[#allocation3 + $0x98] sm:$0xff] %vm2996_vm15, %v2939_v36  ;;  %3017 = vst.msk [vmem:[#allocation3 + $0xa0] sm:$0xff] %vm2996_vm15, %v2941_v39 }
 0x3be   : > { %3312 = vrot.lane.b32.xlu1 %v3235_v40, %s6738_s5  ;;  %3314 = vrot.lane.b32.xlu0 %v3236_v41, %s6738_s5  ;;  %v3428_v40 = vld [vmem:[#allocation2 + $0xcc] sm:$0xff]  ;;  %v3429_v41 = vld [vmem:[#allocation2 + $0xdc] sm:$0xff] }
 0x3c0   : > { %v2943_v43 = vpop.permute.xlu1 %2942  ;;  %v2945_v44 = vpop.permute.xlu0 %2944 }
 0x3c1   : > { %3018 = vst.msk [vmem:[#allocation3 + $0xa8] sm:$0xff] %vm2996_vm15, %v2943_v43  ;;  %3019 = vst.msk [vmem:[#allocation3 + $0xb0] sm:$0xff] %vm2996_vm15, %v2945_v44 }
 0x3c2   : > { %3316 = vrot.lane.b32.xlu1 %v3237_v46, %s6738_s5  ;;  %3318 = vrot.lane.b32.xlu0 %v3238_v47, %s6738_s5  ;;  %v3430_v46 = vld [vmem:[#allocation2 + $0xe4] sm:$0xff]  ;;  %v3431_v47 = vld [vmem:[#allocation2 + $0xf4] sm:$0xff] }
 0x3c4   : > { %v2947_v50 = vpop.permute.xlu1 %2946  ;;  %v2949_v23 = vpop.permute.xlu0 %2948 }
 0x3c5   : > { %3020 = vst.msk [vmem:[#allocation3 + $0xb8] sm:$0xff] %vm2996_vm15, %v2947_v50  ;;  %3021 = vst.msk [vmem:[#allocation3 + $0xc0] sm:$0xff] %vm2996_vm15, %v2949_v23 }
 0x3c6   : > { %3320 = vrot.lane.b32.xlu1 %v3239_v52, %s6738_s5  ;;  %3322 = vrot.lane.b32.xlu0 %v3240_v15, %s6738_s5  ;;  %v3432_v52 = vld [vmem:[#allocation2 + $0xfc] sm:$0xff]  ;;  %v3433_v15 = vld [vmem:[#allocation2 + $0x10c] sm:$0xff] }
 0x3c8   : > { %v2951_v26 = vpop.permute.xlu1 %2950  ;;  %v2953_v29 = vpop.permute.xlu0 %2952 }
 0x3c9   : > { %3022 = vst.msk [vmem:[#allocation3 + $0xc8] sm:$0xff] %vm2996_vm15, %v2951_v26  ;;  %3023 = vst.msk [vmem:[#allocation3 + $0xd0] sm:$0xff] %vm2996_vm15, %v2953_v29 }
 0x3ca   : > { %3324 = vrot.lane.b32.xlu1 %v3241_v32, %s6738_s5  ;;  %3326 = vrot.lane.b32.xlu0 %v3242_v38, %s6738_s5  ;;  %v3434_v32 = vld [vmem:[#allocation2 + $0x114] sm:$0xff]  ;;  %v3435_v38 = vld [vmem:[#allocation2 + $0x124] sm:$0xff] }
 0x3cc   : > { %v2955_v42 = vpop.permute.xlu1 %2954  ;;  %v2957_v45 = vpop.permute.xlu0 %2956 }
 0x3cd   : > { %3024 = vst.msk [vmem:[#allocation3 + $0xd8] sm:$0xff] %vm2996_vm15, %v2955_v42  ;;  %3025 = vst.msk [vmem:[#allocation3 + $0xe0] sm:$0xff] %vm2996_vm15, %v2957_v45 }
 0x3ce   : > { %3328 = vrot.lane.b32.xlu1 %v3243_v48, %s6738_s5  ;;  %3330 = vrot.lane.b32.xlu0 %v3244_v55, %s6738_s5  ;;  %v3436_v48 = vld [vmem:[#allocation2 + $0x12c] sm:$0xff]  ;;  %v3437_v55 = vld [vmem:[#allocation2 + $0x13c] sm:$0xff] }
 0x3d0   : > { %v2959_v59 = vpop.permute.xlu1 %2958  ;;  %v2961_v62 = vpop.permute.xlu0 %2960 }
 0x3d1   : > { %3026 = vst.msk [vmem:[#allocation3 + $0xe8] sm:$0xff] %vm2996_vm15, %v2959_v59  ;;  %3027 = vst.msk [vmem:[#allocation3 + $0xf0] sm:$0xff] %vm2996_vm15, %v2961_v62 }
 0x3d2   : > { %3332 = vrot.lane.b32.xlu1 %v3245_v63, %s6738_s5  ;;  %3334 = vrot.lane.b32.xlu0 %v3246_v8, %s6738_s5  ;;  %v3438_v63 = vld [vmem:[#allocation2 + $0x144] sm:$0xff]  ;;  %v3439_v8 = vld [vmem:[#allocation2 + $0x154] sm:$0xff] }
 0x3d4   : > { %v2963_v10 = vpop.permute.xlu1 %2962  ;;  %v3094_v13 = vpop.permute.xlu0 %3093 }
 0x3d5   : > { %3028 = vst.msk [vmem:[#allocation3 + $0xf8] sm:$0xff] %vm2996_vm15, %v2963_v10  ;;  %vm5507_vm15 = vcmask 1023936  }
 0x3d6   : > { %3190 = vst.msk [vmem:[#allocation3] sm:$0xff] %vm3189_vm1, %v3094_v13  ;;  %3336 = vrot.lane.b32.xlu1 %v3247_v18, %s6738_s5  ;;  %3338 = vrot.lane.b32.xlu0 %v3248_v25, %s6738_s5  ;;  %v3440_v18 = vld [vmem:[#allocation2 + $0x15c] sm:$0xff]  ;;  %v3441_v25 = vld [vmem:[#allocation2 + $0x16c] sm:$0xff] }
 0x3d8   : > { %v3096_v31 = vpop.permute.xlu1 %3095  ;;  %v3098_v35 = vpop.permute.xlu0 %3097 }
 0x3d9   : > { %3191 = vst.msk [vmem:[#allocation3 + $0x8] sm:$0xff] %vm3189_vm1, %v3096_v31  ;;  %3192 = vst.msk [vmem:[#allocation3 + $0x10] sm:$0xff] %vm3189_vm1, %v3098_v35 }
 0x3da   : > { %3340 = vrot.lane.b32.xlu1 %v3249_v37, %s6738_s5  ;;  %3342 = vrot.lane.b32.xlu0 %v3250_v49, %s6738_s5  ;;  %v3442_v37 = vld [vmem:[#allocation2 + $0x174] sm:$0xff]  ;;  %v3443_v49 = vld [vmem:[#allocation2 + $0x184] sm:$0xff] }
 0x3dc   : > { %v3100_v51 = vpop.permute.xlu1 %3099  ;;  %v3102_v54 = vpop.permute.xlu0 %3101 }
 0x3dd   : > { %3193 = vst.msk [vmem:[#allocation3 + $0x18] sm:$0xff] %vm3189_vm1, %v3100_v51  ;;  %3194 = vst.msk [vmem:[#allocation3 + $0x20] sm:$0xff] %vm3189_vm1, %v3102_v54 }
 0x3de   : > { %3344 = vrot.lane.b32.xlu1 %v3251_v60, %s6738_s5  ;;  %3346 = vrot.lane.b32.xlu0 %v3252_v4, %s6738_s5  ;;  %v3444_v60 = vld [vmem:[#allocation2 + $0x18c] sm:$0xff]  ;;  %v3445_v4 = vld [vmem:[#allocation2 + $0x19c] sm:$0xff] }
 0x3e0   : > { %v3104_v9 = vpop.permute.xlu1 %3103  ;;  %v3106_v53 = vpop.permute.xlu0 %3105 }
 0x3e1   : > { %3195 = vst.msk [vmem:[#allocation3 + $0x28] sm:$0xff] %vm3189_vm1, %v3104_v9  ;;  %3196 = vst.msk [vmem:[#allocation3 + $0x30] sm:$0xff] %vm3189_vm1, %v3106_v53 }
 0x3e2   : > { %3348 = vrot.lane.b32.xlu1 %v3253_v14, %s6738_s5  ;;  %3479 = vrot.lane.b32.xlu0 %v3415_v17, %s6739_s6  ;;  %v3446_v14 = vld [vmem:[#allocation2 + $0x1a4] sm:$0xff] }
 0x3e3   : > { %v3609_v17 = vld [vmem:[#allocation2 + $0x48] sm:$0xff] }
 0x3e4   : > { %v3108_v56 = vpop.permute.xlu1 %3107  ;;  %v3110_v57 = vpop.permute.xlu0 %3109 }
 0x3e5   : > { %3197 = vst.msk [vmem:[#allocation3 + $0x38] sm:$0xff] %vm3189_vm1, %v3108_v56  ;;  %3198 = vst.msk [vmem:[#allocation3 + $0x40] sm:$0xff] %vm3189_vm1, %v3110_v57 }
 0x3e6   : > { %3481 = vrot.lane.b32.xlu1 %v3416_v30, %s6739_s6  ;;  %3483 = vrot.lane.b32.xlu0 %v3417_v58, %s6739_s6  ;;  %v3610_v30 = vld [vmem:[#allocation2 + $0x50] sm:$0xff]  ;;  %v3611_v58 = vld [vmem:[#allocation2 + $0x60] sm:$0xff] }
 0x3e8   : > { %v3112_v61 = vpop.permute.xlu1 %3111  ;;  %v3114_v0 = vpop.permute.xlu0 %3113 }
 0x3e9   : > { %3199 = vst.msk [vmem:[#allocation3 + $0x48] sm:$0xff] %vm3189_vm1, %v3112_v61  ;;  %3200 = vst.msk [vmem:[#allocation3 + $0x50] sm:$0xff] %vm3189_vm1, %v3114_v0 }
 0x3ea   : > { %3485 = vrot.lane.b32.xlu1 %v3418_v1, %s6739_s6  ;;  %3487 = vrot.lane.b32.xlu0 %v3419_v2, %s6739_s6  ;;  %v3612_v1 = vld [vmem:[#allocation2 + $0x68] sm:$0xff]  ;;  %v3613_v2 = vld [vmem:[#allocation2 + $0x78] sm:$0xff] }
 0x3ec   : > { %v3116_v3 = vpop.permute.xlu1 %3115  ;;  %v3118_v5 = vpop.permute.xlu0 %3117 }
 0x3ed   : > { %3201 = vst.msk [vmem:[#allocation3 + $0x58] sm:$0xff] %vm3189_vm1, %v3116_v3  ;;  %3202 = vst.msk [vmem:[#allocation3 + $0x60] sm:$0xff] %vm3189_vm1, %v3118_v5 }
 0x3ee   : > { %3489 = vrot.lane.b32.xlu1 %v3420_v6, %s6739_s6  ;;  %3491 = vrot.lane.b32.xlu0 %v3421_v7, %s6739_s6  ;;  %v3614_v6 = vld [vmem:[#allocation2 + $0x80] sm:$0xff]  ;;  %v3615_v7 = vld [vmem:[#allocation2 + $0x90] sm:$0xff] }
 0x3f0   : > { %v3120_v11 = vpop.permute.xlu1 %3119  ;;  %v3122_v12 = vpop.permute.xlu0 %3121 }
 0x3f1   : > { %3203 = vst.msk [vmem:[#allocation3 + $0x68] sm:$0xff] %vm3189_vm1, %v3120_v11  ;;  %3204 = vst.msk [vmem:[#allocation3 + $0x70] sm:$0xff] %vm3189_vm1, %v3122_v12 }
 0x3f2   : > { %3493 = vrot.lane.b32.xlu1 %v3422_v16, %s6739_s6  ;;  %3495 = vrot.lane.b32.xlu0 %v3423_v19, %s6739_s6  ;;  %v3616_v16 = vld [vmem:[#allocation2 + $0x98] sm:$0xff]  ;;  %v3617_v19 = vld [vmem:[#allocation2 + $0xa8] sm:$0xff] }
 0x3f4   : > { %v3124_v20 = vpop.permute.xlu1 %3123  ;;  %v3126_v21 = vpop.permute.xlu0 %3125 }
 0x3f5   : > { %3205 = vst.msk [vmem:[#allocation3 + $0x78] sm:$0xff] %vm3189_vm1, %v3124_v20  ;;  %3206 = vst.msk [vmem:[#allocation3 + $0x80] sm:$0xff] %vm3189_vm1, %v3126_v21 }
 0x3f6   : > { %3497 = vrot.lane.b32.xlu1 %v3424_v22, %s6739_s6  ;;  %3499 = vrot.lane.b32.xlu0 %v3425_v24, %s6739_s6  ;;  %v3618_v22 = vld [vmem:[#allocation2 + $0xb0] sm:$0xff]  ;;  %v3619_v24 = vld [vmem:[#allocation2 + $0xc0] sm:$0xff] }
 0x3f8   : > { %v3128_v27 = vpop.permute.xlu1 %3127  ;;  %v3130_v28 = vpop.permute.xlu0 %3129 }
 0x3f9   : > { %3207 = vst.msk [vmem:[#allocation3 + $0x88] sm:$0xff] %vm3189_vm1, %v3128_v27  ;;  %3208 = vst.msk [vmem:[#allocation3 + $0x90] sm:$0xff] %vm3189_vm1, %v3130_v28 }
 0x3fa   : > { %3501 = vrot.lane.b32.xlu1 %v3426_v33, %s6739_s6  ;;  %3503 = vrot.lane.b32.xlu0 %v3427_v34, %s6739_s6  ;;  %v3620_v33 = vld [vmem:[#allocation2 + $0xc8] sm:$0xff]  ;;  %v3621_v34 = vld [vmem:[#allocation2 + $0xd8] sm:$0xff] }
 0x3fc   : > { %v3132_v36 = vpop.permute.xlu1 %3131  ;;  %v3134_v39 = vpop.permute.xlu0 %3133 }
 0x3fd   : > { %3209 = vst.msk [vmem:[#allocation3 + $0x98] sm:$0xff] %vm3189_vm1, %v3132_v36  ;;  %3210 = vst.msk [vmem:[#allocation3 + $0xa0] sm:$0xff] %vm3189_vm1, %v3134_v39 }
 0x3fe   : > { %3505 = vrot.lane.b32.xlu1 %v3428_v40, %s6739_s6  ;;  %3507 = vrot.lane.b32.xlu0 %v3429_v41, %s6739_s6  ;;  %v3622_v40 = vld [vmem:[#allocation2 + $0xe0] sm:$0xff]  ;;  %v3623_v41 = vld [vmem:[#allocation2 + $0xf0] sm:$0xff] }
 0x400   : > { %v3136_v43 = vpop.permute.xlu1 %3135  ;;  %v3138_v44 = vpop.permute.xlu0 %3137 }
 0x401   : > { %3211 = vst.msk [vmem:[#allocation3 + $0xa8] sm:$0xff] %vm3189_vm1, %v3136_v43  ;;  %3212 = vst.msk [vmem:[#allocation3 + $0xb0] sm:$0xff] %vm3189_vm1, %v3138_v44 }
 0x402   : > { %3509 = vrot.lane.b32.xlu1 %v3430_v46, %s6739_s6  ;;  %3511 = vrot.lane.b32.xlu0 %v3431_v47, %s6739_s6  ;;  %v3624_v46 = vld [vmem:[#allocation2 + $0xf8] sm:$0xff]  ;;  %v3625_v47 = vld [vmem:[#allocation2 + $0x108] sm:$0xff] }
 0x404   : > { %v3140_v50 = vpop.permute.xlu1 %3139  ;;  %v3142_v23 = vpop.permute.xlu0 %3141 }
 0x405   : > { %3213 = vst.msk [vmem:[#allocation3 + $0xb8] sm:$0xff] %vm3189_vm1, %v3140_v50  ;;  %3214 = vst.msk [vmem:[#allocation3 + $0xc0] sm:$0xff] %vm3189_vm1, %v3142_v23 }
 0x406   : > { %3513 = vrot.lane.b32.xlu1 %v3432_v52, %s6739_s6  ;;  %3515 = vrot.lane.b32.xlu0 %v3433_v15, %s6739_s6  ;;  %v3626_v52 = vld [vmem:[#allocation2 + $0x110] sm:$0xff]  ;;  %v3627_v15 = vld [vmem:[#allocation2 + $0x120] sm:$0xff] }
 0x408   : > { %v3144_v26 = vpop.permute.xlu1 %3143  ;;  %v3146_v29 = vpop.permute.xlu0 %3145 }
 0x409   : > { %3215 = vst.msk [vmem:[#allocation3 + $0xc8] sm:$0xff] %vm3189_vm1, %v3144_v26  ;;  %3216 = vst.msk [vmem:[#allocation3 + $0xd0] sm:$0xff] %vm3189_vm1, %v3146_v29 }
 0x40a   : > { %3517 = vrot.lane.b32.xlu1 %v3434_v32, %s6739_s6  ;;  %3519 = vrot.lane.b32.xlu0 %v3435_v38, %s6739_s6  ;;  %v3628_v32 = vld [vmem:[#allocation2 + $0x128] sm:$0xff]  ;;  %v3629_v38 = vld [vmem:[#allocation2 + $0x138] sm:$0xff] }
 0x40c   : > { %v3148_v42 = vpop.permute.xlu1 %3147  ;;  %v3150_v45 = vpop.permute.xlu0 %3149 }
 0x40d   : > { %3217 = vst.msk [vmem:[#allocation3 + $0xd8] sm:$0xff] %vm3189_vm1, %v3148_v42  ;;  %3218 = vst.msk [vmem:[#allocation3 + $0xe0] sm:$0xff] %vm3189_vm1, %v3150_v45 }
 0x40e   : > { %3521 = vrot.lane.b32.xlu1 %v3436_v48, %s6739_s6  ;;  %3523 = vrot.lane.b32.xlu0 %v3437_v55, %s6739_s6  ;;  %v3630_v48 = vld [vmem:[#allocation2 + $0x140] sm:$0xff]  ;;  %v3631_v55 = vld [vmem:[#allocation2 + $0x150] sm:$0xff] }
 0x410   : > { %v3152_v59 = vpop.permute.xlu1 %3151  ;;  %v3154_v62 = vpop.permute.xlu0 %3153 }
 0x411   : > { %3219 = vst.msk [vmem:[#allocation3 + $0xe8] sm:$0xff] %vm3189_vm1, %v3152_v59  ;;  %3220 = vst.msk [vmem:[#allocation3 + $0xf0] sm:$0xff] %vm3189_vm1, %v3154_v62 }
 0x412   : > { %3525 = vrot.lane.b32.xlu1 %v3438_v63, %s6739_s6  ;;  %3527 = vrot.lane.b32.xlu0 %v3439_v8, %s6739_s6  ;;  %v3632_v63 = vld [vmem:[#allocation2 + $0x158] sm:$0xff]  ;;  %v3633_v8 = vld [vmem:[#allocation2 + $0x168] sm:$0xff] }
 0x414   : > { %v3156_v10 = vpop.permute.xlu1 %3155  ;;  %v3287_v13 = vpop.permute.xlu0 %3286 }
 0x415   : > { %3221 = vst.msk [vmem:[#allocation3 + $0xf8] sm:$0xff] %vm3189_vm1, %v3156_v10  ;;  %vm5595_vm1 = vcmask 1022976  }
 0x416   : > { %3383 = vst.msk [vmem:[#allocation3] sm:$0xff] %vm3382_vm3, %v3287_v13  ;;  %3529 = vrot.lane.b32.xlu1 %v3440_v18, %s6739_s6  ;;  %3531 = vrot.lane.b32.xlu0 %v3441_v25, %s6739_s6  ;;  %v3634_v18 = vld [vmem:[#allocation2 + $0x170] sm:$0xff]  ;;  %v3635_v25 = vld [vmem:[#allocation2 + $0x180] sm:$0xff] }
 0x418   : > { %v3289_v31 = vpop.permute.xlu1 %3288  ;;  %v3291_v35 = vpop.permute.xlu0 %3290 }
 0x419   : > { %3384 = vst.msk [vmem:[#allocation3 + $0x8] sm:$0xff] %vm3382_vm3, %v3289_v31  ;;  %3385 = vst.msk [vmem:[#allocation3 + $0x10] sm:$0xff] %vm3382_vm3, %v3291_v35 }
 0x41a   : > { %3533 = vrot.lane.b32.xlu1 %v3442_v37, %s6739_s6  ;;  %3535 = vrot.lane.b32.xlu0 %v3443_v49, %s6739_s6  ;;  %v3636_v37 = vld [vmem:[#allocation2 + $0x188] sm:$0xff]  ;;  %v3637_v49 = vld [vmem:[#allocation2 + $0x198] sm:$0xff] }
 0x41c   : > { %v3293_v51 = vpop.permute.xlu1 %3292  ;;  %v3295_v54 = vpop.permute.xlu0 %3294 }
 0x41d   : > { %3386 = vst.msk [vmem:[#allocation3 + $0x18] sm:$0xff] %vm3382_vm3, %v3293_v51  ;;  %3387 = vst.msk [vmem:[#allocation3 + $0x20] sm:$0xff] %vm3382_vm3, %v3295_v54 }
 0x41e   : > { %3537 = vrot.lane.b32.xlu1 %v3444_v60, %s6739_s6  ;;  %3539 = vrot.lane.b32.xlu0 %v3445_v4, %s6739_s6  ;;  %v3638_v60 = vld [vmem:[#allocation2 + $0x1a0] sm:$0xff]  ;;  %v3639_v4 = vld [vmem:[#allocation2 + $0x1b0] sm:$0xff] }
 0x420   : > { %v3297_v9 = vpop.permute.xlu1 %3296  ;;  %v3299_v53 = vpop.permute.xlu0 %3298 }
 0x421   : > { %3388 = vst.msk [vmem:[#allocation3 + $0x28] sm:$0xff] %vm3382_vm3, %v3297_v9  ;;  %3389 = vst.msk [vmem:[#allocation3 + $0x30] sm:$0xff] %vm3382_vm3, %v3299_v53 }
 0x422   : > { %3541 = vrot.lane.b32.xlu1 %v3446_v14, %s6739_s6  ;;  %3673 = vrot.lane.b32.xlu0 %v3609_v17, %s6740_s7  ;;  %v3640_v14 = vld [vmem:[#allocation2 + $0x1b8] sm:$0xff]  ;;  %v3802_v17 = vld [vmem:[#allocation2 + $0x49] sm:$0xff]  ;;  %s6748_s6 = smov 115  }
 0x424   : > { %v3301_v56 = vpop.permute.xlu1 %3300  ;;  %v3303_v57 = vpop.permute.xlu0 %3302 }
 0x425   : > { %3390 = vst.msk [vmem:[#allocation3 + $0x38] sm:$0xff] %vm3382_vm3, %v3301_v56  ;;  %3391 = vst.msk [vmem:[#allocation3 + $0x40] sm:$0xff] %vm3382_vm3, %v3303_v57 }
 0x426   : > { %3675 = vrot.lane.b32.xlu1 %v3610_v30, %s6740_s7  ;;  %3677 = vrot.lane.b32.xlu0 %v3611_v58, %s6740_s7  ;;  %v3803_v30 = vld [vmem:[#allocation2 + $0x51] sm:$0xff]  ;;  %v3804_v58 = vld [vmem:[#allocation2 + $0x61] sm:$0xff] }
 0x428   : > { %v3305_v61 = vpop.permute.xlu1 %3304  ;;  %v3307_v0 = vpop.permute.xlu0 %3306 }
 0x429   : > { %3392 = vst.msk [vmem:[#allocation3 + $0x48] sm:$0xff] %vm3382_vm3, %v3305_v61  ;;  %3393 = vst.msk [vmem:[#allocation3 + $0x50] sm:$0xff] %vm3382_vm3, %v3307_v0 }
 0x42a   : > { %3679 = vrot.lane.b32.xlu1 %v3612_v1, %s6740_s7  ;;  %3681 = vrot.lane.b32.xlu0 %v3613_v2, %s6740_s7  ;;  %v3805_v1 = vld [vmem:[#allocation2 + $0x69] sm:$0xff]  ;;  %v3806_v2 = vld [vmem:[#allocation2 + $0x79] sm:$0xff] }
 0x42c   : > { %v3309_v3 = vpop.permute.xlu1 %3308  ;;  %v3311_v5 = vpop.permute.xlu0 %3310 }
 0x42d   : > { %3394 = vst.msk [vmem:[#allocation3 + $0x58] sm:$0xff] %vm3382_vm3, %v3309_v3  ;;  %3395 = vst.msk [vmem:[#allocation3 + $0x60] sm:$0xff] %vm3382_vm3, %v3311_v5 }
 0x42e   : > { %3683 = vrot.lane.b32.xlu1 %v3614_v6, %s6740_s7  ;;  %3685 = vrot.lane.b32.xlu0 %v3615_v7, %s6740_s7  ;;  %v3807_v6 = vld [vmem:[#allocation2 + $0x81] sm:$0xff]  ;;  %v3808_v7 = vld [vmem:[#allocation2 + $0x91] sm:$0xff] }
 0x430   : > { %v3313_v11 = vpop.permute.xlu1 %3312  ;;  %v3315_v12 = vpop.permute.xlu0 %3314 }
 0x431   : > { %3396 = vst.msk [vmem:[#allocation3 + $0x68] sm:$0xff] %vm3382_vm3, %v3313_v11  ;;  %3397 = vst.msk [vmem:[#allocation3 + $0x70] sm:$0xff] %vm3382_vm3, %v3315_v12 }
 0x432   : > { %3687 = vrot.lane.b32.xlu1 %v3616_v16, %s6740_s7  ;;  %3689 = vrot.lane.b32.xlu0 %v3617_v19, %s6740_s7  ;;  %v3809_v16 = vld [vmem:[#allocation2 + $0x99] sm:$0xff]  ;;  %v3810_v19 = vld [vmem:[#allocation2 + $0xa9] sm:$0xff] }
 0x434   : > { %v3317_v20 = vpop.permute.xlu1 %3316  ;;  %v3319_v21 = vpop.permute.xlu0 %3318 }
 0x435   : > { %3398 = vst.msk [vmem:[#allocation3 + $0x78] sm:$0xff] %vm3382_vm3, %v3317_v20  ;;  %3399 = vst.msk [vmem:[#allocation3 + $0x80] sm:$0xff] %vm3382_vm3, %v3319_v21 }
 0x436   : > { %3691 = vrot.lane.b32.xlu1 %v3618_v22, %s6740_s7  ;;  %3693 = vrot.lane.b32.xlu0 %v3619_v24, %s6740_s7  ;;  %v3811_v22 = vld [vmem:[#allocation2 + $0xb1] sm:$0xff]  ;;  %v3812_v24 = vld [vmem:[#allocation2 + $0xc1] sm:$0xff] }
 0x438   : > { %v3321_v27 = vpop.permute.xlu1 %3320  ;;  %v3323_v28 = vpop.permute.xlu0 %3322 }
 0x439   : > { %3400 = vst.msk [vmem:[#allocation3 + $0x88] sm:$0xff] %vm3382_vm3, %v3321_v27  ;;  %3401 = vst.msk [vmem:[#allocation3 + $0x90] sm:$0xff] %vm3382_vm3, %v3323_v28 }
 0x43a   : > { %3695 = vrot.lane.b32.xlu1 %v3620_v33, %s6740_s7  ;;  %3697 = vrot.lane.b32.xlu0 %v3621_v34, %s6740_s7  ;;  %v3813_v33 = vld [vmem:[#allocation2 + $0xc9] sm:$0xff]  ;;  %v3814_v34 = vld [vmem:[#allocation2 + $0xd9] sm:$0xff] }
 0x43c   : > { %v3325_v36 = vpop.permute.xlu1 %3324  ;;  %v3327_v39 = vpop.permute.xlu0 %3326 }
 0x43d   : > { %3402 = vst.msk [vmem:[#allocation3 + $0x98] sm:$0xff] %vm3382_vm3, %v3325_v36  ;;  %3403 = vst.msk [vmem:[#allocation3 + $0xa0] sm:$0xff] %vm3382_vm3, %v3327_v39 }
 0x43e   : > { %3699 = vrot.lane.b32.xlu1 %v3622_v40, %s6740_s7  ;;  %3701 = vrot.lane.b32.xlu0 %v3623_v41, %s6740_s7  ;;  %v3815_v40 = vld [vmem:[#allocation2 + $0xe1] sm:$0xff]  ;;  %v3816_v41 = vld [vmem:[#allocation2 + $0xf1] sm:$0xff] }
 0x440   : > { %v3329_v43 = vpop.permute.xlu1 %3328  ;;  %v3331_v44 = vpop.permute.xlu0 %3330 }
 0x441   : > { %3404 = vst.msk [vmem:[#allocation3 + $0xa8] sm:$0xff] %vm3382_vm3, %v3329_v43  ;;  %3405 = vst.msk [vmem:[#allocation3 + $0xb0] sm:$0xff] %vm3382_vm3, %v3331_v44 }
 0x442   : > { %3703 = vrot.lane.b32.xlu1 %v3624_v46, %s6740_s7  ;;  %3705 = vrot.lane.b32.xlu0 %v3625_v47, %s6740_s7  ;;  %v3817_v46 = vld [vmem:[#allocation2 + $0xf9] sm:$0xff]  ;;  %v3818_v47 = vld [vmem:[#allocation2 + $0x109] sm:$0xff] }
 0x444   : > { %v3333_v50 = vpop.permute.xlu1 %3332  ;;  %v3335_v23 = vpop.permute.xlu0 %3334 }
 0x445   : > { %3406 = vst.msk [vmem:[#allocation3 + $0xb8] sm:$0xff] %vm3382_vm3, %v3333_v50  ;;  %3407 = vst.msk [vmem:[#allocation3 + $0xc0] sm:$0xff] %vm3382_vm3, %v3335_v23 }
 0x446   : > { %3707 = vrot.lane.b32.xlu1 %v3626_v52, %s6740_s7  ;;  %3709 = vrot.lane.b32.xlu0 %v3627_v15, %s6740_s7  ;;  %v3819_v52 = vld [vmem:[#allocation2 + $0x111] sm:$0xff]  ;;  %v8229_v15 = vld [vmem:[#allocation2 + $0x121] sm:$0xff] }
 0x448   : > { %v3337_v26 = vpop.permute.xlu1 %3336  ;;  %v3339_v29 = vpop.permute.xlu0 %3338 }
 0x449   : > { %3408 = vst.msk [vmem:[#allocation3 + $0xc8] sm:$0xff] %vm3382_vm3, %v3337_v26  ;;  %3409 = vst.msk [vmem:[#allocation3 + $0xd0] sm:$0xff] %vm3382_vm3, %v3339_v29 }
 0x44a   : > { %3711 = vrot.lane.b32.xlu1 %v3628_v32, %s6740_s7  ;;  %3713 = vrot.lane.b32.xlu0 %v3629_v38, %s6740_s7  ;;  %v8236_v32 = vld [vmem:[#allocation2 + $0x129] sm:$0xff]  ;;  %v3822_v38 = vld [vmem:[#allocation2 + $0x139] sm:$0xff] }
 0x44c   : > { %v3341_v42 = vpop.permute.xlu1 %3340  ;;  %v3343_v45 = vpop.permute.xlu0 %3342 }
 0x44d   : > { %3410 = vst.msk [vmem:[#allocation3 + $0xd8] sm:$0xff] %vm3382_vm3, %v3341_v42  ;;  %3411 = vst.msk [vmem:[#allocation3 + $0xe0] sm:$0xff] %vm3382_vm3, %v3343_v45 }
 0x44e   : > { %3715 = vrot.lane.b32.xlu1 %v3630_v48, %s6740_s7  ;;  %3717 = vrot.lane.b32.xlu0 %v3631_v55, %s6740_s7  ;;  %v3823_v48 = vld [vmem:[#allocation2 + $0x141] sm:$0xff]  ;;  %v3824_v55 = vld [vmem:[#allocation2 + $0x151] sm:$0xff] }
 0x450   : > { %v3345_v59 = vpop.permute.xlu1 %3344  ;;  %v3347_v62 = vpop.permute.xlu0 %3346 }
 0x451   : > { %3412 = vst.msk [vmem:[#allocation3 + $0xe8] sm:$0xff] %vm3382_vm3, %v3345_v59  ;;  %3413 = vst.msk [vmem:[#allocation3 + $0xf0] sm:$0xff] %vm3382_vm3, %v3347_v62 }
 0x452   : > { %3719 = vrot.lane.b32.xlu1 %v3632_v63, %s6740_s7  ;;  %3721 = vrot.lane.b32.xlu0 %v3633_v8, %s6740_s7  ;;  %v3825_v63 = vld [vmem:[#allocation2 + $0x159] sm:$0xff]  ;;  %v3826_v8 = vld [vmem:[#allocation2 + $0x169] sm:$0xff] }
 0x454   : > { %v3349_v10 = vpop.permute.xlu1 %3348  ;;  %v3480_v13 = vpop.permute.xlu0 %3479 }
 0x455   : > { %3414 = vst.msk [vmem:[#allocation3 + $0xf8] sm:$0xff] %vm3382_vm3, %v3349_v10 }
 0x456   : > { %3576 = vst.msk [vmem:[#allocation3] sm:$0xff] %vm3575_vm4, %v3480_v13  ;;  %3723 = vrot.lane.b32.xlu1 %v3634_v18, %s6740_s7  ;;  %3725 = vrot.lane.b32.xlu0 %v3635_v25, %s6740_s7  ;;  %v3827_v18 = vld [vmem:[#allocation2 + $0x171] sm:$0xff]  ;;  %v3828_v25 = vld [vmem:[#allocation2 + $0x181] sm:$0xff] }
 0x458   : > { %v3482_v31 = vpop.permute.xlu1 %3481  ;;  %v3484_v35 = vpop.permute.xlu0 %3483 }
 0x459   : > { %3577 = vst.msk [vmem:[#allocation3 + $0x8] sm:$0xff] %vm3575_vm4, %v3482_v31  ;;  %3578 = vst.msk [vmem:[#allocation3 + $0x10] sm:$0xff] %vm3575_vm4, %v3484_v35 }
 0x45a   : > { %3727 = vrot.lane.b32.xlu1 %v3636_v37, %s6740_s7  ;;  %3729 = vrot.lane.b32.xlu0 %v3637_v49, %s6740_s7  ;;  %v3829_v37 = vld [vmem:[#allocation2 + $0x189] sm:$0xff]  ;;  %v3830_v49 = vld [vmem:[#allocation2 + $0x199] sm:$0xff] }
 0x45c   : > { %v3486_v51 = vpop.permute.xlu1 %3485  ;;  %v3488_v54 = vpop.permute.xlu0 %3487 }
 0x45d   : > { %3579 = vst.msk [vmem:[#allocation3 + $0x18] sm:$0xff] %vm3575_vm4, %v3486_v51  ;;  %3580 = vst.msk [vmem:[#allocation3 + $0x20] sm:$0xff] %vm3575_vm4, %v3488_v54 }
 0x45e   : > { %3731 = vrot.lane.b32.xlu1 %v3638_v60, %s6740_s7  ;;  %3733 = vrot.lane.b32.xlu0 %v3639_v4, %s6740_s7  ;;  %v3831_v60 = vld [vmem:[#allocation2 + $0x1a1] sm:$0xff]  ;;  %v3832_v4 = vld [vmem:[#allocation2 + $0x1b1] sm:$0xff] }
 0x460   : > { %v3490_v9 = vpop.permute.xlu1 %3489  ;;  %v3492_v53 = vpop.permute.xlu0 %3491 }
 0x461   : > { %3581 = vst.msk [vmem:[#allocation3 + $0x28] sm:$0xff] %vm3575_vm4, %v3490_v9  ;;  %3582 = vst.msk [vmem:[#allocation3 + $0x30] sm:$0xff] %vm3575_vm4, %v3492_v53 }
 0x462   : > { %3735 = vrot.lane.b32.xlu1 %v3640_v14, %s6740_s7  ;;  %3866 = vrot.lane.b32.xlu0 %v3802_v17, %s6741_s8  ;;  %v3833_v14 = vld [vmem:[#allocation2 + $0x1b9] sm:$0xff]  ;;  %v3995_v17 = vld [vmem:[#allocation2 + $0x4a] sm:$0xff] }
 0x464   : > { %v3494_v56 = vpop.permute.xlu1 %3493  ;;  %v3496_v57 = vpop.permute.xlu0 %3495 }
 0x465   : > { %3583 = vst.msk [vmem:[#allocation3 + $0x38] sm:$0xff] %vm3575_vm4, %v3494_v56  ;;  %3584 = vst.msk [vmem:[#allocation3 + $0x40] sm:$0xff] %vm3575_vm4, %v3496_v57 }
 0x466   : > { %3868 = vrot.lane.b32.xlu1 %v3803_v30, %s6741_s8  ;;  %3870 = vrot.lane.b32.xlu0 %v3804_v58, %s6741_s8  ;;  %v3996_v30 = vld [vmem:[#allocation2 + $0x52] sm:$0xff]  ;;  %v8267_v58 = vld [vmem:[#allocation2 + $0x62] sm:$0xff] }
 0x468   : > { %v3498_v61 = vpop.permute.xlu1 %3497  ;;  %v3500_v0 = vpop.permute.xlu0 %3499 }
 0x469   : > { %3585 = vst.msk [vmem:[#allocation3 + $0x48] sm:$0xff] %vm3575_vm4, %v3498_v61  ;;  %3586 = vst.msk [vmem:[#allocation3 + $0x50] sm:$0xff] %vm3575_vm4, %v3500_v0 }
 0x46a   : > { %3872 = vrot.lane.b32.xlu1 %v3805_v1, %s6741_s8  ;;  %3874 = vrot.lane.b32.xlu0 %v3806_v2, %s6741_s8  ;;  %v8274_v1 = vld [vmem:[#allocation2 + $0x6a] sm:$0xff]  ;;  %v3999_v2 = vld [vmem:[#allocation2 + $0x7a] sm:$0xff] }
 0x46c   : > { %v3502_v3 = vpop.permute.xlu1 %3501  ;;  %v3504_v5 = vpop.permute.xlu0 %3503 }
 0x46d   : > { %3587 = vst.msk [vmem:[#allocation3 + $0x58] sm:$0xff] %vm3575_vm4, %v3502_v3  ;;  %3588 = vst.msk [vmem:[#allocation3 + $0x60] sm:$0xff] %vm3575_vm4, %v3504_v5 }
 0x46e   : > { %3876 = vrot.lane.b32.xlu1 %v3807_v6, %s6741_s8  ;;  %3878 = vrot.lane.b32.xlu0 %v3808_v7, %s6741_s8  ;;  %v4000_v6 = vld [vmem:[#allocation2 + $0x82] sm:$0xff]  ;;  %v4001_v7 = vld [vmem:[#allocation2 + $0x92] sm:$0xff] }
 0x470   : > { %v3506_v11 = vpop.permute.xlu1 %3505  ;;  %v3508_v12 = vpop.permute.xlu0 %3507 }
 0x471   : > { %3589 = vst.msk [vmem:[#allocation3 + $0x68] sm:$0xff] %vm3575_vm4, %v3506_v11  ;;  %3590 = vst.msk [vmem:[#allocation3 + $0x70] sm:$0xff] %vm3575_vm4, %v3508_v12 }
 0x472   : > { %3880 = vrot.lane.b32.xlu1 %v3809_v16, %s6741_s8  ;;  %3882 = vrot.lane.b32.xlu0 %v3810_v19, %s6741_s8  ;;  %v4002_v16 = vld [vmem:[#allocation2 + $0x9a] sm:$0xff]  ;;  %v4003_v19 = vld [vmem:[#allocation2 + $0xaa] sm:$0xff] }
 0x474   : > { %v3510_v20 = vpop.permute.xlu1 %3509  ;;  %v3512_v21 = vpop.permute.xlu0 %3511 }
 0x475   : > { %3591 = vst.msk [vmem:[#allocation3 + $0x78] sm:$0xff] %vm3575_vm4, %v3510_v20  ;;  %3592 = vst.msk [vmem:[#allocation3 + $0x80] sm:$0xff] %vm3575_vm4, %v3512_v21 }
 0x476   : > { %3884 = vrot.lane.b32.xlu1 %v3811_v22, %s6741_s8  ;;  %3886 = vrot.lane.b32.xlu0 %v3812_v24, %s6741_s8  ;;  %v4004_v22 = vld [vmem:[#allocation2 + $0xb2] sm:$0xff]  ;;  %v4005_v24 = vld [vmem:[#allocation2 + $0xc2] sm:$0xff] }
 0x478   : > { %v3514_v27 = vpop.permute.xlu1 %3513  ;;  %v3516_v28 = vpop.permute.xlu0 %3515 }
 0x479   : > { %3593 = vst.msk [vmem:[#allocation3 + $0x88] sm:$0xff] %vm3575_vm4, %v3514_v27  ;;  %3594 = vst.msk [vmem:[#allocation3 + $0x90] sm:$0xff] %vm3575_vm4, %v3516_v28 }
 0x47a   : > { %3888 = vrot.lane.b32.xlu1 %v3813_v33, %s6741_s8  ;;  %3890 = vrot.lane.b32.xlu0 %v3814_v34, %s6741_s8  ;;  %v4006_v33 = vld [vmem:[#allocation2 + $0xca] sm:$0xff]  ;;  %v4007_v34 = vld [vmem:[#allocation2 + $0xda] sm:$0xff] }
 0x47c   : > { %v3518_v36 = vpop.permute.xlu1 %3517  ;;  %v3520_v39 = vpop.permute.xlu0 %3519 }
 0x47d   : > { %3595 = vst.msk [vmem:[#allocation3 + $0x98] sm:$0xff] %vm3575_vm4, %v3518_v36  ;;  %3596 = vst.msk [vmem:[#allocation3 + $0xa0] sm:$0xff] %vm3575_vm4, %v3520_v39 }
 0x47e   : > { %3892 = vrot.lane.b32.xlu1 %v3815_v40, %s6741_s8  ;;  %3894 = vrot.lane.b32.xlu0 %v3816_v41, %s6741_s8  ;;  %v4008_v40 = vld [vmem:[#allocation2 + $0xe2] sm:$0xff]  ;;  %v4009_v41 = vld [vmem:[#allocation2 + $0xf2] sm:$0xff] }
 0x480   : > { %v3522_v43 = vpop.permute.xlu1 %3521  ;;  %v3524_v44 = vpop.permute.xlu0 %3523 }
 0x481   : > { %3597 = vst.msk [vmem:[#allocation3 + $0xa8] sm:$0xff] %vm3575_vm4, %v3522_v43  ;;  %3598 = vst.msk [vmem:[#allocation3 + $0xb0] sm:$0xff] %vm3575_vm4, %v3524_v44 }
 0x482   : > { %3896 = vrot.lane.b32.xlu1 %v3817_v46, %s6741_s8  ;;  %3898 = vrot.lane.b32.xlu0 %v3818_v47, %s6741_s8  ;;  %v4010_v46 = vld [vmem:[#allocation2 + $0xfa] sm:$0xff]  ;;  %v4011_v47 = vld [vmem:[#allocation2 + $0x10a] sm:$0xff] }
 0x484   : > { %v3526_v50 = vpop.permute.xlu1 %3525  ;;  %v3528_v23 = vpop.permute.xlu0 %3527 }
 0x485   : > { %3599 = vst.msk [vmem:[#allocation3 + $0xb8] sm:$0xff] %vm3575_vm4, %v3526_v50  ;;  %3600 = vst.msk [vmem:[#allocation3 + $0xc0] sm:$0xff] %vm3575_vm4, %v3528_v23 }
 0x486   : > { %3900 = vrot.lane.b32.xlu1 %v3819_v52, %s6741_s8  ;;  %3902 = vrot.lane.b32.xlu0 %v8229_v15, %s6741_s8  ;;  %v4012_v52 = vld [vmem:[#allocation2 + $0x112] sm:$0xff] }
 0x488   : > { %v3530_v26 = vpop.permute.xlu1 %3529  ;;  %v3532_v29 = vpop.permute.xlu0 %3531 }
 0x489   : > { %3601 = vst.msk [vmem:[#allocation3 + $0xc8] sm:$0xff] %vm3575_vm4, %v3530_v26  ;;  %3602 = vst.msk [vmem:[#allocation3 + $0xd0] sm:$0xff] %vm3575_vm4, %v3532_v29  ;;  %v8305_v26 = vld [vmem:[#allocation2 + $0x122] sm:$0xff] }
 0x48a   : > { %3904 = vrot.lane.b32.xlu1 %v8236_v32, %s6741_s8  ;;  %3906 = vrot.lane.b32.xlu0 %v3822_v38, %s6741_s8 }
 0x48c   : > { %v3534_v42 = vpop.permute.xlu1 %3533  ;;  %v3536_v45 = vpop.permute.xlu0 %3535 }
 0x48d   : > { %3603 = vst.msk [vmem:[#allocation3 + $0xd8] sm:$0xff] %vm3575_vm4, %v3534_v42  ;;  %3604 = vst.msk [vmem:[#allocation3 + $0xe0] sm:$0xff] %vm3575_vm4, %v3536_v45  ;;  %v8312_v42 = vld [vmem:[#allocation2 + $0x12a] sm:$0xff]  ;;  %v8314_v45 = vld [vmem:[#allocation2 + $0x13a] sm:$0xff] }
 0x48e   : > { %3908 = vrot.lane.b32.xlu1 %v3823_v48, %s6741_s8  ;;  %3910 = vrot.lane.b32.xlu0 %v3824_v55, %s6741_s8 }
 0x490   : > { %v3538_v59 = vpop.permute.xlu1 %3537  ;;  %v3540_v62 = vpop.permute.xlu0 %3539 }
 0x491   : > { %3605 = vst.msk [vmem:[#allocation3 + $0xe8] sm:$0xff] %vm3575_vm4, %v3538_v59  ;;  %3606 = vst.msk [vmem:[#allocation3 + $0xf0] sm:$0xff] %vm3575_vm4, %v3540_v62  ;;  %v8322_v59 = vld [vmem:[#allocation2 + $0x142] sm:$0xff]  ;;  %v4017_v62 = vld [vmem:[#allocation2 + $0x152] sm:$0xff] }
 0x492   : > { %3912 = vrot.lane.b32.xlu1 %v3825_v63, %s6741_s8  ;;  %3914 = vrot.lane.b32.xlu0 %v3826_v8, %s6741_s8 }
 0x494   : > { %v3542_v10 = vpop.permute.xlu1 %3541  ;;  %v3674_v13 = vpop.permute.xlu0 %3673 }
 0x495   : > { %3607 = vst.msk [vmem:[#allocation3 + $0xf8] sm:$0xff] %vm3575_vm4, %v3542_v10  ;;  %v4018_v10 = vld [vmem:[#allocation2 + $0x15a] sm:$0xff] }
 0x496   : > { %3770 = vst.msk [vmem:[#allocation3] sm:$0xff] %vm3769_vm5, %v3674_v13  ;;  %3916 = vrot.lane.b32.xlu1 %v3827_v18, %s6741_s8  ;;  %3918 = vrot.lane.b32.xlu0 %v3828_v25, %s6741_s8  ;;  %v4019_v13 = vld [vmem:[#allocation2 + $0x16a] sm:$0xff] }
 0x498   : > { %v3676_v31 = vpop.permute.xlu1 %3675  ;;  %v3678_v35 = vpop.permute.xlu0 %3677 }
 0x499   : > { %3771 = vst.msk [vmem:[#allocation3 + $0x8] sm:$0xff] %vm3769_vm5, %v3676_v31  ;;  %3772 = vst.msk [vmem:[#allocation3 + $0x10] sm:$0xff] %vm3769_vm5, %v3678_v35  ;;  %v4020_v31 = vld [vmem:[#allocation2 + $0x172] sm:$0xff]  ;;  %v4021_v35 = vld [vmem:[#allocation2 + $0x182] sm:$0xff] }
 0x49a   : > { %3920 = vrot.lane.b32.xlu1 %v3829_v37, %s6741_s8  ;;  %3922 = vrot.lane.b32.xlu0 %v3830_v49, %s6741_s8 }
 0x49c   : > { %v3680_v51 = vpop.permute.xlu1 %3679  ;;  %v3682_v54 = vpop.permute.xlu0 %3681 }
 0x49d   : > { %3773 = vst.msk [vmem:[#allocation3 + $0x18] sm:$0xff] %vm3769_vm5, %v3680_v51  ;;  %3774 = vst.msk [vmem:[#allocation3 + $0x20] sm:$0xff] %vm3769_vm5, %v3682_v54  ;;  %v4022_v51 = vld [vmem:[#allocation2 + $0x18a] sm:$0xff]  ;;  %v4023_v54 = vld [vmem:[#allocation2 + $0x19a] sm:$0xff] }
 0x49e   : > { %3924 = vrot.lane.b32.xlu1 %v3831_v60, %s6741_s8  ;;  %3926 = vrot.lane.b32.xlu0 %v3832_v4, %s6741_s8 }
 0x4a0   : > { %v3684_v9 = vpop.permute.xlu1 %3683  ;;  %v3686_v53 = vpop.permute.xlu0 %3685 }
 0x4a1   : > { %3775 = vst.msk [vmem:[#allocation3 + $0x28] sm:$0xff] %vm3769_vm5, %v3684_v9  ;;  %3776 = vst.msk [vmem:[#allocation3 + $0x30] sm:$0xff] %vm3769_vm5, %v3686_v53  ;;  %v4024_v9 = vld [vmem:[#allocation2 + $0x1a2] sm:$0xff]  ;;  %v4025_v53 = vld [vmem:[#allocation2 + $0x1b2] sm:$0xff] }
 0x4a2   : > { %3928 = vrot.lane.b32.xlu1 %v3833_v14, %s6741_s8  ;;  %4059 = vrot.lane.b32.xlu0 %v3995_v17, %s6742_s9 }
 0x4a4   : > { %v3688_v56 = vpop.permute.xlu1 %3687  ;;  %v3690_v57 = vpop.permute.xlu0 %3689 }
 0x4a5   : > { %3777 = vst.msk [vmem:[#allocation3 + $0x38] sm:$0xff] %vm3769_vm5, %v3688_v56  ;;  %3778 = vst.msk [vmem:[#allocation3 + $0x40] sm:$0xff] %vm3769_vm5, %v3690_v57  ;;  %v4026_v56 = vld [vmem:[#allocation2 + $0x1ba] sm:$0xff]  ;;  %v4188_v57 = vld [vmem:[#allocation2 + $0x4b] sm:$0xff] }
 0x4a6   : > { %4061 = vrot.lane.b32.xlu1 %v3996_v30, %s6742_s9  ;;  %4063 = vrot.lane.b32.xlu0 %v8267_v58, %s6742_s9 }
 0x4a8   : > { %v3692_v61 = vpop.permute.xlu1 %3691  ;;  %v3694_v0 = vpop.permute.xlu0 %3693 }
 0x4a9   : > { %3779 = vst.msk [vmem:[#allocation3 + $0x48] sm:$0xff] %vm3769_vm5, %v3692_v61  ;;  %3780 = vst.msk [vmem:[#allocation3 + $0x50] sm:$0xff] %vm3769_vm5, %v3694_v0  ;;  %v4189_v0 = vld [vmem:[#allocation2 + $0x53] sm:$0xff] }
 0x4aa   : > { %4065 = vrot.lane.b32.xlu1 %v8274_v1, %s6742_s9  ;;  %4067 = vrot.lane.b32.xlu0 %v3999_v2, %s6742_s9  ;;  %v8349_v2 = vld [vmem:[#allocation2 + $0x63] sm:$0xff] }
 0x4ac   : > { %v3696_v3 = vpop.permute.xlu1 %3695  ;;  %v3698_v5 = vpop.permute.xlu0 %3697 }
 0x4ad   : > { %3781 = vst.msk [vmem:[#allocation3 + $0x58] sm:$0xff] %vm3769_vm5, %v3696_v3  ;;  %3782 = vst.msk [vmem:[#allocation3 + $0x60] sm:$0xff] %vm3769_vm5, %v3698_v5 }
 0x4ae   : > { %4069 = vrot.lane.b32.xlu1 %v4000_v6, %s6742_s9  ;;  %4071 = vrot.lane.b32.xlu0 %v4001_v7, %s6742_s9  ;;  %v8356_v6 = vld [vmem:[#allocation2 + $0x6b] sm:$0xff]  ;;  %v8358_v7 = vld [vmem:[#allocation2 + $0x7b] sm:$0xff] }
 0x4b0   : > { %v3700_v11 = vpop.permute.xlu1 %3699  ;;  %v3702_v12 = vpop.permute.xlu0 %3701 }
 0x4b1   : > { %3783 = vst.msk [vmem:[#allocation3 + $0x68] sm:$0xff] %vm3769_vm5, %v3700_v11  ;;  %3784 = vst.msk [vmem:[#allocation3 + $0x70] sm:$0xff] %vm3769_vm5, %v3702_v12 }
 0x4b2   : > { %4073 = vrot.lane.b32.xlu1 %v4002_v16, %s6742_s9  ;;  %4075 = vrot.lane.b32.xlu0 %v4003_v19, %s6742_s9  ;;  %v8366_v16 = vld [vmem:[#allocation2 + $0x83] sm:$0xff]  ;;  %v8368_v19 = vld [vmem:[#allocation2 + $0x93] sm:$0xff] }
 0x4b4   : > { %v3704_v20 = vpop.permute.xlu1 %3703  ;;  %v3706_v21 = vpop.permute.xlu0 %3705 }
 0x4b5   : > { %3785 = vst.msk [vmem:[#allocation3 + $0x78] sm:$0xff] %vm3769_vm5, %v3704_v20  ;;  %3786 = vst.msk [vmem:[#allocation3 + $0x80] sm:$0xff] %vm3769_vm5, %v3706_v21 }
 0x4b6   : > { %4077 = vrot.lane.b32.xlu1 %v4004_v22, %s6742_s9  ;;  %4079 = vrot.lane.b32.xlu0 %v4005_v24, %s6742_s9  ;;  %v8376_v22 = vld [vmem:[#allocation2 + $0x9b] sm:$0xff]  ;;  %v4196_v24 = vld [vmem:[#allocation2 + $0xab] sm:$0xff] }
 0x4b8   : > { %v3708_v27 = vpop.permute.xlu1 %3707  ;;  %v3710_v28 = vpop.permute.xlu0 %3709 }
 0x4b9   : > { %3787 = vst.msk [vmem:[#allocation3 + $0x88] sm:$0xff] %vm3769_vm5, %v3708_v27  ;;  %3788 = vst.msk [vmem:[#allocation3 + $0x90] sm:$0xff] %vm3769_vm5, %v3710_v28 }
 0x4ba   : > { %4081 = vrot.lane.b32.xlu1 %v4006_v33, %s6742_s9  ;;  %4083 = vrot.lane.b32.xlu0 %v4007_v34, %s6742_s9  ;;  %v4197_v33 = vld [vmem:[#allocation2 + $0xb3] sm:$0xff]  ;;  %v4198_v34 = vld [vmem:[#allocation2 + $0xc3] sm:$0xff] }
 0x4bc   : > { %v3712_v36 = vpop.permute.xlu1 %3711  ;;  %v3714_v39 = vpop.permute.xlu0 %3713 }
 0x4bd   : > { %3789 = vst.msk [vmem:[#allocation3 + $0x98] sm:$0xff] %vm3769_vm5, %v3712_v36  ;;  %3790 = vst.msk [vmem:[#allocation3 + $0xa0] sm:$0xff] %vm3769_vm5, %v3714_v39 }
 0x4be   : > { %4085 = vrot.lane.b32.xlu1 %v4008_v40, %s6742_s9  ;;  %4087 = vrot.lane.b32.xlu0 %v4009_v41, %s6742_s9  ;;  %v4199_v40 = vld [vmem:[#allocation2 + $0xcb] sm:$0xff]  ;;  %v4200_v41 = vld [vmem:[#allocation2 + $0xdb] sm:$0xff] }
 0x4c0   : > { %v3716_v43 = vpop.permute.xlu1 %3715  ;;  %v3718_v44 = vpop.permute.xlu0 %3717 }
 0x4c1   : > { %3791 = vst.msk [vmem:[#allocation3 + $0xa8] sm:$0xff] %vm3769_vm5, %v3716_v43  ;;  %3792 = vst.msk [vmem:[#allocation3 + $0xb0] sm:$0xff] %vm3769_vm5, %v3718_v44 }
 0x4c2   : > { %4089 = vrot.lane.b32.xlu1 %v4010_v46, %s6742_s9  ;;  %4091 = vrot.lane.b32.xlu0 %v4011_v47, %s6742_s9  ;;  %v4201_v46 = vld [vmem:[#allocation2 + $0xe3] sm:$0xff]  ;;  %v4202_v47 = vld [vmem:[#allocation2 + $0xf3] sm:$0xff] }
 0x4c4   : > { %v3720_v50 = vpop.permute.xlu1 %3719  ;;  %v3722_v23 = vpop.permute.xlu0 %3721 }
 0x4c5   : > { %3793 = vst.msk [vmem:[#allocation3 + $0xb8] sm:$0xff] %vm3769_vm5, %v3720_v50  ;;  %3794 = vst.msk [vmem:[#allocation3 + $0xc0] sm:$0xff] %vm3769_vm5, %v3722_v23 }
 0x4c6   : > { %4093 = vrot.lane.b32.xlu1 %v4012_v52, %s6742_s9  ;;  %4095 = vrot.lane.b32.xlu0 %v8305_v26, %s6742_s9  ;;  %v4203_v52 = vld [vmem:[#allocation2 + $0xfb] sm:$0xff] }
 0x4c8   : > { %v3724_v29 = vpop.permute.xlu1 %3723  ;;  %v3726_v38 = vpop.permute.xlu0 %3725 }
 0x4c9   : > { %3795 = vst.msk [vmem:[#allocation3 + $0xc8] sm:$0xff] %vm3769_vm5, %v3724_v29  ;;  %3796 = vst.msk [vmem:[#allocation3 + $0xd0] sm:$0xff] %vm3769_vm5, %v3726_v38  ;;  %v4204_v29 = vld [vmem:[#allocation2 + $0x10b] sm:$0xff] }
 0x4ca   : > { %4097 = vrot.lane.b32.xlu1 %v8312_v42, %s6742_s9  ;;  %4099 = vrot.lane.b32.xlu0 %v8314_v45, %s6742_s9 }
 0x4cc   : > { %v3728_v48 = vpop.permute.xlu1 %3727  ;;  %v3730_v55 = vpop.permute.xlu0 %3729 }
 0x4cd   : > { %3797 = vst.msk [vmem:[#allocation3 + $0xd8] sm:$0xff] %vm3769_vm5, %v3728_v48  ;;  %3798 = vst.msk [vmem:[#allocation3 + $0xe0] sm:$0xff] %vm3769_vm5, %v3730_v55  ;;  %v4205_v55 = vld [vmem:[#allocation2 + $0x113] sm:$0xff] }
 0x4ce   : > { %4101 = vrot.lane.b32.xlu1 %v8322_v59, %s6742_s9  ;;  %4103 = vrot.lane.b32.xlu0 %v4017_v62, %s6742_s9  ;;  %v8399_v62 = vld [vmem:[#allocation2 + $0x123] sm:$0xff] }
 0x4d0   : > { %v3732_v63 = vpop.permute.xlu1 %3731  ;;  %v3734_v8 = vpop.permute.xlu0 %3733 }
 0x4d1   : > { %3799 = vst.msk [vmem:[#allocation3 + $0xe8] sm:$0xff] %vm3769_vm5, %v3732_v63  ;;  %3800 = vst.msk [vmem:[#allocation3 + $0xf0] sm:$0xff] %vm3769_vm5, %v3734_v8 }
 0x4d2   : > { %4105 = vrot.lane.b32.xlu1 %v4018_v10, %s6742_s9  ;;  %4107 = vrot.lane.b32.xlu0 %v4019_v13, %s6742_s9  ;;  %v8406_v10 = vld [vmem:[#allocation2 + $0x12b] sm:$0xff]  ;;  %v8408_v13 = vld [vmem:[#allocation2 + $0x13b] sm:$0xff] }
 0x4d4   : > { %v3736_v18 = vpop.permute.xlu1 %3735  ;;  %v3867_v25 = vpop.permute.xlu0 %3866 }
 0x4d5   : > { %3801 = vst.msk [vmem:[#allocation3 + $0xf8] sm:$0xff] %vm3769_vm5, %v3736_v18 }
 0x4d6   : > { %3963 = vst.msk [vmem:[#allocation3] sm:$0xff] %vm3962_vm6, %v3867_v25  ;;  %4109 = vrot.lane.b32.xlu1 %v4020_v31, %s6742_s9  ;;  %4111 = vrot.lane.b32.xlu0 %v4021_v35, %s6742_s9  ;;  %v8416_v31 = vld [vmem:[#allocation2 + $0x143] sm:$0xff]  ;;  %v8418_v35 = vld [vmem:[#allocation2 + $0x153] sm:$0xff] }
 0x4d8   : > { %v3869_v37 = vpop.permute.xlu1 %3868  ;;  %v3871_v49 = vpop.permute.xlu0 %3870 }
 0x4d9   : > { %3964 = vst.msk [vmem:[#allocation3 + $0x8] sm:$0xff] %vm3962_vm6, %v3869_v37  ;;  %3965 = vst.msk [vmem:[#allocation3 + $0x10] sm:$0xff] %vm3962_vm6, %v3871_v49 }
 0x4da   : > { %4113 = vrot.lane.b32.xlu1 %v4022_v51, %s6742_s9  ;;  %4115 = vrot.lane.b32.xlu0 %v4023_v54, %s6742_s9  ;;  %v8426_v51 = vld [vmem:[#allocation2 + $0x15b] sm:$0xff]  ;;  %v8428_v54 = vld [vmem:[#allocation2 + $0x16b] sm:$0xff] }
 0x4dc   : > { %v3873_v60 = vpop.permute.xlu1 %3872  ;;  %v3875_v4 = vpop.permute.xlu0 %3874 }
 0x4dd   : > { %3966 = vst.msk [vmem:[#allocation3 + $0x18] sm:$0xff] %vm3962_vm6, %v3873_v60  ;;  %3967 = vst.msk [vmem:[#allocation3 + $0x20] sm:$0xff] %vm3962_vm6, %v3875_v4 }
 0x4de   : > { %4117 = vrot.lane.b32.xlu1 %v4024_v9, %s6742_s9  ;;  %4119 = vrot.lane.b32.xlu0 %v4025_v53, %s6742_s9  ;;  %v8436_v9 = vld [vmem:[#allocation2 + $0x173] sm:$0xff]  ;;  %v4214_v53 = vld [vmem:[#allocation2 + $0x183] sm:$0xff] }
 0x4e0   : > { %v3877_v14 = vpop.permute.xlu1 %3876  ;;  %v3879_v17 = vpop.permute.xlu0 %3878 }
 0x4e1   : > { %3968 = vst.msk [vmem:[#allocation3 + $0x28] sm:$0xff] %vm3962_vm6, %v3877_v14  ;;  %3969 = vst.msk [vmem:[#allocation3 + $0x30] sm:$0xff] %vm3962_vm6, %v3879_v17 }
 0x4e2   : > { %4121 = vrot.lane.b32.xlu1 %v4026_v56, %s6742_s9  ;;  %4252 = vrot.lane.b32.xlu0 %v4188_v57, %s6743_s10  ;;  %v4215_v56 = vld [vmem:[#allocation2 + $0x18b] sm:$0xff]  ;;  %v4216_v57 = vld [vmem:[#allocation2 + $0x19b] sm:$0xff] }
 0x4e4   : > { %v3881_v30 = vpop.permute.xlu1 %3880  ;;  %v3883_v61 = vpop.permute.xlu0 %3882 }
 0x4e5   : > { %3970 = vst.msk [vmem:[#allocation3 + $0x38] sm:$0xff] %vm3962_vm6, %v3881_v30  ;;  %3971 = vst.msk [vmem:[#allocation3 + $0x40] sm:$0xff] %vm3962_vm6, %v3883_v61 }
 0x4e6   : > { %4254 = vrot.lane.b32.xlu1 %v4189_v0, %s6743_s10  ;;  %4256 = vrot.lane.b32.xlu0 %v8349_v2, %s6743_s10  ;;  %v4217_v0 = vld [vmem:[#allocation2 + $0x1a3] sm:$0xff] }
 0x4e8   : > { %v3885_v3 = vpop.permute.xlu1 %3884  ;;  %v3887_v5 = vpop.permute.xlu0 %3886 }
 0x4e9   : > { %3972 = vst.msk [vmem:[#allocation3 + $0x48] sm:$0xff] %vm3962_vm6, %v3885_v3  ;;  %3973 = vst.msk [vmem:[#allocation3 + $0x50] sm:$0xff] %vm3962_vm6, %v3887_v5  ;;  %v4218_v3 = vld [vmem:[#allocation2 + $0x1b3] sm:$0xff] }
 0x4ea   : > { %4258 = vrot.lane.b32.xlu1 %v8356_v6, %s6743_s10  ;;  %4260 = vrot.lane.b32.xlu0 %v8358_v7, %s6743_s10 }
 0x4ec   : > { %v3889_v11 = vpop.permute.xlu1 %3888  ;;  %v3891_v12 = vpop.permute.xlu0 %3890 }
 0x4ed   : > { %3974 = vst.msk [vmem:[#allocation3 + $0x58] sm:$0xff] %vm3962_vm6, %v3889_v11  ;;  %3975 = vst.msk [vmem:[#allocation3 + $0x60] sm:$0xff] %vm3962_vm6, %v3891_v12  ;;  %v4219_v12 = vld [vmem:[#allocation2 + $0x1bb] sm:$0xff] }
 0x4ee   : > { %4262 = vrot.lane.b32.xlu1 %v8366_v16, %s6743_s10  ;;  %4264 = vrot.lane.b32.xlu0 %v8368_v19, %s6743_s10 }
 0x4f0   : > { %v3893_v20 = vpop.permute.xlu1 %3892  ;;  %v3895_v21 = vpop.permute.xlu0 %3894 }
 0x4f1   : > { %3976 = vst.msk [vmem:[#allocation3 + $0x68] sm:$0xff] %vm3962_vm6, %v3893_v20  ;;  %3977 = vst.msk [vmem:[#allocation3 + $0x70] sm:$0xff] %vm3962_vm6, %v3895_v21  ;;  %v4381_v20 = vld [vmem:[#allocation2 + $0x4c] sm:$0xff] }
 0x4f2   : > { %4266 = vrot.lane.b32.xlu1 %v8376_v22, %s6743_s10  ;;  %4268 = vrot.lane.b32.xlu0 %v4196_v24, %s6743_s10 }
 0x4f4   : > { %v3897_v27 = vpop.permute.xlu1 %3896  ;;  %v3899_v28 = vpop.permute.xlu0 %3898 }
 0x4f5   : > { %3978 = vst.msk [vmem:[#allocation3 + $0x78] sm:$0xff] %vm3962_vm6, %v3897_v27  ;;  %3979 = vst.msk [vmem:[#allocation3 + $0x80] sm:$0xff] %vm3962_vm6, %v3899_v28  ;;  %v4382_v27 = vld [vmem:[#allocation2 + $0x54] sm:$0xff]  ;;  %v8455_v28 = vld [vmem:[#allocation2 + $0x64] sm:$0xff] }
 0x4f6   : > { %4270 = vrot.lane.b32.xlu1 %v4197_v33, %s6743_s10  ;;  %4272 = vrot.lane.b32.xlu0 %v4198_v34, %s6743_s10 }
 0x4f8   : > { %v3901_v36 = vpop.permute.xlu1 %3900  ;;  %v3903_v39 = vpop.permute.xlu0 %3902 }
 0x4f9   : > { %3980 = vst.msk [vmem:[#allocation3 + $0x88] sm:$0xff] %vm3962_vm6, %v3901_v36  ;;  %3981 = vst.msk [vmem:[#allocation3 + $0x90] sm:$0xff] %vm3962_vm6, %v3903_v39  ;;  %v8462_v36 = vld [vmem:[#allocation2 + $0x6c] sm:$0xff]  ;;  %v8464_v39 = vld [vmem:[#allocation2 + $0x7c] sm:$0xff] }
 0x4fa   : > { %4274 = vrot.lane.b32.xlu1 %v4199_v40, %s6743_s10  ;;  %4276 = vrot.lane.b32.xlu0 %v4200_v41, %s6743_s10 }
 0x4fc   : > { %v3905_v43 = vpop.permute.xlu1 %3904  ;;  %v3907_v44 = vpop.permute.xlu0 %3906 }
 0x4fd   : > { %3982 = vst.msk [vmem:[#allocation3 + $0x98] sm:$0xff] %vm3962_vm6, %v3905_v43  ;;  %3983 = vst.msk [vmem:[#allocation3 + $0xa0] sm:$0xff] %vm3962_vm6, %v3907_v44  ;;  %v8472_v43 = vld [vmem:[#allocation2 + $0x84] sm:$0xff]  ;;  %v8474_v44 = vld [vmem:[#allocation2 + $0x94] sm:$0xff] }
 0x4fe   : > { %4278 = vrot.lane.b32.xlu1 %v4201_v46, %s6743_s10  ;;  %4280 = vrot.lane.b32.xlu0 %v4202_v47, %s6743_s10 }
 0x500   : > { %v3909_v50 = vpop.permute.xlu1 %3908  ;;  %v3911_v23 = vpop.permute.xlu0 %3910 }
 0x501   : > { %3984 = vst.msk [vmem:[#allocation3 + $0xa8] sm:$0xff] %vm3962_vm6, %v3909_v50  ;;  %3985 = vst.msk [vmem:[#allocation3 + $0xb0] sm:$0xff] %vm3962_vm6, %v3911_v23  ;;  %v8482_v50 = vld [vmem:[#allocation2 + $0x9c] sm:$0xff]  ;;  %v8484_v23 = vld [vmem:[#allocation2 + $0xac] sm:$0xff] }
 0x502   : > { %4282 = vrot.lane.b32.xlu1 %v4203_v52, %s6743_s10  ;;  %4284 = vrot.lane.b32.xlu0 %v4204_v29, %s6743_s10 }
 0x504   : > { %v3913_v38 = vpop.permute.xlu1 %3912  ;;  %v3915_v48 = vpop.permute.xlu0 %3914 }
 0x505   : > { %3986 = vst.msk [vmem:[#allocation3 + $0xb8] sm:$0xff] %vm3962_vm6, %v3913_v38  ;;  %3987 = vst.msk [vmem:[#allocation3 + $0xc0] sm:$0xff] %vm3962_vm6, %v3915_v48  ;;  %v8492_v38 = vld [vmem:[#allocation2 + $0xb4] sm:$0xff]  ;;  %v4391_v48 = vld [vmem:[#allocation2 + $0xc4] sm:$0xff] }
 0x506   : > { %4286 = vrot.lane.b32.xlu1 %v4205_v55, %s6743_s10  ;;  %4288 = vrot.lane.b32.xlu0 %v8399_v62, %s6743_s10 }
 0x508   : > { %v3917_v63 = vpop.permute.xlu1 %3916  ;;  %v3919_v8 = vpop.permute.xlu0 %3918 }
 0x509   : > { %3988 = vst.msk [vmem:[#allocation3 + $0xc8] sm:$0xff] %vm3962_vm6, %v3917_v63  ;;  %3989 = vst.msk [vmem:[#allocation3 + $0xd0] sm:$0xff] %vm3962_vm6, %v3919_v8  ;;  %v4392_v8 = vld [vmem:[#allocation2 + $0xcc] sm:$0xff] }
 0x50a   : > { %4290 = vrot.lane.b32.xlu1 %v8406_v10, %s6743_s10  ;;  %4292 = vrot.lane.b32.xlu0 %v8408_v13, %s6743_s10 }
 0x50c   : > { %v3921_v18 = vpop.permute.xlu1 %3920  ;;  %v3923_v25 = vpop.permute.xlu0 %3922 }
 0x50d   : > { %3990 = vst.msk [vmem:[#allocation3 + $0xd8] sm:$0xff] %vm3962_vm6, %v3921_v18  ;;  %3991 = vst.msk [vmem:[#allocation3 + $0xe0] sm:$0xff] %vm3962_vm6, %v3923_v25  ;;  %v4393_v18 = vld [vmem:[#allocation2 + $0xdc] sm:$0xff] }
 0x50e   : > { %4294 = vrot.lane.b32.xlu1 %v8416_v31, %s6743_s10  ;;  %4296 = vrot.lane.b32.xlu0 %v8418_v35, %s6743_s10 }
 0x510   : > { %v3925_v37 = vpop.permute.xlu1 %3924  ;;  %v3927_v49 = vpop.permute.xlu0 %3926 }
 0x511   : > { %3992 = vst.msk [vmem:[#allocation3 + $0xe8] sm:$0xff] %vm3962_vm6, %v3925_v37  ;;  %3993 = vst.msk [vmem:[#allocation3 + $0xf0] sm:$0xff] %vm3962_vm6, %v3927_v49  ;;  %v4394_v49 = vld [vmem:[#allocation2 + $0xe4] sm:$0xff] }
 0x512   : > { %4298 = vrot.lane.b32.xlu1 %v8426_v51, %s6743_s10  ;;  %4300 = vrot.lane.b32.xlu0 %v8428_v54, %s6743_s10 }
 0x514   : > { %v3929_v60 = vpop.permute.xlu1 %3928  ;;  %v4060_v4 = vpop.permute.xlu0 %4059 }
 0x515   : > { %3994 = vst.msk [vmem:[#allocation3 + $0xf8] sm:$0xff] %vm3962_vm6, %v3929_v60  ;;  %v4395_v60 = vld [vmem:[#allocation2 + $0xf4] sm:$0xff] }
 0x516   : > { %4156 = vst.msk [vmem:[#allocation3] sm:$0xff] %vm4155_vm0, %v4060_v4  ;;  %4302 = vrot.lane.b32.xlu1 %v8436_v9, %s6743_s10  ;;  %4304 = vrot.lane.b32.xlu0 %v4214_v53, %s6743_s10 }
 0x518   : > { %v4062_v14 = vpop.permute.xlu1 %4061  ;;  %v4064_v17 = vpop.permute.xlu0 %4063 }
 0x519   : > { %4157 = vst.msk [vmem:[#allocation3 + $0x8] sm:$0xff] %vm4155_vm0, %v4062_v14  ;;  %4158 = vst.msk [vmem:[#allocation3 + $0x10] sm:$0xff] %vm4155_vm0, %v4064_v17  ;;  %v4396_v14 = vld [vmem:[#allocation2 + $0xfc] sm:$0xff]  ;;  %v4397_v17 = vld [vmem:[#allocation2 + $0x10c] sm:$0xff] }
 0x51a   : > { %4306 = vrot.lane.b32.xlu1 %v4215_v56, %s6743_s10  ;;  %4308 = vrot.lane.b32.xlu0 %v4216_v57, %s6743_s10 }
 0x51c   : > { %v4066_v30 = vpop.permute.xlu1 %4065  ;;  %v4068_v61 = vpop.permute.xlu0 %4067 }
 0x51d   : > { %4159 = vst.msk [vmem:[#allocation3 + $0x18] sm:$0xff] %vm4155_vm0, %v4066_v30  ;;  %4160 = vst.msk [vmem:[#allocation3 + $0x20] sm:$0xff] %vm4155_vm0, %v4068_v61  ;;  %v4398_v30 = vld [vmem:[#allocation2 + $0x114] sm:$0xff]  ;;  %v8511_v61 = vld [vmem:[#allocation2 + $0x124] sm:$0xff] }
 0x51e   : > { %4310 = vrot.lane.b32.xlu1 %v4217_v0, %s6743_s10  ;;  %4312 = vrot.lane.b32.xlu0 %v4218_v3, %s6743_s10 }
 0x520   : > { %v4070_v5 = vpop.permute.xlu1 %4069  ;;  %v4072_v11 = vpop.permute.xlu0 %4071 }
 0x521   : > { %4161 = vst.msk [vmem:[#allocation3 + $0x28] sm:$0xff] %vm4155_vm0, %v4070_v5  ;;  %4162 = vst.msk [vmem:[#allocation3 + $0x30] sm:$0xff] %vm4155_vm0, %v4072_v11  ;;  %v8518_v5 = vld [vmem:[#allocation2 + $0x12c] sm:$0xff]  ;;  %v8520_v11 = vld [vmem:[#allocation2 + $0x13c] sm:$0xff] }
 0x522   : > { %4314 = vrot.lane.b32.xlu1 %v4219_v12, %s6743_s10  ;;  %4445 = vrot.lane.b32.xlu0 %v4381_v20, %s6744_s11 }
 0x524   : > { %v4074_v21 = vpop.permute.xlu1 %4073  ;;  %v4076_v24 = vpop.permute.xlu0 %4075 }
 0x525   : > { %4163 = vst.msk [vmem:[#allocation3 + $0x38] sm:$0xff] %vm4155_vm0, %v4074_v21  ;;  %4164 = vst.msk [vmem:[#allocation3 + $0x40] sm:$0xff] %vm4155_vm0, %v4076_v24  ;;  %v8528_v21 = vld [vmem:[#allocation2 + $0x144] sm:$0xff]  ;;  %v8530_v24 = vld [vmem:[#allocation2 + $0x154] sm:$0xff] }
 0x526   : > { %4447 = vrot.lane.b32.xlu1 %v4382_v27, %s6744_s11  ;;  %4449 = vrot.lane.b32.xlu0 %v8455_v28, %s6744_s11 }
 0x528   : > { %v4078_v33 = vpop.permute.xlu1 %4077  ;;  %v4080_v34 = vpop.permute.xlu0 %4079 }
 0x529   : > { %4165 = vst.msk [vmem:[#allocation3 + $0x48] sm:$0xff] %vm4155_vm0, %v4078_v33  ;;  %4166 = vst.msk [vmem:[#allocation3 + $0x50] sm:$0xff] %vm4155_vm0, %v4080_v34  ;;  %v8538_v34 = vld [vmem:[#allocation2 + $0x15c] sm:$0xff] }
 0x52a   : > { %4451 = vrot.lane.b32.xlu1 %v8462_v36, %s6744_s11  ;;  %4453 = vrot.lane.b32.xlu0 %v8464_v39, %s6744_s11 }
 0x52c   : > { %v4082_v40 = vpop.permute.xlu1 %4081  ;;  %v4084_v41 = vpop.permute.xlu0 %4083 }
 0x52d   : > { %4167 = vst.msk [vmem:[#allocation3 + $0x58] sm:$0xff] %vm4155_vm0, %v4082_v40  ;;  %4168 = vst.msk [vmem:[#allocation3 + $0x60] sm:$0xff] %vm4155_vm0, %v4084_v41  ;;  %v8540_v40 = vld [vmem:[#allocation2 + $0x16c] sm:$0xff] }
 0x52e   : > { %4455 = vrot.lane.b32.xlu1 %v8472_v43, %s6744_s11  ;;  %4457 = vrot.lane.b32.xlu0 %v8474_v44, %s6744_s11 }
 0x530   : > { %v4086_v46 = vpop.permute.xlu1 %4085  ;;  %v4088_v47 = vpop.permute.xlu0 %4087 }
 0x531   : > { %4169 = vst.msk [vmem:[#allocation3 + $0x68] sm:$0xff] %vm4155_vm0, %v4086_v46  ;;  %4170 = vst.msk [vmem:[#allocation3 + $0x70] sm:$0xff] %vm4155_vm0, %v4088_v47  ;;  %v8548_v47 = vld [vmem:[#allocation2 + $0x174] sm:$0xff] }
 0x532   : > { %4459 = vrot.lane.b32.xlu1 %v8482_v50, %s6744_s11  ;;  %4461 = vrot.lane.b32.xlu0 %v8484_v23, %s6744_s11 }
 0x534   : > { %v4090_v52 = vpop.permute.xlu1 %4089  ;;  %v4092_v29 = vpop.permute.xlu0 %4091 }
 0x535   : > { %4171 = vst.msk [vmem:[#allocation3 + $0x78] sm:$0xff] %vm4155_vm0, %v4090_v52  ;;  %4172 = vst.msk [vmem:[#allocation3 + $0x80] sm:$0xff] %vm4155_vm0, %v4092_v29  ;;  %v8550_v52 = vld [vmem:[#allocation2 + $0x184] sm:$0xff] }
 0x536   : > { %4463 = vrot.lane.b32.xlu1 %v8492_v38, %s6744_s11  ;;  %4465 = vrot.lane.b32.xlu0 %v4391_v48, %s6744_s11 }
 0x538   : > { %v4094_v55 = vpop.permute.xlu1 %4093  ;;  %v4096_v63 = vpop.permute.xlu0 %4095 }
 0x539   : > { %4173 = vst.msk [vmem:[#allocation3 + $0x88] sm:$0xff] %vm4155_vm0, %v4094_v55  ;;  %4174 = vst.msk [vmem:[#allocation3 + $0x90] sm:$0xff] %vm4155_vm0, %v4096_v63  ;;  %v8558_v55 = vld [vmem:[#allocation2 + $0x18c] sm:$0xff]  ;;  %v4575_v63 = vld [vmem:[#allocation2 + $0x60] sm:$0xff] }
 0x53a   : > { %4467 = vrot.lane.b32.xlu1 %v4392_v8, %s6744_s11  ;;  %4469 = vrot.lane.b32.xlu0 %v4393_v18, %s6744_s11 }
 0x53c   : > { %v4098_v25 = vpop.permute.xlu1 %4097  ;;  %v4100_v37 = vpop.permute.xlu0 %4099 }
 0x53d   : > { %4175 = vst.msk [vmem:[#allocation3 + $0x98] sm:$0xff] %vm4155_vm0, %v4098_v25  ;;  %4176 = vst.msk [vmem:[#allocation3 + $0xa0] sm:$0xff] %vm4155_vm0, %v4100_v37  ;;  %v4591_v25 = vld [vmem:[#allocation2 + $0x120] sm:$0xff]  ;;  %v4576_v37 = vld [vmem:[#allocation2 + $0x68] sm:$0xff] }
 0x53e   : > { %4471 = vrot.lane.b32.xlu1 %v4394_v49, %s6744_s11  ;;  %4473 = vrot.lane.b32.xlu0 %v4395_v60, %s6744_s11 }
 0x540   : > { %v4102_v4 = vpop.permute.xlu1 %4101  ;;  %v4104_v53 = vpop.permute.xlu0 %4103 }
 0x541   : > { %4177 = vst.msk [vmem:[#allocation3 + $0xa8] sm:$0xff] %vm4155_vm0, %v4102_v4  ;;  %4178 = vst.msk [vmem:[#allocation3 + $0xb0] sm:$0xff] %vm4155_vm0, %v4104_v53  ;;  %v4592_v4 = vld [vmem:[#allocation2 + $0x128] sm:$0xff] }
 0x542   : > { %4475 = vrot.lane.b32.xlu1 %v4396_v14, %s6744_s11  ;;  %4477 = vrot.lane.b32.xlu0 %v4397_v17, %s6744_s11  ;;  %v6711_v53 = vld [vmem:[#allocation2 + $0x61] sm:$0xff] }
 0x544   : > { %v4106_v56 = vpop.permute.xlu1 %4105  ;;  %v4108_v57 = vpop.permute.xlu0 %4107 }
 0x545   : > { %4179 = vst.msk [vmem:[#allocation3 + $0xb8] sm:$0xff] %vm4155_vm0, %v4106_v56  ;;  %4180 = vst.msk [vmem:[#allocation3 + $0xc0] sm:$0xff] %vm4155_vm0, %v4108_v57  ;;  %v4769_v56 = vld [vmem:[#allocation2 + $0x69] sm:$0xff]  ;;  %v5572_v57 = vld [vmem:[%s9202_s1] sm:$0xff] }
 0x546   : > { %4479 = vrot.lane.b32.xlu1 %v4398_v30, %s6744_s11  ;;  %4481 = vrot.lane.b32.xlu0 %v8511_v61, %s6744_s11  ;;  %v5573_v30 = vld [vmem:[%s9202_s1 + $0x8] sm:$0xff] }
 0x548   : > { %v4110_v0 = vpop.permute.xlu1 %4109  ;;  %v4112_v3 = vpop.permute.xlu0 %4111 }
 0x549   : > { %4181 = vst.msk [vmem:[#allocation3 + $0xc8] sm:$0xff] %vm4155_vm0, %v4110_v0  ;;  %4182 = vst.msk [vmem:[#allocation3 + $0xd0] sm:$0xff] %vm4155_vm0, %v4112_v3  ;;  %v6427_v0 = vpack.c.bf16 %v5573_v30, %v5572_v57  ;;  %v5584_v57 = vld [vmem:[%s9202_s1 + $0x60] sm:$0xff]  ;;  %v5585_v30 = vld [vmem:[%s9202_s1 + $0x68] sm:$0xff] }
 0x54a   : > { %4483 = vrot.lane.b32.xlu1 %v8518_v5, %s6744_s11  ;;  %4485 = vrot.lane.b32.xlu0 %v8520_v11, %s6744_s11 }
 0x54b   : > { %6428 = vmatprep.subr.bf16.mxu0 %v6427_v0  ;;  %6461 = vmatprep.subr.bf16.mxu1 %v6427_v0 }
 0x54c   : > { %v4114_v12 = vpop.permute.xlu1 %4113  ;;  %v4116_v20 = vpop.permute.xlu0 %4115  ;;  %6430 = vmatpush3.bf16.msra.mxu0 %v6427_v0  ;;  %6469 = vmatpush3.bf16.msra.mxu1 %v6427_v0 }
 0x54d   : > { %4183 = vst.msk [vmem:[#allocation3 + $0xd8] sm:$0xff] %vm4155_vm0, %v4114_v12  ;;  %4184 = vst.msk [vmem:[#allocation3 + $0xe0] sm:$0xff] %vm4155_vm0, %v4116_v20  ;;  %v5574_v20 = vld [vmem:[%s9202_s1 + $0x10] sm:$0xff] }
 0x54e   : > { %4487 = vrot.lane.b32.xlu1 %v8528_v21, %s6744_s11  ;;  %4489 = vrot.lane.b32.xlu0 %v8530_v24, %s6744_s11 }
 0x550   : > { %v4118_v27 = vpop.permute.xlu1 %4117  ;;  %v4120_v33 = vpop.permute.xlu0 %4119 }
 0x551   : > { %4185 = vst.msk [vmem:[#allocation3 + $0xe8] sm:$0xff] %vm4155_vm0, %v4118_v27  ;;  %4186 = vst.msk [vmem:[#allocation3 + $0xf0] sm:$0xff] %vm4155_vm0, %v4120_v33 }
 0x552   : > { %4491 = vrot.lane.b32.xlu1 %v8538_v34, %s6744_s11  ;;  %4493 = vrot.lane.b32.xlu0 %v8540_v40, %s6744_s11 }
 0x554   : > { %v4122_v41 = vpop.permute.xlu1 %4121  ;;  %v4253_v46 = vpop.permute.xlu0 %4252 }
 0x555   : > { %4187 = vst.msk [vmem:[#allocation3 + $0xf8] sm:$0xff] %vm4155_vm0, %v4122_v41 }
 0x556   : > { %4349 = vst.msk [vmem:[#allocation3] sm:$0xff] %vm4348_vm7, %v4253_v46  ;;  %4495 = vrot.lane.b32.xlu1 %v8548_v47, %s6744_s11  ;;  %4497 = vrot.lane.b32.xlu0 %v8550_v52, %s6744_s11  ;;  %v5576_v46 = vld [vmem:[%s9202_s1 + $0x20] sm:$0xff] }
 0x558   : > { %v4255_v29 = vpop.permute.xlu1 %4254  ;;  %v4257_v48 = vpop.permute.xlu0 %4256 }
 0x559   : > { %4350 = vst.msk [vmem:[#allocation3 + $0x8] sm:$0xff] %vm4348_vm7, %v4255_v29  ;;  %4351 = vst.msk [vmem:[#allocation3 + $0x10] sm:$0xff] %vm4348_vm7, %v4257_v48 }
 0x55a   : > { %4499 = vrot.lane.b32.xlu1 %v8558_v55, %s6744_s11  ;;  %4639 = vrot.lane.b32.xlu0 %v4575_v63, %s6745_s14  ;;  %v5578_v63 = vld [vmem:[%s9202_s1 + $0x30] sm:$0xff] }
 0x55c   : > { %v4259_v8 = vpop.permute.xlu1 %4258  ;;  %v4261_v18 = vpop.permute.xlu0 %4260 }
 0x55d   : > { %4352 = vst.msk [vmem:[#allocation3 + $0x18] sm:$0xff] %vm4348_vm7, %v4259_v8  ;;  %4353 = vst.msk [vmem:[#allocation3 + $0x20] sm:$0xff] %vm4348_vm7, %v4261_v18 }
 0x55e   : > { %4671 = vrot.lane.b32.xlu1 %v4591_v25, %s6745_s14  ;;  %4641 = vrot.lane.b32.xlu0 %v4576_v37, %s6745_s14  ;;  %v4577_v25 = vld [vmem:[#allocation2 + $0x78] sm:$0xff]  ;;  %v5580_v37 = vld [vmem:[%s9202_s1 + $0x40] sm:$0xff] }
 0x560   : > { %v4263_v49 = vpop.permute.xlu1 %4262  ;;  %v4265_v60 = vpop.permute.xlu0 %4264 }
 0x561   : > { %4354 = vst.msk [vmem:[#allocation3 + $0x28] sm:$0xff] %vm4348_vm7, %v4263_v49  ;;  %4355 = vst.msk [vmem:[#allocation3 + $0x30] sm:$0xff] %vm4348_vm7, %v4265_v60 }
 0x562   : > { %4673 = vrot.lane.b32.xlu1 %v4592_v4, %s6745_s14  ;;  %4832 = vrot.lane.b32.xlu0 %v6711_v53, %s6746_s15  ;;  %v4593_v4 = vld [vmem:[#allocation2 + $0x138] sm:$0xff]  ;;  %v5582_v53 = vld [vmem:[%s9202_s1 + $0x50] sm:$0xff] }
 0x564   : > { %v4267_v14 = vpop.permute.xlu1 %4266  ;;  %v4269_v17 = vpop.permute.xlu0 %4268 }
 0x565   : > { %4356 = vst.msk [vmem:[#allocation3 + $0x38] sm:$0xff] %vm4348_vm7, %v4267_v14  ;;  %4357 = vst.msk [vmem:[#allocation3 + $0x40] sm:$0xff] %vm4348_vm7, %v4269_v17 }
 0x566   : > { %4864 = vrot.lane.b32.xlu1 %v8229_v15, %s6746_s15  ;;  %4834 = vrot.lane.b32.xlu0 %v4769_v56, %s6746_s15  ;;  %v5575_v15 = vld [vmem:[%s9202_s1 + $0x18] sm:$0xff] }
 0x567   : > { %v6431_v27 = vpack.c.bf16 %v5575_v15, %v5574_v20  ;;  %v5586_v20 = vld [vmem:[%s9202_s1 + $0x70] sm:$0xff] }
 0x568   : > { %v4271_v3 = vpop.permute.xlu1 %4270  ;;  %v4273_v12 = vpop.permute.xlu0 %4272 }
 0x569   : > { %4358 = vst.msk [vmem:[#allocation3 + $0x48] sm:$0xff] %vm4348_vm7, %v4271_v3  ;;  %4359 = vst.msk [vmem:[#allocation3 + $0x50] sm:$0xff] %vm4348_vm7, %v4273_v12  ;;  %6432 = vmatprep.subr.bf16.mxu0 %v6431_v27  ;;  %6462 = vmatprep.subr.bf16.mxu1 %v6431_v27  ;;  %v4578_v12 = vld [vmem:[#allocation2 + $0x80] sm:$0xff] }
 0x56a   : > { %4866 = vrot.lane.b32.xlu1 %v8236_v32, %s6746_s15  ;;  %5025 = vrot.lane.b32.xlu0 %v8267_v58, %s6747_s24  ;;  %v5577_v32 = vld [vmem:[%s9202_s1 + $0x28] sm:$0xff] }
 0x56b   : > { %6434 = vmatpush3.bf16.msra.mxu0 %v6431_v27  ;;  %6470 = vmatpush3.bf16.msra.mxu1 %v6431_v27  ;;  %v6435_v58 = vpack.c.bf16 %v5577_v32, %v5576_v46  ;;  %v4786_v32 = vld [vmem:[#allocation2 + $0x139] sm:$0xff] }
 0x56c   : > { %v4275_v33 = vpop.permute.xlu1 %4274  ;;  %v4277_v41 = vpop.permute.xlu0 %4276 }
 0x56d   : > { %4360 = vst.msk [vmem:[#allocation3 + $0x58] sm:$0xff] %vm4348_vm7, %v4275_v33  ;;  %4361 = vst.msk [vmem:[#allocation3 + $0x60] sm:$0xff] %vm4348_vm7, %v4277_v41  ;;  %6436 = vmatprep.subr.bf16.mxu0 %v6435_v58  ;;  %6463 = vmatprep.subr.bf16.mxu1 %v6435_v58  ;;  %v4594_v33 = vld [vmem:[#allocation2 + $0x140] sm:$0xff] }
 0x56e   : > { %5057 = vrot.lane.b32.xlu1 %v8305_v26, %s6747_s24  ;;  %5027 = vrot.lane.b32.xlu0 %v8274_v1, %s6747_s24  ;;  %v5579_v26 = vld [vmem:[%s9202_s1 + $0x38] sm:$0xff] }
 0x56f   : > { %6438 = vmatpush3.bf16.msra.mxu0 %v6435_v58  ;;  %6471 = vmatpush3.bf16.msra.mxu1 %v6435_v58  ;;  %v6439_v1 = vpack.c.bf16 %v5579_v26, %v5578_v63  ;;  %v4770_v41 = vld [vmem:[#allocation2 + $0x79] sm:$0xff] }
 0x570   : > { %v4279_v29 = vpop.permute.xlu1 %4278  ;;  %v4281_v48 = vpop.permute.xlu0 %4280 }
 0x571   : > { %4362 = vst.msk [vmem:[#allocation3 + $0x68] sm:$0xff] %vm4348_vm7, %v4279_v29  ;;  %4363 = vst.msk [vmem:[#allocation3 + $0x70] sm:$0xff] %vm4348_vm7, %v4281_v48  ;;  %6440 = vmatprep.subr.bf16.mxu0 %v6439_v1  ;;  %6464 = vmatprep.subr.bf16.mxu1 %v6439_v1  ;;  %v4771_v48 = vld [vmem:[#allocation2 + $0x81] sm:$0xff] }
 0x572   : > { %5059 = vrot.lane.b32.xlu1 %v8312_v42, %s6747_s24  ;;  %5218 = vrot.lane.b32.xlu0 %v8349_v2, %s6748_s6  ;;  %v5581_v42 = vld [vmem:[%s9202_s1 + $0x48] sm:$0xff] }
 0x573   : > { %6442 = vmatpush3.bf16.msra.mxu0 %v6439_v1  ;;  %6472 = vmatpush3.bf16.msra.mxu1 %v6439_v1  ;;  %v6443_v2 = vpack.c.bf16 %v5581_v42, %v5580_v37  ;;  %v4787_v1 = vld [vmem:[#allocation2 + $0x141] sm:$0xff] }
 0x574   : > { %v4283_v8 = vpop.permute.xlu1 %4282  ;;  %v4285_v18 = vpop.permute.xlu0 %4284 }
 0x575   : > { %4364 = vst.msk [vmem:[#allocation3 + $0x78] sm:$0xff] %vm4348_vm7, %v4283_v8  ;;  %4365 = vst.msk [vmem:[#allocation3 + $0x80] sm:$0xff] %vm4348_vm7, %v4285_v18  ;;  %6444 = vmatprep.subr.bf16.mxu0 %v6443_v2  ;;  %6465 = vmatprep.subr.bf16.mxu1 %v6443_v2 }
 0x576   : > { %5250 = vrot.lane.b32.xlu1 %v8399_v62, %s6748_s6  ;;  %4643 = vrot.lane.b32.xlu0 %v4577_v25, %s6745_s14  ;;  %v5583_v62 = vld [vmem:[%s9202_s1 + $0x58] sm:$0xff] }
 0x577   : > { %6446 = vmatpush3.bf16.msra.mxu0 %v6443_v2  ;;  %6473 = vmatpush3.bf16.msra.mxu1 %v6443_v2  ;;  %v6447_v14 = vpack.c.bf16 %v5583_v62, %v5582_v53  ;;  %v4580_v62 = vld [vmem:[#allocation2 + $0x98] sm:$0xff] }
 0x578   : > { %v4287_v49 = vpop.permute.xlu1 %4286  ;;  %v4289_v60 = vpop.permute.xlu0 %4288 }
 0x579   : > { %4366 = vst.msk [vmem:[#allocation3 + $0x88] sm:$0xff] %vm4348_vm7, %v4287_v49  ;;  %4367 = vst.msk [vmem:[#allocation3 + $0x90] sm:$0xff] %vm4348_vm7, %v4289_v60  ;;  %6448 = vmatprep.subr.bf16.mxu0 %v6447_v14  ;;  %6466 = vmatprep.subr.bf16.mxu1 %v6447_v14 }
 0x57a   : > { %4675 = vrot.lane.b32.xlu1 %v4593_v4, %s6745_s14  ;;  %5220 = vrot.lane.b32.xlu0 %v8356_v6, %s6748_s6  ;;  %v6451_v6 = vpack.c.bf16 %v5585_v30, %v5584_v57 }
 0x57b   : > { %6450 = vmatpush3.bf16.msra.mxu0 %v6447_v14  ;;  %6474 = vmatpush3.bf16.msra.mxu1 %v6447_v14 }
 0x57c   : > { %v4291_v17 = vpop.permute.xlu1 %4290  ;;  %v4293_v56 = vpop.permute.xlu0 %4292  ;;  %6452 = vmatprep.subr.bf16.mxu0 %v6451_v6  ;;  %6467 = vmatprep.subr.bf16.mxu1 %v6451_v6 }
 0x57d   : > { %4368 = vst.msk [vmem:[#allocation3 + $0x98] sm:$0xff] %vm4348_vm7, %v4291_v17  ;;  %4369 = vst.msk [vmem:[#allocation3 + $0xa0] sm:$0xff] %vm4348_vm7, %v4293_v56 }
 0x57e   : > { %5252 = vrot.lane.b32.xlu1 %v8406_v10, %s6748_s6  ;;  %5411 = vrot.lane.b32.xlu0 %v8455_v28, %s6749_s25  ;;  %v5587_v10 = vld [vmem:[%s9202_s1 + $0x78] sm:$0x1f] }
 0x57f   : > { %6454 = vmatpush3.bf16.msra.mxu0 %v6451_v6  ;;  %6475 = vmatpush3.bf16.msra.mxu1 %v6451_v6  ;;  %v6455_v28 = vpack.c.bf16 %v5587_v10, %v5586_v20  ;;  %v4773_v6 = vld [vmem:[#allocation2 + $0x99] sm:$0xff] }
 0x580   : > { %v4295_v0 = vpop.permute.xlu1 %4294  ;;  %v4297_v3 = vpop.permute.xlu0 %4296 }
 0x581   : > { %4370 = vst.msk [vmem:[#allocation3 + $0xa8] sm:$0xff] %vm4348_vm7, %v4295_v0  ;;  %4371 = vst.msk [vmem:[#allocation3 + $0xb0] sm:$0xff] %vm4348_vm7, %v4297_v3  ;;  %6457 = vmatprep.subr.msk.bf16.mxu0 %vm6456_vm9, %v6455_v28  ;;  %6468 = vmatprep.subr.msk.bf16.mxu1 %vm6456_vm9, %v6455_v28 }
 0x582   : > { %5443 = vrot.lane.b32.xlu1 %v8511_v61, %s6749_s25  ;;  %4645 = vrot.lane.b32.xlu0 %v4578_v12, %s6745_s14  ;;  %v4789_v12 = vld [vmem:[#allocation2 + $0x159] sm:$0xff] }
 0x583   : > { %6460 = vmatpush3.bf16.msk.msra.mxu0 %vm6456_vm9, %v6455_v28  ;;  %6476 = vmatpush3.bf16.msk.msra.mxu1 %vm6456_vm9, %v6455_v28  ;;  %v6714_v28 = vld [vmem:[#allocation2 + $0x152] sm:$0xff] }
 0x584   : > { %v4299_v15 = vpop.permute.xlu1 %4298  ;;  %v4301_v27 = vpop.permute.xlu0 %4300 }
 0x585   : > { %4372 = vst.msk [vmem:[#allocation3 + $0xb8] sm:$0xff] %vm4348_vm7, %v4299_v15  ;;  %4373 = vst.msk [vmem:[#allocation3 + $0xc0] sm:$0xff] %vm4348_vm7, %v4301_v27 }
 0x586   : > { %4677 = vrot.lane.b32.xlu1 %v4594_v33, %s6745_s14  ;;  %4836 = vrot.lane.b32.xlu0 %v4770_v41, %s6746_s15  ;;  %v6715_v33 = vld [vmem:[#allocation2 + $0x15a] sm:$0xff] }
 0x588   : > { %v4303_v61 = vpop.permute.xlu1 %4302  ;;  %v4305_v46 = vpop.permute.xlu0 %4304 }
 0x589   : > { %4374 = vst.msk [vmem:[#allocation3 + $0xc8] sm:$0xff] %vm4348_vm7, %v4303_v61  ;;  %4375 = vst.msk [vmem:[#allocation3 + $0xd0] sm:$0xff] %vm4348_vm7, %v4305_v46  ;;  %v4581_v46 = vld [vmem:[#allocation2 + $0xa8] sm:$0xff] }
 0x58a   : > { %4868 = vrot.lane.b32.xlu1 %v4786_v32, %s6746_s15  ;;  %5413 = vrot.lane.b32.xlu0 %v8462_v36, %s6749_s25  ;;  %v6712_v36 = vld [vmem:[#allocation2 + $0x7a] sm:$0xff] }
 0x58c   : > { %v4307_v58 = vpop.permute.xlu1 %4306  ;;  %v4309_v29 = vpop.permute.xlu0 %4308 }
 0x58d   : > { %4376 = vst.msk [vmem:[#allocation3 + $0xd8] sm:$0xff] %vm4348_vm7, %v4307_v58  ;;  %4377 = vst.msk [vmem:[#allocation3 + $0xe0] sm:$0xff] %vm4348_vm7, %v4309_v29  ;;  %v4597_v29 = vld [vmem:[#allocation2 + $0x168] sm:$0xff] }
 0x58e   : > { %5445 = vrot.lane.b32.xlu1 %v8518_v5, %s6749_s25  ;;  %4838 = vrot.lane.b32.xlu0 %v4771_v48, %s6746_s15  ;;  %v6713_v5 = vld [vmem:[#allocation2 + $0x82] sm:$0xff] }
 0x590   : > { %v4311_v63 = vpop.permute.xlu1 %4310  ;;  %v4313_v26 = vpop.permute.xlu0 %4312 }
 0x591   : > { %4378 = vst.msk [vmem:[#allocation3 + $0xe8] sm:$0xff] %vm4348_vm7, %v4311_v63  ;;  %4379 = vst.msk [vmem:[#allocation3 + $0xf0] sm:$0xff] %vm4348_vm7, %v4313_v26 }
 0x592   : > { %4870 = vrot.lane.b32.xlu1 %v4787_v1, %s6746_s15  ;;  %5029 = vrot.lane.b32.xlu0 %v6712_v36, %s6747_s24 }
 0x594   : > { %v4315_v8 = vpop.permute.xlu1 %4314  ;;  %v4446_v18 = vpop.permute.xlu0 %4445 }
 0x595   : > { %4380 = vst.msk [vmem:[#allocation3 + $0xf8] sm:$0xff] %vm4348_vm7, %v4315_v8 }
 0x596   : > { %4542 = vst.msk [vmem:[#allocation3] sm:$0xff] %vm4541_vm10, %v4446_v18  ;;  %5061 = vrot.lane.b32.xlu1 %v8314_v45, %s6747_s24  ;;  %5031 = vrot.lane.b32.xlu0 %v6713_v5, %s6747_s24  ;;  %v4579_v45 = vld [vmem:[#allocation2 + $0x90] sm:$0xff] }
 0x598   : > { %v4448_v25 = vpop.permute.xlu1 %4447  ;;  %v4450_v37 = vpop.permute.xlu0 %4449 }
 0x599   : > { %4543 = vst.msk [vmem:[#allocation3 + $0x8] sm:$0xff] %vm4541_vm10, %v4448_v25  ;;  %4544 = vst.msk [vmem:[#allocation3 + $0x10] sm:$0xff] %vm4541_vm10, %v4450_v37  ;;  %v4775_v25 = vld [vmem:[#allocation2 + $0xb1] sm:$0xff] }
 0x59a   : > { %5063 = vrot.lane.b32.xlu1 %v8322_v59, %s6747_s24  ;;  %5222 = vrot.lane.b32.xlu0 %v8358_v7, %s6748_s6  ;;  %v4595_v59 = vld [vmem:[#allocation2 + $0x150] sm:$0xff] }
 0x59c   : > { %v4452_v42 = vpop.permute.xlu1 %4451  ;;  %v4454_v2 = vpop.permute.xlu0 %4453 }
 0x59d   : > { %4545 = vst.msk [vmem:[#allocation3 + $0x18] sm:$0xff] %vm4541_vm10, %v4452_v42  ;;  %4546 = vst.msk [vmem:[#allocation3 + $0x20] sm:$0xff] %vm4541_vm10, %v4454_v2  ;;  %v4967_v2 = vld [vmem:[#allocation2 + $0xaa] sm:$0xff] }
 0x59e   : > { %5254 = vrot.lane.b32.xlu1 %v8408_v13, %s6748_s6  ;;  %4647 = vrot.lane.b32.xlu0 %v4579_v45, %s6745_s14 }
 0x5a0   : > { %v4456_v49 = vpop.permute.xlu1 %4455  ;;  %v4458_v60 = vpop.permute.xlu0 %4457 }
 0x5a1   : > { %4547 = vst.msk [vmem:[#allocation3 + $0x28] sm:$0xff] %vm4541_vm10, %v4456_v49  ;;  %4548 = vst.msk [vmem:[#allocation3 + $0x30] sm:$0xff] %vm4541_vm10, %v4458_v60  ;;  %v4968_v60 = vld [vmem:[#allocation2 + $0xb2] sm:$0xff] }
 0x5a2   : > { %4679 = vrot.lane.b32.xlu1 %v4595_v59, %s6745_s14  ;;  %5224 = vrot.lane.b32.xlu0 %v8366_v16, %s6748_s6 }
 0x5a4   : > { %v4460_v7 = vpop.permute.xlu1 %4459  ;;  %v4462_v4 = vpop.permute.xlu0 %4461 }
 0x5a5   : > { %4549 = vst.msk [vmem:[#allocation3 + $0x38] sm:$0xff] %vm4541_vm10, %v4460_v7  ;;  %4550 = vst.msk [vmem:[#allocation3 + $0x40] sm:$0xff] %vm4541_vm10, %v4462_v4  ;;  %v4984_v4 = vld [vmem:[#allocation2 + $0x172] sm:$0xff] }
 0x5a6   : > { %5256 = vrot.lane.b32.xlu1 %v8416_v31, %s6748_s6  ;;  %5415 = vrot.lane.b32.xlu0 %v8464_v39, %s6749_s25  ;;  %v4596_v31 = vld [vmem:[#allocation2 + $0x158] sm:$0xff] }
 0x5a7   : > { %v4772_v39 = vld [vmem:[#allocation2 + $0x91] sm:$0xff] }
 0x5a8   : > { %v4464_v13 = vpop.permute.xlu1 %4463  ;;  %v4466_v53 = vpop.permute.xlu0 %4465 }
 0x5a9   : > { %4551 = vst.msk [vmem:[#allocation3 + $0x48] sm:$0xff] %vm4541_vm10, %v4464_v13  ;;  %4552 = vst.msk [vmem:[#allocation3 + $0x50] sm:$0xff] %vm4541_vm10, %v4466_v53  ;;  %v5160_v13 = vld [vmem:[#allocation2 + $0xab] sm:$0xff] }
 0x5aa   : > { %5447 = vrot.lane.b32.xlu1 %v8520_v11, %s6749_s25  ;;  %4649 = vrot.lane.b32.xlu0 %v4580_v62, %s6745_s14  ;;  %v4788_v11 = vld [vmem:[#allocation2 + $0x151] sm:$0xff] }
 0x5ac   : > { %v4468_v16 = vpop.permute.xlu1 %4467  ;;  %v4470_v14 = vpop.permute.xlu0 %4469 }
 0x5ad   : > { %4553 = vst.msk [vmem:[#allocation3 + $0x58] sm:$0xff] %vm4541_vm10, %v4468_v16  ;;  %4554 = vst.msk [vmem:[#allocation3 + $0x60] sm:$0xff] %vm4541_vm10, %v4470_v14  ;;  %v4583_v16 = vld [vmem:[#allocation2 + $0xc0] sm:$0xff] }
 0x5ae   : > { %4681 = vrot.lane.b32.xlu1 %v4596_v31, %s6745_s14  ;;  %4840 = vrot.lane.b32.xlu0 %v4772_v39, %s6746_s15  ;;  %v4599_v39 = vld [vmem:[#allocation2 + $0x180] sm:$0xff] }
 0x5b0   : > { %v4472_v17 = vpop.permute.xlu1 %4471  ;;  %v4474_v56 = vpop.permute.xlu0 %4473 }
 0x5b1   : > { %4555 = vst.msk [vmem:[#allocation3 + $0x68] sm:$0xff] %vm4541_vm10, %v4472_v17  ;;  %4556 = vst.msk [vmem:[#allocation3 + $0x70] sm:$0xff] %vm4541_vm10, %v4474_v56  ;;  %v5161_v17 = vld [vmem:[#allocation2 + $0xb3] sm:$0xff] }
 0x5b2   : > { %4872 = vrot.lane.b32.xlu1 %v4788_v11, %s6746_s15  ;;  %5417 = vrot.lane.b32.xlu0 %v8472_v43, %s6749_s25  ;;  %v4965_v43 = vld [vmem:[#allocation2 + $0x92] sm:$0xff] }
 0x5b4   : > { %v4476_v57 = vpop.permute.xlu1 %4475  ;;  %v4478_v30 = vpop.permute.xlu0 %4477 }
 0x5b5   : > { %4557 = vst.msk [vmem:[#allocation3 + $0x78] sm:$0xff] %vm4541_vm10, %v4476_v57  ;;  %4558 = vst.msk [vmem:[#allocation3 + $0x80] sm:$0xff] %vm4541_vm10, %v4478_v30 }
 0x5b6   : > { %5449 = vrot.lane.b32.xlu1 %v8528_v21, %s6749_s25  ;;  %4842 = vrot.lane.b32.xlu0 %v4773_v6, %s6746_s15  ;;  %v4966_v21 = vld [vmem:[#allocation2 + $0x9a] sm:$0xff]  ;;  %v4584_v6 = vld [vmem:[#allocation2 + $0xc8] sm:$0xff] }
 0x5b8   : > { %v4480_v0 = vpop.permute.xlu1 %4479  ;;  %v4482_v3 = vpop.permute.xlu0 %4481 }
 0x5b9   : > { %4559 = vst.msk [vmem:[#allocation3 + $0x88] sm:$0xff] %vm4541_vm10, %v4480_v0  ;;  %4560 = vst.msk [vmem:[#allocation3 + $0x90] sm:$0xff] %vm4541_vm10, %v4482_v3 }
 0x5ba   : > { %4874 = vrot.lane.b32.xlu1 %v4789_v12, %s6746_s15  ;;  %5033 = vrot.lane.b32.xlu0 %v4965_v43, %s6747_s24  ;;  %v4776_v12 = vld [vmem:[#allocation2 + $0xc1] sm:$0xff] }
 0x5bc   : > { %v4484_v20 = vpop.permute.xlu1 %4483  ;;  %v4486_v10 = vpop.permute.xlu0 %4485 }
 0x5bd   : > { %4561 = vst.msk [vmem:[#allocation3 + $0x98] sm:$0xff] %vm4541_vm10, %v4484_v20  ;;  %4562 = vst.msk [vmem:[#allocation3 + $0xa0] sm:$0xff] %vm4541_vm10, %v4486_v10 }
 0x5be   : > { %5065 = vrot.lane.b32.xlu1 %v6714_v28, %s6747_s24  ;;  %5035 = vrot.lane.b32.xlu0 %v4966_v21, %s6747_s24 }
 0x5c0   : > { %v4488_v15 = vpop.permute.xlu1 %4487  ;;  %v4490_v27 = vpop.permute.xlu0 %4489 }
 0x5c1   : > { %4563 = vst.msk [vmem:[#allocation3 + $0xa8] sm:$0xff] %vm4541_vm10, %v4488_v15  ;;  %4564 = vst.msk [vmem:[#allocation3 + $0xb0] sm:$0xff] %vm4541_vm10, %v4490_v27  ;;  %v4777_v15 = vld [vmem:[#allocation2 + $0xc9] sm:$0xff] }
 0x5c2   : > { %5067 = vrot.lane.b32.xlu1 %v6715_v33, %s6747_s24  ;;  %5226 = vrot.lane.b32.xlu0 %v8368_v19, %s6748_s6 }
 0x5c4   : > { %v4492_v41 = vpop.permute.xlu1 %4491  ;;  %v4494_v61 = vpop.permute.xlu0 %4493 }
 0x5c5   : > { %4565 = vst.msk [vmem:[#allocation3 + $0xb8] sm:$0xff] %vm4541_vm10, %v4492_v41  ;;  %4566 = vst.msk [vmem:[#allocation3 + $0xc0] sm:$0xff] %vm4541_vm10, %v4494_v61  ;;  %v4969_v61 = vld [vmem:[#allocation2 + $0xc2] sm:$0xff] }
 0x5c6   : > { %5258 = vrot.lane.b32.xlu1 %v8418_v35, %s6748_s6  ;;  %4651 = vrot.lane.b32.xlu0 %v4581_v46, %s6745_s14 }
 0x5c8   : > { %v4496_v32 = vpop.permute.xlu1 %4495  ;;  %v4498_v58 = vpop.permute.xlu0 %4497 }
 0x5c9   : > { %4567 = vst.msk [vmem:[#allocation3 + $0xc8] sm:$0xff] %vm4541_vm10, %v4496_v32  ;;  %4568 = vst.msk [vmem:[#allocation3 + $0xd0] sm:$0xff] %vm4541_vm10, %v4498_v58  ;;  %v4970_v58 = vld [vmem:[#allocation2 + $0xca] sm:$0xff] }
 0x5ca   : > { %4683 = vrot.lane.b32.xlu1 %v4597_v29, %s6745_s14  ;;  %5228 = vrot.lane.b32.xlu0 %v8376_v22, %s6748_s6  ;;  %v4582_v22 = vld [vmem:[#allocation2 + $0xb0] sm:$0xff] }
 0x5cc   : > { %v4500_v19 = vpop.permute.xlu1 %4499  ;;  %v4640_v48 = vpop.permute.xlu0 %4639 }
 0x5cd   : > { %4569 = vst.msk [vmem:[#allocation3 + $0xd8] sm:$0xff] %vm4541_vm10, %v4500_v19 }
 0x5ce   : > { %4736 = vst.msk [vmem:[#allocation3] sm:$0xff] %vm4735_vm11, %v4640_v48  ;;  %5260 = vrot.lane.b32.xlu1 %v8426_v51, %s6748_s6  ;;  %5419 = vrot.lane.b32.xlu0 %v8474_v44, %s6749_s25  ;;  %v4598_v51 = vld [vmem:[#allocation2 + $0x170] sm:$0xff] }
 0x5cf   : > { %v4774_v44 = vld [vmem:[#allocation2 + $0xa9] sm:$0xff] }
 0x5d0   : > { %v4672_v35 = vpop.permute.xlu1 %4671  ;;  %v4642_v63 = vpop.permute.xlu0 %4641  ;;  %v4986_v48 = vld [vmem:[#allocation2 + $0x18a] sm:$0xff] }
 0x5d1   : > { %4752 = vst.msk [vmem:[#allocation3 + $0x80] sm:$0xff] %vm4735_vm11, %v4672_v35  ;;  %4737 = vst.msk [vmem:[#allocation3 + $0x8] sm:$0xff] %vm4735_vm11, %v4642_v63  ;;  %v5162_v35 = vld [vmem:[#allocation2 + $0xc3] sm:$0xff] }
 0x5d2   : > { %5451 = vrot.lane.b32.xlu1 %v8530_v24, %s6749_s25  ;;  %4653 = vrot.lane.b32.xlu0 %v4582_v22, %s6745_s14  ;;  %v4790_v24 = vld [vmem:[#allocation2 + $0x169] sm:$0xff] }
 0x5d4   : > { %v4674_v26 = vpop.permute.xlu1 %4673  ;;  %v4833_v1 = vpop.permute.xlu0 %4832 }
 0x5d5   : > { %4753 = vst.msk [vmem:[#allocation3 + $0x88] sm:$0xff] %vm4735_vm11, %v4674_v26  ;;  %v5178_v26 = vld [vmem:[#allocation2 + $0x183] sm:$0xff] }
 0x5d6   : > { %4929 = vst.msk [vmem:[#allocation3] sm:$0xff] %vm4928_vm12, %v4833_v1  ;;  %4685 = vrot.lane.b32.xlu1 %v4598_v51, %s6745_s14  ;;  %4844 = vrot.lane.b32.xlu0 %v4774_v44, %s6746_s15  ;;  %v4585_v1 = vld [vmem:[#allocation2 + $0xd8] sm:$0xff] }
 0x5d8   : > { %v4865_v36 = vpop.permute.xlu1 %4864  ;;  %v4835_v8 = vpop.permute.xlu0 %4834 }
 0x5d9   : > { %4945 = vst.msk [vmem:[#allocation3 + $0x80] sm:$0xff] %vm4928_vm12, %v4865_v36  ;;  %4930 = vst.msk [vmem:[#allocation3 + $0x8] sm:$0xff] %vm4928_vm12, %v4835_v8  ;;  %v4601_v36 = vld [vmem:[#allocation2 + $0x198] sm:$0xff]  ;;  %v5163_v8 = vld [vmem:[#allocation2 + $0xcb] sm:$0xff] }
 0x5da   : > { %4876 = vrot.lane.b32.xlu1 %v4790_v24, %s6746_s15  ;;  %5421 = vrot.lane.b32.xlu0 %v8482_v50, %s6749_s25  ;;  %v4791_v50 = vld [vmem:[#allocation2 + $0x171] sm:$0xff] }
 0x5dc   : > { %v4867_v18 = vpop.permute.xlu1 %4866  ;;  %v5026_v5 = vpop.permute.xlu0 %5025 }
 0x5dd   : > { %4946 = vst.msk [vmem:[#allocation3 + $0x88] sm:$0xff] %vm4928_vm12, %v4867_v18 }
 0x5de   : > { %5122 = vst.msk [vmem:[#allocation3] sm:$0xff] %vm5121_vm13, %v5026_v5  ;;  %5453 = vrot.lane.b32.xlu1 %v8538_v34, %s6749_s25  ;;  %4846 = vrot.lane.b32.xlu0 %v4775_v25, %s6746_s15  ;;  %v4983_v34 = vld [vmem:[#allocation2 + $0x16a] sm:$0xff] }
 0x5df   : > { %v5179_v5 = vld [vmem:[#allocation2 + $0x18b] sm:$0xff] }
 0x5e0   : > { %v5058_v37 = vpop.permute.xlu1 %5057  ;;  %v5028_v42 = vpop.permute.xlu0 %5027  ;;  %v5355_v25 = vld [vmem:[#allocation2 + $0xc4] sm:$0xff] }
 0x5e1   : > { %5138 = vst.msk [vmem:[#allocation3 + $0x80] sm:$0xff] %vm5121_vm13, %v5058_v37  ;;  %5123 = vst.msk [vmem:[#allocation3 + $0x8] sm:$0xff] %vm5121_vm13, %v5028_v42 }
 0x5e2   : > { %4878 = vrot.lane.b32.xlu1 %v4791_v50, %s6746_s15  ;;  %5037 = vrot.lane.b32.xlu0 %v4967_v2, %s6747_s24  ;;  %v4586_v2 = vld [vmem:[#allocation2 + $0xe0] sm:$0xff] }
 0x5e4   : > { %v5060_v45 = vpop.permute.xlu1 %5059  ;;  %v5219_v49 = vpop.permute.xlu0 %5218 }
 0x5e5   : > { %5139 = vst.msk [vmem:[#allocation3 + $0x88] sm:$0xff] %vm5121_vm13, %v5060_v45 }
 0x5e6   : > { %5315 = vst.msk [vmem:[#allocation3] sm:$0xff] %vm5314_vm14, %v5219_v49  ;;  %5069 = vrot.lane.b32.xlu1 %v4983_v34, %s6747_s24  ;;  %5039 = vrot.lane.b32.xlu0 %v4968_v60, %s6747_s24  ;;  %v4602_v60 = vld [vmem:[#allocation2 + $0x1a0] sm:$0xff] }
 0x5e8   : > { %v5251_v59 = vpop.permute.xlu1 %5250  ;;  %v4644_v7 = vpop.permute.xlu0 %4643 }
 0x5e9   : > { %5331 = vst.msk [vmem:[#allocation3 + $0x80] sm:$0xff] %vm5314_vm14, %v5251_v59  ;;  %v4778_v59 = vld [vmem:[#allocation2 + $0xd9] sm:$0xff] }
 0x5ea   : > { %4738 = vst.msk [vmem:[#allocation3 + $0x10] sm:$0xff] %vm4735_vm11, %v4644_v7  ;;  %5071 = vrot.lane.b32.xlu1 %v4984_v4, %s6747_s24  ;;  %5230 = vrot.lane.b32.xlu0 %v5160_v13, %s6748_s6  ;;  %v5356_v13 = vld [vmem:[#allocation2 + $0xcc] sm:$0xff] }
 0x5ec   : > { %v4676_v53 = vpop.permute.xlu1 %4675  ;;  %v5221_v62 = vpop.permute.xlu0 %5220 }
 0x5ed   : > { %4754 = vst.msk [vmem:[#allocation3 + $0x90] sm:$0xff] %vm4735_vm11, %v4676_v53 }
 0x5ee   : > { %5316 = vst.msk [vmem:[#allocation3 + $0x8] sm:$0xff] %vm5314_vm14, %v5221_v62  ;;  %5262 = vrot.lane.b32.xlu1 %v8428_v54, %s6748_s6  ;;  %4655 = vrot.lane.b32.xlu0 %v4583_v16, %s6745_s14 }
 0x5f0   : > { %v5253_v14 = vpop.permute.xlu1 %5252  ;;  %v5412_v31 = vpop.permute.xlu0 %5411 }
 0x5f1   : > { %5332 = vst.msk [vmem:[#allocation3 + $0x88] sm:$0xff] %vm5314_vm14, %v5253_v14  ;;  %v4779_v14 = vld [vmem:[#allocation2 + $0xe1] sm:$0xff] }
 0x5f2   : > { %5508 = vst.msk [vmem:[#allocation3] sm:$0xff] %vm5507_vm15, %v5412_v31  ;;  %4687 = vrot.lane.b32.xlu1 %v4599_v39, %s6745_s14  ;;  %5232 = vrot.lane.b32.xlu0 %v5161_v17, %s6748_s6 }
 0x5f4   : > { %v5444_v56 = vpop.permute.xlu1 %5443  ;;  %v4646_v11 = vpop.permute.xlu0 %4645 }
 0x5f5   : > { %5524 = vst.msk [vmem:[#allocation3 + $0x80] sm:$0xff] %vm5507_vm15, %v5444_v56  ;;  %v4795_v56 = vld [vmem:[#allocation2 + $0x1a1] sm:$0xff] }
 0x5f6   : > { %4739 = vst.msk [vmem:[#allocation3 + $0x18] sm:$0xff] %vm4735_vm11, %v4646_v11  ;;  %5264 = vrot.lane.b32.xlu1 %v8436_v9, %s6748_s6  ;;  %5423 = vrot.lane.b32.xlu0 %v8484_v23, %s6749_s25  ;;  %v4600_v23 = vld [vmem:[#allocation2 + $0x188] sm:$0xff]  ;;  %v4971_v11 = vld [vmem:[#allocation2 + $0xda] sm:$0xff] }
 0x5f8   : > { %v4678_v54 = vpop.permute.xlu1 %4677  ;;  %v4837_v57 = vpop.permute.xlu0 %4836 }
 0x5f9   : > { %v5540_v30 = vld [vmem:[#allocation3] sm:$0xff]  ;;  %4755 = vst.msk [vmem:[#allocation3 + $0x98] sm:$0xff] %vm4735_vm11, %v4678_v54 }
 0x5fa   : > { %4931 = vst.msk [vmem:[#allocation3 + $0x10] sm:$0xff] %vm4928_vm12, %v4837_v57  ;;  %6379 = vmatprep.mubr.msk.f32.mxu0 %vm5595_vm1, %v5540_v30  ;;  %5455 = vrot.lane.b32.xlu1 %v8540_v40, %s6749_s25  ;;  %v4792_v40 = vld [vmem:[#allocation2 + $0x181] sm:$0xff] }
 0x5fb   : > { %4657 = vrot.lane.b32.xlu0 %v4584_v6, %s6745_s14  ;;  %v4409_v30 = vld [vmem:[#allocation2 + $0x19c] sm:$0xff] }
 0x5fc   : > { %v4869_v9 = vpop.permute.xlu1 %4868  ;;  %v5414_v0 = vpop.permute.xlu0 %5413  ;;  %v5556_v3 = vld [vmem:[#allocation3 + $0x80] sm:$0xff] }
 0x5fd   : > { %4947 = vst.msk [vmem:[#allocation3 + $0x90] sm:$0xff] %vm4928_vm12, %v4869_v9  ;;  %6403 = vmatprep.mubr.msk.f32.mxu1 %vm5595_vm1, %v5556_v3  ;;  %v4988_v3 = vld [vmem:[#allocation2 + $0x1a2] sm:$0xff] }
 0x5fe   : > { %5509 = vst.msk [vmem:[#allocation3 + $0x8] sm:$0xff] %vm5507_vm15, %v5414_v0  ;;  %4689 = vrot.lane.b32.xlu1 %v4600_v23, %s6745_s14  ;;  %v4972_v0 = vld [vmem:[#allocation2 + $0xe2] sm:$0xff] }
 0x5ff   : > { %4848 = vrot.lane.b32.xlu0 %v4776_v12, %s6746_s15 }
 0x600   : > { %v5446_v43 = vpop.permute.xlu1 %5445  ;;  %v4839_v20 = vpop.permute.xlu0 %4838 }
 0x601   : > { %5525 = vst.msk [vmem:[#allocation3 + $0x88] sm:$0xff] %vm5507_vm15, %v5446_v43  ;;  %v5164_v43 = vld [vmem:[#allocation2 + $0xdb] sm:$0xff] }
 0x602   : > { %4932 = vst.msk [vmem:[#allocation3 + $0x18] sm:$0xff] %vm4928_vm12, %v4839_v20  ;;  %4880 = vrot.lane.b32.xlu1 %v4792_v40, %s6746_s15  ;;  %v5180_v20 = vld [vmem:[#allocation2 + $0x19b] sm:$0xff] }
 0x603   : > { %5425 = vrot.lane.b32.xlu0 %v8492_v38, %s6749_s25  ;;  %v4793_v38 = vld [vmem:[#allocation2 + $0x189] sm:$0xff] }
 0x604   : > { %v4871_v10 = vpop.permute.xlu1 %4870  ;;  %v5030_v21 = vpop.permute.xlu0 %5029 }
 0x605   : > { %v5541_v28 = vld [vmem:[#allocation3 + $0x8] sm:$0xff]  ;;  %4948 = vst.msk [vmem:[#allocation3 + $0x98] sm:$0xff] %vm4928_vm12, %v4871_v10 }
 0x606   : > { %5124 = vst.msk [vmem:[#allocation3 + $0x10] sm:$0xff] %vm5121_vm13, %v5030_v21  ;;  %6380 = vmatmul.mubr.msk.f32.vlgmr.msra.gmra.mrb[0].mxu0 %vm5595_vm1, %v5541_v28  ;;  %5457 = vrot.lane.b32.xlu1 %v8548_v47, %s6749_s25  ;;  %v4985_v47 = vld [vmem:[#allocation2 + $0x182] sm:$0xff]  ;;  %v4587_v28 = vld [vmem:[#allocation2 + $0xf0] sm:$0xff] }
 0x607   : > { %4850 = vrot.lane.b32.xlu0 %v4777_v15, %s6746_s15  ;;  %v4410_v21 = vld [vmem:[#allocation2 + $0x1a4] sm:$0xff] }
 0x608   : > { %v5062_v27 = vpop.permute.xlu1 %5061  ;;  %v5032_v33 = vpop.permute.xlu0 %5031  ;;  %v5557_v41 = vld [vmem:[#allocation3 + $0x88] sm:$0xff] }
 0x609   : > { %5140 = vst.msk [vmem:[#allocation3 + $0x90] sm:$0xff] %vm5121_vm13, %v5062_v27  ;;  %5125 = vst.msk [vmem:[#allocation3 + $0x18] sm:$0xff] %vm5121_vm13, %v5032_v33  ;;  %6404 = vmatmul.mubr.msk.f32.vlgmr.msra.gmra.mrb[0].mxu1 %vm5595_vm1, %v5557_v41  ;;  %v4603_v33 = vld [vmem:[#allocation2 + $0x1b0] sm:$0xff]  ;;  %v5165_v41 = vld [vmem:[#allocation2 + $0xe3] sm:$0xff] }
 0x60a   : > { %4882 = vrot.lane.b32.xlu1 %v4793_v38, %s6746_s15 }
 0x60b   : > { %5041 = vrot.lane.b32.xlu0 %v4969_v61, %s6747_s24 }
 0x60c   : > { %v5064_v46 = vpop.permute.xlu1 %5063  ;;  %v5223_v32 = vpop.permute.xlu0 %5222 }
 0x60d   : > { %5141 = vst.msk [vmem:[#allocation3 + $0x98] sm:$0xff] %vm5121_vm13, %v5064_v46 }
 0x60e   : > { %5317 = vst.msk [vmem:[#allocation3 + $0x10] sm:$0xff] %vm5314_vm14, %v5223_v32  ;;  %5073 = vrot.lane.b32.xlu1 %v4985_v47, %s6747_s24  ;;  %v5181_v32 = vld [vmem:[#allocation2 + $0x1a3] sm:$0xff] }
 0x60f   : > { %5043 = vrot.lane.b32.xlu0 %v4970_v58, %s6747_s24  ;;  %v5357_v47 = vld [vmem:[#allocation2 + $0xdc] sm:$0xff] }
 0x610   : > { %v5255_v29 = vpop.permute.xlu1 %5254  ;;  %v4648_v19 = vpop.permute.xlu0 %4647 }
 0x611   : > { %5333 = vst.msk [vmem:[#allocation3 + $0x90] sm:$0xff] %vm5314_vm14, %v5255_v29 }
 0x612   : > { %4740 = vst.msk [vmem:[#allocation3 + $0x20] sm:$0xff] %vm4735_vm11, %v4648_v19  ;;  %5075 = vrot.lane.b32.xlu1 %v4986_v48, %s6747_s24  ;;  %v4588_v48 = vld [vmem:[#allocation2 + $0xf8] sm:$0xff] }
 0x613   : > { %5234 = vrot.lane.b32.xlu0 %v5162_v35, %s6748_s6 }
 0x614   : > { %v4680_v63 = vpop.permute.xlu1 %4679  ;;  %v5225_v22 = vpop.permute.xlu0 %5224 }
 0x615   : > { %4756 = vst.msk [vmem:[#allocation3 + $0xa0] sm:$0xff] %vm4735_vm11, %v4680_v63 }
 0x616   : > { %5318 = vst.msk [vmem:[#allocation3 + $0x18] sm:$0xff] %vm5314_vm14, %v5225_v22  ;;  %5266 = vrot.lane.b32.xlu1 %v5178_v26, %s6748_s6  ;;  %v4604_v22 = vld [vmem:[#allocation2 + $0x1b8] sm:$0xff] }
 0x617   : > { %4659 = vrot.lane.b32.xlu0 %v4585_v1, %s6745_s14  ;;  %v4780_v26 = vld [vmem:[#allocation2 + $0xf1] sm:$0xff] }
 0x618   : > { %v5257_v51 = vpop.permute.xlu1 %5256  ;;  %v5416_v44 = vpop.permute.xlu0 %5415 }
 0x619   : > { %5334 = vst.msk [vmem:[#allocation3 + $0x98] sm:$0xff] %vm5314_vm14, %v5257_v51 }
 0x61a   : > { %5510 = vst.msk [vmem:[#allocation3 + $0x10] sm:$0xff] %vm5507_vm15, %v5416_v44  ;;  %4691 = vrot.lane.b32.xlu1 %v4601_v36, %s6745_s14  ;;  %v4796_v36 = vld [vmem:[#allocation2 + $0x1b1] sm:$0xff] }
 0x61b   : > { %5236 = vrot.lane.b32.xlu0 %v5163_v8, %s6748_s6  ;;  %v5358_v8 = vld [vmem:[#allocation2 + $0xe4] sm:$0xff] }
 0x61c   : > { %v5448_v24 = vpop.permute.xlu1 %5447  ;;  %v4650_v18 = vpop.permute.xlu0 %4649 }
 0x61d   : > { %5526 = vst.msk [vmem:[#allocation3 + $0x90] sm:$0xff] %vm5507_vm15, %v5448_v24 }
 0x61e   : > { %4741 = vst.msk [vmem:[#allocation3 + $0x28] sm:$0xff] %vm4735_vm11, %v4650_v18  ;;  %5268 = vrot.lane.b32.xlu1 %v5179_v5, %s6748_s6 }
 0x61f   : > { %5427 = vrot.lane.b32.xlu0 %v5355_v25, %s6749_s25  ;;  %v4781_v25 = vld [vmem:[#allocation2 + $0xf9] sm:$0xff] }
 0x620   : > { %v4682_v37 = vpop.permute.xlu1 %4681  ;;  %v4841_v42 = vpop.permute.xlu0 %4840 }
 0x621   : > { %v5542_v50 = vld [vmem:[#allocation3 + $0x10] sm:$0xff]  ;;  %4757 = vst.msk [vmem:[#allocation3 + $0xa8] sm:$0xff] %vm4735_vm11, %v4682_v37 }
 0x622   : > { %4933 = vst.msk [vmem:[#allocation3 + $0x20] sm:$0xff] %vm4928_vm12, %v4841_v42  ;;  %6382 = vmatprep.mubr.msk.f32.mxu0 %vm5595_vm1, %v5542_v50  ;;  %5459 = vrot.lane.b32.xlu1 %v8550_v52, %s6749_s25  ;;  %v4794_v52 = vld [vmem:[#allocation2 + $0x199] sm:$0xff] }
 0x623   : > { %4661 = vrot.lane.b32.xlu0 %v4586_v2, %s6745_s14  ;;  %v4797_v50 = vld [vmem:[#allocation2 + $0x1b9] sm:$0xff] }
 0x624   : > { %v4873_v45 = vpop.permute.xlu1 %4872  ;;  %v5418_v49 = vpop.permute.xlu0 %5417  ;;  %v5558_v34 = vld [vmem:[#allocation3 + $0x90] sm:$0xff] }
 0x625   : > { %4949 = vst.msk [vmem:[#allocation3 + $0xa0] sm:$0xff] %vm4928_vm12, %v4873_v45  ;;  %6406 = vmatprep.mubr.msk.f32.mxu1 %vm5595_vm1, %v5558_v34  ;;  %v4973_v2 = vld [vmem:[#allocation2 + $0xf2] sm:$0xff] }
 0x626   : > { %5511 = vst.msk [vmem:[#allocation3 + $0x18] sm:$0xff] %vm5507_vm15, %v5418_v49  ;;  %4693 = vrot.lane.b32.xlu1 %v4602_v60, %s6745_s14  ;;  %v4989_v34 = vld [vmem:[#allocation2 + $0x1b2] sm:$0xff] }
 0x627   : > { %4852 = vrot.lane.b32.xlu0 %v4778_v59, %s6746_s15  ;;  %v4411_v60 = vld [vmem:[#allocation2 + $0x1b4] sm:$0xff] }
 0x628   : > { %v5450_v7 = vpop.permute.xlu1 %5449  ;;  %v4843_v4 = vpop.permute.xlu0 %4842 }
 0x629   : > { %5527 = vst.msk [vmem:[#allocation3 + $0x98] sm:$0xff] %vm5507_vm15, %v5450_v7 }
 0x62a   : > { %4934 = vst.msk [vmem:[#allocation3 + $0x28] sm:$0xff] %vm4928_vm12, %v4843_v4  ;;  %4884 = vrot.lane.b32.xlu1 %v4794_v52, %s6746_s15  ;;  %v4974_v4 = vld [vmem:[#allocation2 + $0xfa] sm:$0xff] }
 0x62b   : > { %5429 = vrot.lane.b32.xlu0 %v5356_v13, %s6749_s25  ;;  %v4990_v52 = vld [vmem:[#allocation2 + $0x1ba] sm:$0xff] }
 0x62c   : > { %v4875_v53 = vpop.permute.xlu1 %4874  ;;  %v5034_v62 = vpop.permute.xlu0 %5033 }
 0x62d   : > { %v5543_v16 = vld [vmem:[#allocation3 + $0x18] sm:$0xff]  ;;  %4950 = vst.msk [vmem:[#allocation3 + $0xa8] sm:$0xff] %vm4928_vm12, %v4875_v53 }
 0x62e   : > { %5126 = vst.msk [vmem:[#allocation3 + $0x20] sm:$0xff] %vm5121_vm13, %v5034_v62  ;;  %6383 = vmatmul.mubr.msk.f32.gmra.mrb[2].mxu0 %vm5595_vm1, %v5543_v16  ;;  %5461 = vrot.lane.b32.xlu1 %v8558_v55, %s6749_s25  ;;  %v4987_v55 = vld [vmem:[#allocation2 + $0x19a] sm:$0xff] }
 0x62f   : > { %4854 = vrot.lane.b32.xlu0 %v4779_v14, %s6746_s15  ;;  %v5166_v62 = vld [vmem:[#allocation2 + $0xf3] sm:$0xff] }
 0x630   : > { %v5066_v31 = vpop.permute.xlu1 %5065  ;;  %v5036_v39 = vpop.permute.xlu0 %5035  ;;  %v5559_v17 = vld [vmem:[#allocation3 + $0x98] sm:$0xff] }
 0x631   : > { %5142 = vst.msk [vmem:[#allocation3 + $0xa0] sm:$0xff] %vm5121_vm13, %v5066_v31  ;;  %5127 = vst.msk [vmem:[#allocation3 + $0x28] sm:$0xff] %vm5121_vm13, %v5036_v39  ;;  %6407 = vmatmul.mubr.msk.f32.gmra.mrb[2].mxu1 %vm5595_vm1, %v5559_v17  ;;  %v5182_v16 = vld [vmem:[#allocation2 + $0x1b3] sm:$0xff]  ;;  %v4412_v39 = vld [vmem:[#allocation2 + $0x1bc] sm:$0xff] }
 0x632   : > { %4886 = vrot.lane.b32.xlu1 %v4795_v56, %s6746_s15  ;;  %v4589_v17 = vld [vmem:[#allocation2 + $0x108] sm:$0xff] }
 0x633   : > { %5045 = vrot.lane.b32.xlu0 %v4971_v11, %s6747_s24 }
 0x634   : > { %v5068_v54 = vpop.permute.xlu1 %5067  ;;  %v5227_v57 = vpop.permute.xlu0 %5226 }
 0x635   : > { %5143 = vst.msk [vmem:[#allocation3 + $0xa8] sm:$0xff] %vm5121_vm13, %v5068_v54 }
 0x636   : > { %5319 = vst.msk [vmem:[#allocation3 + $0x20] sm:$0xff] %vm5314_vm14, %v5227_v57  ;;  %5077 = vrot.lane.b32.xlu1 %v4987_v55, %s6747_s24  ;;  %v4605_v57 = vld [vmem:[#allocation2 + $0x1c8] sm:$0xff]  ;;  %v5167_v55 = vld [vmem:[#allocation2 + $0xfb] sm:$0xff] }
 0x637   : > { %4501 = vrot.lane.b32.xlu0 %v4409_v30, %s6744_s11 }
 0x638   : > { %v5259_v6 = vpop.permute.xlu1 %5258  ;;  %v4652_v9 = vpop.permute.xlu0 %4651 }
 0x639   : > { %5335 = vst.msk [vmem:[#allocation3 + $0xa0] sm:$0xff] %vm5314_vm14, %v5259_v6 }
 0x63a   : > { %4742 = vst.msk [vmem:[#allocation3 + $0x30] sm:$0xff] %vm4735_vm11, %v4652_v9  ;;  %5047 = vrot.lane.b32.xlu1 %v4972_v0, %s6747_s24  ;;  %v5183_v0 = vld [vmem:[#allocation2 + $0x1bb] sm:$0xff] }
 0x63b   : > { %5079 = vrot.lane.b32.xlu0 %v4988_v3, %s6747_s24  ;;  %v5359_v3 = vld [vmem:[#allocation2 + $0xf4] sm:$0xff] }
 0x63c   : > { %v4684_v23 = vpop.permute.xlu1 %4683  ;;  %v5229_v12 = vpop.permute.xlu0 %5228 }
 0x63d   : > { %4758 = vst.msk [vmem:[#allocation3 + $0xb0] sm:$0xff] %vm4735_vm11, %v4684_v23 }
 0x63e   : > { %5320 = vst.msk [vmem:[#allocation3 + $0x28] sm:$0xff] %vm5314_vm14, %v5229_v12  ;;  %5238 = vrot.lane.b32.xlu1 %v5164_v43, %s6748_s6  ;;  %v4590_v43 = vld [vmem:[#allocation2 + $0x110] sm:$0xff] }
 0x63f   : > { %5270 = vrot.lane.b32.xlu0 %v5180_v20, %s6748_s6 }
 0x640   : > { %v5261_v40 = vpop.permute.xlu1 %5260  ;;  %v5420_v10 = vpop.permute.xlu0 %5419 }
 0x641   : > { %5336 = vst.msk [vmem:[#allocation3 + $0xa8] sm:$0xff] %vm5314_vm14, %v5261_v40 }
 0x642   : > { %5512 = vst.msk [vmem:[#allocation3 + $0x20] sm:$0xff] %vm5507_vm15, %v5420_v10  ;;  %4503 = vrot.lane.b32.xlu1 %v4410_v21, %s6744_s11 }
 0x643   : > { %4663 = vrot.lane.b32.xlu0 %v4587_v28, %s6745_s14  ;;  %v4782_v28 = vld [vmem:[#allocation2 + $0x109] sm:$0xff] }
 0x644   : > { %v5452_v15 = vpop.permute.xlu1 %5451  ;;  %v4654_v27 = vpop.permute.xlu0 %4653 }
 0x645   : > { %5528 = vst.msk [vmem:[#allocation3 + $0xa0] sm:$0xff] %vm5507_vm15, %v5452_v15 }
 0x646   : > { %4743 = vst.msk [vmem:[#allocation3 + $0x38] sm:$0xff] %vm4735_vm11, %v4654_v27  ;;  %4695 = vrot.lane.b32.xlu1 %v4603_v33, %s6745_s14 }
 0x647   : > { %5240 = vrot.lane.b32.xlu0 %v5165_v41, %s6748_s6  ;;  %v4798_v41 = vld [vmem:[#allocation2 + $0x1c9] sm:$0xff] }
 0x648   : > { %v4686_v38 = vpop.permute.xlu1 %4685  ;;  %v4845_v61 = vpop.permute.xlu0 %4844 }
 0x649   : > { %v5544_v46 = vld [vmem:[#allocation3 + $0x20] sm:$0xff]  ;;  %4759 = vst.msk [vmem:[#allocation3 + $0xb8] sm:$0xff] %vm4735_vm11, %v4686_v38 }
 0x64a   : > { %4935 = vst.msk [vmem:[#allocation3 + $0x30] sm:$0xff] %vm4928_vm12, %v4845_v61  ;;  %6385 = vmatprep.mubr.msk.f32.mxu0 %vm5595_vm1, %v5544_v46  ;;  %5272 = vrot.lane.b32.xlu1 %v5181_v32, %s6748_s6  ;;  %v5360_v38 = vld [vmem:[#allocation2 + $0xfc] sm:$0xff]  ;;  %v4783_v32 = vld [vmem:[#allocation2 + $0x111] sm:$0xff] }
 0x64b   : > { %5431 = vrot.lane.b32.xlu0 %v5357_v47, %s6749_s25 }
 0x64c   : > { %v4877_v58 = vpop.permute.xlu1 %4876  ;;  %v5422_v29 = vpop.permute.xlu0 %5421  ;;  %v5560_v19 = vld [vmem:[#allocation3 + $0xa0] sm:$0xff] }
 0x64d   : > { %4951 = vst.msk [vmem:[#allocation3 + $0xb0] sm:$0xff] %vm4928_vm12, %v4877_v58  ;;  %6409 = vmatprep.mubr.msk.f32.mxu1 %vm5595_vm1, %v5560_v19  ;;  %v4975_v19 = vld [vmem:[#allocation2 + $0x10a] sm:$0xff] }
 0x64e   : > { %5513 = vst.msk [vmem:[#allocation3 + $0x28] sm:$0xff] %vm5507_vm15, %v5422_v29  ;;  %5463 = vrot.lane.b32.xlu1 %v4409_v30, %s6749_s25  ;;  %v4799_v29 = vld [vmem:[#allocation2 + $0x1d1] sm:$0xff] }
 0x64f   : > { %4665 = vrot.lane.b32.xlu0 %v4588_v48, %s6745_s14 }
 0x650   : > { %v5454_v35 = vpop.permute.xlu1 %5453  ;;  %v4847_v63 = vpop.permute.xlu0 %4846 }
 0x651   : > { %5529 = vst.msk [vmem:[#allocation3 + $0xa8] sm:$0xff] %vm5507_vm15, %v5454_v35 }
 0x652   : > { %4936 = vst.msk [vmem:[#allocation3 + $0x38] sm:$0xff] %vm4928_vm12, %v4847_v63  ;;  %4697 = vrot.lane.b32.xlu1 %v4604_v22, %s6745_s14  ;;  %v4991_v63 = vld [vmem:[#allocation2 + $0x1ca] sm:$0xff]  ;;  %v4976_v22 = vld [vmem:[#allocation2 + $0x112] sm:$0xff] }
 0x653   : > { %4856 = vrot.lane.b32.xlu0 %v4780_v26, %s6746_s15 }
 0x654   : > { %v4879_v1 = vpop.permute.xlu1 %4878  ;;  %v5038_v51 = vpop.permute.xlu0 %5037 }
 0x655   : > { %v5545_v44 = vld [vmem:[#allocation3 + $0x28] sm:$0xff]  ;;  %4952 = vst.msk [vmem:[#allocation3 + $0xb8] sm:$0xff] %vm4928_vm12, %v4879_v1 }
 0x656   : > { %5128 = vst.msk [vmem:[#allocation3 + $0x30] sm:$0xff] %vm5121_vm13, %v5038_v51  ;;  %6386 = vmatmul.mubr.msk.f32.gmra.mrb[4].mxu0 %vm5595_vm1, %v5545_v44  ;;  %4888 = vrot.lane.b32.xlu1 %v4796_v36, %s6746_s15  ;;  %v4992_v51 = vld [vmem:[#allocation2 + $0x1d2] sm:$0xff] }
 0x657   : > { %5433 = vrot.lane.b32.xlu0 %v5358_v8, %s6749_s25  ;;  %v5168_v44 = vld [vmem:[#allocation2 + $0x10b] sm:$0xff] }
 0x658   : > { %v5070_v24 = vpop.permute.xlu1 %5069  ;;  %v5040_v18 = vpop.permute.xlu0 %5039  ;;  %v5561_v5 = vld [vmem:[#allocation3 + $0xa8] sm:$0xff] }
 0x659   : > { %5144 = vst.msk [vmem:[#allocation3 + $0xb0] sm:$0xff] %vm5121_vm13, %v5070_v24  ;;  %5129 = vst.msk [vmem:[#allocation3 + $0x38] sm:$0xff] %vm5121_vm13, %v5040_v18  ;;  %6410 = vmatmul.mubr.msk.f32.gmra.mrb[4].mxu1 %vm5595_vm1, %v5561_v5  ;;  %v5184_v24 = vld [vmem:[#allocation2 + $0x1cb] sm:$0xff]  ;;  %v5169_v18 = vld [vmem:[#allocation2 + $0x113] sm:$0xff] }
 0x65a   : > { %5465 = vrot.lane.b32.xlu1 %v4410_v21, %s6749_s25  ;;  %v4606_v21 = vld [vmem:[#allocation2 + $0x1d0] sm:$0xff] }
 0x65b   : > { %4858 = vrot.lane.b32.xlu0 %v4781_v25, %s6746_s15 }
 0x65c   : > { %v5072_v37 = vpop.permute.xlu1 %5071  ;;  %v5231_v42 = vpop.permute.xlu0 %5230 }
 0x65d   : > { %5145 = vst.msk [vmem:[#allocation3 + $0xb8] sm:$0xff] %vm5121_vm13, %v5072_v37 }
 0x65e   : > { %5321 = vst.msk [vmem:[#allocation3 + $0x30] sm:$0xff] %vm5314_vm14, %v5231_v42  ;;  %4890 = vrot.lane.b32.xlu1 %v4797_v50, %s6746_s15  ;;  %v5185_v42 = vld [vmem:[#allocation2 + $0x1d3] sm:$0xff] }
 0x65f   : > { %5049 = vrot.lane.b32.xlu0 %v4973_v2, %s6747_s24  ;;  %v5361_v50 = vld [vmem:[#allocation2 + $0x10c] sm:$0xff] }
 0x660   : > { %v5263_v45 = vpop.permute.xlu1 %5262  ;;  %v4656_v49 = vpop.permute.xlu0 %4655 }
 0x661   : > { %5337 = vst.msk [vmem:[#allocation3 + $0xb0] sm:$0xff] %vm5314_vm14, %v5263_v45 }
 0x662   : > { %4744 = vst.msk [vmem:[#allocation3 + $0x40] sm:$0xff] %vm4735_vm11, %v4656_v49  ;;  %5081 = vrot.lane.b32.xlu1 %v4989_v34, %s6747_s24  ;;  %v5377_v34 = vld [vmem:[#allocation2 + $0x1cc] sm:$0xff] }
 0x663   : > { %4505 = vrot.lane.b32.xlu0 %v4411_v60, %s6744_s11 }
 0x664   : > { %v4688_v59 = vpop.permute.xlu1 %4687  ;;  %v5233_v7 = vpop.permute.xlu0 %5232 }
 0x665   : > { %4760 = vst.msk [vmem:[#allocation3 + $0xc0] sm:$0xff] %vm4735_vm11, %v4688_v59 }
 0x666   : > { %5322 = vst.msk [vmem:[#allocation3 + $0x38] sm:$0xff] %vm5314_vm14, %v5233_v7  ;;  %5051 = vrot.lane.b32.xlu1 %v4974_v4, %s6747_s24  ;;  %v5378_v4 = vld [vmem:[#allocation2 + $0x1d4] sm:$0xff] }
 0x667   : > { %5083 = vrot.lane.b32.xlu0 %v4990_v52, %s6747_s24 }
 0x668   : > { %v5265_v13 = vpop.permute.xlu1 %5264  ;;  %v5424_v53 = vpop.permute.xlu0 %5423 }
 0x669   : > { %5338 = vst.msk [vmem:[#allocation3 + $0xb8] sm:$0xff] %vm5314_vm14, %v5265_v13 }
 0x66a   : > { %5514 = vst.msk [vmem:[#allocation3 + $0x30] sm:$0xff] %vm5507_vm15, %v5424_v53  ;;  %5242 = vrot.lane.b32.xlu1 %v5166_v62, %s6748_s6 }
 0x66b   : > { %5274 = vrot.lane.b32.xlu0 %v5182_v16, %s6748_s6 }
 0x66c   : > { %v5456_v14 = vpop.permute.xlu1 %5455 }
 0x66d   : > { %v4658_v31 = vpop.permute.xlu0 %4657  ;;  %5530 = vst.msk [vmem:[#allocation3 + $0xb0] sm:$0xff] %vm5507_vm15, %v5456_v14 }
 0x66e   : > { %4745 = vst.msk [vmem:[#allocation3 + $0x48] sm:$0xff] %vm4735_vm11, %v4658_v31  ;;  %4507 = vrot.lane.b32.xlu1 %v4412_v39, %s6744_s11 }
 0x66f   : > { %4667 = vrot.lane.b32.xlu0 %v4589_v17, %s6745_s14 }
 0x670   : > { %v4690_v56 = vpop.permute.xlu1 %4689 }
 0x671   : > { %v4849_v11 = vpop.permute.xlu0 %4848  ;;  %v5546_v54 = vld [vmem:[#allocation3 + $0x30] sm:$0xff]  ;;  %4761 = vst.msk [vmem:[#allocation3 + $0xc8] sm:$0xff] %vm4735_vm11, %v4690_v56 }
 0x672   : > { %4937 = vst.msk [vmem:[#allocation3 + $0x40] sm:$0xff] %vm4928_vm12, %v4849_v11  ;;  %6388 = vmatprep.mubr.msk.f32.mxu0 %vm5595_vm1, %v5546_v54  ;;  %4699 = vrot.lane.b32.xlu1 %v4605_v57, %s6745_s14 }
 0x673   : > { %5244 = vrot.lane.b32.xlu0 %v5167_v55, %s6748_s6 }
 0x674   : > { %v4881_v30 = vpop.permute.xlu1 %4880  ;;  %v5562_v9 = vld [vmem:[#allocation3 + $0xb0] sm:$0xff] }
 0x675   : > { %v5426_v6 = vpop.permute.xlu0 %5425  ;;  %4953 = vst.msk [vmem:[#allocation3 + $0xc0] sm:$0xff] %vm4928_vm12, %v4881_v30  ;;  %6412 = vmatprep.mubr.msk.f32.mxu1 %vm5595_vm1, %v5562_v9 }
 0x676   : > { %5515 = vst.msk [vmem:[#allocation3 + $0x38] sm:$0xff] %vm5507_vm15, %v5426_v6  ;;  %5276 = vrot.lane.b32.xlu1 %v5183_v0, %s6748_s6 }
 0x677   : > { %5435 = vrot.lane.b32.xlu0 %v5359_v3, %s6749_s25 }
 0x678   : > { %v5458_v23 = vpop.permute.xlu1 %5457 }
 0x679   : > { %v4851_v12 = vpop.permute.xlu0 %4850  ;;  %5531 = vst.msk [vmem:[#allocation3 + $0xb8] sm:$0xff] %vm5507_vm15, %v5458_v23 }
 0x67a   : > { %4938 = vst.msk [vmem:[#allocation3 + $0x48] sm:$0xff] %vm4928_vm12, %v4851_v12  ;;  %5467 = vrot.lane.b32.xlu1 %v4411_v60, %s6749_s25  ;;  %v5362_v60 = vld [vmem:[#allocation2 + $0x114] sm:$0xff] }
 0x67b   : > { %4669 = vrot.lane.b32.xlu0 %v4590_v43, %s6745_s14 }
 0x67c   : > { %v4883_v20 = vpop.permute.xlu1 %4882 }
 0x67d   : > { %v5042_v40 = vpop.permute.xlu0 %5041  ;;  %v5547_v10 = vld [vmem:[#allocation3 + $0x38] sm:$0xff]  ;;  %4954 = vst.msk [vmem:[#allocation3 + $0xc8] sm:$0xff] %vm4928_vm12, %v4883_v20 }
 0x67e   : > { %5130 = vst.msk [vmem:[#allocation3 + $0x40] sm:$0xff] %vm5121_vm13, %v5042_v40  ;;  %6389 = vmatmul.mubr.msk.f32.gmra.mrb[6].mxu0 %vm5595_vm1, %v5547_v10  ;;  %4701 = vrot.lane.b32.xlu1 %v4606_v21, %s6745_s14 }
 0x67f   : > { %4860 = vrot.lane.b32.xlu0 %v4782_v28, %s6746_s15 }
 0x680   : > { %v5074_v15 = vpop.permute.xlu1 %5073  ;;  %v5563_v33 = vld [vmem:[#allocation3 + $0xb8] sm:$0xff] }
 0x681   : > { %v5044_v27 = vpop.permute.xlu0 %5043  ;;  %5146 = vst.msk [vmem:[#allocation3 + $0xc0] sm:$0xff] %vm5121_vm13, %v5074_v15  ;;  %6413 = vmatmul.mubr.msk.f32.gmra.mrb[6].mxu1 %vm5595_vm1, %v5563_v33 }
 0x682   : > { %5131 = vst.msk [vmem:[#allocation3 + $0x48] sm:$0xff] %vm5121_vm13, %v5044_v27  ;;  %4892 = vrot.lane.b32.xlu1 %v4798_v41, %s6746_s15 }
 0x683   : > { %5437 = vrot.lane.b32.xlu0 %v5360_v38, %s6749_s25 }
 0x684   : > { %v5076_v61 = vpop.permute.xlu1 %5075 }
 0x685   : > { %v5235_v46 = vpop.permute.xlu0 %5234  ;;  %5147 = vst.msk [vmem:[#allocation3 + $0xc8] sm:$0xff] %vm5121_vm13, %v5076_v61  ;;  %v9031_v61 = vld [vmem:[%s9203_s2] ss:$0 sm:$0xff] }
 0x686   : > { %5323 = vst.msk [vmem:[#allocation3 + $0x40] sm:$0xff] %vm5314_vm14, %v5235_v46  ;;  %5469 = vrot.lane.b32.xlu1 %v4412_v39, %s6749_s25 }
 0x687   : > { %4862 = vrot.lane.b32.xlu0 %v4783_v32, %s6746_s15 }
 0x688   : > { %v5267_v47 = vpop.permute.xlu1 %5266 }
 0x689   : > { %v4660_v58 = vpop.permute.xlu0 %4659  ;;  %5339 = vst.msk [vmem:[#allocation3 + $0xc0] sm:$0xff] %vm5314_vm14, %v5267_v47 }
 0x68a   : > { %4746 = vst.msk [vmem:[#allocation3 + $0x50] sm:$0xff] %vm4735_vm11, %v4660_v58  ;;  %4894 = vrot.lane.b32.xlu1 %v4799_v29, %s6746_s15  ;;  %s6477_s15 = smul.u32 96, %s9207_s13 }
 0x68b   : > { %5053 = vrot.lane.b32.xlu0 %v4975_v19, %s6747_s24 }
 0x68c   : > { %v4692_v48 = vpop.permute.xlu1 %4691  ;;  %s9143_s30 = scalar_lea.vmem %s9204_s3, %s6477_s15 }
 0x68d   : > { %v5237_v35 = vpop.permute.xlu0 %5236  ;;  %4762 = vst.msk [vmem:[#allocation3 + $0xd0] sm:$0xff] %vm4735_vm11, %v4692_v48 }
 0x68e   : > { %5324 = vst.msk [vmem:[#allocation3 + $0x48] sm:$0xff] %vm5314_vm14, %v5237_v35  ;;  %5085 = vrot.lane.b32.xlu1 %v4991_v63, %s6747_s24 }
 0x68f   : > { %5055 = vrot.lane.b32.xlu0 %v4976_v22, %s6747_s24 }
 0x690   : > { %v5269_v26 = vpop.permute.xlu1 %5268 }
 0x691   : > { %v5428_v1 = vpop.permute.xlu0 %5427  ;;  %5340 = vst.msk [vmem:[#allocation3 + $0xc8] sm:$0xff] %vm5314_vm14, %v5269_v26 }
 0x692   : > { %5516 = vst.msk [vmem:[#allocation3 + $0x40] sm:$0xff] %vm5507_vm15, %v5428_v1  ;;  %5087 = vrot.lane.b32.xlu1 %v4992_v51, %s6747_s24 }
 0x693   : > { %5246 = vrot.lane.b32.xlu0 %v5168_v44, %s6748_s6 }
 0x694   : > { %v5460_v36 = vpop.permute.xlu1 %5459 }
 0x695   : > { %v4662_v8 = vpop.permute.xlu0 %4661  ;;  %5532 = vst.msk [vmem:[#allocation3 + $0xc0] sm:$0xff] %vm5507_vm15, %v5460_v36 }
 0x696   : > { %4747 = vst.msk [vmem:[#allocation3 + $0x58] sm:$0xff] %vm4735_vm11, %v4662_v8  ;;  %5278 = vrot.lane.b32.xlu1 %v5184_v24, %s6748_s6 }
 0x697   : > { %5248 = vrot.lane.b32.xlu0 %v5169_v18, %s6748_s6 }
 0x698   : > { %v4694_v5 = vpop.permute.xlu1 %4693 }
 0x699   : > { %v4853_v25 = vpop.permute.xlu0 %4852  ;;  %v5548_v37 = vld [vmem:[#allocation3 + $0x40] sm:$0xff]  ;;  %4763 = vst.msk [vmem:[#allocation3 + $0xd8] sm:$0xff] %vm4735_vm11, %v4694_v5 }
 0x69a   : > { %4939 = vst.msk [vmem:[#allocation3 + $0x50] sm:$0xff] %vm4928_vm12, %v4853_v25  ;;  %6391 = vmatprep.mubr.msk.f32.mxu0 %vm5595_vm1, %v5548_v37  ;;  %5280 = vrot.lane.b32.xlu1 %v5185_v42, %s6748_s6 }
 0x69b   : > { %5439 = vrot.lane.b32.xlu0 %v5361_v50, %s6749_s25 }
 0x69c   : > { %v4885_v2 = vpop.permute.xlu1 %4884  ;;  %v5564_v49 = vld [vmem:[#allocation3 + $0xc0] sm:$0xff] }
 0x69d   : > { %v5430_v45 = vpop.permute.xlu0 %5429  ;;  %4955 = vst.msk [vmem:[#allocation3 + $0xd0] sm:$0xff] %vm4928_vm12, %v4885_v2  ;;  %6415 = vmatprep.mubr.msk.f32.mxu1 %vm5595_vm1, %v5564_v49 }
 0x69e   : > { %5517 = vst.msk [vmem:[#allocation3 + $0x48] sm:$0xff] %vm5507_vm15, %v5430_v45  ;;  %5471 = vrot.lane.b32.xlu1 %v5377_v34, %s6749_s25 }
 0x69f   : > { %5441 = vrot.lane.b32.xlu0 %v5362_v60, %s6749_s25 }
 0x6a0   : > { %v5462_v59 = vpop.permute.xlu1 %5461 }
 0x6a1   : > { %v4855_v7 = vpop.permute.xlu0 %4854  ;;  %5533 = vst.msk [vmem:[#allocation3 + $0xc8] sm:$0xff] %vm5507_vm15, %v5462_v59 }
 0x6a2   : > { %4940 = vst.msk [vmem:[#allocation3 + $0x58] sm:$0xff] %vm4928_vm12, %v4855_v7  ;;  %5473 = vrot.lane.b32.xlu1 %v5378_v4, %s6749_s25 }
 0x6a4   : > { %v4887_v52 = vpop.permute.xlu1 %4886 }
 0x6a5   : > { %v5046_v13 = vpop.permute.xlu0 %5045  ;;  %v5549_v53 = vld [vmem:[#allocation3 + $0x48] sm:$0xff]  ;;  %4956 = vst.msk [vmem:[#allocation3 + $0xd8] sm:$0xff] %vm4928_vm12, %v4887_v52 }
 0x6a6   : > { %5132 = vst.msk [vmem:[#allocation3 + $0x50] sm:$0xff] %vm5121_vm13, %v5046_v13  ;;  %6392 = vmatmul.mubr.msk.f32.gmra.mrb[8].mxu0 %vm5595_vm1, %v5549_v53 }
 0x6a8   : > { %v5078_v62 = vpop.permute.xlu1 %5077  ;;  %v5565_v14 = vld [vmem:[#allocation3 + $0xc8] sm:$0xff] }
 0x6a9   : > { %v4502_v16 = vpop.permute.xlu0 %4501  ;;  %5148 = vst.msk [vmem:[#allocation3 + $0xd0] sm:$0xff] %vm5121_vm13, %v5078_v62  ;;  %6416 = vmatmul.mubr.msk.f32.gmra.mrb[8].mxu1 %vm5595_vm1, %v5565_v14 }
 0x6aa   : > { %4570 = vst.msk [vmem:[#allocation3 + $0xe0] sm:$0xff] %vm4541_vm10, %v4502_v16 }
 0x6ac   : > { %v5048_v31 = vpop.permute.xlu1 %5047 }
 0x6ad   : > { %v5080_v39 = vpop.permute.xlu0 %5079  ;;  %5133 = vst.msk [vmem:[#allocation3 + $0x58] sm:$0xff] %vm5121_vm13, %v5048_v31 }
 0x6ae   : > { %5149 = vst.msk [vmem:[#allocation3 + $0xd8] sm:$0xff] %vm5121_vm13, %v5080_v39 }
 0x6b0   : > { %v5239_v17 = vpop.permute.xlu1 %5238 }
 0x6b1   : > { %v5271_v56 = vpop.permute.xlu0 %5270  ;;  %5325 = vst.msk [vmem:[#allocation3 + $0x50] sm:$0xff] %vm5314_vm14, %v5239_v17 }
 0x6b2   : > { %5341 = vst.msk [vmem:[#allocation3 + $0xd0] sm:$0xff] %vm5314_vm14, %v5271_v56 }
 0x6b4   : > { %v4504_v11 = vpop.permute.xlu1 %4503 }
 0x6b5   : > { %v4664_v54 = vpop.permute.xlu0 %4663  ;;  %4571 = vst.msk [vmem:[#allocation3 + $0xe8] sm:$0xff] %vm4541_vm10, %v4504_v11 }
 0x6b6   : > { %4748 = vst.msk [vmem:[#allocation3 + $0x60] sm:$0xff] %vm4735_vm11, %v4664_v54 }
 0x6b8   : > { %v4696_v57 = vpop.permute.xlu1 %4695 }
 0x6b9   : > { %v5241_v55 = vpop.permute.xlu0 %5240  ;;  %4764 = vst.msk [vmem:[#allocation3 + $0xe0] sm:$0xff] %vm4735_vm11, %v4696_v57 }
 0x6ba   : > { %5326 = vst.msk [vmem:[#allocation3 + $0x58] sm:$0xff] %vm5314_vm14, %v5241_v55 }
 0x6bc   : > { %v5273_v30 = vpop.permute.xlu1 %5272 }
 0x6bd   : > { %v5432_v6 = vpop.permute.xlu0 %5431  ;;  %5342 = vst.msk [vmem:[#allocation3 + $0xd8] sm:$0xff] %vm5314_vm14, %v5273_v30 }
 0x6be   : > { %5518 = vst.msk [vmem:[#allocation3 + $0x50] sm:$0xff] %vm5507_vm15, %v5432_v6 }
 0x6c0   : > { %v5464_v9 = vpop.permute.xlu1 %5463 }
 0x6c1   : > { %v4666_v0 = vpop.permute.xlu0 %4665  ;;  %5534 = vst.msk [vmem:[#allocation3 + $0xd0] sm:$0xff] %vm5507_vm15, %v5464_v9 }
 0x6c2   : > { %4749 = vst.msk [vmem:[#allocation3 + $0x68] sm:$0xff] %vm4735_vm11, %v4666_v0 }
 0x6c4   : > { %v4698_v3 = vpop.permute.xlu1 %4697 }
 0x6c5   : > { %v4857_v23 = vpop.permute.xlu0 %4856  ;;  %v5550_v12 = vld [vmem:[#allocation3 + $0x50] sm:$0xff]  ;;  %4765 = vst.msk [vmem:[#allocation3 + $0xe8] sm:$0xff] %vm4735_vm11, %v4698_v3 }
 0x6c6   : > { %4941 = vst.msk [vmem:[#allocation3 + $0x60] sm:$0xff] %vm4928_vm12, %v4857_v23  ;;  %6394 = vmatprep.mubr.msk.f32.mxu0 %vm5595_vm1, %v5550_v12 }
 0x6c8   : > { %v4889_v43 = vpop.permute.xlu1 %4888  ;;  %v5566_v40 = vld [vmem:[#allocation3 + $0xd0] sm:$0xff] }
 0x6c9   : > { %v5434_v20 = vpop.permute.xlu0 %5433  ;;  %4957 = vst.msk [vmem:[#allocation3 + $0xe0] sm:$0xff] %vm4928_vm12, %v4889_v43  ;;  %6418 = vmatprep.mubr.msk.f32.mxu1 %vm5595_vm1, %v5566_v40 }
 0x6ca   : > { %5519 = vst.msk [vmem:[#allocation3 + $0x58] sm:$0xff] %vm5507_vm15, %v5434_v20 }
 0x6cc   : > { %v5466_v10 = vpop.permute.xlu1 %5465 }
 0x6cd   : > { %v4859_v21 = vpop.permute.xlu0 %4858  ;;  %5535 = vst.msk [vmem:[#allocation3 + $0xd8] sm:$0xff] %vm5507_vm15, %v5466_v10 }
 0x6ce   : > { %4942 = vst.msk [vmem:[#allocation3 + $0x68] sm:$0xff] %vm4928_vm12, %v4859_v21 }
 0x6d0   : > { %v4891_v28 = vpop.permute.xlu1 %4890 }
 0x6d1   : > { %v5050_v15 = vpop.permute.xlu0 %5049  ;;  %v5551_v27 = vld [vmem:[#allocation3 + $0x58] sm:$0xff]  ;;  %4958 = vst.msk [vmem:[#allocation3 + $0xe8] sm:$0xff] %vm4928_vm12, %v4891_v28 }
 0x6d2   : > { %5134 = vst.msk [vmem:[#allocation3 + $0x60] sm:$0xff] %vm5121_vm13, %v5050_v15  ;;  %6395 = vmatmul.mubr.msk.f32.gmra.mrb[10].mxu0 %vm5595_vm1, %v5551_v27 }
 0x6d4   : > { %v5082_v33 = vpop.permute.xlu1 %5081  ;;  %v5567_v38 = vld [vmem:[#allocation3 + $0xd8] sm:$0xff] }
 0x6d5   : > { %v4506_v41 = vpop.permute.xlu0 %4505  ;;  %5150 = vst.msk [vmem:[#allocation3 + $0xe0] sm:$0xff] %vm5121_vm13, %v5082_v33  ;;  %6419 = vmatmul.mubr.msk.f32.gmra.mrb[10].mxu1 %vm5595_vm1, %v5567_v38 }
 0x6d6   : > { %4572 = vst.msk [vmem:[#allocation3 + $0xf0] sm:$0xff] %vm4541_vm10, %v4506_v41 }
 0x6d8   : > { %v5052_v46 = vpop.permute.xlu1 %5051 }
 0x6d9   : > { %v6381_v32 = vpop.f32.mrb[0].mxu0  ;;  %5135 = vst.msk [vmem:[#allocation3 + $0x68] sm:$0xff] %vm5121_vm13, %v5052_v46  ;;  %v5084_v47 = vpop.permute.xlu0 %5083 }
 0x6da   : > { %v5762_v58 = vpop.f32.mrb[1].mxu0  ;;  %5151 = vst.msk [vmem:[#allocation3 + $0xe8] sm:$0xff] %vm5121_vm13, %v5084_v47  ;;  %v5768_v22 = vadd.f32 %v6381_v32, %v9031_v61 }
 0x6db   : > { %v5763_v29 = vadd.f32 %v9031_v61, %v5762_v58 }
 0x6dc   : > { %v5243_v19 = vpop.permute.xlu1 %5242  ;;  %v6405_v48 = vpop.f32.mrb[0].mxu1 }
 0x6dd   : > { %5921 = vxpose.xlu0.b32.start [1/16] (narrow) %v5763_v29, 104  ;;  %5327 = vst.msk [vmem:[#allocation3 + $0x60] sm:$0xff] %vm5314_vm14, %v5243_v19  ;;  %v5275_v35 = vpop.permute.xlu0 %5274  ;;  %v5842_v63 = vpop.f32.mrb[1].mxu1  ;;  %v5848_v44 = vadd.f32 %v6405_v48, %v9031_v61 }
 0x6de   : > { %5343 = vst.msk [vmem:[#allocation3 + $0xe0] sm:$0xff] %vm5314_vm14, %v5275_v35  ;;  %v5843_v26 = vadd.f32 %v9031_v61, %v5842_v63 }
 0x6e0   : > { %v4508_v1 = vpop.permute.xlu1 %4507  ;;  %5953 = vxpose.xlu1.b32.start [1/16] (narrow) %v5843_v26, 104 }
 0x6e1   : > { %5922 = vxpose.xlu0.b32.cont [2/16] (narrow) %v5768_v22, 104  ;;  %4573 = vst.msk [vmem:[#allocation3 + $0xf8] sm:$0xff] %vm4541_vm10, %v4508_v1  ;;  %v4668_v51 = vpop.permute.xlu0 %4667 }
 0x6e2   : > { %4750 = vst.msk [vmem:[#allocation3 + $0x70] sm:$0xff] %vm4735_vm11, %v4668_v51 }
 0x6e4   : > { %v4700_v36 = vpop.permute.xlu1 %4699  ;;  %5954 = vxpose.xlu1.b32.cont [2/16] (narrow) %v5848_v44, 104 }
 0x6e5   : > { %4766 = vst.msk [vmem:[#allocation3 + $0xf0] sm:$0xff] %vm4735_vm11, %v4700_v36  ;;  %v5245_v8 = vpop.permute.xlu0 %5244 }
 0x6e6   : > { %5328 = vst.msk [vmem:[#allocation3 + $0x68] sm:$0xff] %vm5314_vm14, %v5245_v8 }
 0x6e8   : > { %v5277_v24 = vpop.permute.xlu1 %5276 }
 0x6e9   : > { %5344 = vst.msk [vmem:[#allocation3 + $0xe8] sm:$0xff] %vm5314_vm14, %v5277_v24  ;;  %v5436_v18 = vpop.permute.xlu0 %5435 }
 0x6ea   : > { %5520 = vst.msk [vmem:[#allocation3 + $0x60] sm:$0xff] %vm5507_vm15, %v5436_v18 }
 0x6ec   : > { %v5468_v5 = vpop.permute.xlu1 %5467 }
 0x6ed   : > { %5536 = vst.msk [vmem:[#allocation3 + $0xe0] sm:$0xff] %vm5507_vm15, %v5468_v5  ;;  %v4670_v25 = vpop.permute.xlu0 %4669 }
 0x6ee   : > { %4751 = vst.msk [vmem:[#allocation3 + $0x78] sm:$0xff] %vm4735_vm11, %v4670_v25 }
 0x6f0   : > { %v4702_v37 = vpop.permute.xlu1 %4701 }
 0x6f1   : > { %4767 = vst.msk [vmem:[#allocation3 + $0xf8] sm:$0xff] %vm4735_vm11, %v4702_v37  ;;  %v4861_v42 = vpop.permute.xlu0 %4860  ;;  %v5552_v50 = vld [vmem:[#allocation3 + $0x60] sm:$0xff] }
 0x6f2   : > { %4943 = vst.msk [vmem:[#allocation3 + $0x70] sm:$0xff] %vm4928_vm12, %v4861_v42  ;;  %6397 = vmatprep.mubr.msk.f32.mxu0 %vm5595_vm1, %v5552_v50 }
 0x6f4   : > { %v4893_v2 = vpop.permute.xlu1 %4892  ;;  %v5568_v45 = vld [vmem:[#allocation3 + $0xe0] sm:$0xff] }
 0x6f5   : > { %4959 = vst.msk [vmem:[#allocation3 + $0xf0] sm:$0xff] %vm4928_vm12, %v4893_v2  ;;  %v5438_v49 = vpop.permute.xlu0 %5437  ;;  %6421 = vmatprep.mubr.msk.f32.mxu1 %vm5595_vm1, %v5568_v45 }
 0x6f6   : > { %5521 = vst.msk [vmem:[#allocation3 + $0x68] sm:$0xff] %vm5507_vm15, %v5438_v49 }
 0x6f8   : > { %v5470_v34 = vpop.permute.xlu1 %5469 }
 0x6f9   : > { %5537 = vst.msk [vmem:[#allocation3 + $0xe8] sm:$0xff] %vm5507_vm15, %v5470_v34  ;;  %v4863_v60 = vpop.permute.xlu0 %4862 }
 0x6fa   : > { %4944 = vst.msk [vmem:[#allocation3 + $0x78] sm:$0xff] %vm4928_vm12, %v4863_v60 }
 0x6fc   : > { %v4895_v59 = vpop.permute.xlu1 %4894 }
 0x6fd   : > { %4960 = vst.msk [vmem:[#allocation3 + $0xf8] sm:$0xff] %vm4928_vm12, %v4895_v59  ;;  %v5054_v7 = vpop.permute.xlu0 %5053  ;;  %v5553_v4 = vld [vmem:[#allocation3 + $0x68] sm:$0xff] }
 0x6fe   : > { %5136 = vst.msk [vmem:[#allocation3 + $0x70] sm:$0xff] %vm5121_vm13, %v5054_v7  ;;  %6398 = vmatmul.mubr.msk.f32.gmra.mrb[12].mxu0 %vm5595_vm1, %v5553_v4 }
 0x700   : > { %v5086_v52 = vpop.permute.xlu1 %5085  ;;  %v5569_v53 = vld [vmem:[#allocation3 + $0xe8] sm:$0xff] }
 0x701   : > { %v6384_v13 = vpop.f32.mrb[2].mxu0  ;;  %5152 = vst.msk [vmem:[#allocation3 + $0xf0] sm:$0xff] %vm5121_vm13, %v5086_v52  ;;  %v5056_v62 = vpop.permute.xlu0 %5055  ;;  %6422 = vmatmul.mubr.msk.f32.gmra.mrb[12].mxu1 %vm5595_vm1, %v5569_v53 }
 0x702   : > { %v5772_v16 = vpop.f32.mrb[3].mxu0  ;;  %5137 = vst.msk [vmem:[#allocation3 + $0x78] sm:$0xff] %vm5121_vm13, %v5056_v62  ;;  %v5778_v11 = vadd.f32 %v6384_v13, %v9031_v61 }
 0x703   : > { %v5773_v14 = vadd.f32 %v9031_v61, %v5772_v16 }
 0x704   : > { %v5088_v31 = vpop.permute.xlu1 %5087  ;;  %v6408_v39 = vpop.f32.mrb[2].mxu1 }
 0x705   : > { %5923 = vxpose.xlu0.b32.cont [3/16] (narrow) %v5773_v14, 104  ;;  %5153 = vst.msk [vmem:[#allocation3 + $0xf8] sm:$0xff] %vm5121_vm13, %v5088_v31  ;;  %v5247_v17 = vpop.permute.xlu0 %5246  ;;  %v5852_v56 = vpop.f32.mrb[3].mxu1  ;;  %v5858_v30 = vadd.f32 %v6408_v39, %v9031_v61 }
 0x706   : > { %5329 = vst.msk [vmem:[#allocation3 + $0x70] sm:$0xff] %vm5314_vm14, %v5247_v17  ;;  %v5853_v54 = vadd.f32 %v9031_v61, %v5852_v56 }
 0x708   : > { %v5279_v57 = vpop.permute.xlu1 %5278  ;;  %5955 = vxpose.xlu1.b32.cont [3/16] (narrow) %v5853_v54, 104 }
 0x709   : > { %5924 = vxpose.xlu0.b32.cont [4/16] (narrow) %v5778_v11, 104  ;;  %5345 = vst.msk [vmem:[#allocation3 + $0xf0] sm:$0xff] %vm5314_vm14, %v5279_v57  ;;  %v5249_v55 = vpop.permute.xlu0 %5248 }
 0x70a   : > { %5330 = vst.msk [vmem:[#allocation3 + $0x78] sm:$0xff] %vm5314_vm14, %v5249_v55 }
 0x70c   : > { %v5281_v6 = vpop.permute.xlu1 %5280  ;;  %5956 = vxpose.xlu1.b32.cont [4/16] (narrow) %v5858_v30, 104 }
 0x70d   : > { %5346 = vst.msk [vmem:[#allocation3 + $0xf8] sm:$0xff] %vm5314_vm14, %v5281_v6  ;;  %v5440_v9 = vpop.permute.xlu0 %5439 }
 0x70e   : > { %5522 = vst.msk [vmem:[#allocation3 + $0x70] sm:$0xff] %vm5507_vm15, %v5440_v9 }
 0x710   : > { %v5472_v0 = vpop.permute.xlu1 %5471 }
 0x711   : > { %5538 = vst.msk [vmem:[#allocation3 + $0xf0] sm:$0xff] %vm5507_vm15, %v5472_v0  ;;  %v5442_v3 = vpop.permute.xlu0 %5441 }
 0x712   : > { %5523 = vst.msk [vmem:[#allocation3 + $0x78] sm:$0xff] %vm5507_vm15, %v5442_v3 }
 0x714   : > { %v5474_v23 = vpop.permute.xlu1 %5473 }
 0x715   : > { %5539 = vst.msk [vmem:[#allocation3 + $0xf8] sm:$0xff] %vm5507_vm15, %v5474_v23  ;;  %v5554_v12 = vld [vmem:[#allocation3 + $0x70] sm:$0xff] }
 0x716   : > { %6400 = vmatprep.mubr.msk.f32.mxu0 %vm5595_vm1, %v5554_v12 }
 0x718   : > { %v5570_v43 = vld [vmem:[#allocation3 + $0xf0] sm:$0xff] }
 0x719   : > { %v5555_v20 = vld [vmem:[#allocation3 + $0x78] sm:$0xff]  ;;  %6424 = vmatprep.mubr.msk.f32.mxu1 %vm5595_vm1, %v5570_v43 }
 0x71a   : > { %6401 = vmatmul.mubr.msk.f32.gmra.mrb[14].mxu0 %vm5595_vm1, %v5555_v20 }
 0x71c   : > { %v5571_v40 = vld [vmem:[#allocation3 + $0xf8] sm:$0xff] }
 0x71d   : > { %6425 = vmatmul.mubr.msk.f32.gmra.mrb[14].mxu1 %vm5595_vm1, %v5571_v40 }
 0x729   : > { %v6387_v10 = vpop.f32.mrb[4].mxu0 }
 0x72a   : > { %v5782_v21 = vpop.f32.mrb[5].mxu0  ;;  %v5788_v33 = vadd.f32 %v6387_v10, %v9031_v61 }
 0x72b   : > { %v5783_v28 = vadd.f32 %v9031_v61, %v5782_v21 }
 0x72c   : > { %v6411_v15 = vpop.f32.mrb[4].mxu1 }
 0x72d   : > { %5925 = vxpose.xlu0.b32.cont [5/16] (narrow) %v5783_v28, 104  ;;  %v5862_v27 = vpop.f32.mrb[5].mxu1  ;;  %v5868_v38 = vadd.f32 %v6411_v15, %v9031_v61 }
 0x72e   : > { %v5863_v41 = vadd.f32 %v9031_v61, %v5862_v27 }
 0x730   : > { %5957 = vxpose.xlu1.b32.cont [5/16] (narrow) %v5863_v41, 104 }
 0x731   : > { %5926 = vxpose.xlu0.b32.cont [6/16] (narrow) %v5788_v33, 104 }
 0x734   : > { %5958 = vxpose.xlu1.b32.cont [6/16] (narrow) %v5868_v38, 104 }
 0x751   : > { %v6390_v46 = vpop.f32.mrb[6].mxu0 }
 0x752   : > { %v5792_v32 = vpop.f32.mrb[7].mxu0  ;;  %v5798_v19 = vadd.f32 %v6390_v46, %v9031_v61 }
 0x753   : > { %v5793_v47 = vadd.f32 %v9031_v61, %v5792_v32 }
 0x754   : > { %v6414_v58 = vpop.f32.mrb[6].mxu1 }
 0x755   : > { %5927 = vxpose.xlu0.b32.cont [7/16] (narrow) %v5793_v47, 104  ;;  %v5872_v29 = vpop.f32.mrb[7].mxu1  ;;  %v5878_v35 = vadd.f32 %v6414_v58, %v9031_v61 }
 0x756   : > { %v5873_v48 = vadd.f32 %v9031_v61, %v5872_v29 }
 0x758   : > { %5959 = vxpose.xlu1.b32.cont [7/16] (narrow) %v5873_v48, 104 }
 0x759   : > { %5928 = vxpose.xlu0.b32.cont [8/16] (narrow) %v5798_v19, 104 }
 0x75c   : > { %5960 = vxpose.xlu1.b32.cont [8/16] (narrow) %v5878_v35, 104 }
 0x779   : > { %v6393_v63 = vpop.f32.mrb[8].mxu0 }
 0x77a   : > { %v5802_v22 = vpop.f32.mrb[9].mxu0  ;;  %v5808_v44 = vadd.f32 %v6393_v63, %v9031_v61  ;;  %v6107_v63 = vlaneseq }
 0x77b   : > { %v5803_v26 = vadd.f32 %v9031_v61, %v5802_v22 }
 0x77c   : > { %v6417_v1 = vpop.f32.mrb[8].mxu1 }
 0x77d   : > { %5929 = vxpose.xlu0.b32.cont [9/16] (narrow) %v5803_v26, 104  ;;  %v5882_v51 = vpop.f32.mrb[9].mxu1  ;;  %v5888_v8 = vadd.f32 %v6417_v1, %v9031_v61 }
 0x77e   : > { %v5883_v36 = vadd.f32 %v9031_v61, %v5882_v51 }
 0x780   : > { %5961 = vxpose.xlu1.b32.cont [9/16] (narrow) %v5883_v36, 104 }
 0x781   : > { %5930 = vxpose.xlu0.b32.cont [10/16] (narrow) %v5808_v44, 104 }
 0x784   : > { %5962 = vxpose.xlu1.b32.cont [10/16] (narrow) %v5888_v8, 104 }
 0x7a5   : > { %v6396_v24 = vpop.f32.mrb[10].mxu0 }
 0x7a6   : > { %v5812_v18 = vpop.f32.mrb[11].mxu0  ;;  %v5818_v42 = vadd.f32 %v6396_v24, %v9031_v61 }
 0x7a7   : > { %v5813_v5 = vadd.f32 %v9031_v61, %v5812_v18 }
 0x7a8   : > { %v6420_v25 = vpop.f32.mrb[10].mxu1 }
 0x7a9   : > { %5931 = vxpose.xlu0.b32.cont [11/16] (narrow) %v5813_v5, 104  ;;  %v5892_v37 = vpop.f32.mrb[11].mxu1  ;;  %v5898_v2 = vadd.f32 %v6420_v25, %v9031_v61  ;;  %v6108_v5 = vshrl.u32 %v6107_v63, 7 }
 0x7aa   : > { %v5893_v50 = vadd.f32 %v9031_v61, %v5892_v37 }
 0x7ac   : > { %5963 = vxpose.xlu1.b32.cont [11/16] (narrow) %v5893_v50, 104 }
 0x7ad   : > { %5932 = vxpose.xlu0.b32.cont [12/16] (narrow) %v5818_v42, 104 }
 0x7b0   : > { %5964 = vxpose.xlu1.b32.cont [12/16] (narrow) %v5898_v2, 104 }
 0x7d1   : > { %v6399_v45 = vpop.f32.mrb[12].mxu0 }
 0x7d2   : > { %v5822_v49 = vpop.f32.mrb[13].mxu0  ;;  %v5828_v4 = vadd.f32 %v6399_v45, %v9031_v61 }
 0x7d3   : > { %v5823_v34 = vadd.f32 %v9031_v61, %v5822_v49 }
 0x7d4   : > { %v6423_v60 = vpop.f32.mrb[12].mxu1 }
 0x7d5   : > { %5933 = vxpose.xlu0.b32.cont [13/16] (narrow) %v5823_v34, 104  ;;  %v5902_v59 = vpop.f32.mrb[13].mxu1  ;;  %v5908_v52 = vadd.f32 %v6423_v60, %v9031_v61 }
 0x7d6   : > { %v5903_v7 = vadd.f32 %v9031_v61, %v5902_v59 }
 0x7d8   : > { %5965 = vxpose.xlu1.b32.cont [13/16] (narrow) %v5903_v7, 104 }
 0x7d9   : > { %5934 = vxpose.xlu0.b32.cont [14/16] (narrow) %v5828_v4, 104  ;;  %v6109_v4 = vsub.s32 0, %v6108_v5 }
 0x7dc   : > { %5966 = vxpose.xlu1.b32.cont [14/16] (narrow) %v5908_v52, 104 }
 0x7ed   : > { %v6402_v13 = vpop.f32.mrb[14].mxu0 }
 0x7ee   : > { %v5832_v53 = vpop.f32.mrb[15].mxu0  ;;  %v5838_v39 = vadd.f32 %v6402_v13, %v9031_v61 }
 0x7ef   : > { %v5833_v62 = vadd.f32 %v9031_v61, %v5832_v53 }
 0x7f0   : > { %v6426_v16 = vpop.f32.mrb[14].mxu1 }
 0x7f1   : > { %5935 = vxpose.xlu0.b32.cont [15/16] (narrow) %v5833_v62, 104  ;;  %v5912_v14 = vpop.f32.mrb[15].mxu1  ;;  %v5918_v17 = vadd.f32 %v6426_v16, %v9031_v61 }
 0x7f2   : > { %v5913_v31 = vadd.f32 %v9031_v61, %v5912_v14 }
 0x7f4   : > { %5967 = vxpose.xlu1.b32.cont [15/16] (narrow) %v5913_v31, 104 }
 0x7f5   : > { %5936 = vxpose.xlu0.b32.end [16/16] (narrow) %v5838_v39, 104 }
 0x7f8   : > { %5968 = vxpose.xlu1.b32.end [16/16] (narrow) %v5918_v17, 104 }
 0x839   : > { %v9104_v56 = vpop.trf.xlu0 }
 0x83a   : > { %v5997_v59 = vmul.f32 0.2, %v9104_v56  ;;  %vm5985_vm3 = vcmp.ge.f32.partialorder %v9104_v56, 0.0 }
 0x83c   : > { %v9106_v11 = vpop.trf.xlu1 }
 0x83d   : > { %v9108_v54 = vpop.trf.xlu0  ;;  %vm5986_vm4 = vcmp.ge.f32.partialorder %v9106_v11, 0.0 }
 0x83e   : > { %vm5987_vm5 = vcmp.ge.f32.partialorder %v9108_v54, 0.0 }
 0x840   : > { %v9110_v57 = vpop.trf.xlu1 }
 0x841   : > { %v9112_v55 = vpop.trf.xlu0  ;;  %vm5988_vm6 = vcmp.ge.f32.partialorder %v9110_v57, 0.0 }
 0x842   : > { %vm5989_vm0 = vcmp.ge.f32.partialorder %v9112_v55, 0.0 }
 0x844   : > { %v9114_v30 = vpop.trf.xlu1 }
 0x845   : > { %v9116_v6 = vpop.trf.xlu0  ;;  %vm5990_vm7 = vcmp.ge.f32.partialorder %v9114_v30, 0.0 }
 0x846   : > { %vm5991_vm8 = vcmp.ge.f32.partialorder %v9116_v6, 0.0 }
 0x848   : > { %v9118_v9 = vpop.trf.xlu1 }
 0x849   : > { %v9120_v0 = vpop.trf.xlu0  ;;  %vm5992_vm2 = vcmp.ge.f32.partialorder %v9118_v9, 0.0 }
 0x84a   : > { %vm5993_vm9 = vcmp.ge.f32.partialorder %v9120_v0, 0.0 }
 0x84c   : > { %v9122_v61 = vpop.trf.xlu1 }
 0x84d   : > { %v9124_v3 = vpop.trf.xlu0  ;;  %vm5994_vm10 = vcmp.ge.f32.partialorder %v9122_v61, 0.0 }
 0x84e   : > { %vm5995_vm11 = vcmp.ge.f32.partialorder %v9124_v3, 0.0 }
 0x850   : > { %v9126_v23 = vpop.trf.xlu1 }
 0x851   : > { %v5943_v12 = vpop.trf.xlu0  ;;  %vm5996_vm12 = vcmp.ge.f32.partialorder %v9126_v23, 0.0 }
 0x852   : > { %v6021_v43 = vsub.f32 0.0, %v5943_v12  ;;  %v6009_v12 = vsel %vm5985_vm3, %v9104_v56, %v5997_v59 }
 0x854   : > { %v6033_v20 = vmul.f32 1.442695, %v6021_v43  ;;  %v5975_v40 = vpop.trf.xlu1  ;;  %v5998_v43 = vmul.f32 0.2, %v9106_v11 }
 0x855   : > { %v6022_v10 = vsub.f32 0.0, %v5975_v40  ;;  %v5944_v21 = vpop.trf.xlu0 }
 0x856   : > { %6663 = vpow2.f32 %v6033_v20  ;;  %v6023_v28 = vsub.f32 0.0, %v5944_v21 }
 0x857   : > { %v6035_v15 = vmul.f32 1.442695, %v6022_v10 }
 0x858   : > { %v6037_v27 = vmul.f32 1.442695, %v6023_v28  ;;  %v5976_v33 = vpop.trf.xlu1 }
 0x859   : > { %6665 = vpow2.f32 %v6035_v15  ;;  %v6024_v41 = vsub.f32 0.0, %v5976_v33  ;;  %v5945_v38 = vpop.trf.xlu0 }
 0x85a   : > { %6667 = vpow2.f32 %v6037_v27  ;;  %v6025_v46 = vsub.f32 0.0, %v5945_v38  ;;  %v5999_v27 = vmul.f32 0.2, %v9108_v54 }
 0x85b   : > { %v6039_v32 = vmul.f32 1.442695, %v6024_v41 }
 0x85c   : > { %v6041_v47 = vmul.f32 1.442695, %v6025_v46  ;;  %v5977_v58 = vpop.trf.xlu1  ;;  %v6010_v46 = vsel %vm5986_vm4, %v9106_v11, %v5998_v43  ;;  %v6007_v43 = vmul.f32 0.2, %v9124_v3 }
 0x85d   : > { %6669 = vpow2.f32 %v6039_v32  ;;  %v6026_v29 = vsub.f32 0.0, %v5977_v58  ;;  %v5946_v19 = vpop.trf.xlu0  ;;  %v6000_v32 = vmul.f32 0.2, %v9110_v57 }
 0x85e   : > { %6671 = vpow2.f32 %v6041_v47  ;;  %v6027_v48 = vsub.f32 0.0, %v5946_v19 }
 0x85f   : > { %v6043_v35 = vmul.f32 1.442695, %v6026_v29  ;;  %v6001_v29 = vmul.f32 0.2, %v9112_v55 }
 0x860   : > { %v6664_v22 = vpop.eup %6663  ;;  %v6045_v26 = vmul.f32 1.442695, %v6027_v48  ;;  %v5978_v1 = vpop.trf.xlu1 }
 0x861   : > { %v6057_v51 = vadd.f32 1.0, %v6664_v22  ;;  %6673 = vpow2.f32 %v6043_v35  ;;  %v6028_v44 = vsub.f32 0.0, %v5978_v1  ;;  %v5947_v36 = vpop.trf.xlu0  ;;  %v6011_v35 = vsel %vm5987_vm5, %v9108_v54, %v5999_v27 }
 0x862   : > { %6675 = vpow2.f32 %v6045_v26  ;;  %v6029_v8 = vsub.f32 0.0, %v5947_v36  ;;  %v6002_v54 = vmul.f32 0.2, %v9114_v30 }
 0x863   : > { %v6666_v24 = vpop.eup %6665  ;;  %6677 = vrcp.f32 %v6057_v51  ;;  %v6047_v18 = vmul.f32 1.442695, %v6028_v44  ;;  %v6012_v51 = vsel %vm5988_vm6, %v9110_v57, %v6000_v32 }
 0x864   : > { %v6668_v25 = vpop.eup %6667  ;;  %v6058_v37 = vadd.f32 1.0, %v6666_v24  ;;  %v6049_v42 = vmul.f32 1.442695, %v6029_v8  ;;  %v5979_v50 = vpop.trf.xlu1  ;;  %v6013_v24 = vsel %vm5989_vm0, %v9112_v55, %v6001_v29 }
 0x865   : > { %v6059_v2 = vadd.f32 1.0, %v6668_v25  ;;  %6679 = vpow2.f32 %v6047_v18  ;;  %v6030_v45 = vsub.f32 0.0, %v5979_v50  ;;  %v5948_v49 = vpop.trf.xlu0 }
 0x866   : > { %6681 = vrcp.f32 %v6058_v37  ;;  %v6031_v34 = vsub.f32 0.0, %v5948_v49  ;;  %v6003_v37 = vmul.f32 0.2, %v9116_v6 }
 0x867   : > { %v6670_v60 = vpop.eup %6669  ;;  %6683 = vrcp.f32 %v6059_v2  ;;  %v6051_v7 = vmul.f32 1.442695, %v6030_v45 }
 0x868   : > { %v6672_v52 = vpop.eup %6671  ;;  %v6060_v13 = vadd.f32 1.0, %v6670_v60  ;;  %6685 = vpow2.f32 %v6049_v42  ;;  %v6053_v53 = vmul.f32 1.442695, %v6031_v34  ;;  %v5980_v62 = vpop.trf.xlu1  ;;  %v6014_v34 = vsel %vm5990_vm7, %v9114_v30, %v6002_v54 }
 0x869   : > { %v6061_v16 = vadd.f32 1.0, %v6672_v52  ;;  %6687 = vpow2.f32 %v6051_v7  ;;  %v6032_v14 = vsub.f32 0.0, %v5980_v62  ;;  %v5949_v31 = vpop.trf.xlu0  ;;  %v6004_v60 = vmul.f32 0.2, %v9118_v9 }
 0x86a   : > { %6689 = vrcp.f32 %v6060_v13  ;;  %v6105_v39 = vmul.f32 0.04, %v5949_v31  ;;  %v6015_v52 = vsel %vm5991_vm8, %v9116_v6, %v6003_v37  ;;  %v6005_v30 = vmul.f32 0.2, %v9120_v0 }
 0x86b   : > { %v6674_v17 = vpop.eup %6673  ;;  %6691 = vrcp.f32 %v6061_v16  ;;  %v6055_v20 = vmul.f32 1.442695, %v6032_v14  ;;  %v6016_v14 = vsel %vm5992_vm2, %v9118_v9, %v6004_v60  ;;  %v6006_v6 = vmul.f32 0.2, %v9122_v61 }
 0x86c   : > { %v6676_v40 = vpop.eup %6675  ;;  %v6062_v10 = vadd.f32 1.0, %v6674_v17  ;;  %6693 = vpow2.f32 %v6053_v53  ;;  %v9134_v21 = vrot.slane %v6105_v39, %v6109_v4  ;;  %v5981_v28 = vpop.trf.xlu1 }
 0x86d   : > { %v6678_v15 = vpop.eup %6677  ;;  %v6063_v33 = vadd.f32 1.0, %v6676_v40  ;;  %6695 = vpow2.f32 %v6055_v20  ;;  %v6106_v41 = vmul.f32 0.04, %v5981_v28  ;;  %v6018_v40 = vsel %vm5994_vm10, %v9122_v61, %v6006_v6 }
 0x86e   : > { %v6093_v56 = vmul.f32 %v6678_v15, %v6009_v12  ;;  %6697 = vrcp.f32 %v6062_v10  ;;  %v6017_v12 = vsel %vm5993_vm9, %v9120_v0, %v6005_v30  ;;  %v6008_v10 = vmul.f32 0.2, %v9126_v23 }
 0x86f   : > { %v6680_v38 = vpop.eup %6679  ;;  %6699 = vrcp.f32 %v6063_v33  ;;  %v9145_v47 = vrot.slane %v6106_v41, %v6109_v4  ;;  %v6019_v33 = vsel %vm5995_vm11, %v9124_v3, %v6007_v43 }
 0x870   : > { %v6682_v58 = vpop.eup %6681  ;;  %v6064_v19 = vadd.f32 1.0, %v6680_v38  ;;  %v6115_v48 = vmul.f32 %v9134_v21, %v6093_v56  ;;  %v6020_v56 = vsel %vm5996_vm12, %v9126_v23, %v6008_v10 }
 0x871   : > { %v6684_v11 = vpop.eup %6683  ;;  %v6094_v63 = vmul.f32 %v6682_v58, %v6010_v46 }
 0x872   : > { %v6686_v22 = vpop.eup %6685  ;;  %v6095_v26 = vmul.f32 %v6684_v11, %v6011_v35  ;;  %6701 = vrcp.f32 %v6064_v19  ;;  %6127 = vst [vmem:[%s9143_s30] sm:$0xff] %v6115_v48 }
 0x873   : > { %v6688_v1 = vpop.eup %6687  ;;  %v6065_v44 = vadd.f32 1.0, %v6686_v22  ;;  %v6116_v36 = vmul.f32 %v9145_v47, %v6094_v63 }
 0x874   : > { %v6690_v8 = vpop.eup %6689  ;;  %v6066_v18 = vadd.f32 1.0, %v6688_v1  ;;  %v6117_v5 = vmul.f32 %v9134_v21, %v6095_v26 }
 0x875   : > { %v6692_v25 = vpop.eup %6691  ;;  %v6096_v42 = vmul.f32 %v6690_v8, %v6012_v51  ;;  %6703 = vrcp.f32 %v6065_v44  ;;  %6128 = vst [vmem:[%s9143_s30 + $0x8] sm:$0xff] %v6116_v36 }
 0x876   : > { %v6694_v57 = vpop.eup %6693  ;;  %v6097_v50 = vmul.f32 %v6692_v25, %v6013_v24  ;;  %6705 = vrcp.f32 %v6066_v18  ;;  %6129 = vst [vmem:[%s9143_s30 + $0x10] sm:$0xff] %v6117_v5 }
 0x877   : > { %v6696_v55 = vpop.eup %6695  ;;  %v6067_v2 = vadd.f32 1.0, %v6694_v57  ;;  %v6118_v45 = vmul.f32 %v9145_v47, %v6096_v42 }
 0x878   : > { %v6698_v49 = vpop.eup %6697  ;;  %v6068_v59 = vadd.f32 1.0, %v6696_v55  ;;  %v6119_v7 = vmul.f32 %v9134_v21, %v6097_v50 }
 0x879   : > { %v6700_v4 = vpop.eup %6699  ;;  %v6098_v13 = vmul.f32 %v6698_v49, %v6014_v34  ;;  %6707 = vrcp.f32 %v6067_v2  ;;  %6130 = vst [vmem:[%s9143_s30 + $0x18] sm:$0xff] %v6118_v45 }
 0x87a   : > { %v6099_v53 = vmul.f32 %v6700_v4, %v6015_v52  ;;  %6709 = vrcp.f32 %v6068_v59  ;;  %6131 = vst [vmem:[%s9143_s30 + $0x20] sm:$0xff] %v6119_v7 }
 0x87b   : > { %v6120_v62 = vmul.f32 %v9145_v47, %v6098_v13 }
 0x87c   : > { %v6702_v16 = vpop.eup %6701  ;;  %v6121_v31 = vmul.f32 %v9134_v21, %v6099_v53 }
 0x87d   : > { %v6100_v39 = vmul.f32 %v6702_v16, %v6016_v14  ;;  %6132 = vst [vmem:[%s9143_s30 + $0x28] sm:$0xff] %v6120_v62 }
 0x87e   : > { %6133 = vst [vmem:[%s9143_s30 + $0x30] sm:$0xff] %v6121_v31 }
 0x87f   : > { %v6704_v17 = vpop.eup %6703  ;;  %v6122_v20 = vmul.f32 %v9145_v47, %v6100_v39 }
 0x880   : > { %v6706_v9 = vpop.eup %6705  ;;  %v6101_v28 = vmul.f32 %v6704_v17, %v6017_v12 }
 0x881   : > { %v6102_v15 = vmul.f32 %v6706_v9, %v6018_v40  ;;  %6134 = vst [vmem:[%s9143_s30 + $0x38] sm:$0xff] %v6122_v20 }
 0x882   : > { %v6123_v0 = vmul.f32 %v9134_v21, %v6101_v28 }
 0x883   : > { %v6708_v27 = vpop.eup %6707  ;;  %v6124_v41 = vmul.f32 %v9145_v47, %v6102_v15 }
 0x884   : > { %v6710_v61 = vpop.eup %6709  ;;  %v6103_v38 = vmul.f32 %v6708_v27, %v6019_v33  ;;  %6135 = vst [vmem:[%s9143_s30 + $0x40] sm:$0xff] %v6123_v0 }
 0x885   : > { %v6104_v46 = vmul.f32 %v6710_v61, %v6020_v56  ;;  %6136 = vst [vmem:[%s9143_s30 + $0x48] sm:$0xff] %v6124_v41 }
 0x886   : > { %v6125_v32 = vmul.f32 %v9134_v21, %v6103_v38 }
 0x887   : > { %v6126_v58 = vmul.f32 %v9145_v47, %v6104_v46 }
 0x888   : > { %6137 = vst [vmem:[%s9143_s30 + $0x50] sm:$0xff] %v6125_v32 }
 0x889   : > { %6138 = vst [vmem:[%s9143_s30 + $0x58] sm:$0xff] %v6126_v58 }
 0x88a PF: > { %s13_s12 = sadd.s32 1, %s6722_s12  }
 0x88b   : > { %p10_p4 = scmp.ge.s32.totalorder %s13_s12, 4  }
 0x88d   :  { %12 = sbr.rel (!%p10_p4) target bundleno = 1 (0x1), region = 66 }

</bundles_post_ra>
